<compile_context>
chip_gen: v5e
topology: v5e:2x2
jax: 0.10.0
libtpu: 0.0.40
codegen_flags: <defaults>
</compile_context>

<pallas_src>
import numpy as np
import jax
import jax.numpy as jnp
from jax.experimental import pallas as pl
from jax.experimental.pallas import tpu as pltpu

# ---------------- small synthetic config ----------------
BATCH = 2           # batch_size
EMB = 32            # embedding_dim
HID = 32            # encoder_num_units == decoder_num_units
WORDS = 50          # words_number  (vocab = WORDS + 1)
MAXLEN = 8          # max_sentence_length
DECODELEN = 6       # decoder_output_max_length
EVENTLEN = 3        # event_length
EVENT_NUM = 4       # event_number  (predict logits dim = EVENT_NUM + 1)
ENTITY = 8          # entity_size
FUSE = 100          # fuse hidden size (unused at inference: do_copy never consumed)

LANES = 128         # TPU lane width
HP = 128            # hidden dim padded to one full 128-lane block (lane-aligned gates)
G3 = 3 * HP         # three GRU gate blocks
NEG = -1.0e30       # mask value for padded lanes before log-softmax


# ---------------- in-kernel helpers ----------------
def _log_softmax(x):
    m = jnp.max(x, axis=1, keepdims=True)
    s = x - m
    return s - jnp.log(jnp.sum(jnp.exp(s), axis=1, keepdims=True))


def _gru_merge(gx, gh, h):
    # gx, gh: (B, 3*HP), gate order [r|z|n], each gate its own 128-lane block.
    # Slices below are lane-aligned (offsets 0 / 128 / 256).
    r = jax.nn.sigmoid(gx[:, 0:HP] + gh[:, 0:HP])
    z = jax.nn.sigmoid(gx[:, HP:2 * HP] + gh[:, HP:2 * HP])
    n = jnp.tanh(gx[:, 2 * HP:3 * HP] + r * gh[:, 2 * HP:3 * HP])
    # pad lanes: gx=gh=0 -> r=z=0.5, n=0 -> h_pad' = 0.5*h_pad; h starts 0 -> stays 0
    return (1.0 - z) * n + z * h


# ---------------- the fused encoder+decoder kernel ----------------
def _crf_kernel(x_ref,
                wih_f_ref, bih_f_ref, whh_f_ref, bhh_f_ref,
                wih_b_ref, bih_b_ref, whh_b_ref, bhh_b_ref,
                wa_e_ref, w_ctx_gx_ref, sos_gx_ref, event_gx_ref,
                w_hbig_ref, b_hbig_ref,
                pred_out, ent_out):
    T, B, _ = x_ref.shape

    # ===================== encoder: bidirectional GRU =====================
    # input->gate projections hoisted out of the recurrences (no h dependence)
    gx_f = [jnp.dot(x_ref[t], wih_f_ref[...], preferred_element_type=jnp.float32)
            + bih_f_ref[...] for t in range(T)]

    h = jnp.zeros((B, HP), jnp.float32)
    h_fwd = []
    for t in range(T):                       # only h @ whh on the recurrence path
        gh = jnp.dot(h, whh_f_ref[...], preferred_element_type=jnp.float32) + bhh_f_ref[...]
        h = _gru_merge(gx_f[t], gh, h)
        h_fwd.append(h)
    h_f_last = h

    gx_b = [jnp.dot(x_ref[t], wih_b_ref[...], preferred_element_type=jnp.float32)
            + bih_b_ref[...] for t in range(T)]

    h = jnp.zeros((B, HP), jnp.float32)
    enc = [None] * T
    for i in range(T):
        t = T - 1 - i
        gh = jnp.dot(h, whh_b_ref[...], preferred_element_type=jnp.float32) + bhh_b_ref[...]
        h = _gru_merge(gx_b[t], gh, h)
        enc[t] = (h_fwd[t] + h) * 0.5        # sum(split(output, H, dim=2)) / 2
    h0 = (h_f_last + h) * 0.5                # sum(split(hidden, 1, dim=0)) / 2

    # ============== attention context (loop-invariant, exact) ==============
    # score[b,t] = h·wa_h + enc[b,t]·wa_e + b_attn : the h-term and bias are
    # constant over t, so they cancel inside softmax(dim=t) -> the attention
    # weights / context do not depend on the decoder state at all.
    wa_e = wa_e_ref[...]                                             # (1, HP)
    s = [jnp.sum(e * wa_e, axis=-1, keepdims=True) for e in enc]     # T x (B, 1)
    m = s[0]
    for t in range(1, T):
        m = jnp.maximum(m, s[t])
    w = [jnp.exp(v - m) for v in s]
    z = w[0]
    for t in range(1, T):
        z = z + w[t]
    ctx = w[0] * enc[0]
    for t in range(1, T):
        ctx = ctx + w[t] * enc[t]
    context = ctx / z                                                # (B, HP)

    # loop-invariant context part of the decoder GRU input gates:
    #   gx = combine_inputs(cat(emb, context)) @ Wih + bih
    #      = emb_gx + context @ (w_comb_c @ Wih)          (emb_gx precomputed)
    ctx_gx = jnp.dot(context, w_ctx_gx_ref[...], preferred_element_type=jnp.float32)
    emb_gx = sos_gx_ref[...]                 # (1, G3): sos-embedding path, used at t=0

    lane = jax.lax.broadcasted_iota(jnp.int32, (B, LANES), 1)
    lane_f = lane.astype(jnp.float32)

    # ====================== decoder: fully unrolled ======================
    # one lane-concatenated matmul per step covers every consumer of h:
    #   hbig = h @ [w_pred|w_eos | w_ent | whh_r | whh_z | whh_n] + biases
    h = h0
    hbig = jnp.dot(h, w_hbig_ref[...], preferred_element_type=jnp.float32) + b_hbig_ref[...]

    for t in range(DECODELEN):
        gx = emb_gx + ctx_gx                          # (B, G3)
        gh = hbig[:, 2 * LANES:5 * LANES]             # h_{t-1} @ whh + bhh (prev hbig)
        h = _gru_merge(gx, gh, h)
        hbig = jnp.dot(h, w_hbig_ref[...], preferred_element_type=jnp.float32) + b_hbig_ref[...]

        pred_raw = hbig[:, 0:LANES]                   # lanes 0..EVENT_NUM valid ([pred|eos])
        ent = hbig[:, LANES:2 * LANES]                # lanes 0..ENTITY-1 valid
        pred_log = _log_softmax(jnp.where(lane < EVENT_NUM + 1, pred_raw, NEG))
        pred_out[t] = pred_log                        # lane-dense (B, 128) stores
        ent_out[t] = ent

        # feedback: event embedding of argmax(pred), pre-folded through
        # combine_inputs and Wih -> a single one-hot matmul at event steps.
        if t % EVENTLEN == 0:
            mx = jnp.max(pred_log, axis=1, keepdims=True)
            idx = jnp.min(jnp.where(pred_log >= mx, lane_f, float(LANES)),
                          axis=1, keepdims=True)      # first argmax, as torch/np
            onehot = (lane_f == idx).astype(jnp.float32)
            emb_gx = jnp.dot(onehot, event_gx_ref[...], preferred_element_type=jnp.float32)


@jax.jit
def _fused_forward(word_emb, sentence, kparams):
    B = sentence.shape[0]
    x_tbe = word_emb[jnp.transpose(sentence)]         # (T, B, EMB) embedding gather (glue)
    vmem = lambda: pl.BlockSpec(memory_space=pltpu.MemorySpace.VMEM)
    n_in = 1 + len(kparams)
    return pl.pallas_call(
        _crf_kernel,
        out_shape=(jax.ShapeDtypeStruct((DECODELEN, B, LANES), jnp.float32),
                   jax.ShapeDtypeStruct((DECODELEN, B, LANES), jnp.float32)),
        in_specs=[vmem() for _ in range(n_in)],
        out_specs=(vmem(), vmem()),
    )(x_tbe, *kparams)


# ---------------- deterministic parameter init (PyTorch-layout shapes) ----------------
def init_params(key):
    keys = jax.random.split(key, 40)
    it = iter(keys)

    def nrm(shape, scale=0.1):
        return (scale * jax.random.normal(next(it), shape)).astype(jnp.float32)

    p = {}
    p['word_emb'] = nrm((WORDS + 1, EMB))
    # encoder bi-GRU
    p['enc_wih_f'] = nrm((EMB, 3 * HID)); p['enc_whh_f'] = nrm((HID, 3 * HID))
    p['enc_bih_f'] = nrm((1, 3 * HID));   p['enc_bhh_f'] = nrm((1, 3 * HID))
    p['enc_wih_b'] = nrm((EMB, 3 * HID)); p['enc_whh_b'] = nrm((HID, 3 * HID))
    p['enc_bih_b'] = nrm((1, 3 * HID));   p['enc_bhh_b'] = nrm((1, 3 * HID))
    # decoder
    p['event_emb'] = nrm((EVENT_NUM + 1, EMB))
    p['sos_emb'] = nrm((1, EMB))
    p['w_attn'] = nrm((2 * HID, 1));          p['b_attn'] = nrm((1, 1))
    p['w_comb'] = nrm((EMB + HID, EMB));      p['b_comb'] = nrm((1, EMB))
    p['dec_wih'] = nrm((EMB, 3 * HID));       p['dec_whh'] = nrm((HID, 3 * HID))
    p['dec_bih'] = nrm((1, 3 * HID));         p['dec_bhh'] = nrm((1, 3 * HID))
    p['w_eos'] = nrm((HID, 1));               p['b_eos'] = nrm((1, 1))
    p['w_pred'] = nrm((HID, EVENT_NUM));      p['b_pred'] = nrm((1, EVENT_NUM))
    p['w_fuse'] = nrm((2 * HID, FUSE));       p['b_fuse'] = nrm((1, FUSE))
    p['w_copy'] = nrm((FUSE, 1));             p['b_copy'] = nrm((1, 1))
    p['w_ent'] = nrm((HID, ENTITY));          p['b_ent'] = nrm((1, ENTITY))
    trans = jax.random.normal(next(it), (ENTITY, ENTITY)).astype(jnp.float32)
    trans = trans.at[0, :].set(-10000.0)
    trans = trans.at[:, -1].set(-10000.0)
    p['transitions'] = trans
    return p


# ---------------- pack params into lane-aligned / pre-folded kernel layouts ----------------
def pack_params(p):
    def gate_cols(w):   # (in, 3*HID) -> (in, 3*HP), each gate its own 128-lane block
        w = np.asarray(w, np.float32)
        out = np.zeros((w.shape[0], G3), np.float32)
        for g in range(3):
            out[:, g * HP:g * HP + HID] = w[:, g * HID:(g + 1) * HID]
        return out

    def pad_rows(a, rows):
        a = np.asarray(a, np.float32)
        out = np.zeros((rows,) + a.shape[1:], np.float32)
        out[:a.shape[0]] = a
        return out

    # encoder GRU (both directions), lane-aligned gates, whh rows padded to HP
    wih_f = gate_cols(p['enc_wih_f']); bih_f = gate_cols(p['enc_bih_f'])
    whh_f = pad_rows(gate_cols(p['enc_whh_f']), HP); bhh_f = gate_cols(p['enc_bhh_f'])
    wih_b = gate_cols(p['enc_wih_b']); bih_b = gate_cols(p['enc_bih_b'])
    whh_b = pad_rows(gate_cols(p['enc_whh_b']), HP); bhh_b = gate_cols(p['enc_bhh_b'])

    # attention encoder-side weight as a lane row; the decoder-state-side weight
    # wa_h and b_attn cancel inside the softmax over T and are not needed.
    wa = np.asarray(p['w_attn'], np.float32)              # (2H, 1)
    wa_e = np.zeros((1, HP), np.float32); wa_e[0, :HID] = wa[HID:, 0]

    # decoder GRU input path folded through combine_inputs:
    #   gx = (emb @ w_comb_e + context @ w_comb_c + b_comb) @ Wih + bih
    wih_d = gate_cols(p['dec_wih']); bih_d = gate_cols(p['dec_bih'])
    w_comb = np.asarray(p['w_comb'], np.float32)
    b_comb = np.asarray(p['b_comb'], np.float32)
    w_comb_e, w_comb_c = w_comb[:EMB], w_comb[EMB:]
    w_ctx_gx = pad_rows(w_comb_c @ wih_d, HP)                                   # (HP, 3*HP)
    sos_gx = (np.asarray(p['sos_emb'], np.float32) @ w_comb_e + b_comb) @ wih_d + bih_d
    event_gx = np.zeros((LANES, G3), np.float32)
    event_gx[:EVENT_NUM + 1] = (np.asarray(p['event_emb'], np.float32) @ w_comb_e
                                + b_comb) @ wih_d + bih_d

    # one lane-concatenated weight for everything that consumes the decoder state h:
    #   block0 = [pred | eos] (matches torch.cat((predict_logits, eos_logits), dim=1))
    #   block1 = ent ; blocks 2-4 = whh gates r/z/n
    w_hbig = np.zeros((HP, 5 * LANES), np.float32)
    b_hbig = np.zeros((1, 5 * LANES), np.float32)
    w_hbig[:HID, 0:EVENT_NUM] = np.asarray(p['w_pred'], np.float32)
    w_hbig[:HID, EVENT_NUM:EVENT_NUM + 1] = np.asarray(p['w_eos'], np.float32)
    w_hbig[:HID, LANES:LANES + ENTITY] = np.asarray(p['w_ent'], np.float32)
    w_hbig[:, 2 * LANES:5 * LANES] = pad_rows(gate_cols(p['dec_whh']), HP)
    b_hbig[0, 0:EVENT_NUM] = np.asarray(p['b_pred'], np.float32)[0]
    b_hbig[0, EVENT_NUM] = np.asarray(p['b_eos'], np.float32)[0, 0]
    b_hbig[0, LANES:LANES + ENTITY] = np.asarray(p['b_ent'], np.float32)[0]
    b_hbig[0, 2 * LANES:5 * LANES] = gate_cols(p['dec_bhh'])[0]

    return tuple(jnp.asarray(a) for a in
                 (wih_f, bih_f, whh_f, bhh_f,
                  wih_b, bih_b, whh_b, bhh_b,
                  wa_e, w_ctx_gx, sos_gx, event_gx, w_hbig, b_hbig))


# ---------------- full forward (labels=None inference path) ----------------
def crf_seq2seq_forward(params, sentence, sentence_eos, lengths):
    kparams = pack_params(params)
    if lengths:
        # TODO(synk): pack_padded_sequence length masking not implemented; call with lengths=[]
        pass
    del sentence_eos  # decoder only reads its batch size (identical to sentence's)

    # ---- ONE fused Pallas launch: encoder bi-GRU + full decode loop ----
    pred_pad, ent_pad = jax.block_until_ready(
        _fused_forward(params['word_emb'], sentence, kparams))
    B = sentence.shape[0]

    # single device->host sync for all stacked step outputs
    pred_np = np.asarray(pred_pad)[:, :, :EVENT_NUM + 1]    # (DECODELEN, B, EVENT_NUM+1)
    ent_np = np.asarray(ent_pad)[:, :, :ENTITY]             # (DECODELEN, B, ENTITY)

    # ---- host glue: CRF / Viterbi bookkeeping over stacked outputs (as in reference) ----
    # TODO(synk): for a serving loop, port this data-dependent backtrace to jitted JAX.
    pred_action_list = np.zeros((DECODELEN, B), np.float32)
    pred_logits_list = np.zeros((DECODELEN, B, ENTITY), np.float32)
    pred_event_logits_list = np.zeros((DECODELEN // EVENTLEN, B, EVENT_NUM + 1), np.float32)

    trans = np.asarray(params['transitions'])
    init_vvars = np.full((1, B, ENTITY), -10000.0, dtype=np.float32)
    init_vvars[0, 0, :] = 0.0        # faithful to reference `init_vvars[0][:][0] = 0.0`
    forward_var = init_vvars.copy()
    backpointers = []
    path_score_list = np.zeros(B, np.float32)

    for t in range(DECODELEN):
        if t % EVENTLEN == 0:
            pred_t = pred_np[t]
            pred_event_logits_list[t // EVENTLEN] = pred_t
            max_action = np.argmax(pred_t, axis=1)          # same first-argmax as in-kernel
            pred_action_list[t] = max_action
            if t != 0:
                terminal_var = (forward_var + trans[-1])[0]             # (B, ENTITY)
                best_tag_id = np.argmax(terminal_var, axis=-1).tolist()
                for i, best_id in enumerate(best_tag_id):
                    path_score = terminal_var[0][best_id]   # faithful: reference indexes batch 0
                    k = 1
                    pred_action_list[t - k, i] = best_id
                    for bptrs_t in reversed(backpointers):
                        best_id = bptrs_t[best_id][i]
                        if best_id == 0:
                            break
                        k += 1
                        pred_action_list[t - k, i] = best_id
                    path_score_list[i] += path_score
                forward_var = init_vvars.copy()
                backpointers = []
        else:
            ent_t = ent_np[t]
            pred_logits_list[t] = ent_t
            gamar = np.stack([forward_var] * ENTITY)[:, 0, :, :]        # (ENTITY, B, ENTITY)
            next_tag_var = gamar + trans[:, None, :]
            viterbivars_t = next_tag_var.max(axis=-1)                   # (ENTITY, B)
            bptrs_t = next_tag_var.argmax(axis=-1)                      # (ENTITY, B)
            forward_var = np.transpose(viterbivars_t[None], (0, 2, 1)) + ent_t[None]
            backpointers.append(bptrs_t.tolist())

    return pred_action_list, pred_logits_list, pred_event_logits_list


if __name__ == "__main__":
    key = jax.random.PRNGKey(0)
    pkey, skey1, skey2 = jax.random.split(key, 3)
    params = init_params(pkey)

    sentence = jax.random.randint(skey1, (BATCH, MAXLEN), 0, WORDS, dtype=jnp.int32)
    sentence_eos = jax.random.randint(skey2, (BATCH, MAXLEN), 0, WORDS, dtype=jnp.int32)

    pred_action_list, pred_logits_list, pred_event_logits_list = crf_seq2seq_forward(
        params, sentence, sentence_eos, lengths=[])
    jax.block_until_ready(jnp.asarray(pred_action_list))
    jax.block_until_ready(jnp.asarray(pred_event_logits_list))

    # CrfSeq2seq.forward(labels=None) returns (pred_action_list, pred_event_logits_list)
    assert pred_action_list.shape == (DECODELEN, BATCH)
    assert pred_logits_list.shape == (DECODELEN, BATCH, ENTITY)
    assert pred_event_logits_list.shape == (DECODELEN // EVENTLEN, BATCH, EVENT_NUM + 1)
    assert np.all(np.isfinite(pred_event_logits_list))
    assert np.all(np.isfinite(pred_logits_list))
    print("KERNEL_OK")
</pallas_src>

<mosaic_0001>
module attributes {stable_mosaic.version = 11 : i64} {
  func.func @_crf_kernel(%arg0: memref<8x2x32xf32, #tpu.memory_space<vmem>>, %arg1: memref<32x384xf32, #tpu.memory_space<vmem>>, %arg2: memref<1x384xf32, #tpu.memory_space<vmem>>, %arg3: memref<128x384xf32, #tpu.memory_space<vmem>>, %arg4: memref<1x384xf32, #tpu.memory_space<vmem>>, %arg5: memref<32x384xf32, #tpu.memory_space<vmem>>, %arg6: memref<1x384xf32, #tpu.memory_space<vmem>>, %arg7: memref<128x384xf32, #tpu.memory_space<vmem>>, %arg8: memref<1x384xf32, #tpu.memory_space<vmem>>, %arg9: memref<1x128xf32, #tpu.memory_space<vmem>>, %arg10: memref<128x384xf32, #tpu.memory_space<vmem>>, %arg11: memref<1x384xf32, #tpu.memory_space<vmem>>, %arg12: memref<128x384xf32, #tpu.memory_space<vmem>>, %arg13: memref<128x640xf32, #tpu.memory_space<vmem>>, %arg14: memref<1x640xf32, #tpu.memory_space<vmem>>, %arg15: memref<6x2x128xf32, #tpu.memory_space<vmem>>, %arg16: memref<6x2x128xf32, #tpu.memory_space<vmem>>) attributes {dimension_semantics = [], scalar_prefetch = 0 : i64, scratch_operands = 0 : i64, tpu.core_type = #tpu.core_type<tc>} {
    %c0 = arith.constant 0 : index
    %c0_0 = arith.constant 0 : index
    %c0_1 = arith.constant 0 : index
    %0 = vector.load %arg0[%c0, %c0_0, %c0_1] : memref<8x2x32xf32, #tpu.memory_space<vmem>>, vector<1x2x32xf32>
    %1 = vector.shape_cast %0 : vector<1x2x32xf32> to vector<2x32xf32>
    %c0_2 = arith.constant 0 : index
    %c0_3 = arith.constant 0 : index
    %2 = vector.load %arg1[%c0_2, %c0_3] : memref<32x384xf32, #tpu.memory_space<vmem>>, vector<32x384xf32>
    %cst = arith.constant dense<0.000000e+00> : vector<2x384xf32>
    %3 = tpu.matmul %1, %2, %cst {dimension_numbers = #tpu.dot_dimension_numbers<[1], [0], [0], [1], [0, 0, 1, 1], [], []>} : vector<2x32xf32>, vector<32x384xf32>, vector<2x384xf32> -> vector<2x384xf32>
    %c0_4 = arith.constant 0 : index
    %c0_5 = arith.constant 0 : index
    %4 = vector.load %arg2[%c0_4, %c0_5] : memref<1x384xf32, #tpu.memory_space<vmem>>, vector<1x384xf32>
    %5 = vector.broadcast %4 : vector<1x384xf32> to vector<2x384xf32>
    %6 = arith.addf %3, %5 : vector<2x384xf32>
    %c1 = arith.constant 1 : index
    %c0_6 = arith.constant 0 : index
    %c0_7 = arith.constant 0 : index
    %7 = vector.load %arg0[%c1, %c0_6, %c0_7] : memref<8x2x32xf32, #tpu.memory_space<vmem>>, vector<1x2x32xf32>
    %8 = vector.shape_cast %7 : vector<1x2x32xf32> to vector<2x32xf32>
    %c0_8 = arith.constant 0 : index
    %c0_9 = arith.constant 0 : index
    %9 = vector.load %arg1[%c0_8, %c0_9] : memref<32x384xf32, #tpu.memory_space<vmem>>, vector<32x384xf32>
    %cst_10 = arith.constant dense<0.000000e+00> : vector<2x384xf32>
    %10 = tpu.matmul %8, %9, %cst_10 {dimension_numbers = #tpu.dot_dimension_numbers<[1], [0], [0], [1], [0, 0, 1, 1], [], []>} : vector<2x32xf32>, vector<32x384xf32>, vector<2x384xf32> -> vector<2x384xf32>
    %c0_11 = arith.constant 0 : index
    %c0_12 = arith.constant 0 : index
    %11 = vector.load %arg2[%c0_11, %c0_12] : memref<1x384xf32, #tpu.memory_space<vmem>>, vector<1x384xf32>
    %12 = vector.broadcast %11 : vector<1x384xf32> to vector<2x384xf32>
    %13 = arith.addf %10, %12 : vector<2x384xf32>
    %c2 = arith.constant 2 : index
    %c0_13 = arith.constant 0 : index
    %c0_14 = arith.constant 0 : index
    %14 = vector.load %arg0[%c2, %c0_13, %c0_14] : memref<8x2x32xf32, #tpu.memory_space<vmem>>, vector<1x2x32xf32>
    %15 = vector.shape_cast %14 : vector<1x2x32xf32> to vector<2x32xf32>
    %c0_15 = arith.constant 0 : index
    %c0_16 = arith.constant 0 : index
    %16 = vector.load %arg1[%c0_15, %c0_16] : memref<32x384xf32, #tpu.memory_space<vmem>>, vector<32x384xf32>
    %cst_17 = arith.constant dense<0.000000e+00> : vector<2x384xf32>
    %17 = tpu.matmul %15, %16, %cst_17 {dimension_numbers = #tpu.dot_dimension_numbers<[1], [0], [0], [1], [0, 0, 1, 1], [], []>} : vector<2x32xf32>, vector<32x384xf32>, vector<2x384xf32> -> vector<2x384xf32>
    %c0_18 = arith.constant 0 : index
    %c0_19 = arith.constant 0 : index
    %18 = vector.load %arg2[%c0_18, %c0_19] : memref<1x384xf32, #tpu.memory_space<vmem>>, vector<1x384xf32>
    %19 = vector.broadcast %18 : vector<1x384xf32> to vector<2x384xf32>
    %20 = arith.addf %17, %19 : vector<2x384xf32>
    %c3 = arith.constant 3 : index
    %c0_20 = arith.constant 0 : index
    %c0_21 = arith.constant 0 : index
    %21 = vector.load %arg0[%c3, %c0_20, %c0_21] : memref<8x2x32xf32, #tpu.memory_space<vmem>>, vector<1x2x32xf32>
    %22 = vector.shape_cast %21 : vector<1x2x32xf32> to vector<2x32xf32>
    %c0_22 = arith.constant 0 : index
    %c0_23 = arith.constant 0 : index
    %23 = vector.load %arg1[%c0_22, %c0_23] : memref<32x384xf32, #tpu.memory_space<vmem>>, vector<32x384xf32>
    %cst_24 = arith.constant dense<0.000000e+00> : vector<2x384xf32>
    %24 = tpu.matmul %22, %23, %cst_24 {dimension_numbers = #tpu.dot_dimension_numbers<[1], [0], [0], [1], [0, 0, 1, 1], [], []>} : vector<2x32xf32>, vector<32x384xf32>, vector<2x384xf32> -> vector<2x384xf32>
    %c0_25 = arith.constant 0 : index
    %c0_26 = arith.constant 0 : index
    %25 = vector.load %arg2[%c0_25, %c0_26] : memref<1x384xf32, #tpu.memory_space<vmem>>, vector<1x384xf32>
    %26 = vector.broadcast %25 : vector<1x384xf32> to vector<2x384xf32>
    %27 = arith.addf %24, %26 : vector<2x384xf32>
    %c4 = arith.constant 4 : index
    %c0_27 = arith.constant 0 : index
    %c0_28 = arith.constant 0 : index
    %28 = vector.load %arg0[%c4, %c0_27, %c0_28] : memref<8x2x32xf32, #tpu.memory_space<vmem>>, vector<1x2x32xf32>
    %29 = vector.shape_cast %28 : vector<1x2x32xf32> to vector<2x32xf32>
    %c0_29 = arith.constant 0 : index
    %c0_30 = arith.constant 0 : index
    %30 = vector.load %arg1[%c0_29, %c0_30] : memref<32x384xf32, #tpu.memory_space<vmem>>, vector<32x384xf32>
    %cst_31 = arith.constant dense<0.000000e+00> : vector<2x384xf32>
    %31 = tpu.matmul %29, %30, %cst_31 {dimension_numbers = #tpu.dot_dimension_numbers<[1], [0], [0], [1], [0, 0, 1, 1], [], []>} : vector<2x32xf32>, vector<32x384xf32>, vector<2x384xf32> -> vector<2x384xf32>
    %c0_32 = arith.constant 0 : index
    %c0_33 = arith.constant 0 : index
    %32 = vector.load %arg2[%c0_32, %c0_33] : memref<1x384xf32, #tpu.memory_space<vmem>>, vector<1x384xf32>
    %33 = vector.broadcast %32 : vector<1x384xf32> to vector<2x384xf32>
    %34 = arith.addf %31, %33 : vector<2x384xf32>
    %c5 = arith.constant 5 : index
    %c0_34 = arith.constant 0 : index
    %c0_35 = arith.constant 0 : index
    %35 = vector.load %arg0[%c5, %c0_34, %c0_35] : memref<8x2x32xf32, #tpu.memory_space<vmem>>, vector<1x2x32xf32>
    %36 = vector.shape_cast %35 : vector<1x2x32xf32> to vector<2x32xf32>
    %c0_36 = arith.constant 0 : index
    %c0_37 = arith.constant 0 : index
    %37 = vector.load %arg1[%c0_36, %c0_37] : memref<32x384xf32, #tpu.memory_space<vmem>>, vector<32x384xf32>
    %cst_38 = arith.constant dense<0.000000e+00> : vector<2x384xf32>
    %38 = tpu.matmul %36, %37, %cst_38 {dimension_numbers = #tpu.dot_dimension_numbers<[1], [0], [0], [1], [0, 0, 1, 1], [], []>} : vector<2x32xf32>, vector<32x384xf32>, vector<2x384xf32> -> vector<2x384xf32>
    %c0_39 = arith.constant 0 : index
    %c0_40 = arith.constant 0 : index
    %39 = vector.load %arg2[%c0_39, %c0_40] : memref<1x384xf32, #tpu.memory_space<vmem>>, vector<1x384xf32>
    %40 = vector.broadcast %39 : vector<1x384xf32> to vector<2x384xf32>
    %41 = arith.addf %38, %40 : vector<2x384xf32>
    %c6 = arith.constant 6 : index
    %c0_41 = arith.constant 0 : index
    %c0_42 = arith.constant 0 : index
    %42 = vector.load %arg0[%c6, %c0_41, %c0_42] : memref<8x2x32xf32, #tpu.memory_space<vmem>>, vector<1x2x32xf32>
    %43 = vector.shape_cast %42 : vector<1x2x32xf32> to vector<2x32xf32>
    %c0_43 = arith.constant 0 : index
    %c0_44 = arith.constant 0 : index
    %44 = vector.load %arg1[%c0_43, %c0_44] : memref<32x384xf32, #tpu.memory_space<vmem>>, vector<32x384xf32>
    %cst_45 = arith.constant dense<0.000000e+00> : vector<2x384xf32>
    %45 = tpu.matmul %43, %44, %cst_45 {dimension_numbers = #tpu.dot_dimension_numbers<[1], [0], [0], [1], [0, 0, 1, 1], [], []>} : vector<2x32xf32>, vector<32x384xf32>, vector<2x384xf32> -> vector<2x384xf32>
    %c0_46 = arith.constant 0 : index
    %c0_47 = arith.constant 0 : index
    %46 = vector.load %arg2[%c0_46, %c0_47] : memref<1x384xf32, #tpu.memory_space<vmem>>, vector<1x384xf32>
    %47 = vector.broadcast %46 : vector<1x384xf32> to vector<2x384xf32>
    %48 = arith.addf %45, %47 : vector<2x384xf32>
    %c7 = arith.constant 7 : index
    %c0_48 = arith.constant 0 : index
    %c0_49 = arith.constant 0 : index
    %49 = vector.load %arg0[%c7, %c0_48, %c0_49] : memref<8x2x32xf32, #tpu.memory_space<vmem>>, vector<1x2x32xf32>
    %50 = vector.shape_cast %49 : vector<1x2x32xf32> to vector<2x32xf32>
    %c0_50 = arith.constant 0 : index
    %c0_51 = arith.constant 0 : index
    %51 = vector.load %arg1[%c0_50, %c0_51] : memref<32x384xf32, #tpu.memory_space<vmem>>, vector<32x384xf32>
    %cst_52 = arith.constant dense<0.000000e+00> : vector<2x384xf32>
    %52 = tpu.matmul %50, %51, %cst_52 {dimension_numbers = #tpu.dot_dimension_numbers<[1], [0], [0], [1], [0, 0, 1, 1], [], []>} : vector<2x32xf32>, vector<32x384xf32>, vector<2x384xf32> -> vector<2x384xf32>
    %c0_53 = arith.constant 0 : index
    %c0_54 = arith.constant 0 : index
    %53 = vector.load %arg2[%c0_53, %c0_54] : memref<1x384xf32, #tpu.memory_space<vmem>>, vector<1x384xf32>
    %54 = vector.broadcast %53 : vector<1x384xf32> to vector<2x384xf32>
    %55 = arith.addf %52, %54 : vector<2x384xf32>
    %cst_55 = arith.constant 0.000000e+00 : f32
    %56 = vector.broadcast %cst_55 : f32 to vector<2x128xf32>
    %c0_56 = arith.constant 0 : index
    %c0_57 = arith.constant 0 : index
    %57 = vector.load %arg3[%c0_56, %c0_57] : memref<128x384xf32, #tpu.memory_space<vmem>>, vector<128x384xf32>
    %cst_58 = arith.constant dense<0.000000e+00> : vector<2x384xf32>
    %58 = tpu.matmul %56, %57, %cst_58 {dimension_numbers = #tpu.dot_dimension_numbers<[1], [0], [0], [1], [0, 0, 1, 1], [], []>} : vector<2x128xf32>, vector<128x384xf32>, vector<2x384xf32> -> vector<2x384xf32>
    %c0_59 = arith.constant 0 : index
    %c0_60 = arith.constant 0 : index
    %59 = vector.load %arg4[%c0_59, %c0_60] : memref<1x384xf32, #tpu.memory_space<vmem>>, vector<1x384xf32>
    %60 = vector.broadcast %59 : vector<1x384xf32> to vector<2x384xf32>
    %61 = arith.addf %58, %60 : vector<2x384xf32>
    %62 = vector.extract_strided_slice %6 {offsets = [0, 0], sizes = [2, 128], strides = [1, 1]} : vector<2x384xf32> to vector<2x128xf32>
    %63 = vector.extract_strided_slice %61 {offsets = [0, 0], sizes = [2, 128], strides = [1, 1]} : vector<2x384xf32> to vector<2x128xf32>
    %64 = arith.addf %62, %63 : vector<2x128xf32>
    %65 = arith.negf %64 : vector<2x128xf32>
    %66 = math.exp %65 : vector<2x128xf32>
    %cst_61 = arith.constant 1.000000e+00 : f32
    %67 = vector.broadcast %cst_61 : f32 to vector<2x128xf32>
    %68 = arith.addf %67, %66 : vector<2x128xf32>
    %69 = arith.divf %67, %68 : vector<2x128xf32>
    %70 = vector.extract_strided_slice %6 {offsets = [0, 128], sizes = [2, 128], strides = [1, 1]} : vector<2x384xf32> to vector<2x128xf32>
    %71 = vector.extract_strided_slice %61 {offsets = [0, 128], sizes = [2, 128], strides = [1, 1]} : vector<2x384xf32> to vector<2x128xf32>
    %72 = arith.addf %70, %71 : vector<2x128xf32>
    %73 = arith.negf %72 : vector<2x128xf32>
    %74 = math.exp %73 : vector<2x128xf32>
    %cst_62 = arith.constant 1.000000e+00 : f32
    %75 = vector.broadcast %cst_62 : f32 to vector<2x128xf32>
    %76 = arith.addf %75, %74 : vector<2x128xf32>
    %77 = arith.divf %75, %76 : vector<2x128xf32>
    %78 = vector.extract_strided_slice %6 {offsets = [0, 256], sizes = [2, 128], strides = [1, 1]} : vector<2x384xf32> to vector<2x128xf32>
    %79 = vector.extract_strided_slice %61 {offsets = [0, 256], sizes = [2, 128], strides = [1, 1]} : vector<2x384xf32> to vector<2x128xf32>
    %80 = arith.mulf %69, %79 : vector<2x128xf32>
    %81 = arith.addf %78, %80 : vector<2x128xf32>
    %82 = math.tanh %81 : vector<2x128xf32>
    %cst_63 = arith.constant 1.000000e+00 : f32
    %83 = vector.broadcast %cst_63 : f32 to vector<2x128xf32>
    %84 = arith.subf %83, %77 : vector<2x128xf32>
    %85 = arith.mulf %84, %82 : vector<2x128xf32>
    %86 = arith.mulf %77, %56 : vector<2x128xf32>
    %87 = arith.addf %85, %86 : vector<2x128xf32>
    %c0_64 = arith.constant 0 : index
    %c0_65 = arith.constant 0 : index
    %88 = vector.load %arg3[%c0_64, %c0_65] : memref<128x384xf32, #tpu.memory_space<vmem>>, vector<128x384xf32>
    %cst_66 = arith.constant dense<0.000000e+00> : vector<2x384xf32>
    %89 = tpu.matmul %87, %88, %cst_66 {dimension_numbers = #tpu.dot_dimension_numbers<[1], [0], [0], [1], [0, 0, 1, 1], [], []>} : vector<2x128xf32>, vector<128x384xf32>, vector<2x384xf32> -> vector<2x384xf32>
    %c0_67 = arith.constant 0 : index
    %c0_68 = arith.constant 0 : index
    %90 = vector.load %arg4[%c0_67, %c0_68] : memref<1x384xf32, #tpu.memory_space<vmem>>, vector<1x384xf32>
    %91 = vector.broadcast %90 : vector<1x384xf32> to vector<2x384xf32>
    %92 = arith.addf %89, %91 : vector<2x384xf32>
    %93 = vector.extract_strided_slice %13 {offsets = [0, 0], sizes = [2, 128], strides = [1, 1]} : vector<2x384xf32> to vector<2x128xf32>
    %94 = vector.extract_strided_slice %92 {offsets = [0, 0], sizes = [2, 128], strides = [1, 1]} : vector<2x384xf32> to vector<2x128xf32>
    %95 = arith.addf %93, %94 : vector<2x128xf32>
    %96 = arith.negf %95 : vector<2x128xf32>
    %97 = math.exp %96 : vector<2x128xf32>
    %cst_69 = arith.constant 1.000000e+00 : f32
    %98 = vector.broadcast %cst_69 : f32 to vector<2x128xf32>
    %99 = arith.addf %98, %97 : vector<2x128xf32>
    %100 = arith.divf %98, %99 : vector<2x128xf32>
    %101 = vector.extract_strided_slice %13 {offsets = [0, 128], sizes = [2, 128], strides = [1, 1]} : vector<2x384xf32> to vector<2x128xf32>
    %102 = vector.extract_strided_slice %92 {offsets = [0, 128], sizes = [2, 128], strides = [1, 1]} : vector<2x384xf32> to vector<2x128xf32>
    %103 = arith.addf %101, %102 : vector<2x128xf32>
    %104 = arith.negf %103 : vector<2x128xf32>
    %105 = math.exp %104 : vector<2x128xf32>
    %cst_70 = arith.constant 1.000000e+00 : f32
    %106 = vector.broadcast %cst_70 : f32 to vector<2x128xf32>
    %107 = arith.addf %106, %105 : vector<2x128xf32>
    %108 = arith.divf %106, %107 : vector<2x128xf32>
    %109 = vector.extract_strided_slice %13 {offsets = [0, 256], sizes = [2, 128], strides = [1, 1]} : vector<2x384xf32> to vector<2x128xf32>
    %110 = vector.extract_strided_slice %92 {offsets = [0, 256], sizes = [2, 128], strides = [1, 1]} : vector<2x384xf32> to vector<2x128xf32>
    %111 = arith.mulf %100, %110 : vector<2x128xf32>
    %112 = arith.addf %109, %111 : vector<2x128xf32>
    %113 = math.tanh %112 : vector<2x128xf32>
    %cst_71 = arith.constant 1.000000e+00 : f32
    %114 = vector.broadcast %cst_71 : f32 to vector<2x128xf32>
    %115 = arith.subf %114, %108 : vector<2x128xf32>
    %116 = arith.mulf %115, %113 : vector<2x128xf32>
    %117 = arith.mulf %108, %87 : vector<2x128xf32>
    %118 = arith.addf %116, %117 : vector<2x128xf32>
    %c0_72 = arith.constant 0 : index
    %c0_73 = arith.constant 0 : index
    %119 = vector.load %arg3[%c0_72, %c0_73] : memref<128x384xf32, #tpu.memory_space<vmem>>, vector<128x384xf32>
    %cst_74 = arith.constant dense<0.000000e+00> : vector<2x384xf32>
    %120 = tpu.matmul %118, %119, %cst_74 {dimension_numbers = #tpu.dot_dimension_numbers<[1], [0], [0], [1], [0, 0, 1, 1], [], []>} : vector<2x128xf32>, vector<128x384xf32>, vector<2x384xf32> -> vector<2x384xf32>
    %c0_75 = arith.constant 0 : index
    %c0_76 = arith.constant 0 : index
    %121 = vector.load %arg4[%c0_75, %c0_76] : memref<1x384xf32, #tpu.memory_space<vmem>>, vector<1x384xf32>
    %122 = vector.broadcast %121 : vector<1x384xf32> to vector<2x384xf32>
    %123 = arith.addf %120, %122 : vector<2x384xf32>
    %124 = vector.extract_strided_slice %20 {offsets = [0, 0], sizes = [2, 128], strides = [1, 1]} : vector<2x384xf32> to vector<2x128xf32>
    %125 = vector.extract_strided_slice %123 {offsets = [0, 0], sizes = [2, 128], strides = [1, 1]} : vector<2x384xf32> to vector<2x128xf32>
    %126 = arith.addf %124, %125 : vector<2x128xf32>
    %127 = arith.negf %126 : vector<2x128xf32>
    %128 = math.exp %127 : vector<2x128xf32>
    %cst_77 = arith.constant 1.000000e+00 : f32
    %129 = vector.broadcast %cst_77 : f32 to vector<2x128xf32>
    %130 = arith.addf %129, %128 : vector<2x128xf32>
    %131 = arith.divf %129, %130 : vector<2x128xf32>
    %132 = vector.extract_strided_slice %20 {offsets = [0, 128], sizes = [2, 128], strides = [1, 1]} : vector<2x384xf32> to vector<2x128xf32>
    %133 = vector.extract_strided_slice %123 {offsets = [0, 128], sizes = [2, 128], strides = [1, 1]} : vector<2x384xf32> to vector<2x128xf32>
    %134 = arith.addf %132, %133 : vector<2x128xf32>
    %135 = arith.negf %134 : vector<2x128xf32>
    %136 = math.exp %135 : vector<2x128xf32>
    %cst_78 = arith.constant 1.000000e+00 : f32
    %137 = vector.broadcast %cst_78 : f32 to vector<2x128xf32>
    %138 = arith.addf %137, %136 : vector<2x128xf32>
    %139 = arith.divf %137, %138 : vector<2x128xf32>
    %140 = vector.extract_strided_slice %20 {offsets = [0, 256], sizes = [2, 128], strides = [1, 1]} : vector<2x384xf32> to vector<2x128xf32>
    %141 = vector.extract_strided_slice %123 {offsets = [0, 256], sizes = [2, 128], strides = [1, 1]} : vector<2x384xf32> to vector<2x128xf32>
    %142 = arith.mulf %131, %141 : vector<2x128xf32>
    %143 = arith.addf %140, %142 : vector<2x128xf32>
    %144 = math.tanh %143 : vector<2x128xf32>
    %cst_79 = arith.constant 1.000000e+00 : f32
    %145 = vector.broadcast %cst_79 : f32 to vector<2x128xf32>
    %146 = arith.subf %145, %139 : vector<2x128xf32>
    %147 = arith.mulf %146, %144 : vector<2x128xf32>
    %148 = arith.mulf %139, %118 : vector<2x128xf32>
    %149 = arith.addf %147, %148 : vector<2x128xf32>
    %c0_80 = arith.constant 0 : index
    %c0_81 = arith.constant 0 : index
    %150 = vector.load %arg3[%c0_80, %c0_81] : memref<128x384xf32, #tpu.memory_space<vmem>>, vector<128x384xf32>
    %cst_82 = arith.constant dense<0.000000e+00> : vector<2x384xf32>
    %151 = tpu.matmul %149, %150, %cst_82 {dimension_numbers = #tpu.dot_dimension_numbers<[1], [0], [0], [1], [0, 0, 1, 1], [], []>} : vector<2x128xf32>, vector<128x384xf32>, vector<2x384xf32> -> vector<2x384xf32>
    %c0_83 = arith.constant 0 : index
    %c0_84 = arith.constant 0 : index
    %152 = vector.load %arg4[%c0_83, %c0_84] : memref<1x384xf32, #tpu.memory_space<vmem>>, vector<1x384xf32>
    %153 = vector.broadcast %152 : vector<1x384xf32> to vector<2x384xf32>
    %154 = arith.addf %151, %153 : vector<2x384xf32>
    %155 = vector.extract_strided_slice %27 {offsets = [0, 0], sizes = [2, 128], strides = [1, 1]} : vector<2x384xf32> to vector<2x128xf32>
    %156 = vector.extract_strided_slice %154 {offsets = [0, 0], sizes = [2, 128], strides = [1, 1]} : vector<2x384xf32> to vector<2x128xf32>
    %157 = arith.addf %155, %156 : vector<2x128xf32>
    %158 = arith.negf %157 : vector<2x128xf32>
    %159 = math.exp %158 : vector<2x128xf32>
    %cst_85 = arith.constant 1.000000e+00 : f32
    %160 = vector.broadcast %cst_85 : f32 to vector<2x128xf32>
    %161 = arith.addf %160, %159 : vector<2x128xf32>
    %162 = arith.divf %160, %161 : vector<2x128xf32>
    %163 = vector.extract_strided_slice %27 {offsets = [0, 128], sizes = [2, 128], strides = [1, 1]} : vector<2x384xf32> to vector<2x128xf32>
    %164 = vector.extract_strided_slice %154 {offsets = [0, 128], sizes = [2, 128], strides = [1, 1]} : vector<2x384xf32> to vector<2x128xf32>
    %165 = arith.addf %163, %164 : vector<2x128xf32>
    %166 = arith.negf %165 : vector<2x128xf32>
    %167 = math.exp %166 : vector<2x128xf32>
    %cst_86 = arith.constant 1.000000e+00 : f32
    %168 = vector.broadcast %cst_86 : f32 to vector<2x128xf32>
    %169 = arith.addf %168, %167 : vector<2x128xf32>
    %170 = arith.divf %168, %169 : vector<2x128xf32>
    %171 = vector.extract_strided_slice %27 {offsets = [0, 256], sizes = [2, 128], strides = [1, 1]} : vector<2x384xf32> to vector<2x128xf32>
    %172 = vector.extract_strided_slice %154 {offsets = [0, 256], sizes = [2, 128], strides = [1, 1]} : vector<2x384xf32> to vector<2x128xf32>
    %173 = arith.mulf %162, %172 : vector<2x128xf32>
    %174 = arith.addf %171, %173 : vector<2x128xf32>
    %175 = math.tanh %174 : vector<2x128xf32>
    %cst_87 = arith.constant 1.000000e+00 : f32
    %176 = vector.broadcast %cst_87 : f32 to vector<2x128xf32>
    %177 = arith.subf %176, %170 : vector<2x128xf32>
    %178 = arith.mulf %177, %175 : vector<2x128xf32>
    %179 = arith.mulf %170, %149 : vector<2x128xf32>
    %180 = arith.addf %178, %179 : vector<2x128xf32>
    %c0_88 = arith.constant 0 : index
    %c0_89 = arith.constant 0 : index
    %181 = vector.load %arg3[%c0_88, %c0_89] : memref<128x384xf32, #tpu.memory_space<vmem>>, vector<128x384xf32>
    %cst_90 = arith.constant dense<0.000000e+00> : vector<2x384xf32>
    %182 = tpu.matmul %180, %181, %cst_90 {dimension_numbers = #tpu.dot_dimension_numbers<[1], [0], [0], [1], [0, 0, 1, 1], [], []>} : vector<2x128xf32>, vector<128x384xf32>, vector<2x384xf32> -> vector<2x384xf32>
    %c0_91 = arith.constant 0 : index
    %c0_92 = arith.constant 0 : index
    %183 = vector.load %arg4[%c0_91, %c0_92] : memref<1x384xf32, #tpu.memory_space<vmem>>, vector<1x384xf32>
    %184 = vector.broadcast %183 : vector<1x384xf32> to vector<2x384xf32>
    %185 = arith.addf %182, %184 : vector<2x384xf32>
    %186 = vector.extract_strided_slice %34 {offsets = [0, 0], sizes = [2, 128], strides = [1, 1]} : vector<2x384xf32> to vector<2x128xf32>
    %187 = vector.extract_strided_slice %185 {offsets = [0, 0], sizes = [2, 128], strides = [1, 1]} : vector<2x384xf32> to vector<2x128xf32>
    %188 = arith.addf %186, %187 : vector<2x128xf32>
    %189 = arith.negf %188 : vector<2x128xf32>
    %190 = math.exp %189 : vector<2x128xf32>
    %cst_93 = arith.constant 1.000000e+00 : f32
    %191 = vector.broadcast %cst_93 : f32 to vector<2x128xf32>
    %192 = arith.addf %191, %190 : vector<2x128xf32>
    %193 = arith.divf %191, %192 : vector<2x128xf32>
    %194 = vector.extract_strided_slice %34 {offsets = [0, 128], sizes = [2, 128], strides = [1, 1]} : vector<2x384xf32> to vector<2x128xf32>
    %195 = vector.extract_strided_slice %185 {offsets = [0, 128], sizes = [2, 128], strides = [1, 1]} : vector<2x384xf32> to vector<2x128xf32>
    %196 = arith.addf %194, %195 : vector<2x128xf32>
    %197 = arith.negf %196 : vector<2x128xf32>
    %198 = math.exp %197 : vector<2x128xf32>
    %cst_94 = arith.constant 1.000000e+00 : f32
    %199 = vector.broadcast %cst_94 : f32 to vector<2x128xf32>
    %200 = arith.addf %199, %198 : vector<2x128xf32>
    %201 = arith.divf %199, %200 : vector<2x128xf32>
    %202 = vector.extract_strided_slice %34 {offsets = [0, 256], sizes = [2, 128], strides = [1, 1]} : vector<2x384xf32> to vector<2x128xf32>
    %203 = vector.extract_strided_slice %185 {offsets = [0, 256], sizes = [2, 128], strides = [1, 1]} : vector<2x384xf32> to vector<2x128xf32>
    %204 = arith.mulf %193, %203 : vector<2x128xf32>
    %205 = arith.addf %202, %204 : vector<2x128xf32>
    %206 = math.tanh %205 : vector<2x128xf32>
    %cst_95 = arith.constant 1.000000e+00 : f32
    %207 = vector.broadcast %cst_95 : f32 to vector<2x128xf32>
    %208 = arith.subf %207, %201 : vector<2x128xf32>
    %209 = arith.mulf %208, %206 : vector<2x128xf32>
    %210 = arith.mulf %201, %180 : vector<2x128xf32>
    %211 = arith.addf %209, %210 : vector<2x128xf32>
    %c0_96 = arith.constant 0 : index
    %c0_97 = arith.constant 0 : index
    %212 = vector.load %arg3[%c0_96, %c0_97] : memref<128x384xf32, #tpu.memory_space<vmem>>, vector<128x384xf32>
    %cst_98 = arith.constant dense<0.000000e+00> : vector<2x384xf32>
    %213 = tpu.matmul %211, %212, %cst_98 {dimension_numbers = #tpu.dot_dimension_numbers<[1], [0], [0], [1], [0, 0, 1, 1], [], []>} : vector<2x128xf32>, vector<128x384xf32>, vector<2x384xf32> -> vector<2x384xf32>
    %c0_99 = arith.constant 0 : index
    %c0_100 = arith.constant 0 : index
    %214 = vector.load %arg4[%c0_99, %c0_100] : memref<1x384xf32, #tpu.memory_space<vmem>>, vector<1x384xf32>
    %215 = vector.broadcast %214 : vector<1x384xf32> to vector<2x384xf32>
    %216 = arith.addf %213, %215 : vector<2x384xf32>
    %217 = vector.extract_strided_slice %41 {offsets = [0, 0], sizes = [2, 128], strides = [1, 1]} : vector<2x384xf32> to vector<2x128xf32>
    %218 = vector.extract_strided_slice %216 {offsets = [0, 0], sizes = [2, 128], strides = [1, 1]} : vector<2x384xf32> to vector<2x128xf32>
    %219 = arith.addf %217, %218 : vector<2x128xf32>
    %220 = arith.negf %219 : vector<2x128xf32>
    %221 = math.exp %220 : vector<2x128xf32>
    %cst_101 = arith.constant 1.000000e+00 : f32
    %222 = vector.broadcast %cst_101 : f32 to vector<2x128xf32>
    %223 = arith.addf %222, %221 : vector<2x128xf32>
    %224 = arith.divf %222, %223 : vector<2x128xf32>
    %225 = vector.extract_strided_slice %41 {offsets = [0, 128], sizes = [2, 128], strides = [1, 1]} : vector<2x384xf32> to vector<2x128xf32>
    %226 = vector.extract_strided_slice %216 {offsets = [0, 128], sizes = [2, 128], strides = [1, 1]} : vector<2x384xf32> to vector<2x128xf32>
    %227 = arith.addf %225, %226 : vector<2x128xf32>
    %228 = arith.negf %227 : vector<2x128xf32>
    %229 = math.exp %228 : vector<2x128xf32>
    %cst_102 = arith.constant 1.000000e+00 : f32
    %230 = vector.broadcast %cst_102 : f32 to vector<2x128xf32>
    %231 = arith.addf %230, %229 : vector<2x128xf32>
    %232 = arith.divf %230, %231 : vector<2x128xf32>
    %233 = vector.extract_strided_slice %41 {offsets = [0, 256], sizes = [2, 128], strides = [1, 1]} : vector<2x384xf32> to vector<2x128xf32>
    %234 = vector.extract_strided_slice %216 {offsets = [0, 256], sizes = [2, 128], strides = [1, 1]} : vector<2x384xf32> to vector<2x128xf32>
    %235 = arith.mulf %224, %234 : vector<2x128xf32>
    %236 = arith.addf %233, %235 : vector<2x128xf32>
    %237 = math.tanh %236 : vector<2x128xf32>
    %cst_103 = arith.constant 1.000000e+00 : f32
    %238 = vector.broadcast %cst_103 : f32 to vector<2x128xf32>
    %239 = arith.subf %238, %232 : vector<2x128xf32>
    %240 = arith.mulf %239, %237 : vector<2x128xf32>
    %241 = arith.mulf %232, %211 : vector<2x128xf32>
    %242 = arith.addf %240, %241 : vector<2x128xf32>
    %c0_104 = arith.constant 0 : index
    %c0_105 = arith.constant 0 : index
    %243 = vector.load %arg3[%c0_104, %c0_105] : memref<128x384xf32, #tpu.memory_space<vmem>>, vector<128x384xf32>
    %cst_106 = arith.constant dense<0.000000e+00> : vector<2x384xf32>
    %244 = tpu.matmul %242, %243, %cst_106 {dimension_numbers = #tpu.dot_dimension_numbers<[1], [0], [0], [1], [0, 0, 1, 1], [], []>} : vector<2x128xf32>, vector<128x384xf32>, vector<2x384xf32> -> vector<2x384xf32>
    %c0_107 = arith.constant 0 : index
    %c0_108 = arith.constant 0 : index
    %245 = vector.load %arg4[%c0_107, %c0_108] : memref<1x384xf32, #tpu.memory_space<vmem>>, vector<1x384xf32>
    %246 = vector.broadcast %245 : vector<1x384xf32> to vector<2x384xf32>
    %247 = arith.addf %244, %246 : vector<2x384xf32>
    %248 = vector.extract_strided_slice %48 {offsets = [0, 0], sizes = [2, 128], strides = [1, 1]} : vector<2x384xf32> to vector<2x128xf32>
    %249 = vector.extract_strided_slice %247 {offsets = [0, 0], sizes = [2, 128], strides = [1, 1]} : vector<2x384xf32> to vector<2x128xf32>
    %250 = arith.addf %248, %249 : vector<2x128xf32>
    %251 = arith.negf %250 : vector<2x128xf32>
    %252 = math.exp %251 : vector<2x128xf32>
    %cst_109 = arith.constant 1.000000e+00 : f32
    %253 = vector.broadcast %cst_109 : f32 to vector<2x128xf32>
    %254 = arith.addf %253, %252 : vector<2x128xf32>
    %255 = arith.divf %253, %254 : vector<2x128xf32>
    %256 = vector.extract_strided_slice %48 {offsets = [0, 128], sizes = [2, 128], strides = [1, 1]} : vector<2x384xf32> to vector<2x128xf32>
    %257 = vector.extract_strided_slice %247 {offsets = [0, 128], sizes = [2, 128], strides = [1, 1]} : vector<2x384xf32> to vector<2x128xf32>
    %258 = arith.addf %256, %257 : vector<2x128xf32>
    %259 = arith.negf %258 : vector<2x128xf32>
    %260 = math.exp %259 : vector<2x128xf32>
    %cst_110 = arith.constant 1.000000e+00 : f32
    %261 = vector.broadcast %cst_110 : f32 to vector<2x128xf32>
    %262 = arith.addf %261, %260 : vector<2x128xf32>
    %263 = arith.divf %261, %262 : vector<2x128xf32>
    %264 = vector.extract_strided_slice %48 {offsets = [0, 256], sizes = [2, 128], strides = [1, 1]} : vector<2x384xf32> to vector<2x128xf32>
    %265 = vector.extract_strided_slice %247 {offsets = [0, 256], sizes = [2, 128], strides = [1, 1]} : vector<2x384xf32> to vector<2x128xf32>
    %266 = arith.mulf %255, %265 : vector<2x128xf32>
    %267 = arith.addf %264, %266 : vector<2x128xf32>
    %268 = math.tanh %267 : vector<2x128xf32>
    %cst_111 = arith.constant 1.000000e+00 : f32
    %269 = vector.broadcast %cst_111 : f32 to vector<2x128xf32>
    %270 = arith.subf %269, %263 : vector<2x128xf32>
    %271 = arith.mulf %270, %268 : vector<2x128xf32>
    %272 = arith.mulf %263, %242 : vector<2x128xf32>
    %273 = arith.addf %271, %272 : vector<2x128xf32>
    %c0_112 = arith.constant 0 : index
    %c0_113 = arith.constant 0 : index
    %274 = vector.load %arg3[%c0_112, %c0_113] : memref<128x384xf32, #tpu.memory_space<vmem>>, vector<128x384xf32>
    %cst_114 = arith.constant dense<0.000000e+00> : vector<2x384xf32>
    %275 = tpu.matmul %273, %274, %cst_114 {dimension_numbers = #tpu.dot_dimension_numbers<[1], [0], [0], [1], [0, 0, 1, 1], [], []>} : vector<2x128xf32>, vector<128x384xf32>, vector<2x384xf32> -> vector<2x384xf32>
    %c0_115 = arith.constant 0 : index
    %c0_116 = arith.constant 0 : index
    %276 = vector.load %arg4[%c0_115, %c0_116] : memref<1x384xf32, #tpu.memory_space<vmem>>, vector<1x384xf32>
    %277 = vector.broadcast %276 : vector<1x384xf32> to vector<2x384xf32>
    %278 = arith.addf %275, %277 : vector<2x384xf32>
    %279 = vector.extract_strided_slice %55 {offsets = [0, 0], sizes = [2, 128], strides = [1, 1]} : vector<2x384xf32> to vector<2x128xf32>
    %280 = vector.extract_strided_slice %278 {offsets = [0, 0], sizes = [2, 128], strides = [1, 1]} : vector<2x384xf32> to vector<2x128xf32>
    %281 = arith.addf %279, %280 : vector<2x128xf32>
    %282 = arith.negf %281 : vector<2x128xf32>
    %283 = math.exp %282 : vector<2x128xf32>
    %cst_117 = arith.constant 1.000000e+00 : f32
    %284 = vector.broadcast %cst_117 : f32 to vector<2x128xf32>
    %285 = arith.addf %284, %283 : vector<2x128xf32>
    %286 = arith.divf %284, %285 : vector<2x128xf32>
    %287 = vector.extract_strided_slice %55 {offsets = [0, 128], sizes = [2, 128], strides = [1, 1]} : vector<2x384xf32> to vector<2x128xf32>
    %288 = vector.extract_strided_slice %278 {offsets = [0, 128], sizes = [2, 128], strides = [1, 1]} : vector<2x384xf32> to vector<2x128xf32>
    %289 = arith.addf %287, %288 : vector<2x128xf32>
    %290 = arith.negf %289 : vector<2x128xf32>
    %291 = math.exp %290 : vector<2x128xf32>
    %cst_118 = arith.constant 1.000000e+00 : f32
    %292 = vector.broadcast %cst_118 : f32 to vector<2x128xf32>
    %293 = arith.addf %292, %291 : vector<2x128xf32>
    %294 = arith.divf %292, %293 : vector<2x128xf32>
    %295 = vector.extract_strided_slice %55 {offsets = [0, 256], sizes = [2, 128], strides = [1, 1]} : vector<2x384xf32> to vector<2x128xf32>
    %296 = vector.extract_strided_slice %278 {offsets = [0, 256], sizes = [2, 128], strides = [1, 1]} : vector<2x384xf32> to vector<2x128xf32>
    %297 = arith.mulf %286, %296 : vector<2x128xf32>
    %298 = arith.addf %295, %297 : vector<2x128xf32>
    %299 = math.tanh %298 : vector<2x128xf32>
    %cst_119 = arith.constant 1.000000e+00 : f32
    %300 = vector.broadcast %cst_119 : f32 to vector<2x128xf32>
    %301 = arith.subf %300, %294 : vector<2x128xf32>
    %302 = arith.mulf %301, %299 : vector<2x128xf32>
    %303 = arith.mulf %294, %273 : vector<2x128xf32>
    %304 = arith.addf %302, %303 : vector<2x128xf32>
    %c0_120 = arith.constant 0 : index
    %c0_121 = arith.constant 0 : index
    %c0_122 = arith.constant 0 : index
    %305 = vector.load %arg0[%c0_120, %c0_121, %c0_122] : memref<8x2x32xf32, #tpu.memory_space<vmem>>, vector<1x2x32xf32>
    %306 = vector.shape_cast %305 : vector<1x2x32xf32> to vector<2x32xf32>
    %c0_123 = arith.constant 0 : index
    %c0_124 = arith.constant 0 : index
    %307 = vector.load %arg5[%c0_123, %c0_124] : memref<32x384xf32, #tpu.memory_space<vmem>>, vector<32x384xf32>
    %cst_125 = arith.constant dense<0.000000e+00> : vector<2x384xf32>
    %308 = tpu.matmul %306, %307, %cst_125 {dimension_numbers = #tpu.dot_dimension_numbers<[1], [0], [0], [1], [0, 0, 1, 1], [], []>} : vector<2x32xf32>, vector<32x384xf32>, vector<2x384xf32> -> vector<2x384xf32>
    %c0_126 = arith.constant 0 : index
    %c0_127 = arith.constant 0 : index
    %309 = vector.load %arg6[%c0_126, %c0_127] : memref<1x384xf32, #tpu.memory_space<vmem>>, vector<1x384xf32>
    %310 = vector.broadcast %309 : vector<1x384xf32> to vector<2x384xf32>
    %311 = arith.addf %308, %310 : vector<2x384xf32>
    %c1_128 = arith.constant 1 : index
    %c0_129 = arith.constant 0 : index
    %c0_130 = arith.constant 0 : index
    %312 = vector.load %arg0[%c1_128, %c0_129, %c0_130] : memref<8x2x32xf32, #tpu.memory_space<vmem>>, vector<1x2x32xf32>
    %313 = vector.shape_cast %312 : vector<1x2x32xf32> to vector<2x32xf32>
    %c0_131 = arith.constant 0 : index
    %c0_132 = arith.constant 0 : index
    %314 = vector.load %arg5[%c0_131, %c0_132] : memref<32x384xf32, #tpu.memory_space<vmem>>, vector<32x384xf32>
    %cst_133 = arith.constant dense<0.000000e+00> : vector<2x384xf32>
    %315 = tpu.matmul %313, %314, %cst_133 {dimension_numbers = #tpu.dot_dimension_numbers<[1], [0], [0], [1], [0, 0, 1, 1], [], []>} : vector<2x32xf32>, vector<32x384xf32>, vector<2x384xf32> -> vector<2x384xf32>
    %c0_134 = arith.constant 0 : index
    %c0_135 = arith.constant 0 : index
    %316 = vector.load %arg6[%c0_134, %c0_135] : memref<1x384xf32, #tpu.memory_space<vmem>>, vector<1x384xf32>
    %317 = vector.broadcast %316 : vector<1x384xf32> to vector<2x384xf32>
    %318 = arith.addf %315, %317 : vector<2x384xf32>
    %c2_136 = arith.constant 2 : index
    %c0_137 = arith.constant 0 : index
    %c0_138 = arith.constant 0 : index
    %319 = vector.load %arg0[%c2_136, %c0_137, %c0_138] : memref<8x2x32xf32, #tpu.memory_space<vmem>>, vector<1x2x32xf32>
    %320 = vector.shape_cast %319 : vector<1x2x32xf32> to vector<2x32xf32>
    %c0_139 = arith.constant 0 : index
    %c0_140 = arith.constant 0 : index
    %321 = vector.load %arg5[%c0_139, %c0_140] : memref<32x384xf32, #tpu.memory_space<vmem>>, vector<32x384xf32>
    %cst_141 = arith.constant dense<0.000000e+00> : vector<2x384xf32>
    %322 = tpu.matmul %320, %321, %cst_141 {dimension_numbers = #tpu.dot_dimension_numbers<[1], [0], [0], [1], [0, 0, 1, 1], [], []>} : vector<2x32xf32>, vector<32x384xf32>, vector<2x384xf32> -> vector<2x384xf32>
    %c0_142 = arith.constant 0 : index
    %c0_143 = arith.constant 0 : index
    %323 = vector.load %arg6[%c0_142, %c0_143] : memref<1x384xf32, #tpu.memory_space<vmem>>, vector<1x384xf32>
    %324 = vector.broadcast %323 : vector<1x384xf32> to vector<2x384xf32>
    %325 = arith.addf %322, %324 : vector<2x384xf32>
    %c3_144 = arith.constant 3 : index
    %c0_145 = arith.constant 0 : index
    %c0_146 = arith.constant 0 : index
    %326 = vector.load %arg0[%c3_144, %c0_145, %c0_146] : memref<8x2x32xf32, #tpu.memory_space<vmem>>, vector<1x2x32xf32>
    %327 = vector.shape_cast %326 : vector<1x2x32xf32> to vector<2x32xf32>
    %c0_147 = arith.constant 0 : index
    %c0_148 = arith.constant 0 : index
    %328 = vector.load %arg5[%c0_147, %c0_148] : memref<32x384xf32, #tpu.memory_space<vmem>>, vector<32x384xf32>
    %cst_149 = arith.constant dense<0.000000e+00> : vector<2x384xf32>
    %329 = tpu.matmul %327, %328, %cst_149 {dimension_numbers = #tpu.dot_dimension_numbers<[1], [0], [0], [1], [0, 0, 1, 1], [], []>} : vector<2x32xf32>, vector<32x384xf32>, vector<2x384xf32> -> vector<2x384xf32>
    %c0_150 = arith.constant 0 : index
    %c0_151 = arith.constant 0 : index
    %330 = vector.load %arg6[%c0_150, %c0_151] : memref<1x384xf32, #tpu.memory_space<vmem>>, vector<1x384xf32>
    %331 = vector.broadcast %330 : vector<1x384xf32> to vector<2x384xf32>
    %332 = arith.addf %329, %331 : vector<2x384xf32>
    %c4_152 = arith.constant 4 : index
    %c0_153 = arith.constant 0 : index
    %c0_154 = arith.constant 0 : index
    %333 = vector.load %arg0[%c4_152, %c0_153, %c0_154] : memref<8x2x32xf32, #tpu.memory_space<vmem>>, vector<1x2x32xf32>
    %334 = vector.shape_cast %333 : vector<1x2x32xf32> to vector<2x32xf32>
    %c0_155 = arith.constant 0 : index
    %c0_156 = arith.constant 0 : index
    %335 = vector.load %arg5[%c0_155, %c0_156] : memref<32x384xf32, #tpu.memory_space<vmem>>, vector<32x384xf32>
    %cst_157 = arith.constant dense<0.000000e+00> : vector<2x384xf32>
    %336 = tpu.matmul %334, %335, %cst_157 {dimension_numbers = #tpu.dot_dimension_numbers<[1], [0], [0], [1], [0, 0, 1, 1], [], []>} : vector<2x32xf32>, vector<32x384xf32>, vector<2x384xf32> -> vector<2x384xf32>
    %c0_158 = arith.constant 0 : index
    %c0_159 = arith.constant 0 : index
    %337 = vector.load %arg6[%c0_158, %c0_159] : memref<1x384xf32, #tpu.memory_space<vmem>>, vector<1x384xf32>
    %338 = vector.broadcast %337 : vector<1x384xf32> to vector<2x384xf32>
    %339 = arith.addf %336, %338 : vector<2x384xf32>
    %c5_160 = arith.constant 5 : index
    %c0_161 = arith.constant 0 : index
    %c0_162 = arith.constant 0 : index
    %340 = vector.load %arg0[%c5_160, %c0_161, %c0_162] : memref<8x2x32xf32, #tpu.memory_space<vmem>>, vector<1x2x32xf32>
    %341 = vector.shape_cast %340 : vector<1x2x32xf32> to vector<2x32xf32>
    %c0_163 = arith.constant 0 : index
    %c0_164 = arith.constant 0 : index
    %342 = vector.load %arg5[%c0_163, %c0_164] : memref<32x384xf32, #tpu.memory_space<vmem>>, vector<32x384xf32>
    %cst_165 = arith.constant dense<0.000000e+00> : vector<2x384xf32>
    %343 = tpu.matmul %341, %342, %cst_165 {dimension_numbers = #tpu.dot_dimension_numbers<[1], [0], [0], [1], [0, 0, 1, 1], [], []>} : vector<2x32xf32>, vector<32x384xf32>, vector<2x384xf32> -> vector<2x384xf32>
    %c0_166 = arith.constant 0 : index
    %c0_167 = arith.constant 0 : index
    %344 = vector.load %arg6[%c0_166, %c0_167] : memref<1x384xf32, #tpu.memory_space<vmem>>, vector<1x384xf32>
    %345 = vector.broadcast %344 : vector<1x384xf32> to vector<2x384xf32>
    %346 = arith.addf %343, %345 : vector<2x384xf32>
    %c6_168 = arith.constant 6 : index
    %c0_169 = arith.constant 0 : index
    %c0_170 = arith.constant 0 : index
    %347 = vector.load %arg0[%c6_168, %c0_169, %c0_170] : memref<8x2x32xf32, #tpu.memory_space<vmem>>, vector<1x2x32xf32>
    %348 = vector.shape_cast %347 : vector<1x2x32xf32> to vector<2x32xf32>
    %c0_171 = arith.constant 0 : index
    %c0_172 = arith.constant 0 : index
    %349 = vector.load %arg5[%c0_171, %c0_172] : memref<32x384xf32, #tpu.memory_space<vmem>>, vector<32x384xf32>
    %cst_173 = arith.constant dense<0.000000e+00> : vector<2x384xf32>
    %350 = tpu.matmul %348, %349, %cst_173 {dimension_numbers = #tpu.dot_dimension_numbers<[1], [0], [0], [1], [0, 0, 1, 1], [], []>} : vector<2x32xf32>, vector<32x384xf32>, vector<2x384xf32> -> vector<2x384xf32>
    %c0_174 = arith.constant 0 : index
    %c0_175 = arith.constant 0 : index
    %351 = vector.load %arg6[%c0_174, %c0_175] : memref<1x384xf32, #tpu.memory_space<vmem>>, vector<1x384xf32>
    %352 = vector.broadcast %351 : vector<1x384xf32> to vector<2x384xf32>
    %353 = arith.addf %350, %352 : vector<2x384xf32>
    %c7_176 = arith.constant 7 : index
    %c0_177 = arith.constant 0 : index
    %c0_178 = arith.constant 0 : index
    %354 = vector.load %arg0[%c7_176, %c0_177, %c0_178] : memref<8x2x32xf32, #tpu.memory_space<vmem>>, vector<1x2x32xf32>
    %355 = vector.shape_cast %354 : vector<1x2x32xf32> to vector<2x32xf32>
    %c0_179 = arith.constant 0 : index
    %c0_180 = arith.constant 0 : index
    %356 = vector.load %arg5[%c0_179, %c0_180] : memref<32x384xf32, #tpu.memory_space<vmem>>, vector<32x384xf32>
    %cst_181 = arith.constant dense<0.000000e+00> : vector<2x384xf32>
    %357 = tpu.matmul %355, %356, %cst_181 {dimension_numbers = #tpu.dot_dimension_numbers<[1], [0], [0], [1], [0, 0, 1, 1], [], []>} : vector<2x32xf32>, vector<32x384xf32>, vector<2x384xf32> -> vector<2x384xf32>
    %c0_182 = arith.constant 0 : index
    %c0_183 = arith.constant 0 : index
    %358 = vector.load %arg6[%c0_182, %c0_183] : memref<1x384xf32, #tpu.memory_space<vmem>>, vector<1x384xf32>
    %359 = vector.broadcast %358 : vector<1x384xf32> to vector<2x384xf32>
    %360 = arith.addf %357, %359 : vector<2x384xf32>
    %cst_184 = arith.constant 0.000000e+00 : f32
    %361 = vector.broadcast %cst_184 : f32 to vector<2x128xf32>
    %c0_185 = arith.constant 0 : index
    %c0_186 = arith.constant 0 : index
    %362 = vector.load %arg7[%c0_185, %c0_186] : memref<128x384xf32, #tpu.memory_space<vmem>>, vector<128x384xf32>
    %cst_187 = arith.constant dense<0.000000e+00> : vector<2x384xf32>
    %363 = tpu.matmul %361, %362, %cst_187 {dimension_numbers = #tpu.dot_dimension_numbers<[1], [0], [0], [1], [0, 0, 1, 1], [], []>} : vector<2x128xf32>, vector<128x384xf32>, vector<2x384xf32> -> vector<2x384xf32>
    %c0_188 = arith.constant 0 : index
    %c0_189 = arith.constant 0 : index
    %364 = vector.load %arg8[%c0_188, %c0_189] : memref<1x384xf32, #tpu.memory_space<vmem>>, vector<1x384xf32>
    %365 = vector.broadcast %364 : vector<1x384xf32> to vector<2x384xf32>
    %366 = arith.addf %363, %365 : vector<2x384xf32>
    %367 = vector.extract_strided_slice %360 {offsets = [0, 0], sizes = [2, 128], strides = [1, 1]} : vector<2x384xf32> to vector<2x128xf32>
    %368 = vector.extract_strided_slice %366 {offsets = [0, 0], sizes = [2, 128], strides = [1, 1]} : vector<2x384xf32> to vector<2x128xf32>
    %369 = arith.addf %367, %368 : vector<2x128xf32>
    %370 = arith.negf %369 : vector<2x128xf32>
    %371 = math.exp %370 : vector<2x128xf32>
    %cst_190 = arith.constant 1.000000e+00 : f32
    %372 = vector.broadcast %cst_190 : f32 to vector<2x128xf32>
    %373 = arith.addf %372, %371 : vector<2x128xf32>
    %374 = arith.divf %372, %373 : vector<2x128xf32>
    %375 = vector.extract_strided_slice %360 {offsets = [0, 128], sizes = [2, 128], strides = [1, 1]} : vector<2x384xf32> to vector<2x128xf32>
    %376 = vector.extract_strided_slice %366 {offsets = [0, 128], sizes = [2, 128], strides = [1, 1]} : vector<2x384xf32> to vector<2x128xf32>
    %377 = arith.addf %375, %376 : vector<2x128xf32>
    %378 = arith.negf %377 : vector<2x128xf32>
    %379 = math.exp %378 : vector<2x128xf32>
    %cst_191 = arith.constant 1.000000e+00 : f32
    %380 = vector.broadcast %cst_191 : f32 to vector<2x128xf32>
    %381 = arith.addf %380, %379 : vector<2x128xf32>
    %382 = arith.divf %380, %381 : vector<2x128xf32>
    %383 = vector.extract_strided_slice %360 {offsets = [0, 256], sizes = [2, 128], strides = [1, 1]} : vector<2x384xf32> to vector<2x128xf32>
    %384 = vector.extract_strided_slice %366 {offsets = [0, 256], sizes = [2, 128], strides = [1, 1]} : vector<2x384xf32> to vector<2x128xf32>
    %385 = arith.mulf %374, %384 : vector<2x128xf32>
    %386 = arith.addf %383, %385 : vector<2x128xf32>
    %387 = math.tanh %386 : vector<2x128xf32>
    %cst_192 = arith.constant 1.000000e+00 : f32
    %388 = vector.broadcast %cst_192 : f32 to vector<2x128xf32>
    %389 = arith.subf %388, %382 : vector<2x128xf32>
    %390 = arith.mulf %389, %387 : vector<2x128xf32>
    %391 = arith.mulf %382, %361 : vector<2x128xf32>
    %392 = arith.addf %390, %391 : vector<2x128xf32>
    %393 = arith.addf %304, %392 : vector<2x128xf32>
    %cst_193 = arith.constant 5.000000e-01 : f32
    %394 = vector.broadcast %cst_193 : f32 to vector<2x128xf32>
    %395 = arith.mulf %393, %394 : vector<2x128xf32>
    %c0_194 = arith.constant 0 : index
    %c0_195 = arith.constant 0 : index
    %396 = vector.load %arg7[%c0_194, %c0_195] : memref<128x384xf32, #tpu.memory_space<vmem>>, vector<128x384xf32>
    %cst_196 = arith.constant dense<0.000000e+00> : vector<2x384xf32>
    %397 = tpu.matmul %392, %396, %cst_196 {dimension_numbers = #tpu.dot_dimension_numbers<[1], [0], [0], [1], [0, 0, 1, 1], [], []>} : vector<2x128xf32>, vector<128x384xf32>, vector<2x384xf32> -> vector<2x384xf32>
    %c0_197 = arith.constant 0 : index
    %c0_198 = arith.constant 0 : index
    %398 = vector.load %arg8[%c0_197, %c0_198] : memref<1x384xf32, #tpu.memory_space<vmem>>, vector<1x384xf32>
    %399 = vector.broadcast %398 : vector<1x384xf32> to vector<2x384xf32>
    %400 = arith.addf %397, %399 : vector<2x384xf32>
    %401 = vector.extract_strided_slice %353 {offsets = [0, 0], sizes = [2, 128], strides = [1, 1]} : vector<2x384xf32> to vector<2x128xf32>
    %402 = vector.extract_strided_slice %400 {offsets = [0, 0], sizes = [2, 128], strides = [1, 1]} : vector<2x384xf32> to vector<2x128xf32>
    %403 = arith.addf %401, %402 : vector<2x128xf32>
    %404 = arith.negf %403 : vector<2x128xf32>
    %405 = math.exp %404 : vector<2x128xf32>
    %cst_199 = arith.constant 1.000000e+00 : f32
    %406 = vector.broadcast %cst_199 : f32 to vector<2x128xf32>
    %407 = arith.addf %406, %405 : vector<2x128xf32>
    %408 = arith.divf %406, %407 : vector<2x128xf32>
    %409 = vector.extract_strided_slice %353 {offsets = [0, 128], sizes = [2, 128], strides = [1, 1]} : vector<2x384xf32> to vector<2x128xf32>
    %410 = vector.extract_strided_slice %400 {offsets = [0, 128], sizes = [2, 128], strides = [1, 1]} : vector<2x384xf32> to vector<2x128xf32>
    %411 = arith.addf %409, %410 : vector<2x128xf32>
    %412 = arith.negf %411 : vector<2x128xf32>
    %413 = math.exp %412 : vector<2x128xf32>
    %cst_200 = arith.constant 1.000000e+00 : f32
    %414 = vector.broadcast %cst_200 : f32 to vector<2x128xf32>
    %415 = arith.addf %414, %413 : vector<2x128xf32>
    %416 = arith.divf %414, %415 : vector<2x128xf32>
    %417 = vector.extract_strided_slice %353 {offsets = [0, 256], sizes = [2, 128], strides = [1, 1]} : vector<2x384xf32> to vector<2x128xf32>
    %418 = vector.extract_strided_slice %400 {offsets = [0, 256], sizes = [2, 128], strides = [1, 1]} : vector<2x384xf32> to vector<2x128xf32>
    %419 = arith.mulf %408, %418 : vector<2x128xf32>
    %420 = arith.addf %417, %419 : vector<2x128xf32>
    %421 = math.tanh %420 : vector<2x128xf32>
    %cst_201 = arith.constant 1.000000e+00 : f32
    %422 = vector.broadcast %cst_201 : f32 to vector<2x128xf32>
    %423 = arith.subf %422, %416 : vector<2x128xf32>
    %424 = arith.mulf %423, %421 : vector<2x128xf32>
    %425 = arith.mulf %416, %392 : vector<2x128xf32>
    %426 = arith.addf %424, %425 : vector<2x128xf32>
    %427 = arith.addf %273, %426 : vector<2x128xf32>
    %cst_202 = arith.constant 5.000000e-01 : f32
    %428 = vector.broadcast %cst_202 : f32 to vector<2x128xf32>
    %429 = arith.mulf %427, %428 : vector<2x128xf32>
    %c0_203 = arith.constant 0 : index
    %c0_204 = arith.constant 0 : index
    %430 = vector.load %arg7[%c0_203, %c0_204] : memref<128x384xf32, #tpu.memory_space<vmem>>, vector<128x384xf32>
    %cst_205 = arith.constant dense<0.000000e+00> : vector<2x384xf32>
    %431 = tpu.matmul %426, %430, %cst_205 {dimension_numbers = #tpu.dot_dimension_numbers<[1], [0], [0], [1], [0, 0, 1, 1], [], []>} : vector<2x128xf32>, vector<128x384xf32>, vector<2x384xf32> -> vector<2x384xf32>
    %c0_206 = arith.constant 0 : index
    %c0_207 = arith.constant 0 : index
    %432 = vector.load %arg8[%c0_206, %c0_207] : memref<1x384xf32, #tpu.memory_space<vmem>>, vector<1x384xf32>
    %433 = vector.broadcast %432 : vector<1x384xf32> to vector<2x384xf32>
    %434 = arith.addf %431, %433 : vector<2x384xf32>
    %435 = vector.extract_strided_slice %346 {offsets = [0, 0], sizes = [2, 128], strides = [1, 1]} : vector<2x384xf32> to vector<2x128xf32>
    %436 = vector.extract_strided_slice %434 {offsets = [0, 0], sizes = [2, 128], strides = [1, 1]} : vector<2x384xf32> to vector<2x128xf32>
    %437 = arith.addf %435, %436 : vector<2x128xf32>
    %438 = arith.negf %437 : vector<2x128xf32>
    %439 = math.exp %438 : vector<2x128xf32>
    %cst_208 = arith.constant 1.000000e+00 : f32
    %440 = vector.broadcast %cst_208 : f32 to vector<2x128xf32>
    %441 = arith.addf %440, %439 : vector<2x128xf32>
    %442 = arith.divf %440, %441 : vector<2x128xf32>
    %443 = vector.extract_strided_slice %346 {offsets = [0, 128], sizes = [2, 128], strides = [1, 1]} : vector<2x384xf32> to vector<2x128xf32>
    %444 = vector.extract_strided_slice %434 {offsets = [0, 128], sizes = [2, 128], strides = [1, 1]} : vector<2x384xf32> to vector<2x128xf32>
    %445 = arith.addf %443, %444 : vector<2x128xf32>
    %446 = arith.negf %445 : vector<2x128xf32>
    %447 = math.exp %446 : vector<2x128xf32>
    %cst_209 = arith.constant 1.000000e+00 : f32
    %448 = vector.broadcast %cst_209 : f32 to vector<2x128xf32>
    %449 = arith.addf %448, %447 : vector<2x128xf32>
    %450 = arith.divf %448, %449 : vector<2x128xf32>
    %451 = vector.extract_strided_slice %346 {offsets = [0, 256], sizes = [2, 128], strides = [1, 1]} : vector<2x384xf32> to vector<2x128xf32>
    %452 = vector.extract_strided_slice %434 {offsets = [0, 256], sizes = [2, 128], strides = [1, 1]} : vector<2x384xf32> to vector<2x128xf32>
    %453 = arith.mulf %442, %452 : vector<2x128xf32>
    %454 = arith.addf %451, %453 : vector<2x128xf32>
    %455 = math.tanh %454 : vector<2x128xf32>
    %cst_210 = arith.constant 1.000000e+00 : f32
    %456 = vector.broadcast %cst_210 : f32 to vector<2x128xf32>
    %457 = arith.subf %456, %450 : vector<2x128xf32>
    %458 = arith.mulf %457, %455 : vector<2x128xf32>
    %459 = arith.mulf %450, %426 : vector<2x128xf32>
    %460 = arith.addf %458, %459 : vector<2x128xf32>
    %461 = arith.addf %242, %460 : vector<2x128xf32>
    %cst_211 = arith.constant 5.000000e-01 : f32
    %462 = vector.broadcast %cst_211 : f32 to vector<2x128xf32>
    %463 = arith.mulf %461, %462 : vector<2x128xf32>
    %c0_212 = arith.constant 0 : index
    %c0_213 = arith.constant 0 : index
    %464 = vector.load %arg7[%c0_212, %c0_213] : memref<128x384xf32, #tpu.memory_space<vmem>>, vector<128x384xf32>
    %cst_214 = arith.constant dense<0.000000e+00> : vector<2x384xf32>
    %465 = tpu.matmul %460, %464, %cst_214 {dimension_numbers = #tpu.dot_dimension_numbers<[1], [0], [0], [1], [0, 0, 1, 1], [], []>} : vector<2x128xf32>, vector<128x384xf32>, vector<2x384xf32> -> vector<2x384xf32>
    %c0_215 = arith.constant 0 : index
    %c0_216 = arith.constant 0 : index
    %466 = vector.load %arg8[%c0_215, %c0_216] : memref<1x384xf32, #tpu.memory_space<vmem>>, vector<1x384xf32>
    %467 = vector.broadcast %466 : vector<1x384xf32> to vector<2x384xf32>
    %468 = arith.addf %465, %467 : vector<2x384xf32>
    %469 = vector.extract_strided_slice %339 {offsets = [0, 0], sizes = [2, 128], strides = [1, 1]} : vector<2x384xf32> to vector<2x128xf32>
    %470 = vector.extract_strided_slice %468 {offsets = [0, 0], sizes = [2, 128], strides = [1, 1]} : vector<2x384xf32> to vector<2x128xf32>
    %471 = arith.addf %469, %470 : vector<2x128xf32>
    %472 = arith.negf %471 : vector<2x128xf32>
    %473 = math.exp %472 : vector<2x128xf32>
    %cst_217 = arith.constant 1.000000e+00 : f32
    %474 = vector.broadcast %cst_217 : f32 to vector<2x128xf32>
    %475 = arith.addf %474, %473 : vector<2x128xf32>
    %476 = arith.divf %474, %475 : vector<2x128xf32>
    %477 = vector.extract_strided_slice %339 {offsets = [0, 128], sizes = [2, 128], strides = [1, 1]} : vector<2x384xf32> to vector<2x128xf32>
    %478 = vector.extract_strided_slice %468 {offsets = [0, 128], sizes = [2, 128], strides = [1, 1]} : vector<2x384xf32> to vector<2x128xf32>
    %479 = arith.addf %477, %478 : vector<2x128xf32>
    %480 = arith.negf %479 : vector<2x128xf32>
    %481 = math.exp %480 : vector<2x128xf32>
    %cst_218 = arith.constant 1.000000e+00 : f32
    %482 = vector.broadcast %cst_218 : f32 to vector<2x128xf32>
    %483 = arith.addf %482, %481 : vector<2x128xf32>
    %484 = arith.divf %482, %483 : vector<2x128xf32>
    %485 = vector.extract_strided_slice %339 {offsets = [0, 256], sizes = [2, 128], strides = [1, 1]} : vector<2x384xf32> to vector<2x128xf32>
    %486 = vector.extract_strided_slice %468 {offsets = [0, 256], sizes = [2, 128], strides = [1, 1]} : vector<2x384xf32> to vector<2x128xf32>
    %487 = arith.mulf %476, %486 : vector<2x128xf32>
    %488 = arith.addf %485, %487 : vector<2x128xf32>
    %489 = math.tanh %488 : vector<2x128xf32>
    %cst_219 = arith.constant 1.000000e+00 : f32
    %490 = vector.broadcast %cst_219 : f32 to vector<2x128xf32>
    %491 = arith.subf %490, %484 : vector<2x128xf32>
    %492 = arith.mulf %491, %489 : vector<2x128xf32>
    %493 = arith.mulf %484, %460 : vector<2x128xf32>
    %494 = arith.addf %492, %493 : vector<2x128xf32>
    %495 = arith.addf %211, %494 : vector<2x128xf32>
    %cst_220 = arith.constant 5.000000e-01 : f32
    %496 = vector.broadcast %cst_220 : f32 to vector<2x128xf32>
    %497 = arith.mulf %495, %496 : vector<2x128xf32>
    %c0_221 = arith.constant 0 : index
    %c0_222 = arith.constant 0 : index
    %498 = vector.load %arg7[%c0_221, %c0_222] : memref<128x384xf32, #tpu.memory_space<vmem>>, vector<128x384xf32>
    %cst_223 = arith.constant dense<0.000000e+00> : vector<2x384xf32>
    %499 = tpu.matmul %494, %498, %cst_223 {dimension_numbers = #tpu.dot_dimension_numbers<[1], [0], [0], [1], [0, 0, 1, 1], [], []>} : vector<2x128xf32>, vector<128x384xf32>, vector<2x384xf32> -> vector<2x384xf32>
    %c0_224 = arith.constant 0 : index
    %c0_225 = arith.constant 0 : index
    %500 = vector.load %arg8[%c0_224, %c0_225] : memref<1x384xf32, #tpu.memory_space<vmem>>, vector<1x384xf32>
    %501 = vector.broadcast %500 : vector<1x384xf32> to vector<2x384xf32>
    %502 = arith.addf %499, %501 : vector<2x384xf32>
    %503 = vector.extract_strided_slice %332 {offsets = [0, 0], sizes = [2, 128], strides = [1, 1]} : vector<2x384xf32> to vector<2x128xf32>
    %504 = vector.extract_strided_slice %502 {offsets = [0, 0], sizes = [2, 128], strides = [1, 1]} : vector<2x384xf32> to vector<2x128xf32>
    %505 = arith.addf %503, %504 : vector<2x128xf32>
    %506 = arith.negf %505 : vector<2x128xf32>
    %507 = math.exp %506 : vector<2x128xf32>
    %cst_226 = arith.constant 1.000000e+00 : f32
    %508 = vector.broadcast %cst_226 : f32 to vector<2x128xf32>
    %509 = arith.addf %508, %507 : vector<2x128xf32>
    %510 = arith.divf %508, %509 : vector<2x128xf32>
    %511 = vector.extract_strided_slice %332 {offsets = [0, 128], sizes = [2, 128], strides = [1, 1]} : vector<2x384xf32> to vector<2x128xf32>
    %512 = vector.extract_strided_slice %502 {offsets = [0, 128], sizes = [2, 128], strides = [1, 1]} : vector<2x384xf32> to vector<2x128xf32>
    %513 = arith.addf %511, %512 : vector<2x128xf32>
    %514 = arith.negf %513 : vector<2x128xf32>
    %515 = math.exp %514 : vector<2x128xf32>
    %cst_227 = arith.constant 1.000000e+00 : f32
    %516 = vector.broadcast %cst_227 : f32 to vector<2x128xf32>
    %517 = arith.addf %516, %515 : vector<2x128xf32>
    %518 = arith.divf %516, %517 : vector<2x128xf32>
    %519 = vector.extract_strided_slice %332 {offsets = [0, 256], sizes = [2, 128], strides = [1, 1]} : vector<2x384xf32> to vector<2x128xf32>
    %520 = vector.extract_strided_slice %502 {offsets = [0, 256], sizes = [2, 128], strides = [1, 1]} : vector<2x384xf32> to vector<2x128xf32>
    %521 = arith.mulf %510, %520 : vector<2x128xf32>
    %522 = arith.addf %519, %521 : vector<2x128xf32>
    %523 = math.tanh %522 : vector<2x128xf32>
    %cst_228 = arith.constant 1.000000e+00 : f32
    %524 = vector.broadcast %cst_228 : f32 to vector<2x128xf32>
    %525 = arith.subf %524, %518 : vector<2x128xf32>
    %526 = arith.mulf %525, %523 : vector<2x128xf32>
    %527 = arith.mulf %518, %494 : vector<2x128xf32>
    %528 = arith.addf %526, %527 : vector<2x128xf32>
    %529 = arith.addf %180, %528 : vector<2x128xf32>
    %cst_229 = arith.constant 5.000000e-01 : f32
    %530 = vector.broadcast %cst_229 : f32 to vector<2x128xf32>
    %531 = arith.mulf %529, %530 : vector<2x128xf32>
    %c0_230 = arith.constant 0 : index
    %c0_231 = arith.constant 0 : index
    %532 = vector.load %arg7[%c0_230, %c0_231] : memref<128x384xf32, #tpu.memory_space<vmem>>, vector<128x384xf32>
    %cst_232 = arith.constant dense<0.000000e+00> : vector<2x384xf32>
    %533 = tpu.matmul %528, %532, %cst_232 {dimension_numbers = #tpu.dot_dimension_numbers<[1], [0], [0], [1], [0, 0, 1, 1], [], []>} : vector<2x128xf32>, vector<128x384xf32>, vector<2x384xf32> -> vector<2x384xf32>
    %c0_233 = arith.constant 0 : index
    %c0_234 = arith.constant 0 : index
    %534 = vector.load %arg8[%c0_233, %c0_234] : memref<1x384xf32, #tpu.memory_space<vmem>>, vector<1x384xf32>
    %535 = vector.broadcast %534 : vector<1x384xf32> to vector<2x384xf32>
    %536 = arith.addf %533, %535 : vector<2x384xf32>
    %537 = vector.extract_strided_slice %325 {offsets = [0, 0], sizes = [2, 128], strides = [1, 1]} : vector<2x384xf32> to vector<2x128xf32>
    %538 = vector.extract_strided_slice %536 {offsets = [0, 0], sizes = [2, 128], strides = [1, 1]} : vector<2x384xf32> to vector<2x128xf32>
    %539 = arith.addf %537, %538 : vector<2x128xf32>
    %540 = arith.negf %539 : vector<2x128xf32>
    %541 = math.exp %540 : vector<2x128xf32>
    %cst_235 = arith.constant 1.000000e+00 : f32
    %542 = vector.broadcast %cst_235 : f32 to vector<2x128xf32>
    %543 = arith.addf %542, %541 : vector<2x128xf32>
    %544 = arith.divf %542, %543 : vector<2x128xf32>
    %545 = vector.extract_strided_slice %325 {offsets = [0, 128], sizes = [2, 128], strides = [1, 1]} : vector<2x384xf32> to vector<2x128xf32>
    %546 = vector.extract_strided_slice %536 {offsets = [0, 128], sizes = [2, 128], strides = [1, 1]} : vector<2x384xf32> to vector<2x128xf32>
    %547 = arith.addf %545, %546 : vector<2x128xf32>
    %548 = arith.negf %547 : vector<2x128xf32>
    %549 = math.exp %548 : vector<2x128xf32>
    %cst_236 = arith.constant 1.000000e+00 : f32
    %550 = vector.broadcast %cst_236 : f32 to vector<2x128xf32>
    %551 = arith.addf %550, %549 : vector<2x128xf32>
    %552 = arith.divf %550, %551 : vector<2x128xf32>
    %553 = vector.extract_strided_slice %325 {offsets = [0, 256], sizes = [2, 128], strides = [1, 1]} : vector<2x384xf32> to vector<2x128xf32>
    %554 = vector.extract_strided_slice %536 {offsets = [0, 256], sizes = [2, 128], strides = [1, 1]} : vector<2x384xf32> to vector<2x128xf32>
    %555 = arith.mulf %544, %554 : vector<2x128xf32>
    %556 = arith.addf %553, %555 : vector<2x128xf32>
    %557 = math.tanh %556 : vector<2x128xf32>
    %cst_237 = arith.constant 1.000000e+00 : f32
    %558 = vector.broadcast %cst_237 : f32 to vector<2x128xf32>
    %559 = arith.subf %558, %552 : vector<2x128xf32>
    %560 = arith.mulf %559, %557 : vector<2x128xf32>
    %561 = arith.mulf %552, %528 : vector<2x128xf32>
    %562 = arith.addf %560, %561 : vector<2x128xf32>
    %563 = arith.addf %149, %562 : vector<2x128xf32>
    %cst_238 = arith.constant 5.000000e-01 : f32
    %564 = vector.broadcast %cst_238 : f32 to vector<2x128xf32>
    %565 = arith.mulf %563, %564 : vector<2x128xf32>
    %c0_239 = arith.constant 0 : index
    %c0_240 = arith.constant 0 : index
    %566 = vector.load %arg7[%c0_239, %c0_240] : memref<128x384xf32, #tpu.memory_space<vmem>>, vector<128x384xf32>
    %cst_241 = arith.constant dense<0.000000e+00> : vector<2x384xf32>
    %567 = tpu.matmul %562, %566, %cst_241 {dimension_numbers = #tpu.dot_dimension_numbers<[1], [0], [0], [1], [0, 0, 1, 1], [], []>} : vector<2x128xf32>, vector<128x384xf32>, vector<2x384xf32> -> vector<2x384xf32>
    %c0_242 = arith.constant 0 : index
    %c0_243 = arith.constant 0 : index
    %568 = vector.load %arg8[%c0_242, %c0_243] : memref<1x384xf32, #tpu.memory_space<vmem>>, vector<1x384xf32>
    %569 = vector.broadcast %568 : vector<1x384xf32> to vector<2x384xf32>
    %570 = arith.addf %567, %569 : vector<2x384xf32>
    %571 = vector.extract_strided_slice %318 {offsets = [0, 0], sizes = [2, 128], strides = [1, 1]} : vector<2x384xf32> to vector<2x128xf32>
    %572 = vector.extract_strided_slice %570 {offsets = [0, 0], sizes = [2, 128], strides = [1, 1]} : vector<2x384xf32> to vector<2x128xf32>
    %573 = arith.addf %571, %572 : vector<2x128xf32>
    %574 = arith.negf %573 : vector<2x128xf32>
    %575 = math.exp %574 : vector<2x128xf32>
    %cst_244 = arith.constant 1.000000e+00 : f32
    %576 = vector.broadcast %cst_244 : f32 to vector<2x128xf32>
    %577 = arith.addf %576, %575 : vector<2x128xf32>
    %578 = arith.divf %576, %577 : vector<2x128xf32>
    %579 = vector.extract_strided_slice %318 {offsets = [0, 128], sizes = [2, 128], strides = [1, 1]} : vector<2x384xf32> to vector<2x128xf32>
    %580 = vector.extract_strided_slice %570 {offsets = [0, 128], sizes = [2, 128], strides = [1, 1]} : vector<2x384xf32> to vector<2x128xf32>
    %581 = arith.addf %579, %580 : vector<2x128xf32>
    %582 = arith.negf %581 : vector<2x128xf32>
    %583 = math.exp %582 : vector<2x128xf32>
    %cst_245 = arith.constant 1.000000e+00 : f32
    %584 = vector.broadcast %cst_245 : f32 to vector<2x128xf32>
    %585 = arith.addf %584, %583 : vector<2x128xf32>
    %586 = arith.divf %584, %585 : vector<2x128xf32>
    %587 = vector.extract_strided_slice %318 {offsets = [0, 256], sizes = [2, 128], strides = [1, 1]} : vector<2x384xf32> to vector<2x128xf32>
    %588 = vector.extract_strided_slice %570 {offsets = [0, 256], sizes = [2, 128], strides = [1, 1]} : vector<2x384xf32> to vector<2x128xf32>
    %589 = arith.mulf %578, %588 : vector<2x128xf32>
    %590 = arith.addf %587, %589 : vector<2x128xf32>
    %591 = math.tanh %590 : vector<2x128xf32>
    %cst_246 = arith.constant 1.000000e+00 : f32
    %592 = vector.broadcast %cst_246 : f32 to vector<2x128xf32>
    %593 = arith.subf %592, %586 : vector<2x128xf32>
    %594 = arith.mulf %593, %591 : vector<2x128xf32>
    %595 = arith.mulf %586, %562 : vector<2x128xf32>
    %596 = arith.addf %594, %595 : vector<2x128xf32>
    %597 = arith.addf %118, %596 : vector<2x128xf32>
    %cst_247 = arith.constant 5.000000e-01 : f32
    %598 = vector.broadcast %cst_247 : f32 to vector<2x128xf32>
    %599 = arith.mulf %597, %598 : vector<2x128xf32>
    %c0_248 = arith.constant 0 : index
    %c0_249 = arith.constant 0 : index
    %600 = vector.load %arg7[%c0_248, %c0_249] : memref<128x384xf32, #tpu.memory_space<vmem>>, vector<128x384xf32>
    %cst_250 = arith.constant dense<0.000000e+00> : vector<2x384xf32>
    %601 = tpu.matmul %596, %600, %cst_250 {dimension_numbers = #tpu.dot_dimension_numbers<[1], [0], [0], [1], [0, 0, 1, 1], [], []>} : vector<2x128xf32>, vector<128x384xf32>, vector<2x384xf32> -> vector<2x384xf32>
    %c0_251 = arith.constant 0 : index
    %c0_252 = arith.constant 0 : index
    %602 = vector.load %arg8[%c0_251, %c0_252] : memref<1x384xf32, #tpu.memory_space<vmem>>, vector<1x384xf32>
    %603 = vector.broadcast %602 : vector<1x384xf32> to vector<2x384xf32>
    %604 = arith.addf %601, %603 : vector<2x384xf32>
    %605 = vector.extract_strided_slice %311 {offsets = [0, 0], sizes = [2, 128], strides = [1, 1]} : vector<2x384xf32> to vector<2x128xf32>
    %606 = vector.extract_strided_slice %604 {offsets = [0, 0], sizes = [2, 128], strides = [1, 1]} : vector<2x384xf32> to vector<2x128xf32>
    %607 = arith.addf %605, %606 : vector<2x128xf32>
    %608 = arith.negf %607 : vector<2x128xf32>
    %609 = math.exp %608 : vector<2x128xf32>
    %cst_253 = arith.constant 1.000000e+00 : f32
    %610 = vector.broadcast %cst_253 : f32 to vector<2x128xf32>
    %611 = arith.addf %610, %609 : vector<2x128xf32>
    %612 = arith.divf %610, %611 : vector<2x128xf32>
    %613 = vector.extract_strided_slice %311 {offsets = [0, 128], sizes = [2, 128], strides = [1, 1]} : vector<2x384xf32> to vector<2x128xf32>
    %614 = vector.extract_strided_slice %604 {offsets = [0, 128], sizes = [2, 128], strides = [1, 1]} : vector<2x384xf32> to vector<2x128xf32>
    %615 = arith.addf %613, %614 : vector<2x128xf32>
    %616 = arith.negf %615 : vector<2x128xf32>
    %617 = math.exp %616 : vector<2x128xf32>
    %cst_254 = arith.constant 1.000000e+00 : f32
    %618 = vector.broadcast %cst_254 : f32 to vector<2x128xf32>
    %619 = arith.addf %618, %617 : vector<2x128xf32>
    %620 = arith.divf %618, %619 : vector<2x128xf32>
    %621 = vector.extract_strided_slice %311 {offsets = [0, 256], sizes = [2, 128], strides = [1, 1]} : vector<2x384xf32> to vector<2x128xf32>
    %622 = vector.extract_strided_slice %604 {offsets = [0, 256], sizes = [2, 128], strides = [1, 1]} : vector<2x384xf32> to vector<2x128xf32>
    %623 = arith.mulf %612, %622 : vector<2x128xf32>
    %624 = arith.addf %621, %623 : vector<2x128xf32>
    %625 = math.tanh %624 : vector<2x128xf32>
    %cst_255 = arith.constant 1.000000e+00 : f32
    %626 = vector.broadcast %cst_255 : f32 to vector<2x128xf32>
    %627 = arith.subf %626, %620 : vector<2x128xf32>
    %628 = arith.mulf %627, %625 : vector<2x128xf32>
    %629 = arith.mulf %620, %596 : vector<2x128xf32>
    %630 = arith.addf %628, %629 : vector<2x128xf32>
    %631 = arith.addf %87, %630 : vector<2x128xf32>
    %cst_256 = arith.constant 5.000000e-01 : f32
    %632 = vector.broadcast %cst_256 : f32 to vector<2x128xf32>
    %633 = arith.mulf %631, %632 : vector<2x128xf32>
    %634 = arith.addf %304, %630 : vector<2x128xf32>
    %cst_257 = arith.constant 5.000000e-01 : f32
    %635 = vector.broadcast %cst_257 : f32 to vector<2x128xf32>
    %636 = arith.mulf %634, %635 : vector<2x128xf32>
    %c0_258 = arith.constant 0 : index
    %c0_259 = arith.constant 0 : index
    %637 = vector.load %arg9[%c0_258, %c0_259] : memref<1x128xf32, #tpu.memory_space<vmem>>, vector<1x128xf32>
    %638 = vector.broadcast %637 : vector<1x128xf32> to vector<2x128xf32>
    %639 = arith.mulf %633, %638 : vector<2x128xf32>
    %cst_260 = arith.constant dense<0.000000e+00> : vector<2xf32>
    %640 = vector.multi_reduction <add>, %639, %cst_260 [1] : vector<2x128xf32> to vector<2xf32>
    %641 = vector.shape_cast %640 : vector<2xf32> to vector<2x1xf32>
    %642 = vector.broadcast %637 : vector<1x128xf32> to vector<2x128xf32>
    %643 = arith.mulf %599, %642 : vector<2x128xf32>
    %cst_261 = arith.constant dense<0.000000e+00> : vector<2xf32>
    %644 = vector.multi_reduction <add>, %643, %cst_261 [1] : vector<2x128xf32> to vector<2xf32>
    %645 = vector.shape_cast %644 : vector<2xf32> to vector<2x1xf32>
    %646 = vector.broadcast %637 : vector<1x128xf32> to vector<2x128xf32>
    %647 = arith.mulf %565, %646 : vector<2x128xf32>
    %cst_262 = arith.constant dense<0.000000e+00> : vector<2xf32>
    %648 = vector.multi_reduction <add>, %647, %cst_262 [1] : vector<2x128xf32> to vector<2xf32>
    %649 = vector.shape_cast %648 : vector<2xf32> to vector<2x1xf32>
    %650 = vector.broadcast %637 : vector<1x128xf32> to vector<2x128xf32>
    %651 = arith.mulf %531, %650 : vector<2x128xf32>
    %cst_263 = arith.constant dense<0.000000e+00> : vector<2xf32>
    %652 = vector.multi_reduction <add>, %651, %cst_263 [1] : vector<2x128xf32> to vector<2xf32>
    %653 = vector.shape_cast %652 : vector<2xf32> to vector<2x1xf32>
    %654 = vector.broadcast %637 : vector<1x128xf32> to vector<2x128xf32>
    %655 = arith.mulf %497, %654 : vector<2x128xf32>
    %cst_264 = arith.constant dense<0.000000e+00> : vector<2xf32>
    %656 = vector.multi_reduction <add>, %655, %cst_264 [1] : vector<2x128xf32> to vector<2xf32>
    %657 = vector.shape_cast %656 : vector<2xf32> to vector<2x1xf32>
    %658 = vector.broadcast %637 : vector<1x128xf32> to vector<2x128xf32>
    %659 = arith.mulf %463, %658 : vector<2x128xf32>
    %cst_265 = arith.constant dense<0.000000e+00> : vector<2xf32>
    %660 = vector.multi_reduction <add>, %659, %cst_265 [1] : vector<2x128xf32> to vector<2xf32>
    %661 = vector.shape_cast %660 : vector<2xf32> to vector<2x1xf32>
    %662 = vector.broadcast %637 : vector<1x128xf32> to vector<2x128xf32>
    %663 = arith.mulf %429, %662 : vector<2x128xf32>
    %cst_266 = arith.constant dense<0.000000e+00> : vector<2xf32>
    %664 = vector.multi_reduction <add>, %663, %cst_266 [1] : vector<2x128xf32> to vector<2xf32>
    %665 = vector.shape_cast %664 : vector<2xf32> to vector<2x1xf32>
    %666 = vector.broadcast %637 : vector<1x128xf32> to vector<2x128xf32>
    %667 = arith.mulf %395, %666 : vector<2x128xf32>
    %cst_267 = arith.constant dense<0.000000e+00> : vector<2xf32>
    %668 = vector.multi_reduction <add>, %667, %cst_267 [1] : vector<2x128xf32> to vector<2xf32>
    %669 = vector.shape_cast %668 : vector<2xf32> to vector<2x1xf32>
    %670 = arith.maximumf %641, %645 : vector<2x1xf32>
    %671 = arith.maximumf %670, %649 : vector<2x1xf32>
    %672 = arith.maximumf %671, %653 : vector<2x1xf32>
    %673 = arith.maximumf %672, %657 : vector<2x1xf32>
    %674 = arith.maximumf %673, %661 : vector<2x1xf32>
    %675 = arith.maximumf %674, %665 : vector<2x1xf32>
    %676 = arith.maximumf %675, %669 : vector<2x1xf32>
    %677 = arith.subf %641, %676 : vector<2x1xf32>
    %678 = math.exp %677 : vector<2x1xf32>
    %679 = arith.subf %645, %676 : vector<2x1xf32>
    %680 = math.exp %679 : vector<2x1xf32>
    %681 = arith.subf %649, %676 : vector<2x1xf32>
    %682 = math.exp %681 : vector<2x1xf32>
    %683 = arith.subf %653, %676 : vector<2x1xf32>
    %684 = math.exp %683 : vector<2x1xf32>
    %685 = arith.subf %657, %676 : vector<2x1xf32>
    %686 = math.exp %685 : vector<2x1xf32>
    %687 = arith.subf %661, %676 : vector<2x1xf32>
    %688 = math.exp %687 : vector<2x1xf32>
    %689 = arith.subf %665, %676 : vector<2x1xf32>
    %690 = math.exp %689 : vector<2x1xf32>
    %691 = arith.subf %669, %676 : vector<2x1xf32>
    %692 = math.exp %691 : vector<2x1xf32>
    %693 = arith.addf %678, %680 : vector<2x1xf32>
    %694 = arith.addf %693, %682 : vector<2x1xf32>
    %695 = arith.addf %694, %684 : vector<2x1xf32>
    %696 = arith.addf %695, %686 : vector<2x1xf32>
    %697 = arith.addf %696, %688 : vector<2x1xf32>
    %698 = arith.addf %697, %690 : vector<2x1xf32>
    %699 = arith.addf %698, %692 : vector<2x1xf32>
    %700 = vector.broadcast %678 : vector<2x1xf32> to vector<2x128xf32>
    %701 = arith.mulf %700, %633 : vector<2x128xf32>
    %702 = vector.broadcast %680 : vector<2x1xf32> to vector<2x128xf32>
    %703 = arith.mulf %702, %599 : vector<2x128xf32>
    %704 = arith.addf %701, %703 : vector<2x128xf32>
    %705 = vector.broadcast %682 : vector<2x1xf32> to vector<2x128xf32>
    %706 = arith.mulf %705, %565 : vector<2x128xf32>
    %707 = arith.addf %704, %706 : vector<2x128xf32>
    %708 = vector.broadcast %684 : vector<2x1xf32> to vector<2x128xf32>
    %709 = arith.mulf %708, %531 : vector<2x128xf32>
    %710 = arith.addf %707, %709 : vector<2x128xf32>
    %711 = vector.broadcast %686 : vector<2x1xf32> to vector<2x128xf32>
    %712 = arith.mulf %711, %497 : vector<2x128xf32>
    %713 = arith.addf %710, %712 : vector<2x128xf32>
    %714 = vector.broadcast %688 : vector<2x1xf32> to vector<2x128xf32>
    %715 = arith.mulf %714, %463 : vector<2x128xf32>
    %716 = arith.addf %713, %715 : vector<2x128xf32>
    %717 = vector.broadcast %690 : vector<2x1xf32> to vector<2x128xf32>
    %718 = arith.mulf %717, %429 : vector<2x128xf32>
    %719 = arith.addf %716, %718 : vector<2x128xf32>
    %720 = vector.broadcast %692 : vector<2x1xf32> to vector<2x128xf32>
    %721 = arith.mulf %720, %395 : vector<2x128xf32>
    %722 = arith.addf %719, %721 : vector<2x128xf32>
    %723 = vector.broadcast %699 : vector<2x1xf32> to vector<2x128xf32>
    %724 = arith.divf %722, %723 : vector<2x128xf32>
    %c0_268 = arith.constant 0 : index
    %c0_269 = arith.constant 0 : index
    %725 = vector.load %arg10[%c0_268, %c0_269] : memref<128x384xf32, #tpu.memory_space<vmem>>, vector<128x384xf32>
    %cst_270 = arith.constant dense<0.000000e+00> : vector<2x384xf32>
    %726 = tpu.matmul %724, %725, %cst_270 {dimension_numbers = #tpu.dot_dimension_numbers<[1], [0], [0], [1], [0, 0, 1, 1], [], []>} : vector<2x128xf32>, vector<128x384xf32>, vector<2x384xf32> -> vector<2x384xf32>
    %c0_271 = arith.constant 0 : index
    %c0_272 = arith.constant 0 : index
    %727 = vector.load %arg11[%c0_271, %c0_272] : memref<1x384xf32, #tpu.memory_space<vmem>>, vector<1x384xf32>
    %728 = tpu.iota {dimensions = array<i32: 1>} : vector<2x128xi32>
    %729 = arith.sitofp %728 : vector<2x128xi32> to vector<2x128xf32>
    %c0_273 = arith.constant 0 : index
    %c0_274 = arith.constant 0 : index
    %730 = vector.load %arg13[%c0_273, %c0_274] : memref<128x640xf32, #tpu.memory_space<vmem>>, vector<128x640xf32>
    %cst_275 = arith.constant dense<0.000000e+00> : vector<2x640xf32>
    %731 = tpu.matmul %636, %730, %cst_275 {dimension_numbers = #tpu.dot_dimension_numbers<[1], [0], [0], [1], [0, 0, 1, 1], [], []>} : vector<2x128xf32>, vector<128x640xf32>, vector<2x640xf32> -> vector<2x640xf32>
    %c0_276 = arith.constant 0 : index
    %c0_277 = arith.constant 0 : index
    %732 = vector.load %arg14[%c0_276, %c0_277] : memref<1x640xf32, #tpu.memory_space<vmem>>, vector<1x640xf32>
    %733 = vector.broadcast %732 : vector<1x640xf32> to vector<2x640xf32>
    %734 = arith.addf %731, %733 : vector<2x640xf32>
    %735 = vector.broadcast %727 : vector<1x384xf32> to vector<2x384xf32>
    %736 = arith.addf %735, %726 : vector<2x384xf32>
    %737 = vector.extract_strided_slice %734 {offsets = [0, 256], sizes = [2, 384], strides = [1, 1]} : vector<2x640xf32> to vector<2x384xf32>
    %738 = vector.extract_strided_slice %736 {offsets = [0, 0], sizes = [2, 128], strides = [1, 1]} : vector<2x384xf32> to vector<2x128xf32>
    %739 = vector.extract_strided_slice %737 {offsets = [0, 0], sizes = [2, 128], strides = [1, 1]} : vector<2x384xf32> to vector<2x128xf32>
    %740 = arith.addf %738, %739 : vector<2x128xf32>
    %741 = arith.negf %740 : vector<2x128xf32>
    %742 = math.exp %741 : vector<2x128xf32>
    %cst_278 = arith.constant 1.000000e+00 : f32
    %743 = vector.broadcast %cst_278 : f32 to vector<2x128xf32>
    %744 = arith.addf %743, %742 : vector<2x128xf32>
    %745 = arith.divf %743, %744 : vector<2x128xf32>
    %746 = vector.extract_strided_slice %736 {offsets = [0, 128], sizes = [2, 128], strides = [1, 1]} : vector<2x384xf32> to vector<2x128xf32>
    %747 = vector.extract_strided_slice %737 {offsets = [0, 128], sizes = [2, 128], strides = [1, 1]} : vector<2x384xf32> to vector<2x128xf32>
    %748 = arith.addf %746, %747 : vector<2x128xf32>
    %749 = arith.negf %748 : vector<2x128xf32>
    %750 = math.exp %749 : vector<2x128xf32>
    %cst_279 = arith.constant 1.000000e+00 : f32
    %751 = vector.broadcast %cst_279 : f32 to vector<2x128xf32>
    %752 = arith.addf %751, %750 : vector<2x128xf32>
    %753 = arith.divf %751, %752 : vector<2x128xf32>
    %754 = vector.extract_strided_slice %736 {offsets = [0, 256], sizes = [2, 128], strides = [1, 1]} : vector<2x384xf32> to vector<2x128xf32>
    %755 = vector.extract_strided_slice %737 {offsets = [0, 256], sizes = [2, 128], strides = [1, 1]} : vector<2x384xf32> to vector<2x128xf32>
    %756 = arith.mulf %745, %755 : vector<2x128xf32>
    %757 = arith.addf %754, %756 : vector<2x128xf32>
    %758 = math.tanh %757 : vector<2x128xf32>
    %cst_280 = arith.constant 1.000000e+00 : f32
    %759 = vector.broadcast %cst_280 : f32 to vector<2x128xf32>
    %760 = arith.subf %759, %753 : vector<2x128xf32>
    %761 = arith.mulf %760, %758 : vector<2x128xf32>
    %762 = arith.mulf %753, %636 : vector<2x128xf32>
    %763 = arith.addf %761, %762 : vector<2x128xf32>
    %c0_281 = arith.constant 0 : index
    %c0_282 = arith.constant 0 : index
    %764 = vector.load %arg13[%c0_281, %c0_282] : memref<128x640xf32, #tpu.memory_space<vmem>>, vector<128x640xf32>
    %cst_283 = arith.constant dense<0.000000e+00> : vector<2x640xf32>
    %765 = tpu.matmul %763, %764, %cst_283 {dimension_numbers = #tpu.dot_dimension_numbers<[1], [0], [0], [1], [0, 0, 1, 1], [], []>} : vector<2x128xf32>, vector<128x640xf32>, vector<2x640xf32> -> vector<2x640xf32>
    %c0_284 = arith.constant 0 : index
    %c0_285 = arith.constant 0 : index
    %766 = vector.load %arg14[%c0_284, %c0_285] : memref<1x640xf32, #tpu.memory_space<vmem>>, vector<1x640xf32>
    %767 = vector.broadcast %766 : vector<1x640xf32> to vector<2x640xf32>
    %768 = arith.addf %765, %767 : vector<2x640xf32>
    %769 = vector.extract_strided_slice %768 {offsets = [0, 0], sizes = [2, 128], strides = [1, 1]} : vector<2x640xf32> to vector<2x128xf32>
    %770 = vector.extract_strided_slice %768 {offsets = [0, 128], sizes = [2, 128], strides = [1, 1]} : vector<2x640xf32> to vector<2x128xf32>
    %c5_i32 = arith.constant 5 : i32
    %771 = vector.broadcast %c5_i32 : i32 to vector<2x128xi32>
    %772 = arith.cmpi slt, %728, %771 : vector<2x128xi32>
    %cst_286 = arith.constant -1.000000e+30 : f32
    %773 = vector.broadcast %cst_286 : f32 to vector<2x128xf32>
    %774 = arith.select %772, %769, %773 : vector<2x128xi1>, vector<2x128xf32>
    %cst_287 = arith.constant dense<0xFF800000> : vector<2xf32>
    %775 = vector.multi_reduction <maximumf>, %774, %cst_287 [1] : vector<2x128xf32> to vector<2xf32>
    %776 = vector.shape_cast %775 : vector<2xf32> to vector<2x1xf32>
    %777 = vector.broadcast %776 : vector<2x1xf32> to vector<2x128xf32>
    %778 = arith.subf %774, %777 : vector<2x128xf32>
    %779 = math.exp %778 : vector<2x128xf32>
    %cst_288 = arith.constant dense<0.000000e+00> : vector<2xf32>
    %780 = vector.multi_reduction <add>, %779, %cst_288 [1] : vector<2x128xf32> to vector<2xf32>
    %781 = vector.shape_cast %780 : vector<2xf32> to vector<2x1xf32>
    %782 = math.log %781 : vector<2x1xf32>
    %783 = vector.broadcast %782 : vector<2x1xf32> to vector<2x128xf32>
    %784 = arith.subf %778, %783 : vector<2x128xf32>
    %c0_289 = arith.constant 0 : index
    %c0_290 = arith.constant 0 : index
    %c0_291 = arith.constant 0 : index
    %785 = vector.load %arg15[%c0_289, %c0_290, %c0_291] : memref<6x2x128xf32, #tpu.memory_space<vmem>>, vector<1x2x128xf32>
    %786 = vector.shape_cast %785 : vector<1x2x128xf32> to vector<2x128xf32>
    %787 = vector.shape_cast %784 : vector<2x128xf32> to vector<1x2x128xf32>
    tpu.vector_store %arg15[%c0_289, %c0_290, %c0_291], %787 {strides = array<i32>} : memref<6x2x128xf32, #tpu.memory_space<vmem>>, vector<1x2x128xf32>,
    %c0_292 = arith.constant 0 : index
    %c0_293 = arith.constant 0 : index
    %c0_294 = arith.constant 0 : index
    %788 = vector.load %arg16[%c0_292, %c0_293, %c0_294] : memref<6x2x128xf32, #tpu.memory_space<vmem>>, vector<1x2x128xf32>
    %789 = vector.shape_cast %788 : vector<1x2x128xf32> to vector<2x128xf32>
    %790 = vector.shape_cast %770 : vector<2x128xf32> to vector<1x2x128xf32>
    tpu.vector_store %arg16[%c0_292, %c0_293, %c0_294], %790 {strides = array<i32>} : memref<6x2x128xf32, #tpu.memory_space<vmem>>, vector<1x2x128xf32>,
    %cst_295 = arith.constant dense<0xFF800000> : vector<2xf32>
    %791 = vector.multi_reduction <maximumf>, %784, %cst_295 [1] : vector<2x128xf32> to vector<2xf32>
    %792 = vector.shape_cast %791 : vector<2xf32> to vector<2x1xf32>
    %793 = vector.broadcast %792 : vector<2x1xf32> to vector<2x128xf32>
    %794 = arith.cmpf oge, %784, %793 : vector<2x128xf32>
    %cst_296 = arith.constant 1.280000e+02 : f32
    %795 = vector.broadcast %cst_296 : f32 to vector<2x128xf32>
    %796 = arith.select %794, %729, %795 : vector<2x128xi1>, vector<2x128xf32>
    %cst_297 = arith.constant dense<0x7F800000> : vector<2xf32>
    %797 = vector.multi_reduction <minimumf>, %796, %cst_297 [1] : vector<2x128xf32> to vector<2xf32>
    %798 = vector.shape_cast %797 : vector<2xf32> to vector<2x1xf32>
    %799 = vector.broadcast %798 : vector<2x1xf32> to vector<2x128xf32>
    %800 = arith.cmpf oeq, %729, %799 : vector<2x128xf32>
    %801 = arith.extui %800 : vector<2x128xi1> to vector<2x128xi32>
    %802 = arith.sitofp %801 : vector<2x128xi32> to vector<2x128xf32>
    %c0_298 = arith.constant 0 : index
    %c0_299 = arith.constant 0 : index
    %803 = vector.load %arg12[%c0_298, %c0_299] : memref<128x384xf32, #tpu.memory_space<vmem>>, vector<128x384xf32>
    %cst_300 = arith.constant dense<0.000000e+00> : vector<2x384xf32>
    %804 = tpu.matmul %802, %803, %cst_300 {dimension_numbers = #tpu.dot_dimension_numbers<[1], [0], [0], [1], [0, 0, 1, 1], [], []>} : vector<2x128xf32>, vector<128x384xf32>, vector<2x384xf32> -> vector<2x384xf32>
    %805 = arith.addf %804, %726 : vector<2x384xf32>
    %806 = vector.extract_strided_slice %768 {offsets = [0, 256], sizes = [2, 384], strides = [1, 1]} : vector<2x640xf32> to vector<2x384xf32>
    %807 = vector.extract_strided_slice %805 {offsets = [0, 0], sizes = [2, 128], strides = [1, 1]} : vector<2x384xf32> to vector<2x128xf32>
    %808 = vector.extract_strided_slice %806 {offsets = [0, 0], sizes = [2, 128], strides = [1, 1]} : vector<2x384xf32> to vector<2x128xf32>
    %809 = arith.addf %807, %808 : vector<2x128xf32>
    %810 = arith.negf %809 : vector<2x128xf32>
    %811 = math.exp %810 : vector<2x128xf32>
    %cst_301 = arith.constant 1.000000e+00 : f32
    %812 = vector.broadcast %cst_301 : f32 to vector<2x128xf32>
    %813 = arith.addf %812, %811 : vector<2x128xf32>
    %814 = arith.divf %812, %813 : vector<2x128xf32>
    %815 = vector.extract_strided_slice %805 {offsets = [0, 128], sizes = [2, 128], strides = [1, 1]} : vector<2x384xf32> to vector<2x128xf32>
    %816 = vector.extract_strided_slice %806 {offsets = [0, 128], sizes = [2, 128], strides = [1, 1]} : vector<2x384xf32> to vector<2x128xf32>
    %817 = arith.addf %815, %816 : vector<2x128xf32>
    %818 = arith.negf %817 : vector<2x128xf32>
    %819 = math.exp %818 : vector<2x128xf32>
    %cst_302 = arith.constant 1.000000e+00 : f32
    %820 = vector.broadcast %cst_302 : f32 to vector<2x128xf32>
    %821 = arith.addf %820, %819 : vector<2x128xf32>
    %822 = arith.divf %820, %821 : vector<2x128xf32>
    %823 = vector.extract_strided_slice %805 {offsets = [0, 256], sizes = [2, 128], strides = [1, 1]} : vector<2x384xf32> to vector<2x128xf32>
    %824 = vector.extract_strided_slice %806 {offsets = [0, 256], sizes = [2, 128], strides = [1, 1]} : vector<2x384xf32> to vector<2x128xf32>
    %825 = arith.mulf %814, %824 : vector<2x128xf32>
    %826 = arith.addf %823, %825 : vector<2x128xf32>
    %827 = math.tanh %826 : vector<2x128xf32>
    %cst_303 = arith.constant 1.000000e+00 : f32
    %828 = vector.broadcast %cst_303 : f32 to vector<2x128xf32>
    %829 = arith.subf %828, %822 : vector<2x128xf32>
    %830 = arith.mulf %829, %827 : vector<2x128xf32>
    %831 = arith.mulf %822, %763 : vector<2x128xf32>
    %832 = arith.addf %830, %831 : vector<2x128xf32>
    %c0_304 = arith.constant 0 : index
    %c0_305 = arith.constant 0 : index
    %833 = vector.load %arg13[%c0_304, %c0_305] : memref<128x640xf32, #tpu.memory_space<vmem>>, vector<128x640xf32>
    %cst_306 = arith.constant dense<0.000000e+00> : vector<2x640xf32>
    %834 = tpu.matmul %832, %833, %cst_306 {dimension_numbers = #tpu.dot_dimension_numbers<[1], [0], [0], [1], [0, 0, 1, 1], [], []>} : vector<2x128xf32>, vector<128x640xf32>, vector<2x640xf32> -> vector<2x640xf32>
    %c0_307 = arith.constant 0 : index
    %c0_308 = arith.constant 0 : index
    %835 = vector.load %arg14[%c0_307, %c0_308] : memref<1x640xf32, #tpu.memory_space<vmem>>, vector<1x640xf32>
    %836 = vector.broadcast %835 : vector<1x640xf32> to vector<2x640xf32>
    %837 = arith.addf %834, %836 : vector<2x640xf32>
    %838 = vector.extract_strided_slice %837 {offsets = [0, 0], sizes = [2, 128], strides = [1, 1]} : vector<2x640xf32> to vector<2x128xf32>
    %839 = vector.extract_strided_slice %837 {offsets = [0, 128], sizes = [2, 128], strides = [1, 1]} : vector<2x640xf32> to vector<2x128xf32>
    %c5_i32_309 = arith.constant 5 : i32
    %840 = vector.broadcast %c5_i32_309 : i32 to vector<2x128xi32>
    %841 = arith.cmpi slt, %728, %840 : vector<2x128xi32>
    %cst_310 = arith.constant -1.000000e+30 : f32
    %842 = vector.broadcast %cst_310 : f32 to vector<2x128xf32>
    %843 = arith.select %841, %838, %842 : vector<2x128xi1>, vector<2x128xf32>
    %cst_311 = arith.constant dense<0xFF800000> : vector<2xf32>
    %844 = vector.multi_reduction <maximumf>, %843, %cst_311 [1] : vector<2x128xf32> to vector<2xf32>
    %845 = vector.shape_cast %844 : vector<2xf32> to vector<2x1xf32>
    %846 = vector.broadcast %845 : vector<2x1xf32> to vector<2x128xf32>
    %847 = arith.subf %843, %846 : vector<2x128xf32>
    %848 = math.exp %847 : vector<2x128xf32>
    %cst_312 = arith.constant dense<0.000000e+00> : vector<2xf32>
    %849 = vector.multi_reduction <add>, %848, %cst_312 [1] : vector<2x128xf32> to vector<2xf32>
    %850 = vector.shape_cast %849 : vector<2xf32> to vector<2x1xf32>
    %851 = math.log %850 : vector<2x1xf32>
    %852 = vector.broadcast %851 : vector<2x1xf32> to vector<2x128xf32>
    %853 = arith.subf %847, %852 : vector<2x128xf32>
    %c1_313 = arith.constant 1 : index
    %c0_314 = arith.constant 0 : index
    %c0_315 = arith.constant 0 : index
    %854 = vector.load %arg15[%c1_313, %c0_314, %c0_315] : memref<6x2x128xf32, #tpu.memory_space<vmem>>, vector<1x2x128xf32>
    %855 = vector.shape_cast %854 : vector<1x2x128xf32> to vector<2x128xf32>
    %856 = vector.shape_cast %853 : vector<2x128xf32> to vector<1x2x128xf32>
    tpu.vector_store %arg15[%c1_313, %c0_314, %c0_315], %856 {strides = array<i32>} : memref<6x2x128xf32, #tpu.memory_space<vmem>>, vector<1x2x128xf32>,
    %c1_316 = arith.constant 1 : index
    %c0_317 = arith.constant 0 : index
    %c0_318 = arith.constant 0 : index
    %857 = vector.load %arg16[%c1_316, %c0_317, %c0_318] : memref<6x2x128xf32, #tpu.memory_space<vmem>>, vector<1x2x128xf32>
    %858 = vector.shape_cast %857 : vector<1x2x128xf32> to vector<2x128xf32>
    %859 = vector.shape_cast %839 : vector<2x128xf32> to vector<1x2x128xf32>
    tpu.vector_store %arg16[%c1_316, %c0_317, %c0_318], %859 {strides = array<i32>} : memref<6x2x128xf32, #tpu.memory_space<vmem>>, vector<1x2x128xf32>,
    %860 = arith.addf %804, %726 : vector<2x384xf32>
    %861 = vector.extract_strided_slice %837 {offsets = [0, 256], sizes = [2, 384], strides = [1, 1]} : vector<2x640xf32> to vector<2x384xf32>
    %862 = vector.extract_strided_slice %860 {offsets = [0, 0], sizes = [2, 128], strides = [1, 1]} : vector<2x384xf32> to vector<2x128xf32>
    %863 = vector.extract_strided_slice %861 {offsets = [0, 0], sizes = [2, 128], strides = [1, 1]} : vector<2x384xf32> to vector<2x128xf32>
    %864 = arith.addf %862, %863 : vector<2x128xf32>
    %865 = arith.negf %864 : vector<2x128xf32>
    %866 = math.exp %865 : vector<2x128xf32>
    %cst_319 = arith.constant 1.000000e+00 : f32
    %867 = vector.broadcast %cst_319 : f32 to vector<2x128xf32>
    %868 = arith.addf %867, %866 : vector<2x128xf32>
    %869 = arith.divf %867, %868 : vector<2x128xf32>
    %870 = vector.extract_strided_slice %860 {offsets = [0, 128], sizes = [2, 128], strides = [1, 1]} : vector<2x384xf32> to vector<2x128xf32>
    %871 = vector.extract_strided_slice %861 {offsets = [0, 128], sizes = [2, 128], strides = [1, 1]} : vector<2x384xf32> to vector<2x128xf32>
    %872 = arith.addf %870, %871 : vector<2x128xf32>
    %873 = arith.negf %872 : vector<2x128xf32>
    %874 = math.exp %873 : vector<2x128xf32>
    %cst_320 = arith.constant 1.000000e+00 : f32
    %875 = vector.broadcast %cst_320 : f32 to vector<2x128xf32>
    %876 = arith.addf %875, %874 : vector<2x128xf32>
    %877 = arith.divf %875, %876 : vector<2x128xf32>
    %878 = vector.extract_strided_slice %860 {offsets = [0, 256], sizes = [2, 128], strides = [1, 1]} : vector<2x384xf32> to vector<2x128xf32>
    %879 = vector.extract_strided_slice %861 {offsets = [0, 256], sizes = [2, 128], strides = [1, 1]} : vector<2x384xf32> to vector<2x128xf32>
    %880 = arith.mulf %869, %879 : vector<2x128xf32>
    %881 = arith.addf %878, %880 : vector<2x128xf32>
    %882 = math.tanh %881 : vector<2x128xf32>
    %cst_321 = arith.constant 1.000000e+00 : f32
    %883 = vector.broadcast %cst_321 : f32 to vector<2x128xf32>
    %884 = arith.subf %883, %877 : vector<2x128xf32>
    %885 = arith.mulf %884, %882 : vector<2x128xf32>
    %886 = arith.mulf %877, %832 : vector<2x128xf32>
    %887 = arith.addf %885, %886 : vector<2x128xf32>
    %c0_322 = arith.constant 0 : index
    %c0_323 = arith.constant 0 : index
    %888 = vector.load %arg13[%c0_322, %c0_323] : memref<128x640xf32, #tpu.memory_space<vmem>>, vector<128x640xf32>
    %cst_324 = arith.constant dense<0.000000e+00> : vector<2x640xf32>
    %889 = tpu.matmul %887, %888, %cst_324 {dimension_numbers = #tpu.dot_dimension_numbers<[1], [0], [0], [1], [0, 0, 1, 1], [], []>} : vector<2x128xf32>, vector<128x640xf32>, vector<2x640xf32> -> vector<2x640xf32>
    %c0_325 = arith.constant 0 : index
    %c0_326 = arith.constant 0 : index
    %890 = vector.load %arg14[%c0_325, %c0_326] : memref<1x640xf32, #tpu.memory_space<vmem>>, vector<1x640xf32>
    %891 = vector.broadcast %890 : vector<1x640xf32> to vector<2x640xf32>
    %892 = arith.addf %889, %891 : vector<2x640xf32>
    %893 = vector.extract_strided_slice %892 {offsets = [0, 0], sizes = [2, 128], strides = [1, 1]} : vector<2x640xf32> to vector<2x128xf32>
    %894 = vector.extract_strided_slice %892 {offsets = [0, 128], sizes = [2, 128], strides = [1, 1]} : vector<2x640xf32> to vector<2x128xf32>
    %c5_i32_327 = arith.constant 5 : i32
    %895 = vector.broadcast %c5_i32_327 : i32 to vector<2x128xi32>
    %896 = arith.cmpi slt, %728, %895 : vector<2x128xi32>
    %cst_328 = arith.constant -1.000000e+30 : f32
    %897 = vector.broadcast %cst_328 : f32 to vector<2x128xf32>
    %898 = arith.select %896, %893, %897 : vector<2x128xi1>, vector<2x128xf32>
    %cst_329 = arith.constant dense<0xFF800000> : vector<2xf32>
    %899 = vector.multi_reduction <maximumf>, %898, %cst_329 [1] : vector<2x128xf32> to vector<2xf32>
    %900 = vector.shape_cast %899 : vector<2xf32> to vector<2x1xf32>
    %901 = vector.broadcast %900 : vector<2x1xf32> to vector<2x128xf32>
    %902 = arith.subf %898, %901 : vector<2x128xf32>
    %903 = math.exp %902 : vector<2x128xf32>
    %cst_330 = arith.constant dense<0.000000e+00> : vector<2xf32>
    %904 = vector.multi_reduction <add>, %903, %cst_330 [1] : vector<2x128xf32> to vector<2xf32>
    %905 = vector.shape_cast %904 : vector<2xf32> to vector<2x1xf32>
    %906 = math.log %905 : vector<2x1xf32>
    %907 = vector.broadcast %906 : vector<2x1xf32> to vector<2x128xf32>
    %908 = arith.subf %902, %907 : vector<2x128xf32>
    %c2_331 = arith.constant 2 : index
    %c0_332 = arith.constant 0 : index
    %c0_333 = arith.constant 0 : index
    %909 = vector.load %arg15[%c2_331, %c0_332, %c0_333] : memref<6x2x128xf32, #tpu.memory_space<vmem>>, vector<1x2x128xf32>
    %910 = vector.shape_cast %909 : vector<1x2x128xf32> to vector<2x128xf32>
    %911 = vector.shape_cast %908 : vector<2x128xf32> to vector<1x2x128xf32>
    tpu.vector_store %arg15[%c2_331, %c0_332, %c0_333], %911 {strides = array<i32>} : memref<6x2x128xf32, #tpu.memory_space<vmem>>, vector<1x2x128xf32>,
    %c2_334 = arith.constant 2 : index
    %c0_335 = arith.constant 0 : index
    %c0_336 = arith.constant 0 : index
    %912 = vector.load %arg16[%c2_334, %c0_335, %c0_336] : memref<6x2x128xf32, #tpu.memory_space<vmem>>, vector<1x2x128xf32>
    %913 = vector.shape_cast %912 : vector<1x2x128xf32> to vector<2x128xf32>
    %914 = vector.shape_cast %894 : vector<2x128xf32> to vector<1x2x128xf32>
    tpu.vector_store %arg16[%c2_334, %c0_335, %c0_336], %914 {strides = array<i32>} : memref<6x2x128xf32, #tpu.memory_space<vmem>>, vector<1x2x128xf32>,
    %915 = arith.addf %804, %726 : vector<2x384xf32>
    %916 = vector.extract_strided_slice %892 {offsets = [0, 256], sizes = [2, 384], strides = [1, 1]} : vector<2x640xf32> to vector<2x384xf32>
    %917 = vector.extract_strided_slice %915 {offsets = [0, 0], sizes = [2, 128], strides = [1, 1]} : vector<2x384xf32> to vector<2x128xf32>
    %918 = vector.extract_strided_slice %916 {offsets = [0, 0], sizes = [2, 128], strides = [1, 1]} : vector<2x384xf32> to vector<2x128xf32>
    %919 = arith.addf %917, %918 : vector<2x128xf32>
    %920 = arith.negf %919 : vector<2x128xf32>
    %921 = math.exp %920 : vector<2x128xf32>
    %cst_337 = arith.constant 1.000000e+00 : f32
    %922 = vector.broadcast %cst_337 : f32 to vector<2x128xf32>
    %923 = arith.addf %922, %921 : vector<2x128xf32>
    %924 = arith.divf %922, %923 : vector<2x128xf32>
    %925 = vector.extract_strided_slice %915 {offsets = [0, 128], sizes = [2, 128], strides = [1, 1]} : vector<2x384xf32> to vector<2x128xf32>
    %926 = vector.extract_strided_slice %916 {offsets = [0, 128], sizes = [2, 128], strides = [1, 1]} : vector<2x384xf32> to vector<2x128xf32>
    %927 = arith.addf %925, %926 : vector<2x128xf32>
    %928 = arith.negf %927 : vector<2x128xf32>
    %929 = math.exp %928 : vector<2x128xf32>
    %cst_338 = arith.constant 1.000000e+00 : f32
    %930 = vector.broadcast %cst_338 : f32 to vector<2x128xf32>
    %931 = arith.addf %930, %929 : vector<2x128xf32>
    %932 = arith.divf %930, %931 : vector<2x128xf32>
    %933 = vector.extract_strided_slice %915 {offsets = [0, 256], sizes = [2, 128], strides = [1, 1]} : vector<2x384xf32> to vector<2x128xf32>
    %934 = vector.extract_strided_slice %916 {offsets = [0, 256], sizes = [2, 128], strides = [1, 1]} : vector<2x384xf32> to vector<2x128xf32>
    %935 = arith.mulf %924, %934 : vector<2x128xf32>
    %936 = arith.addf %933, %935 : vector<2x128xf32>
    %937 = math.tanh %936 : vector<2x128xf32>
    %cst_339 = arith.constant 1.000000e+00 : f32
    %938 = vector.broadcast %cst_339 : f32 to vector<2x128xf32>
    %939 = arith.subf %938, %932 : vector<2x128xf32>
    %940 = arith.mulf %939, %937 : vector<2x128xf32>
    %941 = arith.mulf %932, %887 : vector<2x128xf32>
    %942 = arith.addf %940, %941 : vector<2x128xf32>
    %c0_340 = arith.constant 0 : index
    %c0_341 = arith.constant 0 : index
    %943 = vector.load %arg13[%c0_340, %c0_341] : memref<128x640xf32, #tpu.memory_space<vmem>>, vector<128x640xf32>
    %cst_342 = arith.constant dense<0.000000e+00> : vector<2x640xf32>
    %944 = tpu.matmul %942, %943, %cst_342 {dimension_numbers = #tpu.dot_dimension_numbers<[1], [0], [0], [1], [0, 0, 1, 1], [], []>} : vector<2x128xf32>, vector<128x640xf32>, vector<2x640xf32> -> vector<2x640xf32>
    %c0_343 = arith.constant 0 : index
    %c0_344 = arith.constant 0 : index
    %945 = vector.load %arg14[%c0_343, %c0_344] : memref<1x640xf32, #tpu.memory_space<vmem>>, vector<1x640xf32>
    %946 = vector.broadcast %945 : vector<1x640xf32> to vector<2x640xf32>
    %947 = arith.addf %944, %946 : vector<2x640xf32>
    %948 = vector.extract_strided_slice %947 {offsets = [0, 0], sizes = [2, 128], strides = [1, 1]} : vector<2x640xf32> to vector<2x128xf32>
    %949 = vector.extract_strided_slice %947 {offsets = [0, 128], sizes = [2, 128], strides = [1, 1]} : vector<2x640xf32> to vector<2x128xf32>
    %c5_i32_345 = arith.constant 5 : i32
    %950 = vector.broadcast %c5_i32_345 : i32 to vector<2x128xi32>
    %951 = arith.cmpi slt, %728, %950 : vector<2x128xi32>
    %cst_346 = arith.constant -1.000000e+30 : f32
    %952 = vector.broadcast %cst_346 : f32 to vector<2x128xf32>
    %953 = arith.select %951, %948, %952 : vector<2x128xi1>, vector<2x128xf32>
    %cst_347 = arith.constant dense<0xFF800000> : vector<2xf32>
    %954 = vector.multi_reduction <maximumf>, %953, %cst_347 [1] : vector<2x128xf32> to vector<2xf32>
    %955 = vector.shape_cast %954 : vector<2xf32> to vector<2x1xf32>
    %956 = vector.broadcast %955 : vector<2x1xf32> to vector<2x128xf32>
    %957 = arith.subf %953, %956 : vector<2x128xf32>
    %958 = math.exp %957 : vector<2x128xf32>
    %cst_348 = arith.constant dense<0.000000e+00> : vector<2xf32>
    %959 = vector.multi_reduction <add>, %958, %cst_348 [1] : vector<2x128xf32> to vector<2xf32>
    %960 = vector.shape_cast %959 : vector<2xf32> to vector<2x1xf32>
    %961 = math.log %960 : vector<2x1xf32>
    %962 = vector.broadcast %961 : vector<2x1xf32> to vector<2x128xf32>
    %963 = arith.subf %957, %962 : vector<2x128xf32>
    %c3_349 = arith.constant 3 : index
    %c0_350 = arith.constant 0 : index
    %c0_351 = arith.constant 0 : index
    %964 = vector.load %arg15[%c3_349, %c0_350, %c0_351] : memref<6x2x128xf32, #tpu.memory_space<vmem>>, vector<1x2x128xf32>
    %965 = vector.shape_cast %964 : vector<1x2x128xf32> to vector<2x128xf32>
    %966 = vector.shape_cast %963 : vector<2x128xf32> to vector<1x2x128xf32>
    tpu.vector_store %arg15[%c3_349, %c0_350, %c0_351], %966 {strides = array<i32>} : memref<6x2x128xf32, #tpu.memory_space<vmem>>, vector<1x2x128xf32>,
    %c3_352 = arith.constant 3 : index
    %c0_353 = arith.constant 0 : index
    %c0_354 = arith.constant 0 : index
    %967 = vector.load %arg16[%c3_352, %c0_353, %c0_354] : memref<6x2x128xf32, #tpu.memory_space<vmem>>, vector<1x2x128xf32>
    %968 = vector.shape_cast %967 : vector<1x2x128xf32> to vector<2x128xf32>
    %969 = vector.shape_cast %949 : vector<2x128xf32> to vector<1x2x128xf32>
    tpu.vector_store %arg16[%c3_352, %c0_353, %c0_354], %969 {strides = array<i32>} : memref<6x2x128xf32, #tpu.memory_space<vmem>>, vector<1x2x128xf32>,
    %cst_355 = arith.constant dense<0xFF800000> : vector<2xf32>
    %970 = vector.multi_reduction <maximumf>, %963, %cst_355 [1] : vector<2x128xf32> to vector<2xf32>
    %971 = vector.shape_cast %970 : vector<2xf32> to vector<2x1xf32>
    %972 = vector.broadcast %971 : vector<2x1xf32> to vector<2x128xf32>
    %973 = arith.cmpf oge, %963, %972 : vector<2x128xf32>
    %cst_356 = arith.constant 1.280000e+02 : f32
    %974 = vector.broadcast %cst_356 : f32 to vector<2x128xf32>
    %975 = arith.select %973, %729, %974 : vector<2x128xi1>, vector<2x128xf32>
    %cst_357 = arith.constant dense<0x7F800000> : vector<2xf32>
    %976 = vector.multi_reduction <minimumf>, %975, %cst_357 [1] : vector<2x128xf32> to vector<2xf32>
    %977 = vector.shape_cast %976 : vector<2xf32> to vector<2x1xf32>
    %978 = vector.broadcast %977 : vector<2x1xf32> to vector<2x128xf32>
    %979 = arith.cmpf oeq, %729, %978 : vector<2x128xf32>
    %980 = arith.extui %979 : vector<2x128xi1> to vector<2x128xi32>
    %981 = arith.sitofp %980 : vector<2x128xi32> to vector<2x128xf32>
    %c0_358 = arith.constant 0 : index
    %c0_359 = arith.constant 0 : index
    %982 = vector.load %arg12[%c0_358, %c0_359] : memref<128x384xf32, #tpu.memory_space<vmem>>, vector<128x384xf32>
    %cst_360 = arith.constant dense<0.000000e+00> : vector<2x384xf32>
    %983 = tpu.matmul %981, %982, %cst_360 {dimension_numbers = #tpu.dot_dimension_numbers<[1], [0], [0], [1], [0, 0, 1, 1], [], []>} : vector<2x128xf32>, vector<128x384xf32>, vector<2x384xf32> -> vector<2x384xf32>
    %984 = arith.addf %983, %726 : vector<2x384xf32>
    %985 = vector.extract_strided_slice %947 {offsets = [0, 256], sizes = [2, 384], strides = [1, 1]} : vector<2x640xf32> to vector<2x384xf32>
    %986 = vector.extract_strided_slice %984 {offsets = [0, 0], sizes = [2, 128], strides = [1, 1]} : vector<2x384xf32> to vector<2x128xf32>
    %987 = vector.extract_strided_slice %985 {offsets = [0, 0], sizes = [2, 128], strides = [1, 1]} : vector<2x384xf32> to vector<2x128xf32>
    %988 = arith.addf %986, %987 : vector<2x128xf32>
    %989 = arith.negf %988 : vector<2x128xf32>
    %990 = math.exp %989 : vector<2x128xf32>
    %cst_361 = arith.constant 1.000000e+00 : f32
    %991 = vector.broadcast %cst_361 : f32 to vector<2x128xf32>
    %992 = arith.addf %991, %990 : vector<2x128xf32>
    %993 = arith.divf %991, %992 : vector<2x128xf32>
    %994 = vector.extract_strided_slice %984 {offsets = [0, 128], sizes = [2, 128], strides = [1, 1]} : vector<2x384xf32> to vector<2x128xf32>
    %995 = vector.extract_strided_slice %985 {offsets = [0, 128], sizes = [2, 128], strides = [1, 1]} : vector<2x384xf32> to vector<2x128xf32>
    %996 = arith.addf %994, %995 : vector<2x128xf32>
    %997 = arith.negf %996 : vector<2x128xf32>
    %998 = math.exp %997 : vector<2x128xf32>
    %cst_362 = arith.constant 1.000000e+00 : f32
    %999 = vector.broadcast %cst_362 : f32 to vector<2x128xf32>
    %1000 = arith.addf %999, %998 : vector<2x128xf32>
    %1001 = arith.divf %999, %1000 : vector<2x128xf32>
    %1002 = vector.extract_strided_slice %984 {offsets = [0, 256], sizes = [2, 128], strides = [1, 1]} : vector<2x384xf32> to vector<2x128xf32>
    %1003 = vector.extract_strided_slice %985 {offsets = [0, 256], sizes = [2, 128], strides = [1, 1]} : vector<2x384xf32> to vector<2x128xf32>
    %1004 = arith.mulf %993, %1003 : vector<2x128xf32>
    %1005 = arith.addf %1002, %1004 : vector<2x128xf32>
    %1006 = math.tanh %1005 : vector<2x128xf32>
    %cst_363 = arith.constant 1.000000e+00 : f32
    %1007 = vector.broadcast %cst_363 : f32 to vector<2x128xf32>
    %1008 = arith.subf %1007, %1001 : vector<2x128xf32>
    %1009 = arith.mulf %1008, %1006 : vector<2x128xf32>
    %1010 = arith.mulf %1001, %942 : vector<2x128xf32>
    %1011 = arith.addf %1009, %1010 : vector<2x128xf32>
    %c0_364 = arith.constant 0 : index
    %c0_365 = arith.constant 0 : index
    %1012 = vector.load %arg13[%c0_364, %c0_365] : memref<128x640xf32, #tpu.memory_space<vmem>>, vector<128x640xf32>
    %cst_366 = arith.constant dense<0.000000e+00> : vector<2x640xf32>
    %1013 = tpu.matmul %1011, %1012, %cst_366 {dimension_numbers = #tpu.dot_dimension_numbers<[1], [0], [0], [1], [0, 0, 1, 1], [], []>} : vector<2x128xf32>, vector<128x640xf32>, vector<2x640xf32> -> vector<2x640xf32>
    %c0_367 = arith.constant 0 : index
    %c0_368 = arith.constant 0 : index
    %1014 = vector.load %arg14[%c0_367, %c0_368] : memref<1x640xf32, #tpu.memory_space<vmem>>, vector<1x640xf32>
    %1015 = vector.broadcast %1014 : vector<1x640xf32> to vector<2x640xf32>
    %1016 = arith.addf %1013, %1015 : vector<2x640xf32>
    %1017 = vector.extract_strided_slice %1016 {offsets = [0, 0], sizes = [2, 128], strides = [1, 1]} : vector<2x640xf32> to vector<2x128xf32>
    %1018 = vector.extract_strided_slice %1016 {offsets = [0, 128], sizes = [2, 128], strides = [1, 1]} : vector<2x640xf32> to vector<2x128xf32>
    %c5_i32_369 = arith.constant 5 : i32
    %1019 = vector.broadcast %c5_i32_369 : i32 to vector<2x128xi32>
    %1020 = arith.cmpi slt, %728, %1019 : vector<2x128xi32>
    %cst_370 = arith.constant -1.000000e+30 : f32
    %1021 = vector.broadcast %cst_370 : f32 to vector<2x128xf32>
    %1022 = arith.select %1020, %1017, %1021 : vector<2x128xi1>, vector<2x128xf32>
    %cst_371 = arith.constant dense<0xFF800000> : vector<2xf32>
    %1023 = vector.multi_reduction <maximumf>, %1022, %cst_371 [1] : vector<2x128xf32> to vector<2xf32>
    %1024 = vector.shape_cast %1023 : vector<2xf32> to vector<2x1xf32>
    %1025 = vector.broadcast %1024 : vector<2x1xf32> to vector<2x128xf32>
    %1026 = arith.subf %1022, %1025 : vector<2x128xf32>
    %1027 = math.exp %1026 : vector<2x128xf32>
    %cst_372 = arith.constant dense<0.000000e+00> : vector<2xf32>
    %1028 = vector.multi_reduction <add>, %1027, %cst_372 [1] : vector<2x128xf32> to vector<2xf32>
    %1029 = vector.shape_cast %1028 : vector<2xf32> to vector<2x1xf32>
    %1030 = math.log %1029 : vector<2x1xf32>
    %1031 = vector.broadcast %1030 : vector<2x1xf32> to vector<2x128xf32>
    %1032 = arith.subf %1026, %1031 : vector<2x128xf32>
    %c4_373 = arith.constant 4 : index
    %c0_374 = arith.constant 0 : index
    %c0_375 = arith.constant 0 : index
    %1033 = vector.load %arg15[%c4_373, %c0_374, %c0_375] : memref<6x2x128xf32, #tpu.memory_space<vmem>>, vector<1x2x128xf32>
    %1034 = vector.shape_cast %1033 : vector<1x2x128xf32> to vector<2x128xf32>
    %1035 = vector.shape_cast %1032 : vector<2x128xf32> to vector<1x2x128xf32>
    tpu.vector_store %arg15[%c4_373, %c0_374, %c0_375], %1035 {strides = array<i32>} : memref<6x2x128xf32, #tpu.memory_space<vmem>>, vector<1x2x128xf32>,
    %c4_376 = arith.constant 4 : index
    %c0_377 = arith.constant 0 : index
    %c0_378 = arith.constant 0 : index
    %1036 = vector.load %arg16[%c4_376, %c0_377, %c0_378] : memref<6x2x128xf32, #tpu.memory_space<vmem>>, vector<1x2x128xf32>
    %1037 = vector.shape_cast %1036 : vector<1x2x128xf32> to vector<2x128xf32>
    %1038 = vector.shape_cast %1018 : vector<2x128xf32> to vector<1x2x128xf32>
    tpu.vector_store %arg16[%c4_376, %c0_377, %c0_378], %1038 {strides = array<i32>} : memref<6x2x128xf32, #tpu.memory_space<vmem>>, vector<1x2x128xf32>,
    %1039 = arith.addf %983, %726 : vector<2x384xf32>
    %1040 = vector.extract_strided_slice %1016 {offsets = [0, 256], sizes = [2, 384], strides = [1, 1]} : vector<2x640xf32> to vector<2x384xf32>
    %1041 = vector.extract_strided_slice %1039 {offsets = [0, 0], sizes = [2, 128], strides = [1, 1]} : vector<2x384xf32> to vector<2x128xf32>
    %1042 = vector.extract_strided_slice %1040 {offsets = [0, 0], sizes = [2, 128], strides = [1, 1]} : vector<2x384xf32> to vector<2x128xf32>
    %1043 = arith.addf %1041, %1042 : vector<2x128xf32>
    %1044 = arith.negf %1043 : vector<2x128xf32>
    %1045 = math.exp %1044 : vector<2x128xf32>
    %cst_379 = arith.constant 1.000000e+00 : f32
    %1046 = vector.broadcast %cst_379 : f32 to vector<2x128xf32>
    %1047 = arith.addf %1046, %1045 : vector<2x128xf32>
    %1048 = arith.divf %1046, %1047 : vector<2x128xf32>
    %1049 = vector.extract_strided_slice %1039 {offsets = [0, 128], sizes = [2, 128], strides = [1, 1]} : vector<2x384xf32> to vector<2x128xf32>
    %1050 = vector.extract_strided_slice %1040 {offsets = [0, 128], sizes = [2, 128], strides = [1, 1]} : vector<2x384xf32> to vector<2x128xf32>
    %1051 = arith.addf %1049, %1050 : vector<2x128xf32>
    %1052 = arith.negf %1051 : vector<2x128xf32>
    %1053 = math.exp %1052 : vector<2x128xf32>
    %cst_380 = arith.constant 1.000000e+00 : f32
    %1054 = vector.broadcast %cst_380 : f32 to vector<2x128xf32>
    %1055 = arith.addf %1054, %1053 : vector<2x128xf32>
    %1056 = arith.divf %1054, %1055 : vector<2x128xf32>
    %1057 = vector.extract_strided_slice %1039 {offsets = [0, 256], sizes = [2, 128], strides = [1, 1]} : vector<2x384xf32> to vector<2x128xf32>
    %1058 = vector.extract_strided_slice %1040 {offsets = [0, 256], sizes = [2, 128], strides = [1, 1]} : vector<2x384xf32> to vector<2x128xf32>
    %1059 = arith.mulf %1048, %1058 : vector<2x128xf32>
    %1060 = arith.addf %1057, %1059 : vector<2x128xf32>
    %1061 = math.tanh %1060 : vector<2x128xf32>
    %cst_381 = arith.constant 1.000000e+00 : f32
    %1062 = vector.broadcast %cst_381 : f32 to vector<2x128xf32>
    %1063 = arith.subf %1062, %1056 : vector<2x128xf32>
    %1064 = arith.mulf %1063, %1061 : vector<2x128xf32>
    %1065 = arith.mulf %1056, %1011 : vector<2x128xf32>
    %1066 = arith.addf %1064, %1065 : vector<2x128xf32>
    %c0_382 = arith.constant 0 : index
    %c0_383 = arith.constant 0 : index
    %1067 = vector.load %arg13[%c0_382, %c0_383] : memref<128x640xf32, #tpu.memory_space<vmem>>, vector<128x640xf32>
    %cst_384 = arith.constant dense<0.000000e+00> : vector<2x640xf32>
    %1068 = tpu.matmul %1066, %1067, %cst_384 {dimension_numbers = #tpu.dot_dimension_numbers<[1], [0], [0], [1], [0, 0, 1, 1], [], []>} : vector<2x128xf32>, vector<128x640xf32>, vector<2x640xf32> -> vector<2x640xf32>
    %c0_385 = arith.constant 0 : index
    %c0_386 = arith.constant 0 : index
    %1069 = vector.load %arg14[%c0_385, %c0_386] : memref<1x640xf32, #tpu.memory_space<vmem>>, vector<1x640xf32>
    %1070 = vector.broadcast %1069 : vector<1x640xf32> to vector<2x640xf32>
    %1071 = arith.addf %1068, %1070 : vector<2x640xf32>
    %1072 = vector.extract_strided_slice %1071 {offsets = [0, 0], sizes = [2, 128], strides = [1, 1]} : vector<2x640xf32> to vector<2x128xf32>
    %1073 = vector.extract_strided_slice %1071 {offsets = [0, 128], sizes = [2, 128], strides = [1, 1]} : vector<2x640xf32> to vector<2x128xf32>
    %c5_i32_387 = arith.constant 5 : i32
    %1074 = vector.broadcast %c5_i32_387 : i32 to vector<2x128xi32>
    %1075 = arith.cmpi slt, %728, %1074 : vector<2x128xi32>
    %cst_388 = arith.constant -1.000000e+30 : f32
    %1076 = vector.broadcast %cst_388 : f32 to vector<2x128xf32>
    %1077 = arith.select %1075, %1072, %1076 : vector<2x128xi1>, vector<2x128xf32>
    %cst_389 = arith.constant dense<0xFF800000> : vector<2xf32>
    %1078 = vector.multi_reduction <maximumf>, %1077, %cst_389 [1] : vector<2x128xf32> to vector<2xf32>
    %1079 = vector.shape_cast %1078 : vector<2xf32> to vector<2x1xf32>
    %1080 = vector.broadcast %1079 : vector<2x1xf32> to vector<2x128xf32>
    %1081 = arith.subf %1077, %1080 : vector<2x128xf32>
    %1082 = math.exp %1081 : vector<2x128xf32>
    %cst_390 = arith.constant dense<0.000000e+00> : vector<2xf32>
    %1083 = vector.multi_reduction <add>, %1082, %cst_390 [1] : vector<2x128xf32> to vector<2xf32>
    %1084 = vector.shape_cast %1083 : vector<2xf32> to vector<2x1xf32>
    %1085 = math.log %1084 : vector<2x1xf32>
    %1086 = vector.broadcast %1085 : vector<2x1xf32> to vector<2x128xf32>
    %1087 = arith.subf %1081, %1086 : vector<2x128xf32>
    %c5_391 = arith.constant 5 : index
    %c0_392 = arith.constant 0 : index
    %c0_393 = arith.constant 0 : index
    %1088 = vector.load %arg15[%c5_391, %c0_392, %c0_393] : memref<6x2x128xf32, #tpu.memory_space<vmem>>, vector<1x2x128xf32>
    %1089 = vector.shape_cast %1088 : vector<1x2x128xf32> to vector<2x128xf32>
    %1090 = vector.shape_cast %1087 : vector<2x128xf32> to vector<1x2x128xf32>
    tpu.vector_store %arg15[%c5_391, %c0_392, %c0_393], %1090 {strides = array<i32>} : memref<6x2x128xf32, #tpu.memory_space<vmem>>, vector<1x2x128xf32>,
    %c5_394 = arith.constant 5 : index
    %c0_395 = arith.constant 0 : index
    %c0_396 = arith.constant 0 : index
    %1091 = vector.load %arg16[%c5_394, %c0_395, %c0_396] : memref<6x2x128xf32, #tpu.memory_space<vmem>>, vector<1x2x128xf32>
    %1092 = vector.shape_cast %1091 : vector<1x2x128xf32> to vector<2x128xf32>
    %1093 = vector.shape_cast %1073 : vector<2x128xf32> to vector<1x2x128xf32>
    tpu.vector_store %arg16[%c5_394, %c0_395, %c0_396], %1093 {strides = array<i32>} : memref<6x2x128xf32, #tpu.memory_space<vmem>>, vector<1x2x128xf32>,
    return
  }
}

</mosaic_0001>

<bundles_post_ra>
// kernel: _fused_forward.1
= control target key start
LH: loop header
LB: loop body
LE: loop exit
PB: predicated region body
PF: predicated region fallthrough
CT: control target
= control target key end

     0   :  { %s8881_s0 = inlined_call_operand.vmem [shape: f32[8,2,32], index: 0, kind: input, shape index: {}]   ;;  %s8882_s1 = inlined_call_operand.vmem [shape: f32[32,384], index: 1, kind: input, shape index: {}]   ;;  %s8883_s2 = inlined_call_operand.vmem [shape: f32[1,384], index: 2, kind: input, shape index: {}]   ;;  %s8884_s3 = inlined_call_operand.hbm [shape: f32[128,384], index: 3, kind: input, shape index: {}]   ;;  %s8885_s4 = inlined_call_operand.vmem [shape: f32[1,384], index: 4, kind: input, shape index: {}]   ;;  %s8886_s5 = inlined_call_operand.vmem [shape: f32[32,384], index: 5, kind: input, shape index: {}]   ;;  %s8887_s6 = inlined_call_operand.vmem [shape: f32[1,384], index: 6, kind: input, shape index: {}]   ;;  %s8888_s7 = inlined_call_operand.hbm [shape: f32[128,384], index: 7, kind: input, shape index: {}]   ;;  %s8889_s8 = inlined_call_operand.vmem [shape: f32[1,384], index: 8, kind: input, shape index: {}]   ;;  %s8890_s9 = inlined_call_operand.vmem [shape: f32[1,128], index: 9, kind: input, shape index: {}]   ;;  %s8891_s10 = inlined_call_operand.hbm [shape: f32[128,384], index: 10, kind: input, shape index: {}]   ;;  %s8892_s11 = inlined_call_operand.vmem [shape: f32[1,384], index: 11, kind: input, shape index: {}]   ;;  %s8893_s12 = inlined_call_operand.hbm [shape: f32[128,384], index: 12, kind: input, shape index: {}]   ;;  %s8894_s13 = inlined_call_operand.hbm [shape: f32[128,640], index: 13, kind: input, shape index: {}]   ;;  %s8895_s14 = inlined_call_operand.vmem [shape: f32[1,640], index: 14, kind: input, shape index: {}]   ;;  %s8896_s15 = inlined_call_operand.hbm [shape: f32[6,2,128], index: 15, kind: output, shape index: {0}]   ;;  %s8897_s16 = inlined_call_operand.hbm [shape: f32[6,2,128], index: 16, kind: output, shape index: {1}]  }
   0x1   :  { %9014 = sst [smem:[#allocation61_spill]] %s8881_s0 }
   0x2   :  { %22 = vsyncpa [#allocation3], 0 }
   0x3   :  { %23 = vsyncpa [#allocation6], 0 }
   0x4   :  { %24 = vsyncpa [#allocation9], 0 }
   0x5   :  { %25 = vsyncpa [#allocation4], 0 }
   0x6   :  { %26 = vsyncpa [#allocation13], 0  ;;  %s56_s23 = sshll.u32 %s8888_s7, 4  ;;  %s5666_s24 = smov [#allocation5]   ;;  %s57_s23 = int_to_ptr.hbm [resolvable:$true] %s56_s23 }
   0x7   :  { %s58_s25 = sshll.u32 %s5666_s24, 4  ;;  %s88_s28 = sshll.u32 %s8893_s12, 4  ;;  %s59_s25 = int_to_ptr.vmem [resolvable:$true] %s58_s25  ;;  %s89_s28 = int_to_ptr.hbm [resolvable:$true] %s88_s28 }
   0x8   :  { %s5667_s29 = smov 384   ;;  %s5668_s30 = smov 24  }
   0x9   :  { %64 = dma.hbm_to_vmem [thread:$0]  %s57_s23, 6144, %s59_s25, [#allocation6], %s5667_s29, %s5667_s29, %s5668_s30  }
   0xa   :  { %s5669_s0 = smov [#allocation8]   ;;  %s37_s20 = sshll.u32 %s8884_s3, 4  ;;  %s38_s20 = int_to_ptr.hbm [resolvable:$true] %s37_s20 }
   0xb   :  { %s90_s17 = sshll.u32 %s5669_s0, 4  ;;  %s73_s22 = sshll.u32 %s8891_s10, 4  ;;  %s91_s17 = int_to_ptr.vmem [resolvable:$true] %s90_s17  ;;  %s74_s22 = int_to_ptr.hbm [resolvable:$true] %s73_s22 }
   0xc   :  { %96 = dma.hbm_to_vmem [thread:$0]  %s89_s28, 6144, %s91_s17, [#allocation9], %s5667_s29, %s5667_s29, %s5668_s30  }
   0xd   :  { %s5670_s24 = smov [#allocation2]   ;;  %s5671_s12 = smov [#allocation7]  }
   0xe   :  { %s39_s26 = sshll.u32 %s5670_s24, 4  ;;  %s75_s23 = sshll.u32 %s5671_s12, 4  ;;  %s40_s26 = int_to_ptr.vmem [resolvable:$true] %s39_s26  ;;  %s76_s23 = int_to_ptr.vmem [resolvable:$true] %s75_s23 }
   0xf   :  { %45 = dma.hbm_to_vmem [thread:$0]  %s38_s20, 6144, %s40_s26, [#allocation3], %s5667_s29, %s5667_s29, %s5668_s30  }
  0x10   :  { %s101_s0 = sshll.u32 %s8894_s13, 4  ;;  %s5672_s3 = smov [#allocation10]   ;;  %s102_s0 = int_to_ptr.hbm [resolvable:$true] %s101_s0 }
  0x11   :  { %81 = dma.hbm_to_vmem [thread:$0]  %s74_s22, 6144, %s76_s23, [#allocation6], %s5667_s29, %s5667_s29, %s5668_s30  }
  0x12   :  { %s103_s28 = sshll.u32 %s5672_s3, 4  ;;  %s5673_s17 = smov 640   ;;  %s104_s28 = int_to_ptr.vmem [resolvable:$true] %s103_s28 }
  0x13   :  { %s5674_s18 = smov 40  }
  0x14   :  { %109 = dma.hbm_to_vmem [thread:$0]  %s102_s0, 10240, %s104_s28, [#allocation9], %s5673_s17, %s5673_s17, %s5674_s18  }
  0x15   :  { %5656 = dma.done.wait [#allocation3], 6144  }
  0x16   :  { %5657 = vsyncadd [#allocation3], 4294961152 }
  0x17   :  { %5658 = dma.done.wait [#allocation6], 12288  }
  0x18   :  { %5659 = vsyncadd [#allocation6], 4294955008 }
  0x19   :  { %5660 = dma.done.wait [#allocation9], 16384  }
  0x1a   :  { %5661 = vsyncadd [#allocation9], 4294950912  ;;  %v5784_v0 = vld [vmem:[%s8882_s1 + $0x50] sm:$0xff]  ;;  %v5789_v1 = vld [vmem:[%s8882_s1 + $0x58] sm:$0xff]  ;;  %vm153_vm0 = vcmask 261120   ;;  %s9015_s13 = sld [smem:[#allocation61_spill]] }
  0x1b   :  { %v5794_v2 = vld [vmem:[%s8882_s1 + $0x38] sm:$0xff]  ;;  %254 = vmatpush.msra.mxu0 %v5784_v0  ;;  %274 = vmatpush.msra.mxu1 %v5789_v1  ;;  %v5801_v3 = vld [vmem:[%s8882_s1 + $0x40] sm:$0xff]  ;;  %v5811_v5 = vld [vmem:[%s8882_s1 + $0x28] sm:$0xff]  ;;  %v8899_v57 = vmov 0.0   ;;  %s4979_s27 = sshll.u32 %s8897_s16, 4  ;;  %s5678_s0 = smov 32   ;;  %s4980_s27 = int_to_ptr.hbm [resolvable:$true] %s4979_s27 }
  0x1c   :  { %v5806_v4 = vld [vmem:[%s8882_s1 + $0x20] sm:$0xff]  ;;  %v5818_v6 = vld [vmem:[%s8882_s1 + $0x48] sm:$0xff]  ;;  %v5828_v8 = vld [vmem:[%s8882_s1 + $0x10] sm:$0xff]  ;;  %s5679_s3 = smov 2   ;;  %s5680_s28 = smov [#allocation11]  }
  0x1d   :  { %255 = vmatpush.msra.mxu0 %v5794_v2  ;;  %275 = vmatpush.msra.mxu1 %v5801_v3  ;;  %v5823_v7 = vld [vmem:[%s8882_s1 + $0x8] sm:$0xff]  ;;  %v5837_v9 = vld [vmem:[%s8882_s1 + $0x30] sm:$0xff]  ;;  %v5857_v11 = vld [vmem:[%s8882_s1 + $0x18] sm:$0xff]  ;;  %s4964_s17 = sshll.u32 %s5680_s28, 4  ;;  %s4966_s10 = sshll.u32 %s8896_s15, 4  ;;  %s4965_s17 = int_to_ptr.vmem [resolvable:$true] %s4964_s17  ;;  %s4967_s10 = int_to_ptr.hbm [resolvable:$true] %s4966_s10 }
  0x1e   :  { %299 = vmatpush.msra.mxu2 %v5818_v6  ;;  %169 = vmatpush.msra.mxu3 %v5818_v6  ;;  %v5864_v12 = vld [vmem:[%s8882_s1] sm:$0xff]  ;;  %v5944_v18 = vld [vmem:[#allocation2 + $0x168] sm:$0xff]  ;;  %v5946_v19 = vld [vmem:[#allocation2 + $0x170] sm:$0xff] }
  0x1f   :  { %256 = vmatpush.msra.mxu0 %v5806_v4  ;;  %276 = vmatpush.msra.mxu1 %v5811_v5  ;;  %v5956_v20 = vld [vmem:[#allocation2 + $0x150] sm:$0xff]  ;;  %v5958_v21 = vld [vmem:[#allocation2 + $0x158] sm:$0xff]  ;;  %v5964_v23 = vld [vmem:[#allocation2 + $0x140] sm:$0xff] }
  0x20   :  { %v5842_v10 = vld [vmem:[%s9015_s13 + $0x2] sm:$0x3]  ;;  %300 = vmatpush.msra.mxu2 %v5837_v9  ;;  %170 = vmatpush.msra.mxu3 %v5837_v9  ;;  %v5879_v13 = vld [vmem:[%s9015_s13 + $0x4] sm:$0x3]  ;;  %v5884_v14 = vld [vmem:[%s9015_s13 + $0x6] sm:$0x3] }
  0x21   :  { %257 = vmatpush.msra.mxu0 %v5823_v7  ;;  %277 = vmatpush.msra.mxu1 %v5828_v8  ;;  %v5903_v15 = vld [vmem:[%s9015_s13] sm:$0x3]  ;;  %v5916_v16 = vld [vmem:[%s9015_s13 + $0x8] sm:$0x3]  ;;  %v5942_v17 = vld [vmem:[%s9015_s13 + $0xa] sm:$0x3] }
  0x22   :  { %5004 = vmatmul.msk.f32.vlgmr.msra.gmra.mxu0 %vm153_vm0, %v5842_v10  ;;  %5005 = vmatmul.msk.f32.vlgmr.msra.gmra.mxu1 %vm153_vm0, %v5842_v10  ;;  %v5962_v22 = vld [vmem:[#allocation2 + $0x138] sm:$0xff]  ;;  %v5970_v24 = vld [vmem:[#allocation2 + $0x120] sm:$0xff]  ;;  %v5972_v25 = vld [vmem:[#allocation2 + $0x128] sm:$0xff] }
  0x23   :  { %339 = vmatpush.msrb.mxu0 %v5789_v1  ;;  %364 = vmatpush.msrb.mxu1 %v5818_v6  ;;  %v5982_v26 = vld [vmem:[%s9015_s13 + $0xc] sm:$0x3]  ;;  %v5986_v28 = vld [vmem:[#allocation2 + $0x110] sm:$0xff]  ;;  %v5995_v29 = vld [vmem:[%s9015_s13 + $0xe] sm:$0x3] }
  0x24   :  { %301 = vmatpush.msra.mxu2 %v5857_v11  ;;  %171 = vmatpush.msra.mxu3 %v5857_v11  ;;  %v5984_v27 = vld [vmem:[#allocation2 + $0x108] sm:$0xff]  ;;  %v5998_v30 = vld [vmem:[#allocation2 + $0xf0] sm:$0xff]  ;;  %v6000_v31 = vld [vmem:[#allocation2 + $0xf8] sm:$0xff] }
  0x25   :  { %340 = vmatpush.msrb.mxu0 %v5801_v3  ;;  %365 = vmatpush.msrb.mxu1 %v5837_v9  ;;  %v6007_v32 = vld [vmem:[#allocation2 + $0xd8] sm:$0xff]  ;;  %v6009_v33 = vld [vmem:[#allocation2 + $0xe0] sm:$0xff]  ;;  %v6018_v35 = vld [vmem:[#allocation2 + $0xc8] sm:$0xff] }
  0x26   :  { %302 = vmatpush.msra.mxu2 %v5864_v12  ;;  %172 = vmatpush.msra.mxu3 %v5864_v12  ;;  %v6016_v34 = vld [vmem:[#allocation2 + $0xc0] sm:$0xff]  ;;  %v6026_v36 = vld [vmem:[#allocation2 + $0xa8] sm:$0xff]  ;;  %v6028_v37 = vld [vmem:[#allocation2 + $0xb0] sm:$0xff] }
  0x27   :  { %341 = vmatpush.msrb.mxu0 %v5811_v5  ;;  %366 = vmatpush.msrb.mxu1 %v5857_v11  ;;  %v6034_v38 = vld [vmem:[#allocation2 + $0x90] sm:$0xff]  ;;  %v6036_v39 = vld [vmem:[#allocation2 + $0x98] sm:$0xff]  ;;  %v6044_v41 = vld [vmem:[#allocation2 + $0x80] sm:$0xff] }
  0x28   :  { %384 = vmatpush.msrb.mxu2 %v5784_v0  ;;  %189 = vmatpush.msrb.mxu3 %v5784_v0  ;;  %v6042_v40 = vld [vmem:[#allocation2 + $0x78] sm:$0xff]  ;;  %v6050_v42 = vld [vmem:[#allocation2 + $0x60] sm:$0xff]  ;;  %v6052_v43 = vld [vmem:[#allocation2 + $0x68] sm:$0xff] }
  0x29   :  { %342 = vmatpush.msrb.mxu0 %v5828_v8  ;;  %367 = vmatpush.msrb.mxu1 %v5864_v12  ;;  %v6058_v44 = vld [vmem:[#allocation2 + $0x48] sm:$0xff]  ;;  %v6063_v45 = vld [vmem:[#allocation2 + $0x50] sm:$0xff]  ;;  %v6065_v46 = vld [vmem:[#allocation2 + $0x178] sm:$0xff] }
  0x2a   :  { %5009 = vmatmul.msk.f32.vlgmr.msrb.gmra.mxu0 %vm153_vm0, %v5879_v13  ;;  %5011 = vmatmul.msk.f32.vlgmr.msrb.gmra.mxu1 %vm153_vm0, %v5884_v14  ;;  %v6068_v47 = vld [vmem:[#allocation2 + $0x30] sm:$0xff]  ;;  %v6074_v48 = vld [vmem:[#allocation2 + $0x38] sm:$0xff]  ;;  %v6076_v49 = vld [vmem:[#allocation2 + $0x160] sm:$0xff] }
  0x2b   :  { %429 = vmatpush.msra.mxu0 %v5818_v6  ;;  %449 = vmatpush.msra.mxu1 %v5784_v0  ;;  %9016 = vst [vmem:[#allocation19_spill] sm:$0xff] %v6068_v47  ;;  %v6080_v50 = vld [vmem:[#allocation2 + $0x18] sm:$0xff]  ;;  %v6083_v51 = vld [vmem:[#allocation2 + $0x20] sm:$0xff]  ;;  %v6085_v52 = vld [vmem:[#allocation2 + $0x148] sm:$0xff] }
  0x2c   :  { %385 = vmatpush.msrb.mxu2 %v5794_v2  ;;  %190 = vmatpush.msrb.mxu3 %v5794_v2  ;;  %9017 = vst [vmem:[#allocation20_spill] sm:$0xff] %v6074_v48  ;;  %v6091_v53 = vld [vmem:[#allocation2] sm:$0xff]  ;;  %v6094_v54 = vld [vmem:[#allocation2 + $0x8] sm:$0xff]  ;;  %v6096_v55 = vld [vmem:[#allocation2 + $0x130] sm:$0xff] }
  0x2d   :  { %430 = vmatpush.msra.mxu0 %v5837_v9  ;;  %450 = vmatpush.msra.mxu1 %v5794_v2  ;;  %9018 = vst [vmem:[#allocation21_spill] sm:$0xff] %v6080_v50  ;;  %v6102_v56 = vld [vmem:[#allocation2 + $0x118] sm:$0xff]  ;;  %v6109_v58 = vld [vmem:[#allocation2 + $0x100] sm:$0xff]  ;;  %v6113_v59 = vld [vmem:[#allocation2 + $0xe8] sm:$0xff] }
  0x2e   :  { %5007 = vmatmul.msk.f32.vlgmr.msra.gmra.mxu2 %vm153_vm0, %v5879_v13  ;;  %4999 = vmatmul.msk.f32.vlgmr.msra.gmra.mxu3 %vm153_vm0, %v5903_v15  ;;  %9019 = vst [vmem:[#allocation22_spill] sm:$0xff] %v6083_v51  ;;  %v6121_v60 = vld [vmem:[#allocation2 + $0xd0] sm:$0xff]  ;;  %v6127_v61 = vld [vmem:[#allocation2 + $0xb8] sm:$0xff]  ;;  %v6133_v62 = vld [vmem:[#allocation2 + $0xa0] sm:$0xff] }
  0x2f   :  { %431 = vmatpush.msra.mxu0 %v5857_v11  ;;  %451 = vmatpush.msra.mxu1 %v5806_v4  ;;  %9020 = vst [vmem:[#allocation23_spill] sm:$0xff] %v6091_v53  ;;  %v6139_v63 = vld [vmem:[#allocation2 + $0x88] sm:$0xff] }
  0x30   :  { %386 = vmatpush.msrb.mxu2 %v5806_v4  ;;  %191 = vmatpush.msrb.mxu3 %v5806_v4  ;;  %9021 = vst [vmem:[#allocation24_spill] sm:$0xff] %v6094_v54 }
  0x31   :  { %432 = vmatpush.msra.mxu0 %v5864_v12  ;;  %452 = vmatpush.msra.mxu1 %v5823_v7 }
  0x32   :  { %5015 = vmatmul.msk.f32.vlgmr.msra.gmra.mxu0 %vm153_vm0, %v5916_v16  ;;  %5016 = vmatmul.msk.f32.vlgmr.msra.gmra.mxu1 %vm153_vm0, %v5916_v16 }
  0x33   :  { %514 = vmatpush.msrb.mxu0 %v5784_v0  ;;  %534 = vmatpush.msrb.mxu1 %v5789_v1 }
  0x34   :  { %387 = vmatpush.msrb.mxu2 %v5823_v7  ;;  %192 = vmatpush.msrb.mxu3 %v5823_v7 }
  0x35   :  { %515 = vmatpush.msrb.mxu0 %v5794_v2  ;;  %535 = vmatpush.msrb.mxu1 %v5801_v3 }
  0x36   :  { %469 = vmatpush.msra.mxu2 %v5789_v1  ;;  %5000 = vmatmul.msk.f32.vlgmr.msrb.gmra.mxu3 %vm153_vm0, %v5903_v15 }
  0x37   :  { %516 = vmatpush.msrb.mxu0 %v5806_v4  ;;  %536 = vmatpush.msrb.mxu1 %v5811_v5 }
  0x38   :  { %470 = vmatpush.msra.mxu2 %v5801_v3  ;;  %209 = vmatpush.msra.mxu3 %v5789_v1 }
  0x39   :  { %517 = vmatpush.msrb.mxu0 %v5823_v7  ;;  %537 = vmatpush.msrb.mxu1 %v5828_v8 }
  0x3a   :  { %5020 = vmatmul.msk.f32.vlgmr.msrb.gmra.mxu0 %vm153_vm0, %v5942_v17  ;;  %5021 = vmatmul.msk.f32.vlgmr.msrb.gmra.mxu1 %vm153_vm0, %v5942_v17 }
  0x3b   :  { %599 = vmatpush.msra.mxu0 %v5789_v1  ;;  %624 = vmatpush.msra.mxu1 %v5818_v6 }
  0x3c   :  { %471 = vmatpush.msra.mxu2 %v5811_v5  ;;  %210 = vmatpush.msra.mxu3 %v5801_v3 }
  0x3d   :  { %600 = vmatpush.msra.mxu0 %v5801_v3  ;;  %625 = vmatpush.msra.mxu1 %v5837_v9 }
  0x3e   :  { %5012 = vmatmul.msk.f32.vlgmr.msrb.gmra.mxu2 %vm153_vm0, %v5884_v14  ;;  %211 = vmatpush.msra.mxu3 %v5811_v5 }
  0x3f   :  { %601 = vmatpush.msra.mxu0 %v5811_v5  ;;  %626 = vmatpush.msra.mxu1 %v5857_v11 }
  0x40   :  { %472 = vmatpush.msra.mxu2 %v5828_v8  ;;  %212 = vmatpush.msra.mxu3 %v5828_v8 }
  0x41   :  { %602 = vmatpush.msra.mxu0 %v5828_v8  ;;  %627 = vmatpush.msra.mxu1 %v5864_v12 }
  0x42   :  { %559 = vmatpush.msrb.mxu2 %v5818_v6  ;;  %5025 = vmatmul.msk.f32.vlgmr.msra.gmra.mxu0 %vm153_vm0, %v5982_v26 }
  0x43   :  { %728 = vmatpush.msrb.mxu0 %v5944_v18  ;;  %748 = vmatpush.msrb.mxu1 %v5946_v19 }
  0x44   :  { %560 = vmatpush.msrb.mxu2 %v5837_v9  ;;  %5027 = vmatmul.msk.f32.vlgmr.msra.gmra.mxu1 %vm153_vm0, %v5995_v29 }
  0x45   :  { %729 = vmatpush.msrb.mxu0 %v5956_v20  ;;  %749 = vmatpush.msrb.mxu1 %v5958_v21 }
  0x46   :  { %561 = vmatpush.msrb.mxu2 %v5857_v11  ;;  %5001 = vmatmul.msk.f32.vlgmr.msra.gmra.mxu3 %vm153_vm0, %v5903_v15 }
  0x47   :  { %730 = vmatpush.msrb.mxu0 %v5962_v22  ;;  %750 = vmatpush.msrb.mxu1 %v5964_v23 }
  0x48   :  { %5017 = vmatmul.msk.f32.vlgmr.msra.gmra.mxu2 %vm153_vm0, %v5916_v16  ;;  %234 = vmatpush.msrb.mxu3 %v5818_v6 }
  0x49   :  { %731 = vmatpush.msrb.mxu0 %v5970_v24  ;;  %751 = vmatpush.msrb.mxu1 %v5972_v25 }
  0x4a   :  { %562 = vmatpush.msrb.mxu2 %v5864_v12  ;;  %235 = vmatpush.msrb.mxu3 %v5837_v9 }
  0x4b   :  { %732 = vmatpush.msrb.mxu0 %v5984_v27  ;;  %752 = vmatpush.msrb.mxu1 %v5986_v28 }
  0x4c   :  { %644 = vmatpush.msra.mxu2 %v5784_v0  ;;  %236 = vmatpush.msrb.mxu3 %v5857_v11 }
  0x4d   :  { %733 = vmatpush.msrb.mxu0 %v5998_v30  ;;  %753 = vmatpush.msrb.mxu1 %v6000_v31 }
  0x4e   :  { %645 = vmatpush.msra.mxu2 %v5794_v2  ;;  %237 = vmatpush.msrb.mxu3 %v5864_v12 }
  0x4f   :  { %734 = vmatpush.msrb.mxu0 %v6007_v32  ;;  %754 = vmatpush.msrb.mxu1 %v6009_v33 }
  0x50   :  { %646 = vmatpush.msra.mxu2 %v5806_v4  ;;  %319 = vmatpush.msra.mxu3 %v5784_v0 }
  0x51   :  { %735 = vmatpush.msrb.mxu0 %v6016_v34  ;;  %755 = vmatpush.msrb.mxu1 %v6018_v35 }
  0x52   :  { %647 = vmatpush.msra.mxu2 %v5823_v7  ;;  %320 = vmatpush.msra.mxu3 %v5794_v2 }
  0x53   :  { %736 = vmatpush.msrb.mxu0 %v6026_v36  ;;  %756 = vmatpush.msrb.mxu1 %v6028_v37 }
  0x54   :  { %5023 = vmatmul.msk.f32.vlgmr.msrb.gmra.mxu2 %vm153_vm0, %v5982_v26  ;;  %5003 = vmatmul.msk.f32.vlgmr.msrb.gmra.mxu3 %vm153_vm0, %v5842_v10  ;;  %v6146_v10 = vld [vmem:[#allocation2 + $0x70] sm:$0xff] }
  0x55   :  { %737 = vmatpush.msrb.mxu0 %v6034_v38  ;;  %757 = vmatpush.msrb.mxu1 %v6036_v39 }
  0x56   :  { %768 = vmatpush.msrb.mxu2 %v6065_v46  ;;  %321 = vmatpush.msra.mxu3 %v5806_v4 }
  0x57   :  { %738 = vmatpush.msrb.mxu0 %v6042_v40  ;;  %758 = vmatpush.msrb.mxu1 %v6044_v41 }
  0x58   :  { %769 = vmatpush.msrb.mxu2 %v6076_v49  ;;  %322 = vmatpush.msra.mxu3 %v5823_v7 }
  0x59   :  { %739 = vmatpush.msrb.mxu0 %v6050_v42  ;;  %759 = vmatpush.msrb.mxu1 %v6052_v43 }
  0x5a   :  { %770 = vmatpush.msrb.mxu2 %v6085_v52  ;;  %404 = vmatpush.msrb.mxu3 %v5789_v1 }
  0x5b   :  { %740 = vmatpush.msrb.mxu0 %v6058_v44  ;;  %760 = vmatpush.msrb.mxu1 %v6063_v45 }
  0x5c   :  { %771 = vmatpush.msrb.mxu2 %v6096_v55  ;;  %5008 = vmatmul.msk.f32.vlgmr.msra.gmra.mxu3 %vm153_vm0, %v5879_v13 }
  0x5d   :  { %741 = vmatpush.msrb.mxu0 %v6068_v47  ;;  %761 = vmatpush.msrb.mxu1 %v6074_v48 }
  0x5e   :  { %772 = vmatpush.msrb.mxu2 %v6102_v56  ;;  %405 = vmatpush.msrb.mxu3 %v5801_v3 }
  0x5f   :  { %742 = vmatpush.msrb.mxu0 %v6080_v50  ;;  %762 = vmatpush.msrb.mxu1 %v6083_v51 }
  0x60   :  { %5028 = vmatmul.msk.f32.vlgmr.msra.gmra.mxu2 %vm153_vm0, %v5995_v29  ;;  %406 = vmatpush.msrb.mxu3 %v5811_v5 }
  0x61   :  { %743 = vmatpush.msrb.mxu0 %v6091_v53  ;;  %763 = vmatpush.msrb.mxu1 %v6094_v54 }
  0x62   :  { %744 = vmatmul.f32.vlgmr.msrb.gmra.mxu0 %v8899_v57  ;;  %764 = vmatmul.f32.vlgmr.msrb.gmra.mxu1 %v8899_v57 }
  0x63   :  { %773 = vmatpush.msrb.mxu2 %v6109_v58  ;;  %855 = vmatpush.msra.mxu0 %v5946_v19 }
  0x64   :  { %875 = vmatpush.msra.mxu1 %v6065_v46  ;;  %407 = vmatpush.msrb.mxu3 %v5828_v8 }
  0x65   :  { %774 = vmatpush.msrb.mxu2 %v6113_v59  ;;  %856 = vmatpush.msra.mxu0 %v5958_v21 }
  0x66   :  { %876 = vmatpush.msra.mxu1 %v6076_v49  ;;  %494 = vmatpush.msra.mxu3 %v5818_v6  ;;  %v6152_v6 = vld [vmem:[#allocation2 + $0x58] sm:$0xff] }
  0x67   :  { %775 = vmatpush.msrb.mxu2 %v6121_v60  ;;  %857 = vmatpush.msra.mxu0 %v5964_v23 }
  0x68   :  { %877 = vmatpush.msra.mxu1 %v6085_v52  ;;  %495 = vmatpush.msra.mxu3 %v5837_v9  ;;  %v6158_v9 = vld [vmem:[#allocation2 + $0x40] sm:$0xff] }
  0x69   :  { %776 = vmatpush.msrb.mxu2 %v6127_v61  ;;  %858 = vmatpush.msra.mxu0 %v5972_v25 }
  0x6a   :  { %5013 = vmatmul.msk.f32.vlgmr.msrb.gmra.mxu3 %vm153_vm0, %v5884_v14  ;;  %878 = vmatpush.msra.mxu1 %v6096_v55 }
  0x6b   :  { %777 = vmatpush.msrb.mxu2 %v6133_v62  ;;  %496 = vmatpush.msra.mxu3 %v5857_v11  ;;  %v6164_v11 = vld [vmem:[#allocation2 + $0x28] sm:$0xff] }
  0x6c   :  { %859 = vmatpush.msra.mxu0 %v5986_v28  ;;  %879 = vmatpush.msra.mxu1 %v6102_v56  ;;  %9022 = vst [vmem:[#allocation25_spill] sm:$0xff] %v6164_v11 }
  0x6d   :  { %778 = vmatpush.msrb.mxu2 %v6139_v63  ;;  %497 = vmatpush.msra.mxu3 %v5864_v12 }
  0x6e   :  { %860 = vmatpush.msra.mxu0 %v6000_v31  ;;  %880 = vmatpush.msra.mxu1 %v6109_v58 }
  0x6f   :  { %779 = vmatpush.msrb.mxu2 %v6146_v10  ;;  %579 = vmatpush.msrb.mxu3 %v5784_v0  ;;  %v6170_v0 = vld [vmem:[#allocation2 + $0x10] sm:$0xff] }
  0x70   :  { %861 = vmatpush.msra.mxu0 %v6009_v33  ;;  %881 = vmatpush.msra.mxu1 %v6113_v59  ;;  %9023 = vst [vmem:[#allocation26_spill] sm:$0xff] %v6170_v0 }
  0x71   :  { %780 = vmatpush.msrb.mxu2 %v6152_v6  ;;  %580 = vmatpush.msrb.mxu3 %v5794_v2 }
  0x72   :  { %5019 = vmatmul.msk.f32.vlgmr.msra.gmra.mxu3 %vm153_vm0, %v5942_v17  ;;  %862 = vmatpush.msra.mxu0 %v6018_v35 }
  0x73   :  { %781 = vmatpush.msrb.mxu2 %v6158_v9  ;;  %581 = vmatpush.msrb.mxu3 %v5806_v4 }
  0x74   :  { %882 = vmatpush.msra.mxu1 %v6121_v60  ;;  %863 = vmatpush.msra.mxu0 %v6028_v37 }
  0x75   :  { %782 = vmatpush.msrb.mxu2 %v6164_v11  ;;  %582 = vmatpush.msrb.mxu3 %v5823_v7 }
  0x76   :  { %883 = vmatpush.msra.mxu1 %v6127_v61  ;;  %864 = vmatpush.msra.mxu0 %v6036_v39 }
  0x77   :  { %664 = vmatpush.msra.mxu3 %v5789_v1  ;;  %783 = vmatpush.msrb.mxu2 %v6170_v0 }
  0x78   :  { %784 = vmatmul.f32.vlgmr.msrb.gmra.mxu2 %v8899_v57  ;;  %884 = vmatpush.msra.mxu1 %v6133_v62 }
  0x79   :  { %665 = vmatpush.msra.mxu3 %v5801_v3  ;;  %942 = vmatpush.msra.mxu2 %v5944_v18 }
  0x7a   :  { %865 = vmatpush.msra.mxu0 %v6044_v41  ;;  %5024 = vmatmul.msk.f32.vlgmr.msrb.gmra.mxu3 %vm153_vm0, %v5982_v26  ;;  %v145_v26 = vld [vmem:[%s8883_s2] sm:$0x7] }
  0x7b   :  { %666 = vmatpush.msra.mxu3 %v5811_v5  ;;  %943 = vmatpush.msra.mxu2 %v5956_v20 }
  0x7c   :  { %885 = vmatpush.msra.mxu1 %v6139_v63  ;;  %866 = vmatpush.msra.mxu0 %v6052_v43 }
  0x7d   :  { %667 = vmatpush.msra.mxu3 %v5828_v8  ;;  %944 = vmatpush.msra.mxu2 %v5962_v22 }
  0x7e   :  { %886 = vmatpush.msra.mxu1 %v6146_v10  ;;  %867 = vmatpush.msra.mxu0 %v6063_v45 }
  0x7f   :  { %835 = vmatpush.msrb.mxu3 %v5944_v18  ;;  %945 = vmatpush.msra.mxu2 %v5970_v24 }
  0x80   :  { %887 = vmatpush.msra.mxu1 %v6152_v6  ;;  %868 = vmatpush.msra.mxu0 %v6074_v48 }
  0x81   :  { %836 = vmatpush.msrb.mxu3 %v5956_v20  ;;  %946 = vmatpush.msra.mxu2 %v5984_v27 }
  0x82   :  { %888 = vmatpush.msra.mxu1 %v6158_v9  ;;  %869 = vmatpush.msra.mxu0 %v6083_v51 }
  0x83   :  { %837 = vmatpush.msrb.mxu3 %v5962_v22  ;;  %947 = vmatpush.msra.mxu2 %v5998_v30 }
  0x84   :  { %5029 = vmatmul.msk.f32.vlgmr.msra.gmra.mxu3 %vm153_vm0, %v5995_v29  ;;  %889 = vmatpush.msra.mxu1 %v6164_v11  ;;  %v720_v29 = vld [vmem:[%s8885_s4] sm:$0x7] }
  0x85   :  { %838 = vmatpush.msrb.mxu3 %v5970_v24  ;;  %870 = vmatpush.msra.mxu0 %v6094_v54 }
  0x86   :  { %890 = vmatpush.msra.mxu1 %v6170_v0  ;;  %948 = vmatpush.msra.mxu2 %v6007_v32 }
  0x87   :  { %839 = vmatpush.msrb.mxu3 %v5984_v27  ;;  %982 = vmatpush.msrb.mxu0 %v6065_v46 }
  0x88   :  { %1049 = vmatpush.msrb.mxu1 %v5944_v18  ;;  %949 = vmatpush.msra.mxu2 %v6016_v34 }
  0x89   :  { %840 = vmatpush.msrb.mxu3 %v5998_v30  ;;  %983 = vmatpush.msrb.mxu0 %v6076_v49 }
  0x8a   :  { %1050 = vmatpush.msrb.mxu1 %v5956_v20  ;;  %950 = vmatpush.msra.mxu2 %v6026_v36 }
  0x8b   :  { %841 = vmatpush.msrb.mxu3 %v6007_v32  ;;  %984 = vmatpush.msrb.mxu0 %v6085_v52 }
  0x8c   :  { %1051 = vmatpush.msrb.mxu1 %v5962_v22  ;;  %951 = vmatpush.msra.mxu2 %v6034_v38 }
  0x8d   :  { %842 = vmatpush.msrb.mxu3 %v6016_v34  ;;  %985 = vmatpush.msrb.mxu0 %v6096_v55 }
  0x8e   :  { %1052 = vmatpush.msrb.mxu1 %v5970_v24  ;;  %952 = vmatpush.msra.mxu2 %v6042_v40 }
  0x8f   :  { %843 = vmatpush.msrb.mxu3 %v6026_v36  ;;  %986 = vmatpush.msrb.mxu0 %v6102_v56 }
  0x90   :  { %1053 = vmatpush.msrb.mxu1 %v5984_v27  ;;  %953 = vmatpush.msra.mxu2 %v6050_v42 }
  0x91   :  { %844 = vmatpush.msrb.mxu3 %v6034_v38  ;;  %987 = vmatpush.msrb.mxu0 %v6109_v58 }
  0x92   :  { %1054 = vmatpush.msrb.mxu1 %v5998_v30  ;;  %954 = vmatpush.msra.mxu2 %v6058_v44 }
  0x93   :  { %845 = vmatpush.msrb.mxu3 %v6042_v40  ;;  %988 = vmatpush.msrb.mxu0 %v6113_v59 }
  0x94   :  { %1055 = vmatpush.msrb.mxu1 %v6007_v32  ;;  %955 = vmatpush.msra.mxu2 %v6068_v47 }
  0x95   :  { %846 = vmatpush.msrb.mxu3 %v6050_v42  ;;  %989 = vmatpush.msrb.mxu0 %v6121_v60 }
  0x96   :  { %1056 = vmatpush.msrb.mxu1 %v6016_v34  ;;  %956 = vmatpush.msra.mxu2 %v6080_v50 }
  0x97   :  { %847 = vmatpush.msrb.mxu3 %v6058_v44  ;;  %990 = vmatpush.msrb.mxu0 %v6127_v61 }
  0x98   :  { %1057 = vmatpush.msrb.mxu1 %v6026_v36  ;;  %957 = vmatpush.msra.mxu2 %v6091_v53 }
  0x99   :  { %848 = vmatpush.msrb.mxu3 %v6068_v47  ;;  %991 = vmatpush.msrb.mxu0 %v6133_v62 }
  0x9a   :  { %1058 = vmatpush.msrb.mxu1 %v6034_v38  ;;  %1069 = vmatpush.msrb.mxu2 %v5946_v19 }
  0x9b   :  { %849 = vmatpush.msrb.mxu3 %v6080_v50  ;;  %992 = vmatpush.msrb.mxu0 %v6139_v63 }
  0x9c   :  { %1059 = vmatpush.msrb.mxu1 %v6042_v40  ;;  %1070 = vmatpush.msrb.mxu2 %v5958_v21 }
  0x9d   :  { %850 = vmatpush.msrb.mxu3 %v6091_v53  ;;  %993 = vmatpush.msrb.mxu0 %v6146_v10 }
  0x9e   :  { %1060 = vmatpush.msrb.mxu1 %v6050_v42  ;;  %1071 = vmatpush.msrb.mxu2 %v5964_v23 }
  0x9f   :  { %962 = vmatpush.msra.mxu3 %v5946_v19  ;;  %994 = vmatpush.msrb.mxu0 %v6152_v6  ;;  %v6284_v1 = vpop.f32.mrf.mxu0  ;;  %v6286_v2 = vpop.f32.mrf.mxu1 }
  0xa0   :  { %1061 = vmatpush.msrb.mxu1 %v6058_v44  ;;  %1072 = vmatpush.msrb.mxu2 %v5972_v25  ;;  %9024 = vst [vmem:[#allocation27_spill] sm:$0xff] %v6284_v1 }
  0xa1   :  { %963 = vmatpush.msra.mxu3 %v5958_v21  ;;  %995 = vmatpush.msrb.mxu0 %v6158_v9  ;;  %9025 = vst [vmem:[#allocation28_spill] sm:$0xff] %v6286_v2 }
  0xa2   :  { %1062 = vmatpush.msrb.mxu1 %v6068_v47  ;;  %1073 = vmatpush.msrb.mxu2 %v5986_v28 }
  0xa3   :  { %964 = vmatpush.msra.mxu3 %v5964_v23  ;;  %996 = vmatpush.msrb.mxu0 %v6164_v11 }
  0xa4   :  { %1063 = vmatpush.msrb.mxu1 %v6080_v50  ;;  %1074 = vmatpush.msrb.mxu2 %v6000_v31 }
  0xa5   :  { %965 = vmatpush.msra.mxu3 %v5972_v25  ;;  %997 = vmatpush.msrb.mxu0 %v6170_v0 }
  0xa6   :  { %1064 = vmatpush.msrb.mxu1 %v6091_v53  ;;  %1075 = vmatpush.msrb.mxu2 %v6009_v33 }
  0xa7   :  { %966 = vmatpush.msra.mxu3 %v5986_v28  ;;  %v6298_v3 = vpop.f32.mrf.mxu0  ;;  %v6300_v4 = vpop.f32.mrf.mxu1 }
  0xa8   :  { %1076 = vmatpush.msrb.mxu2 %v6018_v35  ;;  %9026 = vst [vmem:[#allocation29_spill] sm:$0xff] %v6298_v3 }
  0xa9   :  { %967 = vmatpush.msra.mxu3 %v6000_v31  ;;  %9027 = vst [vmem:[#allocation30_spill] sm:$0xff] %v6300_v4 }
  0xaa   :  { %1077 = vmatpush.msrb.mxu2 %v6028_v37 }
  0xab   :  { %968 = vmatpush.msra.mxu3 %v6009_v33 }
  0xac   :  { %1078 = vmatpush.msrb.mxu2 %v6036_v39 }
  0xad   :  { %969 = vmatpush.msra.mxu3 %v6018_v35 }
  0xae   :  { %1079 = vmatpush.msrb.mxu2 %v6044_v41 }
  0xaf   :  { %970 = vmatpush.msra.mxu3 %v6028_v37  ;;  %v6308_v5 = vpop.f32.mrf.mxu0  ;;  %v6310_v7 = vpop.f32.mrf.mxu1 }
  0xb0   :  { %1080 = vmatpush.msrb.mxu2 %v6052_v43  ;;  %9028 = vst [vmem:[#allocation31_spill] sm:$0xff] %v6308_v5 }
  0xb1   :  { %971 = vmatpush.msra.mxu3 %v6036_v39  ;;  %9029 = vst [vmem:[#allocation32_spill] sm:$0xff] %v6310_v7  ;;  %v6312_v8 = vpop.f32.mrf.mxu2  ;;  %v174_v14 = vpop.f32.mrf.mxu3  ;;  %v6330_v7 = vperm.slane %v145_v26, 1 }
  0xb2   :  { %1081 = vmatpush.msrb.mxu2 %v6063_v45  ;;  %9030 = vst [vmem:[#allocation33_spill] sm:$0xff] %v6312_v8 }
  0xb3   :  { %972 = vmatpush.msra.mxu3 %v6044_v41  ;;  %9036 = vst [vmem:[#allocation39_spill] sm:$0xff] %v6330_v7 }
  0xb4   :  { %1082 = vmatpush.msrb.mxu2 %v6074_v48 }
  0xb5   :  { %973 = vmatpush.msra.mxu3 %v6052_v43 }
  0xb6   :  { %1083 = vmatpush.msrb.mxu2 %v6083_v51 }
  0xb7   :  { %974 = vmatpush.msra.mxu3 %v6063_v45  ;;  %v6314_v12 = vpop.f32.mrf.mxu0  ;;  %v6316_v13 = vpop.f32.mrf.mxu1 }
  0xb8   :  { %1084 = vmatpush.msrb.mxu2 %v6094_v54  ;;  %9031 = vst [vmem:[#allocation34_spill] sm:$0xff] %v6314_v12  ;;  %v6332_v12 = vperm.slane %v145_v26, 0 }
  0xb9   :  { %975 = vmatpush.msra.mxu3 %v6074_v48  ;;  %9032 = vst [vmem:[#allocation35_spill] sm:$0xff] %v6316_v13  ;;  %v194_v57 = vpop.f32.mrf.mxu3  ;;  %v6334_v13 = vperm.slane %v720_v29, 0 }
  0xba   :  { %9037 = vst [vmem:[#allocation40_spill] sm:$0xff] %v6332_v12  ;;  %v195_v5 = vadd.f32 %v194_v57, %v6330_v7 }
  0xbb   :  { %976 = vmatpush.msra.mxu3 %v6083_v51  ;;  %9038 = vst [vmem:[#allocation41_spill] sm:$0xff] %v6334_v13 }
  0xbd   :  { %977 = vmatpush.msra.mxu3 %v6094_v54 }
  0xbf   :  { %v6318_v15 = vpop.f32.mrf.mxu0 }
  0xc0   :  { %9033 = vst [vmem:[#allocation36_spill] sm:$0xff] %v6318_v15  ;;  %v6336_v15 = vperm.slane %v720_v29, 1 }
  0xc1   :  { %v6320_v16 = vpop.f32.mrf.mxu1  ;;  %v6322_v17 = vpop.f32.mrf.mxu2 }
  0xc2   :  { %9034 = vst [vmem:[#allocation37_spill] sm:$0xff] %v6320_v16  ;;  %v175_v16 = vadd.f32 %v174_v14, %v6332_v12 }
  0xc3   :  { %9035 = vst [vmem:[#allocation38_spill] sm:$0xff] %v6322_v17 }
  0xc4   :  { %9039 = vst [vmem:[#allocation42_spill] sm:$0xff] %v6336_v15 }
  0xcb   :  { %v6342_v2 = vpop.f32.mrf.mxu2 }
  0xcc   :  { %9040 = vst [vmem:[#allocation43_spill] sm:$0xff] %v6342_v2 }
  0xd7   :  { %v6344_v51 = vpop.f32.mrf.mxu2 }
  0xd8   :  { %9041 = vst [vmem:[#allocation44_spill] sm:$0xff] %v6344_v51 }
  0xdf   :  { %v745_v17 = vpop.f32.mrf.mxu0  ;;  %v765_v4 = vpop.f32.mrf.mxu1 }
  0xe0   :  { %v746_v3 = vadd.f32 %v745_v17, %v6334_v13  ;;  %v766_v8 = vadd.f32 %v765_v4, %v6336_v15 }
  0xe2   :  { %v788_v1 = vadd.f32 %v746_v3, %v175_v16  ;;  %v808_v54 = vadd.f32 %v766_v8, %v195_v5  ;;  %v214_v16 = vpop.f32.mrf.mxu3 }
  0xe3   :  { %v6346_v7 = vpop.f32.mrf.mxu2 }
  0xe4   :  { %v5030_v53 = vmul.f32 -1.442695, %v788_v1  ;;  %v5031_v0 = vmul.f32 -1.442695, %v808_v54  ;;  %9042 = vst [vmem:[#allocation45_spill] sm:$0xff] %v6346_v7  ;;  %v6348_v54 = vperm.slane %v720_v29, 2 }
  0xe6   :  { %5122 = vpow2.f32 %v5030_v53 }
  0xe7   :  { %5124 = vpow2.f32 %v5031_v0 }
  0xec   :  { %v5123_v50 = vpop.eup %5122 }
  0xed   :  { %v5125_v14 = vpop.eup %5124  ;;  %v792_v12 = vadd.f32 1.0, %v5123_v50  ;;  %v6350_v50 = vperm.slane %v145_v26, 2 }
  0xee   :  { %v812_v57 = vadd.f32 1.0, %v5125_v14 }
  0xef   :  { %5126 = vrcp.f32 %v792_v12  ;;  %v804_v1 = vand.u32 2147483648, %v792_v12  ;;  %v802_v0 = vand.u32 2147483647, %v792_v12  ;;  %vm798_vm2 = vweird.f32 %v792_v12 }
  0xf0   :  { %5128 = vrcp.f32 %v812_v57  ;;  %vm818_vm5 = vweird.f32 %v812_v57  ;;  %v822_v48 = vand.u32 2147483647, %v812_v57 }
  0xf1   :  { %v805_v7 = vor.u32 1.1754944e-38, %v804_v1  ;;  %vm803_vm4 = vcmp.eq.f32.partialorder %v802_v0, 8.507059e+37 }
  0xf2   :  { %vm823_vm8 = vcmp.eq.f32.partialorder %v822_v48, 8.507059e+37  ;;  %v9045_v48 = vld [vmem:[#allocation20_spill] sm:$0xff] }
  0xf5   :  { %v5127_v17 = vpop.eup %5126 }
  0xf6   :  { %v5129_v4 = vpop.eup %5128  ;;  %v794_v13 = vmul.f32 %v5127_v17, %v792_v12  ;;  %vm799_vm1 = vweird.f32 %v5127_v17 }
  0xf7   :  { %v814_v2 = vmul.f32 %v5129_v4, %v812_v57  ;;  %vm800_vm3 = vmor %vm798_vm2, %vm799_vm1  ;;  %vm819_vm6 = vweird.f32 %v5129_v4 }
  0xf8   :  { %v795_v3 = vsub.f32 1.0, %v794_v13  ;;  %vm820_vm7 = vmor %vm818_vm5, %vm819_vm6 }
  0xf9   :  { %v815_v5 = vsub.f32 1.0, %v814_v2  ;;  %v215_v2 = vadd.f32 %v214_v16, %v6350_v50  ;;  %v239_v16 = vpop.f32.mrf.mxu3 }
  0xfa   :  { %v796_v53 = vmul.f32 %v5127_v17, %v795_v3  ;;  %v824_v3 = vand.u32 2147483648, %v812_v57  ;;  %v9049_v57 = vld [vmem:[#allocation26_spill] sm:$0xff] }
  0xfb   :  { %v816_v8 = vmul.f32 %v5129_v4, %v815_v5  ;;  %v785_v51 = vpop.f32.mrf.mxu2 }
  0xfc   :  { %v797_v14 = vadd.f32 %v5127_v17, %v796_v53  ;;  %v786_v15 = vadd.f32 %v785_v51, %v6348_v54  ;;  %v825_v12 = vor.u32 1.1754944e-38, %v824_v3 }
  0xfd   :  { %v817_v29 = vadd.f32 %v5129_v4, %v816_v8  ;;  %v9051_v8 = vld [vmem:[#allocation24_spill] sm:$0xff] }
  0xfe   :  { %v801_v11 = vsel %vm800_vm3, %v5127_v17, %v797_v14 }
  0xff   :  { %v806_v13 = vsel %vm803_vm4, %v805_v7, %v801_v11  ;;  %v821_v53 = vsel %vm820_vm7, %v5129_v4, %v817_v29  ;;  %v9046_v11 = vld [vmem:[#allocation25_spill] sm:$0xff]  ;;  %v9050_v4 = vld [vmem:[#allocation23_spill] sm:$0xff] }
 0x100   :  { %v828_v5 = vmul.f32 %v806_v13, %v786_v15  ;;  %v826_v1 = vsel %vm823_vm8, %v825_v12, %v821_v53  ;;  %v9047_v7 = vld [vmem:[#allocation21_spill] sm:$0xff]  ;;  %v9048_v15 = vld [vmem:[#allocation22_spill] sm:$0xff]  ;;  %v9057_v53 = vld [vmem:[#allocation39_spill] sm:$0xff] }
 0x101   :  { %v831_v47 = vsub.f32 1.0, %v826_v1  ;;  %v833_v0 = vmul.f32 0.0, %v826_v1  ;;  %v9058_v12 = vld [vmem:[#allocation27_spill] sm:$0xff] }
 0x102   :  { %v829_v26 = vadd.f32 %v828_v5, %v215_v2  ;;  %v6407_v2 = vpop.f32.mrf.mxu3  ;;  %v260_v1 = vadd.f32 %v9058_v12, %v9057_v53 }
 0x103   :  { %9052 = vst [vmem:[#allocation47_spill] sm:$0xff] %v6407_v2  ;;  %v9061_v2 = vld [vmem:[#allocation41_spill] sm:$0xff] }
 0x104   :  { %5130 = vtanh.f32 %v829_v26 }
 0x10a   :  { %v5131_v51 = vpop.eup %5130  ;;  %v6409_v13 = vpop.f32.mrf.mxu3 }
 0x10b   :  { %v832_v17 = vmul.f32 %v5131_v51, %v831_v47  ;;  %v9044_v47 = vld [vmem:[#allocation19_spill] sm:$0xff]  ;;  %9053 = vst [vmem:[#allocation48_spill] sm:$0xff] %v6409_v13  ;;  %v9059_v51 = vld [vmem:[#allocation42_spill] sm:$0xff] }
 0x10d   :  { %v6354_v14 = vadd.f32 %v833_v0, %v832_v17 }
 0x10f   :  { %9043 = vst [vmem:[#allocation46_spill] sm:$0xff] %v6354_v14  ;;  %851 = vmatmul.f32.vlgmr.msrb.gmra.mxu3 %v6354_v14  ;;  %871 = vmatmul.f32.vlgmr.msra.gmra.mxu0 %v6354_v14 }
 0x110   :  { %891 = vmatmul.f32.vlgmr.msra.gmra.mxu1 %v6354_v14  ;;  %1089 = vmatpush.msrb.mxu3 %v6065_v46 }
 0x111   :  { %1156 = vmatpush.msra.mxu0 %v5944_v18  ;;  %1176 = vmatpush.msra.mxu1 %v5946_v19 }
 0x112   :  { %1090 = vmatpush.msrb.mxu3 %v6076_v49  ;;  %v6411_v29 = vpop.f32.mrf.mxu3 }
 0x113   :  { %1157 = vmatpush.msra.mxu0 %v5956_v20  ;;  %1177 = vmatpush.msra.mxu1 %v5958_v21  ;;  %9054 = vst [vmem:[#allocation49_spill] sm:$0xff] %v6411_v29 }
 0x114   :  { %1091 = vmatpush.msrb.mxu3 %v6085_v52 }
 0x115   :  { %1158 = vmatpush.msra.mxu0 %v5962_v22  ;;  %1178 = vmatpush.msra.mxu1 %v5964_v23 }
 0x116   :  { %1092 = vmatpush.msrb.mxu3 %v6096_v55 }
 0x117   :  { %1159 = vmatpush.msra.mxu0 %v5970_v24  ;;  %1179 = vmatpush.msra.mxu1 %v5972_v25 }
 0x118   :  { %1093 = vmatpush.msrb.mxu3 %v6102_v56 }
 0x119   :  { %1160 = vmatpush.msra.mxu0 %v5984_v27  ;;  %1180 = vmatpush.msra.mxu1 %v5986_v28 }
 0x11a   :  { %1094 = vmatpush.msrb.mxu3 %v6109_v58  ;;  %v6413_v3 = vpop.f32.mrf.mxu3 }
 0x11b   :  { %1161 = vmatpush.msra.mxu0 %v5998_v30  ;;  %1181 = vmatpush.msra.mxu1 %v6000_v31  ;;  %9055 = vst [vmem:[#allocation50_spill] sm:$0xff] %v6413_v3 }
 0x11c   :  { %1095 = vmatpush.msrb.mxu3 %v6113_v59 }
 0x11d   :  { %1162 = vmatpush.msra.mxu0 %v6007_v32  ;;  %1182 = vmatpush.msra.mxu1 %v6009_v33 }
 0x11e   :  { %1096 = vmatpush.msrb.mxu3 %v6121_v60 }
 0x11f   :  { %1163 = vmatpush.msra.mxu0 %v6016_v34  ;;  %1183 = vmatpush.msra.mxu1 %v6018_v35 }
 0x120   :  { %1097 = vmatpush.msrb.mxu3 %v6127_v61 }
 0x121   :  { %1164 = vmatpush.msra.mxu0 %v6026_v36  ;;  %1184 = vmatpush.msra.mxu1 %v6028_v37 }
 0x122   :  { %1098 = vmatpush.msrb.mxu3 %v6133_v62  ;;  %v6415_v5 = vpop.f32.mrf.mxu3 }
 0x123   :  { %1165 = vmatpush.msra.mxu0 %v6034_v38  ;;  %1185 = vmatpush.msra.mxu1 %v6036_v39  ;;  %9056 = vst [vmem:[#allocation51_spill] sm:$0xff] %v6415_v5 }
 0x124   :  { %1099 = vmatpush.msrb.mxu3 %v6139_v63 }
 0x125   :  { %1166 = vmatpush.msra.mxu0 %v6042_v40  ;;  %1186 = vmatpush.msra.mxu1 %v6044_v41 }
 0x126   :  { %1100 = vmatpush.msrb.mxu3 %v6146_v10 }
 0x127   :  { %1167 = vmatpush.msra.mxu0 %v6050_v42  ;;  %1187 = vmatpush.msra.mxu1 %v6052_v43 }
 0x128   :  { %1101 = vmatpush.msrb.mxu3 %v6152_v6 }
 0x129   :  { %1168 = vmatpush.msra.mxu0 %v6058_v44  ;;  %1188 = vmatpush.msra.mxu1 %v6063_v45 }
 0x12a   :  { %1102 = vmatpush.msrb.mxu3 %v6158_v9 }
 0x12b   :  { %1169 = vmatpush.msra.mxu0 %v9044_v47  ;;  %1189 = vmatpush.msra.mxu1 %v9045_v48 }
 0x12c   :  { %1103 = vmatpush.msrb.mxu3 %v9046_v11 }
 0x12d   :  { %1170 = vmatpush.msra.mxu0 %v9047_v7  ;;  %1190 = vmatpush.msra.mxu1 %v9048_v15 }
 0x12e   :  { %1104 = vmatpush.msrb.mxu3 %v9049_v57  ;;  %v9060_v57 = vld [vmem:[#allocation40_spill] sm:$0xff] }
 0x12f   :  { %1171 = vmatpush.msra.mxu0 %v9050_v4  ;;  %1191 = vmatpush.msra.mxu1 %v9051_v8  ;;  %v240_v15 = vadd.f32 %v239_v16, %v9060_v57 }
 0x18c   :  { %v872_v26 = vpop.f32.mrf.mxu0 }
 0x18d   :  { %v873_v17 = vadd.f32 %v872_v26, %v9059_v51 }
 0x18f   :  { %v915_v0 = vadd.f32 %v873_v17, %v260_v1 }
 0x191   :  { %v5033_v4 = vmul.f32 -1.442695, %v915_v0 }
 0x192   :  { %v852_v8 = vpop.f32.mrf.mxu3 }
 0x193   :  { %5132 = vpow2.f32 %v5033_v4  ;;  %v853_v13 = vadd.f32 %v852_v8, %v9061_v2 }
 0x195   :  { %v895_v7 = vadd.f32 %v853_v13, %v240_v15  ;;  %v892_v15 = vpop.f32.mrf.mxu1 }
 0x196   :  { %v893_v13 = vadd.f32 %v892_v15, %v6348_v54 }
 0x197   :  { %v5032_v29 = vmul.f32 -1.442695, %v895_v7 }
 0x199   :  { %v5133_v11 = vpop.eup %5132  ;;  %5134 = vpow2.f32 %v5032_v29 }
 0x19a   :  { %v919_v3 = vadd.f32 1.0, %v5133_v11 }
 0x19c   :  { %5136 = vrcp.f32 %v919_v3  ;;  %v931_v57 = vand.u32 2147483648, %v919_v3  ;;  %vm925_vm14 = vweird.f32 %v919_v3  ;;  %v929_v47 = vand.u32 2147483647, %v919_v3 }
 0x19e   :  { %vm930_vm1 = vcmp.eq.f32.partialorder %v929_v47, 8.507059e+37 }
 0x19f   :  { %v5135_v5 = vpop.eup %5134 }
 0x1a0   :  { %v899_v48 = vadd.f32 1.0, %v5135_v5 }
 0x1a2   :  { %5138 = vrcp.f32 %v899_v48  ;;  %v5137_v12 = vpop.eup %5136  ;;  %v911_v51 = vand.u32 2147483648, %v899_v48  ;;  %v909_v4 = vand.u32 2147483647, %v899_v48  ;;  %vm905_vm10 = vweird.f32 %v899_v48 }
 0x1a3   :  { %v921_v53 = vmul.f32 %v5137_v12, %v919_v3  ;;  %vm926_vm13 = vweird.f32 %v5137_v12 }
 0x1a4   :  { %v912_v11 = vor.u32 1.1754944e-38, %v911_v51  ;;  %vm910_vm12 = vcmp.eq.f32.partialorder %v909_v4, 8.507059e+37  ;;  %vm927_vm15 = vmor %vm925_vm14, %vm926_vm13 }
 0x1a5   :  { %v922_v17 = vsub.f32 1.0, %v921_v53  ;;  %v9062_v53 = vld [vmem:[#allocation28_spill] sm:$0xff] }
 0x1a7   :  { %v923_v8 = vmul.f32 %v5137_v12, %v922_v17 }
 0x1a8   :  { %v5139_v26 = vpop.eup %5138 }
 0x1a9   :  { %v901_v1 = vmul.f32 %v5139_v26, %v899_v48  ;;  %vm906_vm9 = vweird.f32 %v5139_v26  ;;  %v924_v2 = vadd.f32 %v5137_v12, %v923_v8  ;;  %v932_v48 = vor.u32 1.1754944e-38, %v931_v57 }
 0x1aa   :  { %vm907_vm11 = vmor %vm905_vm10, %vm906_vm9 }
 0x1ab   :  { %v902_v0 = vsub.f32 1.0, %v901_v1  ;;  %v280_v1 = vadd.f32 %v9062_v53, %v6350_v50 }
 0x1ad   :  { %v903_v16 = vmul.f32 %v5139_v26, %v902_v0 }
 0x1af   :  { %v904_v7 = vadd.f32 %v5139_v26, %v903_v16  ;;  %v928_v16 = vsel %vm927_vm15, %v5137_v12, %v924_v2 }
 0x1b0   :  { %v933_v51 = vsel %vm930_vm1, %v932_v48, %v928_v16 }
 0x1b1   :  { %v908_v29 = vsel %vm907_vm11, %v5139_v26, %v904_v7  ;;  %v938_v15 = vsub.f32 1.0, %v933_v51  ;;  %v940_v8 = vmul.f32 %v933_v51, %v6354_v14 }
 0x1b2   :  { %v913_v5 = vsel %vm910_vm12, %v912_v11, %v908_v29 }
 0x1b3   :  { %v935_v0 = vmul.f32 %v913_v5, %v893_v13 }
 0x1b5   :  { %v936_v17 = vadd.f32 %v935_v0, %v280_v1 }
 0x1b7   :  { %5140 = vtanh.f32 %v936_v17 }
 0x1bd   :  { %v5141_v26 = vpop.eup %5140 }
 0x1be   :  { %v939_v4 = vmul.f32 %v5141_v26, %v938_v15 }
 0x1c0   :  { %v6426_v7 = vadd.f32 %v940_v8, %v939_v4  ;;  %v9078_v4 = vld [vmem:[#allocation29_spill] sm:$0xff] }
 0x1c1   :  { %v345_v8 = vadd.f32 %v9078_v4, %v6350_v50 }
 0x1c2   :  { %9063 = vst [vmem:[#allocation27_spill] sm:$0xff] %v6426_v7  ;;  %958 = vmatmul.f32.vlgmr.msra.gmra.mxu2 %v6426_v7  ;;  %978 = vmatmul.f32.vlgmr.msra.gmra.mxu3 %v6426_v7 }
 0x1c3   :  { %998 = vmatmul.f32.vlgmr.msrb.gmra.mxu0 %v6426_v7  ;;  %1196 = vmatpush.msra.mxu2 %v6065_v46 }
 0x1c4   :  { %1263 = vmatpush.msra.mxu3 %v5944_v18  ;;  %1283 = vmatpush.msrb.mxu0 %v5946_v19  ;;  %v9064_v18 = vld [vmem:[#allocation19_spill] sm:$0xff]  ;;  %v9065_v19 = vld [vmem:[#allocation20_spill] sm:$0xff] }
 0x1c5   :  { %1197 = vmatpush.msra.mxu2 %v6076_v49 }
 0x1c6   :  { %1264 = vmatpush.msra.mxu3 %v5956_v20  ;;  %1284 = vmatpush.msrb.mxu0 %v5958_v21  ;;  %v9066_v20 = vld [vmem:[#allocation25_spill] sm:$0xff] }
 0x1c7   :  { %1198 = vmatpush.msra.mxu2 %v6085_v52  ;;  %v9067_v21 = vld [vmem:[#allocation21_spill] sm:$0xff] }
 0x1c8   :  { %1265 = vmatpush.msra.mxu3 %v5962_v22  ;;  %1285 = vmatpush.msrb.mxu0 %v5964_v23  ;;  %v9068_v22 = vld [vmem:[#allocation22_spill] sm:$0xff] }
 0x1c9   :  { %1199 = vmatpush.msra.mxu2 %v6096_v55  ;;  %v9069_v23 = vld [vmem:[#allocation26_spill] sm:$0xff] }
 0x1ca   :  { %1266 = vmatpush.msra.mxu3 %v5970_v24  ;;  %1286 = vmatpush.msrb.mxu0 %v5972_v25  ;;  %v9070_v24 = vld [vmem:[#allocation23_spill] sm:$0xff]  ;;  %v9071_v25 = vld [vmem:[#allocation24_spill] sm:$0xff] }
 0x1cb   :  { %1200 = vmatpush.msra.mxu2 %v6102_v56 }
 0x1cc   :  { %1267 = vmatpush.msra.mxu3 %v5984_v27  ;;  %1287 = vmatpush.msrb.mxu0 %v5986_v28 }
 0x1cd   :  { %1201 = vmatpush.msra.mxu2 %v6109_v58 }
 0x1ce   :  { %1268 = vmatpush.msra.mxu3 %v5998_v30  ;;  %1288 = vmatpush.msrb.mxu0 %v6000_v31  ;;  %v9072_v30 = vld [vmem:[#allocation40_spill] sm:$0xff]  ;;  %v9073_v31 = vld [vmem:[#allocation33_spill] sm:$0xff] }
 0x1cf   :  { %1202 = vmatpush.msra.mxu2 %v6113_v59 }
 0x1d0   :  { %1269 = vmatpush.msra.mxu3 %v6007_v32  ;;  %1289 = vmatpush.msrb.mxu0 %v6009_v33  ;;  %v305_v32 = vadd.f32 %v9073_v31, %v9072_v30  ;;  %v9074_v33 = vld [vmem:[#allocation39_spill] sm:$0xff] }
 0x1d1   :  { %1203 = vmatpush.msra.mxu2 %v6121_v60 }
 0x1d2   :  { %1270 = vmatpush.msra.mxu3 %v6016_v34  ;;  %1290 = vmatpush.msrb.mxu0 %v6018_v35  ;;  %v9075_v34 = vld [vmem:[#allocation47_spill] sm:$0xff] }
 0x1d3   :  { %1204 = vmatpush.msra.mxu2 %v6127_v61  ;;  %v325_v35 = vadd.f32 %v9075_v34, %v9074_v33 }
 0x1d4   :  { %1271 = vmatpush.msra.mxu3 %v6026_v36  ;;  %1291 = vmatpush.msrb.mxu0 %v6028_v37  ;;  %v9076_v36 = vld [vmem:[#allocation41_spill] sm:$0xff] }
 0x1d5   :  { %1205 = vmatpush.msra.mxu2 %v6133_v62 }
 0x1d6   :  { %1272 = vmatpush.msra.mxu3 %v6034_v38  ;;  %1292 = vmatpush.msrb.mxu0 %v6036_v39  ;;  %v9077_v38 = vld [vmem:[#allocation42_spill] sm:$0xff] }
 0x1d7   :  { %1206 = vmatpush.msra.mxu2 %v6139_v63 }
 0x1d8   :  { %1273 = vmatpush.msra.mxu3 %v6042_v40  ;;  %1293 = vmatpush.msrb.mxu0 %v6044_v41 }
 0x1d9   :  { %1207 = vmatpush.msra.mxu2 %v6146_v10 }
 0x1da   :  { %1274 = vmatpush.msra.mxu3 %v6050_v42  ;;  %1294 = vmatpush.msrb.mxu0 %v6052_v43 }
 0x1db   :  { %1208 = vmatpush.msra.mxu2 %v6152_v6 }
 0x1dc   :  { %1275 = vmatpush.msra.mxu3 %v6058_v44  ;;  %1295 = vmatpush.msrb.mxu0 %v6063_v45 }
 0x1dd   :  { %1209 = vmatpush.msra.mxu2 %v6158_v9 }
 0x1de   :  { %1276 = vmatpush.msra.mxu3 %v9064_v18  ;;  %1296 = vmatpush.msrb.mxu0 %v9065_v19 }
 0x1df   :  { %1210 = vmatpush.msra.mxu2 %v9066_v20 }
 0x1e0   :  { %1277 = vmatpush.msra.mxu3 %v9067_v21  ;;  %1297 = vmatpush.msrb.mxu0 %v9068_v22 }
 0x1e1   :  { %1211 = vmatpush.msra.mxu2 %v9069_v23 }
 0x1e2   :  { %1278 = vmatpush.msra.mxu3 %v9070_v24  ;;  %1298 = vmatpush.msrb.mxu0 %v9071_v25 }
 0x240   :  { %v999_v1 = vpop.f32.mrf.mxu0 }
 0x241   :  { %v1000_v48 = vadd.f32 %v999_v1, %v6348_v54  ;;  %v6605_v1 = vld [vmem:[#allocation2 + $0x8] sm:$0xff] }
 0x245   :  { %v959_v27 = vpop.f32.mrf.mxu2  ;;  %v979_v28 = vpop.f32.mrf.mxu3 }
 0x246   :  { %v960_v37 = vadd.f32 %v959_v27, %v9076_v36  ;;  %v980_v39 = vadd.f32 %v979_v28, %v9077_v38 }
 0x248   :  { %v1002_v40 = vadd.f32 %v960_v37, %v305_v32  ;;  %v1022_v41 = vadd.f32 %v980_v39, %v325_v35  ;;  %v6494_v37 = vld [vmem:[#allocation2 + $0x178] sm:$0xff]  ;;  %v6497_v39 = vld [vmem:[#allocation2 + $0x168] sm:$0xff] }
 0x24a   :  { %v5034_v42 = vmul.f32 -1.442695, %v1002_v40  ;;  %v5035_v43 = vmul.f32 -1.442695, %v1022_v41  ;;  %v6500_v40 = vld [vmem:[#allocation2 + $0x170] sm:$0xff] }
 0x24b   :  { %v6504_v41 = vld [vmem:[#allocation2 + $0x150] sm:$0xff] }
 0x24c   :  { %5142 = vpow2.f32 %v5034_v42  ;;  %v6507_v42 = vld [vmem:[#allocation2 + $0x158] sm:$0xff] }
 0x24d   :  { %5144 = vpow2.f32 %v5035_v43  ;;  %v6511_v43 = vld [vmem:[#allocation2 + $0x138] sm:$0xff] }
 0x252   :  { %v5143_v44 = vpop.eup %5142 }
 0x253   :  { %v5145_v45 = vpop.eup %5144  ;;  %v1006_v46 = vadd.f32 1.0, %v5143_v44  ;;  %v6514_v44 = vld [vmem:[#allocation2 + $0x140] sm:$0xff] }
 0x254   :  { %v1026_v47 = vadd.f32 1.0, %v5145_v45  ;;  %v6521_v45 = vld [vmem:[#allocation2 + $0x128] sm:$0xff] }
 0x255   :  { %5146 = vrcp.f32 %v1006_v46  ;;  %v1018_v13 = vand.u32 2147483648, %v1006_v46  ;;  %v1016_v53 = vand.u32 2147483647, %v1006_v46  ;;  %vm1012_vm3 = vweird.f32 %v1006_v46 }
 0x256   :  { %5148 = vrcp.f32 %v1026_v47  ;;  %v1038_v19 = vand.u32 2147483648, %v1026_v47  ;;  %vm1032_vm7 = vweird.f32 %v1026_v47  ;;  %v1036_v21 = vand.u32 2147483647, %v1026_v47 }
 0x257   :  { %v1019_v16 = vor.u32 1.1754944e-38, %v1018_v13  ;;  %vm1017_vm5 = vcmp.eq.f32.partialorder %v1016_v53, 8.507059e+37  ;;  %v6577_v13 = vld [vmem:[#allocation2 + $0x68] sm:$0xff]  ;;  %v6598_v53 = vld [vmem:[#allocation2 + $0x20] sm:$0xff] }
 0x258   :  { %v1039_v25 = vor.u32 1.1754944e-38, %v1038_v19  ;;  %vm1037_vm9 = vcmp.eq.f32.partialorder %v1036_v21, 8.507059e+37 }
 0x25b   :  { %v5147_v57 = vpop.eup %5146 }
 0x25c   :  { %v5149_v2 = vpop.eup %5148  ;;  %v1008_v3 = vmul.f32 %v5147_v57, %v1006_v46  ;;  %vm1013_vm2 = vweird.f32 %v5147_v57  ;;  %v6528_v46 = vld [vmem:[#allocation2 + $0x110] sm:$0xff] }
 0x25d   :  { %v1028_v12 = vmul.f32 %v5149_v2, %v1026_v47  ;;  %vm1014_vm4 = vmor %vm1012_vm3, %vm1013_vm2  ;;  %vm1033_vm6 = vweird.f32 %v5149_v2  ;;  %v6535_v47 = vld [vmem:[#allocation2 + $0xf8] sm:$0xff] }
 0x25e   :  { %v1009_v11 = vsub.f32 1.0, %v1008_v3  ;;  %vm1034_vm8 = vmor %vm1032_vm7, %vm1033_vm6  ;;  %v6556_v3 = vld [vmem:[#allocation2 + $0xb0] sm:$0xff] }
 0x25f   :  { %v1029_v29 = vsub.f32 1.0, %v1028_v12  ;;  %v6563_v12 = vld [vmem:[#allocation2 + $0x98] sm:$0xff] }
 0x260   :  { %v1010_v5 = vmul.f32 %v5147_v57, %v1009_v11  ;;  %v6570_v11 = vld [vmem:[#allocation2 + $0x80] sm:$0xff] }
 0x261   :  { %v1030_v0 = vmul.f32 %v5149_v2, %v1029_v29  ;;  %v6584_v29 = vld [vmem:[#allocation2 + $0x50] sm:$0xff] }
 0x262   :  { %v1011_v17 = vadd.f32 %v5147_v57, %v1010_v5  ;;  %v6591_v5 = vld [vmem:[#allocation2 + $0x38] sm:$0xff] }
 0x263   :  { %v1031_v26 = vadd.f32 %v5149_v2, %v1030_v0 }
 0x264   :  { %v1015_v51 = vsel %vm1014_vm4, %v5147_v57, %v1011_v17  ;;  %v6542_v57 = vld [vmem:[#allocation2 + $0xe0] sm:$0xff] }
 0x265   :  { %v1020_v15 = vsel %vm1017_vm5, %v1019_v16, %v1015_v51  ;;  %v1035_v24 = vsel %vm1034_vm8, %v5149_v2, %v1031_v26  ;;  %v6549_v2 = vld [vmem:[#allocation2 + $0xc8] sm:$0xff]  ;;  %v9081_v26 = vld [vmem:[#allocation38_spill] sm:$0xff] }
 0x266   :  { %v1042_v18 = vmul.f32 %v1020_v15, %v1000_v48  ;;  %v1040_v27 = vsel %vm1037_vm9, %v1039_v25, %v1035_v24 }
 0x267   :  { %v1045_v28 = vsub.f32 1.0, %v1040_v27  ;;  %v1047_v34 = vmul.f32 %v1040_v27, %v6426_v7  ;;  %v9108_v7 = vld [vmem:[#allocation37_spill] sm:$0xff] }
 0x268   :  { %v1043_v22 = vadd.f32 %v1042_v18, %v345_v8  ;;  %v630_v14 = vadd.f32 %v9108_v7, %v9072_v30  ;;  %v9110_v7 = vld [vmem:[#allocation45_spill] sm:$0xff] }
 0x26a   :  { %5150 = vtanh.f32 %v1043_v22 }
 0x270   :  { %v5151_v31 = vpop.eup %5150 }
 0x271   :  { %v1046_v32 = vmul.f32 %v5151_v31, %v1045_v28 }
 0x273   :  { %v6489_v35 = vadd.f32 %v1047_v34, %v1046_v32 }
 0x275   :  { %9079 = vst [vmem:[#allocation28_spill] sm:$0xff] %v6489_v35  ;;  %1065 = vmatmul.f32.vlgmr.msrb.gmra.mxu1 %v6489_v35  ;;  %1085 = vmatmul.f32.vlgmr.msrb.gmra.mxu2 %v6489_v35 }
 0x276   :  { %1105 = vmatmul.f32.vlgmr.msrb.gmra.mxu3 %v6489_v35  ;;  %1303 = vmatpush.msrb.mxu1 %v6494_v37 }
 0x277   :  { %1370 = vmatpush.msrb.mxu2 %v6497_v39  ;;  %1390 = vmatpush.msrb.mxu3 %v6500_v40 }
 0x278   :  { %1304 = vmatpush.msrb.mxu1 %v6076_v49  ;;  %v6518_v49 = vld [vmem:[#allocation2 + $0x120] sm:$0xff] }
 0x279   :  { %1371 = vmatpush.msrb.mxu2 %v6504_v41  ;;  %1391 = vmatpush.msrb.mxu3 %v6507_v42 }
 0x27a   :  { %1305 = vmatpush.msrb.mxu1 %v6085_v52  ;;  %v6525_v52 = vld [vmem:[#allocation2 + $0x108] sm:$0xff] }
 0x27b   :  { %1372 = vmatpush.msrb.mxu2 %v6511_v43  ;;  %1392 = vmatpush.msrb.mxu3 %v6514_v44 }
 0x27c   :  { %1306 = vmatpush.msrb.mxu1 %v6096_v55  ;;  %v6532_v55 = vld [vmem:[#allocation2 + $0xf0] sm:$0xff] }
 0x27d   :  { %1373 = vmatpush.msrb.mxu2 %v6518_v49  ;;  %1393 = vmatpush.msrb.mxu3 %v6521_v45 }
 0x27e   :  { %1307 = vmatpush.msrb.mxu1 %v6102_v56  ;;  %v6539_v56 = vld [vmem:[#allocation2 + $0xd8] sm:$0xff] }
 0x27f   :  { %1374 = vmatpush.msrb.mxu2 %v6525_v52  ;;  %1394 = vmatpush.msrb.mxu3 %v6528_v46 }
 0x280   :  { %1308 = vmatpush.msrb.mxu1 %v6109_v58  ;;  %v6546_v58 = vld [vmem:[#allocation2 + $0xc0] sm:$0xff] }
 0x281   :  { %1375 = vmatpush.msrb.mxu2 %v6532_v55  ;;  %1395 = vmatpush.msrb.mxu3 %v6535_v47 }
 0x282   :  { %1309 = vmatpush.msrb.mxu1 %v6113_v59  ;;  %v6553_v59 = vld [vmem:[#allocation2 + $0xa8] sm:$0xff] }
 0x283   :  { %1376 = vmatpush.msrb.mxu2 %v6539_v56  ;;  %1396 = vmatpush.msrb.mxu3 %v6542_v57 }
 0x284   :  { %1310 = vmatpush.msrb.mxu1 %v6121_v60  ;;  %v6560_v60 = vld [vmem:[#allocation2 + $0x90] sm:$0xff] }
 0x285   :  { %1377 = vmatpush.msrb.mxu2 %v6546_v58  ;;  %1397 = vmatpush.msrb.mxu3 %v6549_v2 }
 0x286   :  { %1311 = vmatpush.msrb.mxu1 %v6127_v61  ;;  %v6567_v61 = vld [vmem:[#allocation2 + $0x78] sm:$0xff] }
 0x287   :  { %1378 = vmatpush.msrb.mxu2 %v6553_v59  ;;  %1398 = vmatpush.msrb.mxu3 %v6556_v3 }
 0x288   :  { %1312 = vmatpush.msrb.mxu1 %v6133_v62  ;;  %v6574_v62 = vld [vmem:[#allocation2 + $0x60] sm:$0xff] }
 0x289   :  { %1379 = vmatpush.msrb.mxu2 %v6560_v60  ;;  %1399 = vmatpush.msrb.mxu3 %v6563_v12 }
 0x28a   :  { %1313 = vmatpush.msrb.mxu1 %v6139_v63  ;;  %v6581_v63 = vld [vmem:[#allocation2 + $0x48] sm:$0xff] }
 0x28b   :  { %1380 = vmatpush.msrb.mxu2 %v6567_v61  ;;  %1400 = vmatpush.msrb.mxu3 %v6570_v11 }
 0x28c   :  { %1314 = vmatpush.msrb.mxu1 %v6146_v10  ;;  %v6588_v10 = vld [vmem:[#allocation2 + $0x30] sm:$0xff] }
 0x28d   :  { %1381 = vmatpush.msrb.mxu2 %v6574_v62  ;;  %1401 = vmatpush.msrb.mxu3 %v6577_v13 }
 0x28e   :  { %1315 = vmatpush.msrb.mxu1 %v6152_v6  ;;  %v6595_v6 = vld [vmem:[#allocation2 + $0x18] sm:$0xff] }
 0x28f   :  { %1382 = vmatpush.msrb.mxu2 %v6581_v63  ;;  %1402 = vmatpush.msrb.mxu3 %v6584_v29 }
 0x290   :  { %1316 = vmatpush.msrb.mxu1 %v6158_v9  ;;  %v6602_v9 = vld [vmem:[#allocation2] sm:$0xff] }
 0x291   :  { %1383 = vmatpush.msrb.mxu2 %v6588_v10  ;;  %1403 = vmatpush.msrb.mxu3 %v6591_v5 }
 0x292   :  { %1317 = vmatpush.msrb.mxu1 %v9066_v20  ;;  %v9080_v20 = vld [vmem:[#allocation30_spill] sm:$0xff] }
 0x293   :  { %1384 = vmatpush.msrb.mxu2 %v6595_v6  ;;  %1404 = vmatpush.msrb.mxu3 %v6598_v53  ;;  %v370_v17 = vadd.f32 %v9080_v20, %v9072_v30 }
 0x294   :  { %1318 = vmatpush.msrb.mxu1 %v9069_v23  ;;  %v390_v23 = vadd.f32 %v9081_v26, %v9074_v33 }
 0x295   :  { %1385 = vmatpush.msrb.mxu2 %v6602_v9  ;;  %1405 = vmatpush.msrb.mxu3 %v6605_v1 }
 0x2f2   :  { %v1066_v0 = vpop.f32.mrf.mxu1 }
 0x2f3   :  { %v1067_v16 = vadd.f32 %v1066_v0, %v9076_v36 }
 0x2f5   :  { %v1109_v48 = vadd.f32 %v1067_v16, %v370_v17 }
 0x2f7   :  { %v5036_v51 = vmul.f32 -1.442695, %v1109_v48 }
 0x2f8   :  { %v1086_v15 = vpop.f32.mrf.mxu2 }
 0x2f9   :  { %5152 = vpow2.f32 %v5036_v51  ;;  %v1087_v4 = vadd.f32 %v1086_v15, %v9077_v38  ;;  %v1106_v20 = vpop.f32.mrf.mxu3 }
 0x2fa   :  { %v1107_v15 = vadd.f32 %v1106_v20, %v6348_v54 }
 0x2fb   :  { %v1129_v8 = vadd.f32 %v1087_v4, %v390_v23  ;;  %v9082_v23 = vld [vmem:[#allocation48_spill] sm:$0xff] }
 0x2fc   :  { %v410_v4 = vadd.f32 %v9082_v23, %v6350_v50 }
 0x2fd   :  { %v5037_v18 = vmul.f32 -1.442695, %v1129_v8 }
 0x2ff   :  { %v5153_v19 = vpop.eup %5152  ;;  %5154 = vpow2.f32 %v5037_v18 }
 0x300   :  { %v1113_v21 = vadd.f32 1.0, %v5153_v19 }
 0x302   :  { %5156 = vrcp.f32 %v1113_v21  ;;  %v1125_v31 = vand.u32 2147483648, %v1113_v21  ;;  %v1123_v34 = vand.u32 2147483647, %v1113_v21  ;;  %vm1119_vm11 = vweird.f32 %v1113_v21 }
 0x304   :  { %v1126_v48 = vor.u32 1.1754944e-38, %v1125_v31  ;;  %vm1124_vm13 = vcmp.eq.f32.partialorder %v1123_v34, 8.507059e+37 }
 0x305   :  { %v5155_v22 = vpop.eup %5154 }
 0x306   :  { %v1133_v24 = vadd.f32 1.0, %v5155_v22 }
 0x308   :  { %v5157_v25 = vpop.eup %5156  ;;  %5158 = vrcp.f32 %v1133_v24  ;;  %v1145_v19 = vand.u32 2147483648, %v1133_v24  ;;  %vm1139_vm15 = vweird.f32 %v1133_v24 }
 0x309   :  { %v1115_v27 = vmul.f32 %v5157_v25, %v1113_v21  ;;  %vm1120_vm10 = vweird.f32 %v5157_v25 }
 0x30a   :  { %vm1121_vm12 = vmor %vm1119_vm11, %vm1120_vm10  ;;  %v1146_v21 = vor.u32 1.1754944e-38, %v1145_v19 }
 0x30b   :  { %v1116_v28 = vsub.f32 1.0, %v1115_v27  ;;  %v1143_v27 = vand.u32 2147483647, %v1133_v24 }
 0x30d   :  { %v1117_v32 = vmul.f32 %v5157_v25, %v1116_v28  ;;  %vm1144_vm2 = vcmp.eq.f32.partialorder %v1143_v27, 8.507059e+37 }
 0x30e   :  { %v5159_v0 = vpop.eup %5158 }
 0x30f   :  { %v1135_v17 = vmul.f32 %v5159_v0, %v1133_v24  ;;  %v1118_v16 = vadd.f32 %v5157_v25, %v1117_v32  ;;  %vm1140_vm14 = vweird.f32 %v5159_v0  ;;  %v6626_v24 = vld [vmem:[#allocation2 + $0x160] sm:$0xff] }
 0x310   :  { %vm1141_vm1 = vmor %vm1139_vm15, %vm1140_vm14 }
 0x311   :  { %v1136_v51 = vsub.f32 1.0, %v1135_v17  ;;  %v1122_v26 = vsel %vm1121_vm12, %v5157_v25, %v1118_v16 }
 0x312   :  { %v1127_v8 = vsel %vm1124_vm13, %v1126_v48, %v1122_v26 }
 0x313   :  { %v1137_v18 = vmul.f32 %v5159_v0, %v1136_v51  ;;  %v1149_v22 = vmul.f32 %v1127_v8, %v1107_v15  ;;  %v6636_v51 = vld [vmem:[#allocation2 + $0x130] sm:$0xff] }
 0x315   :  { %v1138_v28 = vadd.f32 %v5159_v0, %v1137_v18  ;;  %v1150_v32 = vadd.f32 %v1149_v22, %v410_v4 }
 0x317   :  { %v1142_v31 = vsel %vm1141_vm1, %v5159_v0, %v1138_v28  ;;  %5160 = vtanh.f32 %v1150_v32  ;;  %v6631_v0 = vld [vmem:[#allocation2 + $0x148] sm:$0xff] }
 0x318   :  { %v1147_v20 = vsel %vm1144_vm2, %v1146_v21, %v1142_v31 }
 0x319   :  { %v1152_v25 = vsub.f32 1.0, %v1147_v20  ;;  %v1154_v16 = vmul.f32 %v1147_v20, %v6489_v35  ;;  %v9086_v20 = vld [vmem:[#allocation43_spill] sm:$0xff] }
 0x31d   :  { %v5161_v34 = vpop.eup %5160 }
 0x31e   :  { %v1153_v17 = vmul.f32 %v5161_v34, %v1152_v25  ;;  %v475_v25 = vadd.f32 %v9086_v20, %v6350_v50 }
 0x320   :  { %v6618_v48 = vadd.f32 %v1154_v16, %v1153_v17 }
 0x322   :  { %9083 = vst [vmem:[#allocation19_spill] sm:$0xff] %v6618_v48  ;;  %1172 = vmatmul.f32.vlgmr.msra.gmra.mxu0 %v6618_v48  ;;  %1192 = vmatmul.f32.vlgmr.msra.gmra.mxu1 %v6618_v48 }
 0x323   :  { %1212 = vmatmul.f32.vlgmr.msra.gmra.mxu2 %v6618_v48  ;;  %1410 = vmatpush.msra.mxu0 %v6494_v37 }
 0x324   :  { %1477 = vmatpush.msra.mxu1 %v6497_v39  ;;  %1497 = vmatpush.msra.mxu2 %v6500_v40  ;;  %v6641_v39 = vld [vmem:[#allocation2 + $0x118] sm:$0xff]  ;;  %v6646_v40 = vld [vmem:[#allocation2 + $0x100] sm:$0xff] }
 0x325   :  { %1411 = vmatpush.msra.mxu0 %v6626_v24 }
 0x326   :  { %1478 = vmatpush.msra.mxu1 %v6504_v41  ;;  %1498 = vmatpush.msra.mxu2 %v6507_v42  ;;  %v6651_v41 = vld [vmem:[#allocation2 + $0xe8] sm:$0xff]  ;;  %v6656_v42 = vld [vmem:[#allocation2 + $0xd0] sm:$0xff] }
 0x327   :  { %1412 = vmatpush.msra.mxu0 %v6631_v0 }
 0x328   :  { %1479 = vmatpush.msra.mxu1 %v6511_v43  ;;  %1499 = vmatpush.msra.mxu2 %v6514_v44  ;;  %v6661_v43 = vld [vmem:[#allocation2 + $0xb8] sm:$0xff]  ;;  %v6666_v44 = vld [vmem:[#allocation2 + $0xa0] sm:$0xff] }
 0x329   :  { %1413 = vmatpush.msra.mxu0 %v6636_v51 }
 0x32a   :  { %1480 = vmatpush.msra.mxu1 %v6518_v49  ;;  %1500 = vmatpush.msra.mxu2 %v6521_v45  ;;  %v6671_v49 = vld [vmem:[#allocation2 + $0x88] sm:$0xff]  ;;  %v6676_v45 = vld [vmem:[#allocation2 + $0x70] sm:$0xff] }
 0x32b   :  { %1414 = vmatpush.msra.mxu0 %v6641_v39 }
 0x32c   :  { %1481 = vmatpush.msra.mxu1 %v6525_v52  ;;  %1501 = vmatpush.msra.mxu2 %v6528_v46  ;;  %v6681_v52 = vld [vmem:[#allocation2 + $0x58] sm:$0xff]  ;;  %v6686_v46 = vld [vmem:[#allocation2 + $0x40] sm:$0xff] }
 0x32d   :  { %1415 = vmatpush.msra.mxu0 %v6646_v40 }
 0x32e   :  { %1482 = vmatpush.msra.mxu1 %v6532_v55  ;;  %1502 = vmatpush.msra.mxu2 %v6535_v47  ;;  %v6691_v55 = vld [vmem:[#allocation2 + $0x28] sm:$0xff]  ;;  %v6696_v47 = vld [vmem:[#allocation2 + $0x10] sm:$0xff] }
 0x32f   :  { %1416 = vmatpush.msra.mxu0 %v6651_v41 }
 0x330   :  { %1483 = vmatpush.msra.mxu1 %v6539_v56  ;;  %1503 = vmatpush.msra.mxu2 %v6542_v57 }
 0x331   :  { %1417 = vmatpush.msra.mxu0 %v6656_v42 }
 0x332   :  { %1484 = vmatpush.msra.mxu1 %v6546_v58  ;;  %1504 = vmatpush.msra.mxu2 %v6549_v2  ;;  %v9084_v58 = vld [vmem:[#allocation31_spill] sm:$0xff] }
 0x333   :  { %1418 = vmatpush.msra.mxu0 %v6661_v43  ;;  %v435_v2 = vadd.f32 %v9084_v58, %v9072_v30 }
 0x334   :  { %1485 = vmatpush.msra.mxu1 %v6553_v59  ;;  %1505 = vmatpush.msra.mxu2 %v6556_v3  ;;  %v9085_v59 = vld [vmem:[#allocation32_spill] sm:$0xff] }
 0x335   :  { %1419 = vmatpush.msra.mxu0 %v6666_v44  ;;  %v455_v3 = vadd.f32 %v9085_v59, %v9074_v33 }
 0x336   :  { %1486 = vmatpush.msra.mxu1 %v6560_v60  ;;  %1506 = vmatpush.msra.mxu2 %v6563_v12 }
 0x337   :  { %1420 = vmatpush.msra.mxu0 %v6671_v49 }
 0x338   :  { %1487 = vmatpush.msra.mxu1 %v6567_v61  ;;  %1507 = vmatpush.msra.mxu2 %v6570_v11 }
 0x339   :  { %1421 = vmatpush.msra.mxu0 %v6676_v45 }
 0x33a   :  { %1488 = vmatpush.msra.mxu1 %v6574_v62  ;;  %1508 = vmatpush.msra.mxu2 %v6577_v13 }
 0x33b   :  { %1422 = vmatpush.msra.mxu0 %v6681_v52 }
 0x33c   :  { %1489 = vmatpush.msra.mxu1 %v6581_v63  ;;  %1509 = vmatpush.msra.mxu2 %v6584_v29 }
 0x33d   :  { %1423 = vmatpush.msra.mxu0 %v6686_v46 }
 0x33e   :  { %1490 = vmatpush.msra.mxu1 %v6588_v10  ;;  %1510 = vmatpush.msra.mxu2 %v6591_v5 }
 0x33f   :  { %1424 = vmatpush.msra.mxu0 %v6691_v55 }
 0x340   :  { %1491 = vmatpush.msra.mxu1 %v6595_v6  ;;  %1511 = vmatpush.msra.mxu2 %v6598_v53 }
 0x341   :  { %1425 = vmatpush.msra.mxu0 %v6696_v47 }
 0x342   :  { %1492 = vmatpush.msra.mxu1 %v6602_v9  ;;  %1512 = vmatpush.msra.mxu2 %v6605_v1 }
 0x39f   :  { %v1173_v56 = vpop.f32.mrf.mxu0  ;;  %v1193_v57 = vpop.f32.mrf.mxu1 }
 0x3a0   :  { %v1174_v60 = vadd.f32 %v1173_v56, %v9076_v36  ;;  %v1194_v12 = vadd.f32 %v1193_v57, %v9077_v38 }
 0x3a2   :  { %v1216_v61 = vadd.f32 %v1174_v60, %v435_v2  ;;  %v1236_v11 = vadd.f32 %v1194_v12, %v455_v3 }
 0x3a4   :  { %v5038_v62 = vmul.f32 -1.442695, %v1216_v61  ;;  %v5039_v13 = vmul.f32 -1.442695, %v1236_v11 }
 0x3a6   :  { %5162 = vpow2.f32 %v5038_v62  ;;  %v1213_v19 = vpop.f32.mrf.mxu2 }
 0x3a7   :  { %5164 = vpow2.f32 %v5039_v13  ;;  %v1214_v28 = vadd.f32 %v1213_v19, %v6348_v54  ;;  %v9090_v19 = vld [vmem:[#allocation35_spill] sm:$0xff] }
 0x3ac   :  { %v5163_v63 = vpop.eup %5162 }
 0x3ad   :  { %v5165_v29 = vpop.eup %5164  ;;  %v1220_v10 = vadd.f32 1.0, %v5163_v63 }
 0x3ae   :  { %v1240_v5 = vadd.f32 1.0, %v5165_v29 }
 0x3af   :  { %5166 = vrcp.f32 %v1220_v10  ;;  %v1232_v23 = vand.u32 2147483648, %v1220_v10  ;;  %v1230_v8 = vand.u32 2147483647, %v1220_v10  ;;  %vm1226_vm4 = vweird.f32 %v1220_v10 }
 0x3b0   :  { %5168 = vrcp.f32 %v1240_v5  ;;  %v1252_v34 = vand.u32 2147483648, %v1240_v5  ;;  %vm1246_vm8 = vweird.f32 %v1240_v5  ;;  %v1250_v16 = vand.u32 2147483647, %v1240_v5 }
 0x3b1   :  { %v1233_v27 = vor.u32 1.1754944e-38, %v1232_v23  ;;  %vm1231_vm6 = vcmp.eq.f32.partialorder %v1230_v8, 8.507059e+37 }
 0x3b2   :  { %v1253_v58 = vor.u32 1.1754944e-38, %v1252_v34  ;;  %vm1251_vm10 = vcmp.eq.f32.partialorder %v1250_v16, 8.507059e+37 }
 0x3b5   :  { %v5167_v6 = vpop.eup %5166 }
 0x3b6   :  { %v5169_v53 = vpop.eup %5168  ;;  %v1222_v9 = vmul.f32 %v5167_v6, %v1220_v10  ;;  %vm1227_vm3 = vweird.f32 %v5167_v6 }
 0x3b7   :  { %v1242_v1 = vmul.f32 %v5169_v53, %v1240_v5  ;;  %vm1228_vm5 = vmor %vm1226_vm4, %vm1227_vm3  ;;  %vm1247_vm7 = vweird.f32 %v5169_v53 }
 0x3b8   :  { %v1223_v15 = vsub.f32 1.0, %v1222_v9  ;;  %vm1248_vm9 = vmor %vm1246_vm8, %vm1247_vm7 }
 0x3b9   :  { %v1243_v26 = vsub.f32 1.0, %v1242_v1 }
 0x3ba   :  { %v1224_v4 = vmul.f32 %v5167_v6, %v1223_v15 }
 0x3bb   :  { %v1244_v18 = vmul.f32 %v5169_v53, %v1243_v26 }
 0x3bc   :  { %v1225_v22 = vadd.f32 %v5167_v6, %v1224_v4 }
 0x3bd   :  { %v1245_v31 = vadd.f32 %v5169_v53, %v1244_v18 }
 0x3be   :  { %v1229_v32 = vsel %vm1228_vm5, %v5167_v6, %v1225_v22  ;;  %v540_v22 = vadd.f32 %v9090_v19, %v6350_v50 }
 0x3bf   :  { %v1234_v21 = vsel %vm1231_vm6, %v1233_v27, %v1229_v32  ;;  %v1249_v57 = vsel %vm1248_vm9, %v5169_v53, %v1245_v31 }
 0x3c0   :  { %v1256_v17 = vmul.f32 %v1234_v21, %v1214_v28  ;;  %v1254_v2 = vsel %vm1251_vm10, %v1253_v58, %v1249_v57  ;;  %v6750_v58 = vld [vmem:[%s8886_s5 + $0x48] sm:$0xff] }
 0x3c1   :  { %v1259_v59 = vsub.f32 1.0, %v1254_v2  ;;  %v1261_v12 = vmul.f32 %v1254_v2, %v6618_v48  ;;  %v6757_v2 = vld [vmem:[%s8886_s5 + $0x30] sm:$0xff] }
 0x3c2   :  { %v1257_v56 = vadd.f32 %v1256_v17, %v475_v25 }
 0x3c4   :  { %5170 = vtanh.f32 %v1257_v56 }
 0x3ca   :  { %v5171_v3 = vpop.eup %5170 }
 0x3cb   :  { %v1260_v60 = vmul.f32 %v5171_v3, %v1259_v59  ;;  %v6764_v59 = vld [vmem:[%s8886_s5 + $0x18] sm:$0xff]  ;;  %v6771_v3 = vld [vmem:[%s8886_s5] sm:$0xff] }
 0x3cd   :  { %v6711_v61 = vadd.f32 %v1261_v12, %v1260_v60  ;;  %v6777_v60 = vld [vmem:[%s8886_s5 + $0x50] sm:$0xff] }
 0x3cf   :  { %9087 = vst [vmem:[#allocation20_spill] sm:$0xff] %v6711_v61  ;;  %1279 = vmatmul.f32.vlgmr.msra.gmra.mxu3 %v6711_v61  ;;  %1299 = vmatmul.f32.vlgmr.msrb.gmra.mxu0 %v6711_v61 }
 0x3d0   :  { %1319 = vmatmul.f32.vlgmr.msrb.gmra.mxu1 %v6711_v61  ;;  %1517 = vmatpush.msra.mxu3 %v6494_v37 }
 0x3d1   :  { %1616 = vmatpush.msrb.mxu0 %v6750_v58  ;;  %1636 = vmatpush.msrb.mxu1 %v6777_v60 }
 0x3d2   :  { %1518 = vmatpush.msra.mxu3 %v6626_v24  ;;  %v9088_v24 = vld [vmem:[#allocation34_spill] sm:$0xff] }
 0x3d3   :  { %1617 = vmatpush.msrb.mxu0 %v6757_v2 }
 0x3d4   :  { %1519 = vmatpush.msra.mxu3 %v6631_v0  ;;  %v520_v0 = vadd.f32 %v9088_v24, %v9074_v33  ;;  %v9092_v24 = vld [vmem:[#allocation44_spill] sm:$0xff] }
 0x3d5   :  { %1618 = vmatpush.msrb.mxu0 %v6764_v59 }
 0x3d6   :  { %1520 = vmatpush.msra.mxu3 %v6636_v51 }
 0x3d7   :  { %1619 = vmatpush.msrb.mxu0 %v6771_v3 }
 0x3d8   :  { %1521 = vmatpush.msra.mxu3 %v6641_v39 }
 0x3da   :  { %1522 = vmatpush.msra.mxu3 %v6646_v40 }
 0x3dc   :  { %1523 = vmatpush.msra.mxu3 %v6651_v41 }
 0x3de   :  { %1524 = vmatpush.msra.mxu3 %v6656_v42  ;;  %v9089_v42 = vld [vmem:[#allocation49_spill] sm:$0xff] }
 0x3e0   :  { %1525 = vmatpush.msra.mxu3 %v6661_v43  ;;  %v500_v43 = vadd.f32 %v9089_v42, %v9072_v30  ;;  %v6791_v42 = vld [vmem:[%s8886_s5 + $0x38] sm:$0xff] }
 0x3e1   :  { %1637 = vmatpush.msrb.mxu1 %v6791_v42 }
 0x3e2   :  { %1526 = vmatpush.msra.mxu3 %v6666_v44 }
 0x3e4   :  { %1527 = vmatpush.msra.mxu3 %v6671_v49 }
 0x3e6   :  { %1528 = vmatpush.msra.mxu3 %v6676_v45 }
 0x3e8   :  { %1529 = vmatpush.msra.mxu3 %v6681_v52 }
 0x3ea   :  { %1530 = vmatpush.msra.mxu3 %v6686_v46 }
 0x3ec   :  { %1531 = vmatpush.msra.mxu3 %v6691_v55 }
 0x3ee   :  { %1532 = vmatpush.msra.mxu3 %v6696_v47 }
 0x44c   :  { %v1300_v37 = vpop.f32.mrf.mxu0 }
 0x44d   :  { %v1301_v51 = vadd.f32 %v1300_v37, %v9077_v38  ;;  %v1320_v1 = vpop.f32.mrf.mxu1 }
 0x44e   :  { %v1321_v23 = vadd.f32 %v1320_v1, %v6348_v54 }
 0x44f   :  { %v1343_v39 = vadd.f32 %v1301_v51, %v520_v0  ;;  %v565_v0 = vadd.f32 %v9092_v24, %v9072_v30  ;;  %v9093_v51 = vld [vmem:[#allocation50_spill] sm:$0xff]  ;;  %v6879_v24 = vld [vmem:[#allocation5 + $0x168] sm:$0xff]  ;;  %v650_v30 = vadd.f32 %v9110_v7, %v9074_v33 }
 0x451   :  { %v5041_v40 = vmul.f32 -1.442695, %v1343_v39  ;;  %v585_v39 = vadd.f32 %v9093_v51, %v9074_v33 }
 0x452   :  { %v1280_v41 = vpop.f32.mrf.mxu3 }
 0x453   :  { %5172 = vpow2.f32 %v5041_v40  ;;  %v1281_v44 = vadd.f32 %v1280_v41, %v9076_v36 }
 0x455   :  { %v1323_v49 = vadd.f32 %v1281_v44, %v500_v43  ;;  %v6796_v43 = vld [vmem:[%s9015_s13] sm:$0x3] }
 0x456   :  { %v6803_v44 = vld [vmem:[%s8886_s5 + $0x20] sm:$0xff] }
 0x457   :  { %v5040_v45 = vmul.f32 -1.442695, %v1323_v49  ;;  %v6809_v49 = vld [vmem:[%s8886_s5 + $0x58] sm:$0xff]  ;;  %1638 = vmatpush.msrb.mxu1 %v6803_v44 }
 0x459   :  { %v5173_v52 = vpop.eup %5172  ;;  %5174 = vpow2.f32 %v5040_v45 }
 0x45a   :  { %v1347_v46 = vadd.f32 1.0, %v5173_v52 }
 0x45c   :  { %5176 = vrcp.f32 %v1347_v46  ;;  %v1359_v27 = vand.u32 2147483648, %v1347_v46  ;;  %vm1353_vm1 = vweird.f32 %v1347_v46  ;;  %v1357_v32 = vand.u32 2147483647, %v1347_v46 }
 0x45e   :  { %v1360_v20 = vor.u32 1.1754944e-38, %v1359_v27  ;;  %vm1358_vm3 = vcmp.eq.f32.partialorder %v1357_v32, 8.507059e+37 }
 0x45f   :  { %v5175_v55 = vpop.eup %5174 }
 0x460   :  { %v1327_v47 = vadd.f32 1.0, %v5175_v55  ;;  %v6822_v55 = vld [vmem:[%s8886_s5 + $0x40] sm:$0xff] }
 0x462   :  { %5178 = vrcp.f32 %v1327_v47  ;;  %v5177_v11 = vpop.eup %5176  ;;  %v1339_v5 = vand.u32 2147483648, %v1327_v47  ;;  %v1337_v53 = vand.u32 2147483647, %v1327_v47  ;;  %vm1333_vm12 = vweird.f32 %v1327_v47 }
 0x463   :  { %v1349_v62 = vmul.f32 %v5177_v11, %v1347_v46  ;;  %vm1354_vm15 = vweird.f32 %v5177_v11  ;;  %v6815_v46 = vld [vmem:[%s8886_s5 + $0x8] sm:$0xff] }
 0x464   :  { %v1340_v26 = vor.u32 1.1754944e-38, %v1339_v5  ;;  %vm1338_vm14 = vcmp.eq.f32.partialorder %v1337_v53, 8.507059e+37  ;;  %vm1355_vm2 = vmor %vm1353_vm1, %vm1354_vm15  ;;  %1639 = vmatpush.msrb.mxu1 %v6815_v46  ;;  %v6857_v53 = vld [vmem:[%s9015_s13 + $0x4] sm:$0x3] }
 0x465   :  { %v1350_v29 = vsub.f32 1.0, %v1349_v62  ;;  %v6830_v62 = vld [vmem:[%s8886_s5 + $0x28] sm:$0xff] }
 0x467   :  { %v1351_v9 = vmul.f32 %v5177_v11, %v1350_v29 }
 0x468   :  { %v5179_v13 = vpop.eup %5178 }
 0x469   :  { %v1329_v63 = vmul.f32 %v5179_v13, %v1327_v47  ;;  %vm1334_vm11 = vweird.f32 %v5179_v13  ;;  %v1352_v18 = vadd.f32 %v5177_v11, %v1351_v9 }
 0x46a   :  { %vm1335_vm13 = vmor %vm1333_vm12, %vm1334_vm11 }
 0x46b   :  { %v1330_v10 = vsub.f32 1.0, %v1329_v63  ;;  %v1356_v31 = vsel %vm1355_vm2, %v5177_v11, %v1352_v18  ;;  %v6845_v63 = vld [vmem:[%s9015_s13 + $0x2] sm:$0x3] }
 0x46c   :  { %v1361_v25 = vsel %vm1358_vm3, %v1360_v20, %v1356_v31 }
 0x46d   :  { %v1331_v6 = vmul.f32 %v5179_v13, %v1330_v10  ;;  %v1366_v34 = vsub.f32 1.0, %v1361_v25  ;;  %v1368_v56 = vmul.f32 %v1361_v25, %v6711_v61 }
 0x46f   :  { %v1332_v15 = vadd.f32 %v5179_v13, %v1331_v6 }
 0x471   :  { %v1336_v4 = vsel %vm1335_vm13, %v5179_v13, %v1332_v15  ;;  %v6838_v13 = vld [vmem:[%s8886_s5 + $0x10] sm:$0xff] }
 0x472   :  { %v1341_v8 = vsel %vm1338_vm14, %v1340_v26, %v1336_v4 }
 0x473   :  { %v1363_v28 = vmul.f32 %v1341_v8, %v1321_v23 }
 0x475   :  { %v1364_v21 = vadd.f32 %v1363_v28, %v540_v22  ;;  %v6868_v22 = vld [vmem:[%s9015_s13 + $0x8] sm:$0x3] }
 0x477   :  { %5180 = vtanh.f32 %v1364_v21 }
 0x47d   :  { %v5181_v17 = vpop.eup %5180 }
 0x47e   :  { %v1367_v16 = vmul.f32 %v5181_v17, %v1366_v34  ;;  %v9094_v17 = vld [vmem:[#allocation36_spill] sm:$0xff] }
 0x480   :  { %v6742_v57 = vadd.f32 %v1368_v56, %v1367_v16  ;;  %v605_v16 = vadd.f32 %v9094_v17, %v6350_v50  ;;  %v7073_v17 = vld [vmem:[#allocation5 + $0x100] sm:$0xff] }
 0x482   :  { %9091 = vst [vmem:[#allocation25_spill] sm:$0xff] %v6742_v57  ;;  %1386 = vmatmul.f32.vlgmr.msrb.gmra.mxu2 %v6742_v57  ;;  %1406 = vmatmul.f32.vlgmr.msrb.gmra.mxu3 %v6742_v57 }
 0x483   :  { %1426 = vmatmul.f32.vlgmr.msra.gmra.mxu0 %v6742_v57  ;;  %1676 = vmatpush.msrb.mxu3 %v6750_v58 }
 0x484   :  { %1696 = vmatpush.msra.mxu0 %v6777_v60  ;;  %1656 = vmatpush.msrb.mxu2 %v6809_v49 }
 0x485   :  { %1677 = vmatpush.msrb.mxu3 %v6757_v2 }
 0x486   :  { %1697 = vmatpush.msra.mxu0 %v6791_v42  ;;  %1657 = vmatpush.msrb.mxu2 %v6822_v55 }
 0x487   :  { %1678 = vmatpush.msrb.mxu3 %v6764_v59 }
 0x488   :  { %1698 = vmatpush.msra.mxu0 %v6803_v44  ;;  %1658 = vmatpush.msrb.mxu2 %v6830_v62 }
 0x489   :  { %1679 = vmatpush.msrb.mxu3 %v6771_v3 }
 0x48a   :  { %1699 = vmatpush.msra.mxu0 %v6815_v46  ;;  %1659 = vmatpush.msrb.mxu2 %v6838_v13 }
 0x48b   :  { %5046 = vmatmul.msk.f32.vlgmr.msrb.gmra.mxu0 %vm153_vm0, %v6796_v43 }
 0x48c   :  { %1776 = vmatpush.msrb.mxu0 %v6809_v49 }
 0x48e   :  { %1777 = vmatpush.msrb.mxu0 %v6822_v55 }
 0x490   :  { %1778 = vmatpush.msrb.mxu0 %v6830_v62 }
 0x492   :  { %1779 = vmatpush.msrb.mxu0 %v6838_v13 }
 0x493   :  { %5050 = vmatmul.msk.f32.vlgmr.msra.gmra.mxu0 %vm153_vm0, %v6845_v63 }
 0x494   :  { %1856 = vmatpush.msra.mxu0 %v6750_v58 }
 0x496   :  { %1857 = vmatpush.msra.mxu0 %v6757_v2 }
 0x498   :  { %1858 = vmatpush.msra.mxu0 %v6764_v59 }
 0x49a   :  { %1859 = vmatpush.msra.mxu0 %v6771_v3 }
 0x49b   :  { %5054 = vmatmul.msk.f32.vlgmr.msrb.gmra.mxu0 %vm153_vm0, %v6857_v53 }
 0x49c   :  { %1936 = vmatpush.msrb.mxu0 %v6777_v60 }
 0x49e   :  { %1937 = vmatpush.msrb.mxu0 %v6791_v42 }
 0x4a0   :  { %1938 = vmatpush.msrb.mxu0 %v6803_v44 }
 0x4a2   :  { %1939 = vmatpush.msrb.mxu0 %v6815_v46 }
 0x4a3   :  { %5058 = vmatmul.msk.f32.vlgmr.msra.gmra.mxu0 %vm153_vm0, %v6868_v22 }
 0x4a4   :  { %2016 = vmatpush.msra.mxu0 %v6809_v49 }
 0x4a6   :  { %2017 = vmatpush.msra.mxu0 %v6822_v55 }
 0x4a8   :  { %2018 = vmatpush.msra.mxu0 %v6830_v62 }
 0x4aa   :  { %2019 = vmatpush.msra.mxu0 %v6838_v13 }
 0x500   :  { %v1427_v27 = vpop.f32.mrf.mxu0 }
 0x501   :  { %v1428_v31 = vadd.f32 %v1427_v27, %v6348_v54  ;;  %v6970_v27 = vld [vmem:[#allocation5 + $0x30] sm:$0xff] }
 0x502   :  { %9096 = vst [vmem:[#allocation22_spill] sm:$0xff] %v6970_v27 }
 0x505   :  { %v1387_v12 = vpop.f32.mrf.mxu2  ;;  %v1407_v37 = vpop.f32.mrf.mxu3 }
 0x506   :  { %v1388_v40 = vadd.f32 %v1387_v12, %v9076_v36  ;;  %v1408_v41 = vadd.f32 %v1407_v37, %v9077_v38 }
 0x508   :  { %v1430_v45 = vadd.f32 %v1388_v40, %v565_v0  ;;  %v1450_v52 = vadd.f32 %v1408_v41, %v585_v39  ;;  %v6885_v39 = vld [vmem:[%s9015_s13 + $0xa] sm:$0x3]  ;;  %v6889_v40 = vld [vmem:[#allocation5 + $0x150] sm:$0xff] }
 0x509   :  { %5062 = vmatmul.msk.f32.vlgmr.msrb.gmra.mxu0 %vm153_vm0, %v6885_v39 }
 0x50a   :  { %v5042_v47 = vmul.f32 -1.442695, %v1430_v45  ;;  %v5043_v11 = vmul.f32 -1.442695, %v1450_v52  ;;  %2140 = vmatpush.msrb.mxu0 %v6879_v24  ;;  %v6892_v45 = vld [vmem:[#allocation5 + $0x138] sm:$0xff] }
 0x50c   :  { %5182 = vpow2.f32 %v5042_v47  ;;  %2141 = vmatpush.msrb.mxu0 %v6889_v40  ;;  %v6895_v47 = vld [vmem:[#allocation5 + $0x120] sm:$0xff] }
 0x50d   :  { %5184 = vpow2.f32 %v5043_v11 }
 0x50e   :  { %2142 = vmatpush.msrb.mxu0 %v6892_v45 }
 0x510   :  { %2143 = vmatpush.msrb.mxu0 %v6895_v47 }
 0x512   :  { %v5183_v29 = vpop.eup %5182 }
 0x513   :  { %v5185_v10 = vpop.eup %5184  ;;  %v1434_v5 = vadd.f32 1.0, %v5183_v29  ;;  %v6898_v29 = vld [vmem:[#allocation5 + $0x108] sm:$0xff] }
 0x514   :  { %v1454_v6 = vadd.f32 1.0, %v5185_v10  ;;  %2144 = vmatpush.msrb.mxu0 %v6898_v29 }
 0x515   :  { %5186 = vrcp.f32 %v1434_v5  ;;  %v1446_v4 = vand.u32 2147483648, %v1434_v5  ;;  %v1444_v19 = vand.u32 2147483647, %v1434_v5  ;;  %vm1440_vm5 = vweird.f32 %v1434_v5 }
 0x516   :  { %5188 = vrcp.f32 %v1454_v6  ;;  %v1466_v12 = vand.u32 2147483648, %v1454_v6  ;;  %vm1460_vm9 = vweird.f32 %v1454_v6  ;;  %v1464_v37 = vand.u32 2147483647, %v1454_v6 }
 0x517   :  { %v1447_v21 = vor.u32 1.1754944e-38, %v1446_v4  ;;  %vm1445_vm7 = vcmp.eq.f32.partialorder %v1444_v19, 8.507059e+37  ;;  %v6926_v4 = vld [vmem:[#allocation5 + $0xa8] sm:$0xff] }
 0x518   :  { %v1467_v41 = vor.u32 1.1754944e-38, %v1466_v12  ;;  %vm1465_vm11 = vcmp.eq.f32.partialorder %v1464_v37, 8.507059e+37  ;;  %v6962_v19 = vld [vmem:[#allocation5 + $0x48] sm:$0xff]  ;;  %v7090_v12 = vld [vmem:[#allocation5 + $0xd0] sm:$0xff]  ;;  %v7098_v37 = vld [vmem:[#allocation5 + $0xb8] sm:$0xff] }
 0x51b   :  { %v5187_v9 = vpop.eup %5186 }
 0x51c   :  { %v5189_v1 = vpop.eup %5188  ;;  %v1436_v15 = vmul.f32 %v5187_v9, %v1434_v5  ;;  %vm1441_vm4 = vweird.f32 %v5187_v9 }
 0x51d   :  { %v1456_v26 = vmul.f32 %v5189_v1, %v1454_v6  ;;  %vm1442_vm6 = vmor %vm1440_vm5, %vm1441_vm4  ;;  %vm1461_vm8 = vweird.f32 %v5189_v1 }
 0x51e   :  { %v1437_v23 = vsub.f32 1.0, %v1436_v15  ;;  %vm1462_vm10 = vmor %vm1460_vm9, %vm1461_vm8 }
 0x51f   :  { %v1457_v8 = vsub.f32 1.0, %v1456_v26  ;;  %v6915_v26 = vld [vmem:[#allocation5 + $0xd8] sm:$0xff] }
 0x520   :  { %v1438_v18 = vmul.f32 %v5187_v9, %v1437_v23  ;;  %v6921_v23 = vld [vmem:[#allocation5 + $0xc0] sm:$0xff] }
 0x521   :  { %v1458_v28 = vmul.f32 %v5189_v1, %v1457_v8  ;;  %v6941_v8 = vld [vmem:[#allocation5 + $0x90] sm:$0xff] }
 0x522   :  { %v1439_v32 = vadd.f32 %v5187_v9, %v1438_v18  ;;  %v6948_v18 = vld [vmem:[#allocation5 + $0x78] sm:$0xff] }
 0x523   :  { %v1459_v34 = vadd.f32 %v5189_v1, %v1458_v28  ;;  %v6977_v28 = vld [vmem:[#allocation5 + $0x18] sm:$0xff] }
 0x524   :  { %v1443_v20 = vsel %vm1442_vm6, %v5187_v9, %v1439_v32  ;;  %v6902_v9 = vld [vmem:[#allocation5 + $0xf0] sm:$0xff]  ;;  %9097 = vst [vmem:[#allocation26_spill] sm:$0xff] %v6977_v28  ;;  %v9099_v32 = vmov 0.0  }
 0x525   :  { %v1448_v25 = vsel %vm1445_vm7, %v1447_v21, %v1443_v20  ;;  %v1463_v51 = vsel %vm1462_vm10, %v5189_v1, %v1459_v34  ;;  %v6907_v1 = vld [vmem:[%s9015_s13 + $0xc] sm:$0x3]  ;;  %2145 = vmatpush.msrb.mxu0 %v6902_v9  ;;  %v7005_v21 = vld [vmem:[#allocation5 + $0x170] sm:$0xff]  ;;  %v7023_v20 = vld [vmem:[#allocation5 + $0x140] sm:$0xff] }
 0x526   :  { %v1470_v56 = vmul.f32 %v1448_v25, %v1428_v31  ;;  %v1468_v52 = vsel %vm1465_vm11, %v1467_v41, %v1463_v51  ;;  %5066 = vmatmul.msk.f32.vlgmr.msra.gmra.mxu0 %vm153_vm0, %v6907_v1  ;;  %v7017_v31 = vld [vmem:[#allocation5 + $0x158] sm:$0xff]  ;;  %v7056_v25 = vld [vmem:[#allocation5 + $0x130] sm:$0xff]  ;;  %v7114_v51 = vld [vmem:[#allocation5 + $0x88] sm:$0xff] }
 0x527   :  { %v1473_v11 = vsub.f32 1.0, %v1468_v52  ;;  %v1475_v6 = vmul.f32 %v1468_v52, %v6742_v57  ;;  %2146 = vmatpush.msrb.mxu0 %v6915_v26  ;;  %v7064_v34 = vld [vmem:[#allocation5 + $0x118] sm:$0xff] }
 0x528   :  { %v1471_v0 = vadd.f32 %v1470_v56, %v605_v16  ;;  %v7081_v16 = vld [vmem:[#allocation5 + $0xe8] sm:$0xff]  ;;  %v7130_v41 = vld [vmem:[#allocation5 + $0x58] sm:$0xff] }
 0x529   :  { %2147 = vmatpush.msrb.mxu0 %v6921_v23  ;;  %v7086_v56 = vld [vmem:[#allocation5 + $0xc8] sm:$0xff]  ;;  %v7134_v52 = vld [vmem:[#allocation5 + $0x38] sm:$0xff] }
 0x52a   :  { %5190 = vtanh.f32 %v1471_v0  ;;  %v7106_v0 = vld [vmem:[#allocation5 + $0xa0] sm:$0xff]  ;;  %9100 = vst [vmem:[#allocation24_spill] sm:$0xff] %v7134_v52 }
 0x52b   :  { %2148 = vmatpush.msrb.mxu0 %v6926_v4 }
 0x52d   :  { %2149 = vmatpush.msrb.mxu0 %v6941_v8 }
 0x52f   :  { %2150 = vmatpush.msrb.mxu0 %v6948_v18 }
 0x530   :  { %v5191_v10 = vpop.eup %5190 }
 0x531   :  { %v1474_v5 = vmul.f32 %v5191_v10, %v1473_v11  ;;  %v7138_v11 = vld [vmem:[#allocation5 + $0x40] sm:$0xff] }
 0x532   :  { %9101 = vst [vmem:[#allocation40_spill] sm:$0xff] %v7138_v11  ;;  %v7142_v10 = vld [vmem:[#allocation5 + $0x20] sm:$0xff] }
 0x533   :  { %v6912_v15 = vadd.f32 %v1475_v6, %v1474_v5  ;;  %9102 = vst [vmem:[#allocation33_spill] sm:$0xff] %v7142_v10  ;;  %v7146_v5 = vld [vmem:[#allocation5 + $0x28] sm:$0xff] }
 0x534   :  { %9103 = vst [vmem:[#allocation39_spill] sm:$0xff] %v7146_v5  ;;  %v7150_v6 = vld [vmem:[#allocation5 + $0x8] sm:$0xff] }
 0x535   :  { %9095 = vst [vmem:[#allocation21_spill] sm:$0xff] %v6912_v15  ;;  %1493 = vmatmul.f32.vlgmr.msra.gmra.mxu1 %v6912_v15  ;;  %1513 = vmatmul.f32.vlgmr.msra.gmra.mxu2 %v6912_v15 }
 0x536   :  { %1533 = vmatmul.f32.vlgmr.msra.gmra.mxu3 %v6912_v15  ;;  %1716 = vmatpush.msra.mxu1 %v6809_v49  ;;  %9104 = vst [vmem:[#allocation47_spill] sm:$0xff] %v7150_v6 }
 0x537   :  { %1736 = vmatpush.msra.mxu2 %v6750_v58  ;;  %1756 = vmatpush.msra.mxu3 %v6777_v60 }
 0x538   :  { %1717 = vmatpush.msra.mxu1 %v6822_v55 }
 0x539   :  { %1737 = vmatpush.msra.mxu2 %v6757_v2  ;;  %1757 = vmatpush.msra.mxu3 %v6791_v42 }
 0x53a   :  { %1718 = vmatpush.msra.mxu1 %v6830_v62 }
 0x53b   :  { %1738 = vmatpush.msra.mxu2 %v6764_v59  ;;  %1758 = vmatpush.msra.mxu3 %v6803_v44 }
 0x53c   :  { %1719 = vmatpush.msra.mxu1 %v6838_v13 }
 0x53d   :  { %5047 = vmatmul.msk.f32.vlgmr.msrb.gmra.mxu1 %vm153_vm0, %v6796_v43  ;;  %5048 = vmatmul.msk.f32.vlgmr.msrb.gmra.mxu2 %vm153_vm0, %v6796_v43  ;;  %v6953_v43 = vld [vmem:[#allocation5 + $0x60] sm:$0xff] }
 0x53e   :  { %1796 = vmatpush.msrb.mxu1 %v6750_v58  ;;  %1739 = vmatpush.msra.mxu2 %v6771_v3 }
 0x53f   :  { %5049 = vmatmul.msk.f32.vlgmr.msrb.gmra.mxu3 %vm153_vm0, %v6845_v63  ;;  %2151 = vmatpush.msrb.mxu0 %v6953_v43 }
 0x540   :  { %1816 = vmatpush.msrb.mxu2 %v6777_v60  ;;  %1797 = vmatpush.msrb.mxu1 %v6757_v2 }
 0x541   :  { %1759 = vmatpush.msra.mxu3 %v6815_v46  ;;  %2152 = vmatpush.msrb.mxu0 %v6962_v19 }
 0x542   :  { %1817 = vmatpush.msrb.mxu2 %v6791_v42  ;;  %1798 = vmatpush.msrb.mxu1 %v6764_v59 }
 0x543   :  { %1836 = vmatpush.msrb.mxu3 %v6809_v49  ;;  %2153 = vmatpush.msrb.mxu0 %v6970_v27 }
 0x544   :  { %1818 = vmatpush.msrb.mxu2 %v6803_v44  ;;  %1799 = vmatpush.msrb.mxu1 %v6771_v3 }
 0x545   :  { %5051 = vmatmul.msk.f32.vlgmr.msra.gmra.mxu1 %vm153_vm0, %v6845_v63  ;;  %5052 = vmatmul.msk.f32.vlgmr.msra.gmra.mxu2 %vm153_vm0, %v6857_v53  ;;  %v6987_v63 = vld [vmem:[#allocation5] sm:$0xff] }
 0x546   :  { %1876 = vmatpush.msra.mxu1 %v6777_v60  ;;  %1819 = vmatpush.msrb.mxu2 %v6815_v46  ;;  %9098 = vst [vmem:[#allocation23_spill] sm:$0xff] %v6987_v63 }
 0x547   :  { %5053 = vmatmul.msk.f32.vlgmr.msra.gmra.mxu3 %vm153_vm0, %v6857_v53  ;;  %2154 = vmatpush.msrb.mxu0 %v6977_v28  ;;  %v5438_v53 = vld [vmem:[%s9015_s13 + $0x6] sm:$0x3] }
 0x548   :  { %1896 = vmatpush.msra.mxu2 %v6809_v49  ;;  %1877 = vmatpush.msra.mxu1 %v6791_v42 }
 0x549   :  { %1837 = vmatpush.msrb.mxu3 %v6822_v55  ;;  %2155 = vmatpush.msrb.mxu0 %v6987_v63 }
 0x54a   :  { %1897 = vmatpush.msra.mxu2 %v6822_v55  ;;  %1878 = vmatpush.msra.mxu1 %v6803_v44 }
 0x54b   :  { %1838 = vmatpush.msrb.mxu3 %v6830_v62  ;;  %2156 = vmatmul.f32.vlgmr.msrb.gmra.mxu0 %v9099_v32 }
 0x54c   :  { %1898 = vmatpush.msra.mxu2 %v6830_v62  ;;  %1879 = vmatpush.msra.mxu1 %v6815_v46 }
 0x54d   :  { %5055 = vmatmul.msk.f32.vlgmr.msrb.gmra.mxu1 %vm153_vm0, %v5438_v53  ;;  %5056 = vmatmul.msk.f32.vlgmr.msrb.gmra.mxu2 %vm153_vm0, %v5438_v53 }
 0x54e   :  { %1956 = vmatpush.msrb.mxu1 %v6809_v49  ;;  %1899 = vmatpush.msra.mxu2 %v6838_v13 }
 0x54f   :  { %1839 = vmatpush.msrb.mxu3 %v6838_v13  ;;  %2269 = vmatpush.msra.mxu0 %v7005_v21 }
 0x550   :  { %1976 = vmatpush.msrb.mxu2 %v6750_v58  ;;  %1957 = vmatpush.msrb.mxu1 %v6822_v55 }
 0x551   :  { %5057 = vmatmul.msk.f32.vlgmr.msrb.gmra.mxu3 %vm153_vm0, %v5438_v53  ;;  %2270 = vmatpush.msra.mxu0 %v7017_v31  ;;  %v7237_v53 = vpop.f32.mrf.mxu0 }
 0x552   :  { %1977 = vmatpush.msrb.mxu2 %v6757_v2  ;;  %1958 = vmatpush.msrb.mxu1 %v6830_v62  ;;  %9106 = vst [vmem:[#allocation42_spill] sm:$0xff] %v7237_v53 }
 0x553   :  { %1916 = vmatpush.msra.mxu3 %v6750_v58  ;;  %2271 = vmatpush.msra.mxu0 %v7023_v20 }
 0x554   :  { %1978 = vmatpush.msrb.mxu2 %v6764_v59  ;;  %1959 = vmatpush.msrb.mxu1 %v6838_v13 }
 0x555   :  { %5059 = vmatmul.msk.f32.vlgmr.msra.gmra.mxu1 %vm153_vm0, %v6868_v22  ;;  %5060 = vmatmul.msk.f32.vlgmr.msra.gmra.mxu2 %vm153_vm0, %v6868_v22  ;;  %v7052_v22 = vld [vmem:[#allocation5 + $0x110] sm:$0xff] }
 0x556   :  { %2036 = vmatpush.msra.mxu1 %v6750_v58  ;;  %1979 = vmatpush.msrb.mxu2 %v6771_v3  ;;  %v7031_v58 = vld [vmem:[#allocation5 + $0x178] sm:$0xff] }
 0x557   :  { %1917 = vmatpush.msra.mxu3 %v6757_v2 }
 0x558   :  { %2056 = vmatpush.msra.mxu2 %v6777_v60  ;;  %2037 = vmatpush.msra.mxu1 %v6757_v2  ;;  %v7041_v2 = vld [vmem:[#allocation5 + $0x160] sm:$0xff] }
 0x559   :  { %1918 = vmatpush.msra.mxu3 %v6764_v59 }
 0x55a   :  { %2057 = vmatpush.msra.mxu2 %v6791_v42  ;;  %2038 = vmatpush.msra.mxu1 %v6764_v59  ;;  %v7044_v59 = vld [vmem:[#allocation5 + $0x128] sm:$0xff] }
 0x55b   :  { %1919 = vmatpush.msra.mxu3 %v6771_v3  ;;  %2272 = vmatpush.msra.mxu0 %v7044_v59 }
 0x55c   :  { %2058 = vmatpush.msra.mxu2 %v6803_v44  ;;  %2039 = vmatpush.msra.mxu1 %v6771_v3  ;;  %v7048_v3 = vld [vmem:[#allocation5 + $0x148] sm:$0xff] }
 0x55d   :  { %5061 = vmatmul.msk.f32.vlgmr.msra.gmra.mxu3 %vm153_vm0, %v6885_v39  ;;  %5063 = vmatmul.msk.f32.vlgmr.msrb.gmra.mxu1 %vm153_vm0, %v6885_v39  ;;  %v7122_v39 = vld [vmem:[#allocation5 + $0x70] sm:$0xff] }
 0x55e   :  { %2059 = vmatpush.msra.mxu2 %v6815_v46  ;;  %2160 = vmatpush.msrb.mxu1 %v7005_v21 }
 0x55f   :  { %5064 = vmatmul.msk.f32.vlgmr.msrb.gmra.mxu2 %vm153_vm0, %v6907_v1  ;;  %1996 = vmatpush.msrb.mxu3 %v6777_v60  ;;  %v7060_v60 = vld [vmem:[#allocation5 + $0xf8] sm:$0xff] }
 0x560   :  { %2180 = vmatpush.msrb.mxu2 %v7031_v58  ;;  %2161 = vmatpush.msrb.mxu1 %v7017_v31 }
 0x561   :  { %1997 = vmatpush.msrb.mxu3 %v6791_v42  ;;  %2273 = vmatpush.msra.mxu0 %v7052_v22  ;;  %v5439_v42 = vld [vmem:[%s9015_s13 + $0xe] sm:$0x3] }
 0x562   :  { %2181 = vmatpush.msrb.mxu2 %v7041_v2  ;;  %2162 = vmatpush.msrb.mxu1 %v7023_v20 }
 0x563   :  { %1998 = vmatpush.msrb.mxu3 %v6803_v44  ;;  %2274 = vmatpush.msra.mxu0 %v7060_v60  ;;  %v7077_v44 = vld [vmem:[#allocation5 + $0xe0] sm:$0xff] }
 0x564   :  { %2182 = vmatpush.msrb.mxu2 %v7048_v3  ;;  %2163 = vmatpush.msrb.mxu1 %v7044_v59 }
 0x565   :  { %5067 = vmatmul.msk.f32.vlgmr.msra.gmra.mxu1 %vm153_vm0, %v5439_v42  ;;  %1999 = vmatpush.msrb.mxu3 %v6815_v46  ;;  %v7094_v46 = vld [vmem:[#allocation5 + $0xb0] sm:$0xff] }
 0x566   :  { %2183 = vmatpush.msrb.mxu2 %v7056_v25  ;;  %2164 = vmatpush.msrb.mxu1 %v7052_v22 }
 0x567   :  { %5068 = vmatmul.msk.f32.vlgmr.msra.gmra.mxu2 %vm153_vm0, %v5439_v42  ;;  %5065 = vmatmul.msk.f32.vlgmr.msrb.gmra.mxu3 %vm153_vm0, %v6907_v1  ;;  %v7154_v1 = vld [vmem:[#allocation5 + $0x10] sm:$0xff] }
 0x568   :  { %2184 = vmatpush.msrb.mxu2 %v7064_v34  ;;  %2165 = vmatpush.msrb.mxu1 %v7060_v60  ;;  %9105 = vst [vmem:[#allocation41_spill] sm:$0xff] %v7154_v1 }
 0x569   :  { %2076 = vmatpush.msra.mxu3 %v6809_v49  ;;  %2275 = vmatpush.msra.mxu0 %v7077_v44  ;;  %v7102_v49 = vld [vmem:[#allocation5 + $0x98] sm:$0xff] }
 0x56a   :  { %2185 = vmatpush.msrb.mxu2 %v7073_v17  ;;  %2166 = vmatpush.msrb.mxu1 %v7077_v44 }
 0x56b   :  { %2077 = vmatpush.msra.mxu3 %v6822_v55  ;;  %2276 = vmatpush.msra.mxu0 %v7086_v56  ;;  %v7110_v55 = vld [vmem:[#allocation5 + $0x80] sm:$0xff] }
 0x56c   :  { %2186 = vmatpush.msrb.mxu2 %v7081_v16  ;;  %2167 = vmatpush.msrb.mxu1 %v7086_v56 }
 0x56d   :  { %2078 = vmatpush.msra.mxu3 %v6830_v62  ;;  %2277 = vmatpush.msra.mxu0 %v7094_v46  ;;  %v7118_v62 = vld [vmem:[#allocation5 + $0x68] sm:$0xff] }
 0x56e   :  { %2187 = vmatpush.msrb.mxu2 %v7090_v12  ;;  %2168 = vmatpush.msrb.mxu1 %v7094_v46 }
 0x56f   :  { %2079 = vmatpush.msra.mxu3 %v6838_v13  ;;  %2278 = vmatpush.msra.mxu0 %v7102_v49  ;;  %v7126_v13 = vld [vmem:[#allocation5 + $0x50] sm:$0xff] }
 0x570   :  { %2188 = vmatpush.msrb.mxu2 %v7098_v37  ;;  %2169 = vmatpush.msrb.mxu1 %v7102_v49 }
 0x571   :  { %5069 = vmatmul.msk.f32.vlgmr.msra.gmra.mxu3 %vm153_vm0, %v5439_v42  ;;  %2279 = vmatpush.msra.mxu0 %v7110_v55 }
 0x572   :  { %2189 = vmatpush.msrb.mxu2 %v7106_v0  ;;  %2249 = vmatpush.msrb.mxu3 %v6879_v24 }
 0x573   :  { %2170 = vmatpush.msrb.mxu1 %v7110_v55  ;;  %2280 = vmatpush.msra.mxu0 %v7118_v62 }
 0x574   :  { %2190 = vmatpush.msrb.mxu2 %v7114_v51  ;;  %2250 = vmatpush.msrb.mxu3 %v6889_v40 }
 0x575   :  { %2171 = vmatpush.msrb.mxu1 %v7118_v62  ;;  %2281 = vmatpush.msra.mxu0 %v7126_v13 }
 0x576   :  { %2191 = vmatpush.msrb.mxu2 %v7122_v39  ;;  %2251 = vmatpush.msrb.mxu3 %v6892_v45 }
 0x577   :  { %2172 = vmatpush.msrb.mxu1 %v7126_v13  ;;  %2282 = vmatpush.msra.mxu0 %v7134_v52 }
 0x578   :  { %2192 = vmatpush.msrb.mxu2 %v7130_v41  ;;  %2252 = vmatpush.msrb.mxu3 %v6895_v47 }
 0x579   :  { %2173 = vmatpush.msrb.mxu1 %v7134_v52  ;;  %2283 = vmatpush.msra.mxu0 %v7142_v10 }
 0x57a   :  { %2193 = vmatpush.msrb.mxu2 %v7138_v11  ;;  %2253 = vmatpush.msrb.mxu3 %v6898_v29 }
 0x57b   :  { %2174 = vmatpush.msrb.mxu1 %v7142_v10  ;;  %2284 = vmatpush.msra.mxu0 %v7150_v6 }
 0x57c   :  { %2194 = vmatpush.msrb.mxu2 %v7146_v5  ;;  %2254 = vmatpush.msrb.mxu3 %v6902_v9 }
 0x57d   :  { %2175 = vmatpush.msrb.mxu1 %v7150_v6  ;;  %2398 = vmatpush.msrb.mxu0 %v7031_v58 }
 0x57e   :  { %2176 = vmatmul.f32.vlgmr.msrb.gmra.mxu1 %v9099_v32  ;;  %2195 = vmatpush.msrb.mxu2 %v7154_v1 }
 0x57f   :  { %2196 = vmatmul.f32.vlgmr.msrb.gmra.mxu2 %v9099_v32  ;;  %2289 = vmatpush.msra.mxu1 %v7031_v58  ;;  %v7254_v32 = vpop.f32.mrf.mxu0 }
 0x580   :  { %2255 = vmatpush.msrb.mxu3 %v6915_v26  ;;  %2358 = vmatpush.msra.mxu2 %v6879_v24  ;;  %9107 = vst [vmem:[#allocation29_spill] sm:$0xff] %v7254_v32 }
 0x581   :  { %2290 = vmatpush.msra.mxu1 %v7041_v2  ;;  %2399 = vmatpush.msrb.mxu0 %v7041_v2 }
 0x582   :  { %2256 = vmatpush.msrb.mxu3 %v6921_v23  ;;  %2359 = vmatpush.msra.mxu2 %v6889_v40 }
 0x583   :  { %2291 = vmatpush.msra.mxu1 %v7048_v3  ;;  %2400 = vmatpush.msrb.mxu0 %v7048_v3 }
 0x584   :  { %2257 = vmatpush.msrb.mxu3 %v6926_v4  ;;  %2360 = vmatpush.msra.mxu2 %v6892_v45 }
 0x585   :  { %2292 = vmatpush.msra.mxu1 %v7056_v25  ;;  %2401 = vmatpush.msrb.mxu0 %v7056_v25 }
 0x586   :  { %2258 = vmatpush.msrb.mxu3 %v6941_v8  ;;  %2361 = vmatpush.msra.mxu2 %v6895_v47 }
 0x587   :  { %2293 = vmatpush.msra.mxu1 %v7064_v34  ;;  %2402 = vmatpush.msrb.mxu0 %v7064_v34  ;;  %v7271_v57 = vpop.f32.mrf.mxu0 }
 0x588   :  { %2259 = vmatpush.msrb.mxu3 %v6948_v18  ;;  %2362 = vmatpush.msra.mxu2 %v6898_v29  ;;  %9109 = vst [vmem:[#allocation30_spill] sm:$0xff] %v7271_v57 }
 0x589   :  { %2294 = vmatpush.msra.mxu1 %v7073_v17  ;;  %2403 = vmatpush.msrb.mxu0 %v7073_v17 }
 0x58a   :  { %2260 = vmatpush.msrb.mxu3 %v6953_v43  ;;  %2363 = vmatpush.msra.mxu2 %v6902_v9 }
 0x58b   :  { %2295 = vmatpush.msra.mxu1 %v7081_v16  ;;  %2404 = vmatpush.msrb.mxu0 %v7081_v16 }
 0x58c   :  { %2261 = vmatpush.msrb.mxu3 %v6962_v19  ;;  %2364 = vmatpush.msra.mxu2 %v6915_v26 }
 0x58d   :  { %2296 = vmatpush.msra.mxu1 %v7090_v12  ;;  %2405 = vmatpush.msrb.mxu0 %v7090_v12 }
 0x58e   :  { %2262 = vmatpush.msrb.mxu3 %v6970_v27  ;;  %2365 = vmatpush.msra.mxu2 %v6921_v23 }
 0x58f   :  { %2297 = vmatpush.msra.mxu1 %v7098_v37  ;;  %2406 = vmatpush.msrb.mxu0 %v7098_v37 }
 0x590   :  { %2263 = vmatpush.msrb.mxu3 %v6977_v28  ;;  %2366 = vmatpush.msra.mxu2 %v6926_v4 }
 0x591   :  { %2298 = vmatpush.msra.mxu1 %v7106_v0  ;;  %2407 = vmatpush.msrb.mxu0 %v7106_v0 }
 0x592   :  { %2264 = vmatpush.msrb.mxu3 %v6987_v63  ;;  %2367 = vmatpush.msra.mxu2 %v6941_v8 }
 0x593   :  { %2299 = vmatpush.msra.mxu1 %v7114_v51  ;;  %2408 = vmatpush.msrb.mxu0 %v7114_v51 }
 0x594   :  { %2378 = vmatpush.msra.mxu3 %v7005_v21  ;;  %2368 = vmatpush.msra.mxu2 %v6948_v18 }
 0x595   :  { %2300 = vmatpush.msra.mxu1 %v7122_v39  ;;  %2409 = vmatpush.msrb.mxu0 %v7122_v39 }
 0x596   :  { %2379 = vmatpush.msra.mxu3 %v7017_v31  ;;  %2369 = vmatpush.msra.mxu2 %v6953_v43 }
 0x597   :  { %2301 = vmatpush.msra.mxu1 %v7130_v41  ;;  %2410 = vmatpush.msrb.mxu0 %v7130_v41 }
 0x598   :  { %2380 = vmatpush.msra.mxu3 %v7023_v20  ;;  %2370 = vmatpush.msra.mxu2 %v6962_v19 }
 0x599   :  { %2302 = vmatpush.msra.mxu1 %v7138_v11  ;;  %2411 = vmatpush.msrb.mxu0 %v7138_v11 }
 0x59a   :  { %2381 = vmatpush.msra.mxu3 %v7044_v59  ;;  %2371 = vmatpush.msra.mxu2 %v6970_v27 }
 0x59b   :  { %2303 = vmatpush.msra.mxu1 %v7146_v5  ;;  %2412 = vmatpush.msrb.mxu0 %v7146_v5 }
 0x59c   :  { %2382 = vmatpush.msra.mxu3 %v7052_v22  ;;  %2372 = vmatpush.msra.mxu2 %v6977_v28 }
 0x59d   :  { %2304 = vmatpush.msra.mxu1 %v7154_v1  ;;  %2413 = vmatpush.msrb.mxu0 %v7154_v1 }
 0x59e   :  { %2383 = vmatpush.msra.mxu3 %v7060_v60  ;;  %2373 = vmatpush.msra.mxu2 %v6987_v63 }
 0x59f   :  { %2467 = vmatpush.msrb.mxu1 %v6879_v24 }
 0x5a0   :  { %2384 = vmatpush.msra.mxu3 %v7077_v44  ;;  %2487 = vmatpush.msrb.mxu2 %v7005_v21 }
 0x5a1   :  { %2468 = vmatpush.msrb.mxu1 %v6889_v40 }
 0x5a2   :  { %2385 = vmatpush.msra.mxu3 %v7086_v56  ;;  %2488 = vmatpush.msrb.mxu2 %v7017_v31 }
 0x5a3   :  { %2469 = vmatpush.msrb.mxu1 %v6892_v45 }
 0x5a4   :  { %2386 = vmatpush.msra.mxu3 %v7094_v46  ;;  %2489 = vmatpush.msrb.mxu2 %v7023_v20 }
 0x5a5   :  { %2470 = vmatpush.msrb.mxu1 %v6895_v47 }
 0x5a6   :  { %2387 = vmatpush.msra.mxu3 %v7102_v49  ;;  %2490 = vmatpush.msrb.mxu2 %v7044_v59 }
 0x5a7   :  { %2471 = vmatpush.msrb.mxu1 %v6898_v29 }
 0x5a8   :  { %2388 = vmatpush.msra.mxu3 %v7110_v55  ;;  %2491 = vmatpush.msrb.mxu2 %v7052_v22 }
 0x5a9   :  { %2472 = vmatpush.msrb.mxu1 %v6902_v9 }
 0x5aa   :  { %2389 = vmatpush.msra.mxu3 %v7118_v62  ;;  %2492 = vmatpush.msrb.mxu2 %v7060_v60 }
 0x5ab   :  { %2473 = vmatpush.msrb.mxu1 %v6915_v26 }
 0x5ac   :  { %2390 = vmatpush.msra.mxu3 %v7126_v13  ;;  %2493 = vmatpush.msrb.mxu2 %v7077_v44 }
 0x5ad   :  { %2474 = vmatpush.msrb.mxu1 %v6921_v23 }
 0x5ae   :  { %2391 = vmatpush.msra.mxu3 %v7134_v52  ;;  %2494 = vmatpush.msrb.mxu2 %v7086_v56 }
 0x5af   :  { %2475 = vmatpush.msrb.mxu1 %v6926_v4 }
 0x5b0   :  { %2392 = vmatpush.msra.mxu3 %v7142_v10  ;;  %2495 = vmatpush.msrb.mxu2 %v7094_v46 }
 0x5b1   :  { %2476 = vmatpush.msrb.mxu1 %v6941_v8 }
 0x5b2   :  { %2393 = vmatpush.msra.mxu3 %v7150_v6  ;;  %v1494_v42 = vpop.f32.mrf.mxu1  ;;  %2496 = vmatpush.msrb.mxu2 %v7102_v49 }
 0x5b3   :  { %v1495_v53 = vadd.f32 %v1494_v42, %v9076_v36  ;;  %2477 = vmatpush.msrb.mxu1 %v6948_v18 }
 0x5b4   :  { %2497 = vmatpush.msrb.mxu2 %v7110_v55 }
 0x5b5   :  { %v1537_v32 = vadd.f32 %v1495_v53, %v630_v14  ;;  %2478 = vmatpush.msrb.mxu1 %v6953_v43 }
 0x5b6   :  { %2498 = vmatpush.msrb.mxu2 %v7118_v62 }
 0x5b7   :  { %v5044_v48 = vmul.f32 -1.442695, %v1537_v32  ;;  %2479 = vmatpush.msrb.mxu1 %v6962_v19 }
 0x5b8   :  { %v1514_v35 = vpop.f32.mrf.mxu2  ;;  %2499 = vmatpush.msrb.mxu2 %v7126_v13 }
 0x5b9   :  { %5192 = vpow2.f32 %v5044_v48  ;;  %v1515_v36 = vadd.f32 %v1514_v35, %v9077_v38  ;;  %2480 = vmatpush.msrb.mxu1 %v6970_v27  ;;  %v7287_v35 = vpop.f32.mrf.mxu0 }
 0x5ba   :  { %v7278_v14 = vpop.f32.mrf.mxu1  ;;  %2500 = vmatpush.msrb.mxu2 %v7134_v52  ;;  %9113 = vst [vmem:[#allocation31_spill] sm:$0xff] %v7287_v35 }
 0x5bb   :  { %9111 = vst [vmem:[#allocation38_spill] sm:$0xff] %v7278_v14  ;;  %v1557_v53 = vadd.f32 %v1515_v36, %v650_v30  ;;  %2481 = vmatpush.msrb.mxu1 %v6977_v28 }
 0x5bc   :  { %2501 = vmatpush.msrb.mxu2 %v7142_v10 }
 0x5bd   :  { %v5045_v32 = vmul.f32 -1.442695, %v1557_v53  ;;  %2482 = vmatpush.msrb.mxu1 %v6987_v63 }
 0x5be   :  { %2502 = vmatpush.msrb.mxu2 %v7150_v6 }
 0x5bf   :  { %v5193_v33 = vpop.eup %5192  ;;  %5194 = vpow2.f32 %v5045_v32 }
 0x5c0   :  { %v1541_v48 = vadd.f32 1.0, %v5193_v33  ;;  %v7289_v30 = vpop.f32.mrf.mxu2 }
 0x5c1   :  { %9114 = vst [vmem:[#allocation32_spill] sm:$0xff] %v7289_v30  ;;  %v7293_v6 = vpop.f32.mrf.mxu0 }
 0x5c2   :  { %5196 = vrcp.f32 %v1541_v48  ;;  %v7285_v38 = vpop.f32.mrf.mxu1  ;;  %v1553_v61 = vand.u32 2147483648, %v1541_v48  ;;  %9116 = vst [vmem:[#allocation34_spill] sm:$0xff] %v7293_v6  ;;  %v1551_v33 = vand.u32 2147483647, %v1541_v48  ;;  %vm1547_vm12 = vweird.f32 %v1541_v48 }
 0x5c3   :  { %9112 = vst [vmem:[#allocation48_spill] sm:$0xff] %v7285_v38  ;;  %v1534_v38 = vpop.f32.mrf.mxu3 }
 0x5c4   :  { %v1535_v28 = vadd.f32 %v1534_v38, %v6348_v54  ;;  %vm1552_vm14 = vcmp.eq.f32.partialorder %v1551_v33, 8.507059e+37 }
 0x5c5   :  { %v5195_v42 = vpop.eup %5194 }
 0x5c6   :  { %v1561_v7 = vadd.f32 1.0, %v5195_v42  ;;  %v1554_v42 = vor.u32 1.1754944e-38, %v1553_v61 }
 0x5c8   :  { %v5197_v36 = vpop.eup %5196  ;;  %5198 = vrcp.f32 %v1561_v7  ;;  %v7295_v30 = vpop.f32.mrf.mxu2  ;;  %v1571_v61 = vand.u32 2147483647, %v1561_v7  ;;  %vm1567_vm1 = vweird.f32 %v1561_v7 }
 0x5c9   :  { %v1543_v14 = vmul.f32 %v5197_v36, %v1541_v48  ;;  %vm1548_vm0 = vweird.f32 %v5197_v36  ;;  %9117 = vst [vmem:[#allocation49_spill] sm:$0xff] %v7295_v30  ;;  %v7302_v48 = vpop.f32.mrf.mxu0 }
 0x5ca   :  { %v7291_v53 = vpop.f32.mrf.mxu1  ;;  %vm1549_vm13 = vmor %vm1547_vm12, %vm1548_vm0  ;;  %9120 = vst [vmem:[#allocation44_spill] sm:$0xff] %v7302_v48  ;;  %vm1572_vm3 = vcmp.eq.f32.partialorder %v1571_v61, 8.507059e+37 }
 0x5cb   :  { %9115 = vst [vmem:[#allocation43_spill] sm:$0xff] %v7291_v53  ;;  %v1544_v57 = vsub.f32 1.0, %v1543_v14  ;;  %v9118_v14 = vld [vmem:[#allocation51_spill] sm:$0xff]  ;;  %v7304_v38 = vpop.f32.mrf.mxu3 }
 0x5cc   :  { %v670_v6 = vadd.f32 %v9118_v14, %v6350_v50  ;;  %9121 = vst [vmem:[#allocation50_spill] sm:$0xff] %v7304_v38 }
 0x5cd   :  { %v1545_v32 = vmul.f32 %v5197_v36, %v1544_v57 }
 0x5ce   :  { %v5199_v63 = vpop.eup %5198 }
 0x5cf   :  { %v1563_v1 = vmul.f32 %v5199_v63, %v1561_v7  ;;  %v1546_v35 = vadd.f32 %v5197_v36, %v1545_v32  ;;  %vm1568_vm15 = vweird.f32 %v5199_v63  ;;  %v1573_v32 = vand.u32 2147483648, %v1561_v7 }
 0x5d0   :  { %vm1569_vm2 = vmor %vm1567_vm1, %vm1568_vm15 }
 0x5d1   :  { %v1564_v10 = vsub.f32 1.0, %v1563_v1  ;;  %v1550_v53 = vsel %vm1549_vm13, %v5197_v36, %v1546_v35  ;;  %v1574_v1 = vor.u32 1.1754944e-38, %v1573_v32 }
 0x5d2   :  { %v1555_v57 = vsel %vm1552_vm14, %v1554_v42, %v1550_v53  ;;  %v7300_v5 = vpop.f32.mrf.mxu1 }
 0x5d3   :  { %9119 = vst [vmem:[#allocation35_spill] sm:$0xff] %v7300_v5  ;;  %v1577_v52 = vmul.f32 %v1555_v57, %v1535_v28  ;;  %v1565_v27 = vmul.f32 %v5199_v63, %v1564_v10  ;;  %v7308_v28 = vpop.f32.mrf.mxu2  ;;  %v2132_v10 = vld [vmem:[%s8889_s8] sm:$0x7]  ;;  %v7324_v14 = vpop.f32.mrf.mxu3 }
 0x5d4   :  { %9123 = vst [vmem:[#allocation37_spill] sm:$0xff] %v7308_v28 }
 0x5d5   :  { %v1578_v11 = vadd.f32 %v1577_v52, %v670_v6  ;;  %v1566_v30 = vadd.f32 %v5199_v63, %v1565_v27  ;;  %v7313_v27 = vperm.slane %v2132_v10, 0  ;;  %9127 = vst [vmem:[#allocation53_spill] sm:$0xff] %v7324_v14 }
 0x5d7   :  { %5200 = vtanh.f32 %v1578_v11  ;;  %v1570_v54 = vsel %vm1569_vm2, %v5199_v63, %v1566_v30  ;;  %9124 = vst [vmem:[#allocation45_spill] sm:$0xff] %v7313_v27  ;;  %v1596_v63 = vld [vmem:[%s8887_s6] sm:$0x7]  ;;  %v2157_v11 = vpop.f32.mrf.mxu0 }
 0x5d8   :  { %v1575_v50 = vsel %vm1572_vm3, %v1574_v1, %v1570_v54  ;;  %v7321_v53 = vperm.slane %v1596_v63, 0  ;;  %v2158_v33 = vadd.f32 %v2157_v11, %v7313_v27 }
 0x5d9   :  { %v1580_v36 = vsub.f32 1.0, %v1575_v50  ;;  %v1582_v7 = vmul.f32 %v1575_v50, %v6912_v15  ;;  %v7337_v15 = vperm.slane %v2132_v10, 1 }
 0x5da   :  { %v7306_v35 = vpop.f32.mrf.mxu1  ;;  %9126 = vst [vmem:[#allocation52_spill] sm:$0xff] %v7321_v53 }
 0x5db   :  { %9122 = vst [vmem:[#allocation36_spill] sm:$0xff] %v7306_v35  ;;  %v7327_v32 = vpop.f32.mrf.mxu2  ;;  %v7329_v1 = vpop.f32.mrf.mxu3  ;;  %v7343_v35 = vperm.slane %v2132_v10, 2 }
 0x5dc   :  { %9128 = vst [vmem:[#allocation54_spill] sm:$0xff] %v7327_v32 }
 0x5dd   :  { %v5201_v52 = vpop.eup %5200  ;;  %9129 = vst [vmem:[#allocation55_spill] sm:$0xff] %v7329_v1 }
 0x5de   :  { %v1581_v6 = vmul.f32 %v5201_v52, %v1580_v36  ;;  %9133 = vst [vmem:[#allocation59_spill] sm:$0xff] %v7337_v15 }
 0x5e0   :  { %v7319_v30 = vadd.f32 %v1582_v7, %v1581_v6  ;;  %v7333_v7 = vperm.slane %v1596_v63, 1 }
 0x5e2   :  { %9125 = vst [vmem:[#allocation51_spill] sm:$0xff] %v7319_v30  ;;  %v2041_v42 = vpop.f32.mrf.mxu1 }
 0x5e3   :  { %v2042_v57 = vadd.f32 %v2041_v42, %v7321_v53  ;;  %v7331_v36 = vpop.f32.mrf.mxu2  ;;  %9131 = vst [vmem:[#allocation57_spill] sm:$0xff] %v7333_v7  ;;  %v7335_v11 = vpop.f32.mrf.mxu3 }
 0x5e4   :  { %9130 = vst [vmem:[#allocation56_spill] sm:$0xff] %v7331_v36 }
 0x5e5   :  { %v2200_v61 = vadd.f32 %v2158_v33, %v2042_v57  ;;  %9132 = vst [vmem:[#allocation58_spill] sm:$0xff] %v7335_v11 }
 0x5e7   :  { %v5070_v54 = vmul.f32 -1.442695, %v2200_v61 }
 0x5e9   :  { %5202 = vpow2.f32 %v5070_v54 }
 0x5eb   :  { %v2061_v6 = vpop.f32.mrf.mxu2 }
 0x5ec   :  { %v2062_v38 = vadd.f32 %v2061_v6, %v7333_v7 }
 0x5ef   :  { %v5203_v50 = vpop.eup %5202 }
 0x5f0   :  { %v2204_v52 = vadd.f32 1.0, %v5203_v50  ;;  %v7341_v50 = vpop.f32.mrf.mxu3 }
 0x5f2   :  { %5204 = vrcp.f32 %v2204_v52  ;;  %vm2210_vm4 = vweird.f32 %v2204_v52  ;;  %v2216_v28 = vand.u32 2147483648, %v2204_v52  ;;  %v2214_v5 = vand.u32 2147483647, %v2204_v52 }
 0x5f4   :  { %v2217_v48 = vor.u32 1.1754944e-38, %v2216_v28  ;;  %vm2215_vm7 = vcmp.eq.f32.partialorder %v2214_v5, 8.507059e+37 }
 0x5f8   :  { %v5205_v42 = vpop.eup %5204 }
 0x5f9   :  { %v2206_v33 = vmul.f32 %v5205_v42, %v2204_v52  ;;  %vm2211_vm5 = vweird.f32 %v5205_v42 }
 0x5fa   :  { %vm2212_vm6 = vmor %vm2210_vm4, %vm2211_vm5 }
 0x5fb   :  { %v2177_v57 = vpop.f32.mrf.mxu1  ;;  %v2207_v54 = vsub.f32 1.0, %v2206_v33  ;;  %v7346_v33 = vperm.slane %v1596_v63, 2 }
 0x5fc   :  { %v2178_v61 = vadd.f32 %v2177_v57, %v7337_v15 }
 0x5fd   :  { %v2208_v1 = vmul.f32 %v5205_v42, %v2207_v54 }
 0x5fe   :  { %v2220_v30 = vadd.f32 %v2178_v61, %v2062_v38 }
 0x5ff   :  { %v2209_v32 = vadd.f32 %v5205_v42, %v2208_v1 }
 0x600   :  { %v5071_v14 = vmul.f32 -1.442695, %v2220_v30 }
 0x601   :  { %v2213_v57 = vsel %vm2212_vm6, %v5205_v42, %v2209_v32 }
 0x602   :  { %5206 = vpow2.f32 %v5071_v14  ;;  %v2197_v11 = vpop.f32.mrf.mxu2  ;;  %v2218_v30 = vsel %vm2215_vm7, %v2217_v48, %v2213_v57  ;;  %v2081_v14 = vpop.f32.mrf.mxu3 }
 0x603   :  { %v2198_v38 = vadd.f32 %v2197_v11, %v7343_v35  ;;  %v2082_v1 = vadd.f32 %v2081_v14, %v7346_v33 }
 0x605   :  { %v2240_v61 = vmul.f32 %v2218_v30, %v2198_v38  ;;  %v9146_v30 = vld [vmem:[#allocation56_spill] sm:$0xff] }
 0x607   :  { %v2241_v10 = vadd.f32 %v2240_v61, %v2082_v1  ;;  %v9147_v61 = vld [vmem:[#allocation45_spill] sm:$0xff] }
 0x608   :  { %v5207_v6 = vpop.eup %5206 }
 0x609   :  { %v2224_v27 = vadd.f32 1.0, %v5207_v6 }
 0x60b   :  { %5208 = vrcp.f32 %v2224_v27  ;;  %v2236_v53 = vand.u32 2147483648, %v2224_v27  ;;  %v2234_v28 = vand.u32 2147483647, %v2224_v27  ;;  %vm2230_vm9 = vweird.f32 %v2224_v27 }
 0x60c   :  { %5210 = vtanh.f32 %v2241_v10 }
 0x60d   :  { %v2237_v32 = vor.u32 1.1754944e-38, %v2236_v53  ;;  %vm2235_vm11 = vcmp.eq.f32.partialorder %v2234_v28, 8.507059e+37 }
 0x611   :  { %v5209_v52 = vpop.eup %5208 }
 0x612   :  { %v2226_v54 = vmul.f32 %v5209_v52, %v2224_v27  ;;  %vm2231_vm8 = vweird.f32 %v5209_v52  ;;  %v5211_v42 = vpop.eup %5210 }
 0x613   :  { %vm2232_vm10 = vmor %vm2230_vm9, %vm2231_vm8 }
 0x614   :  { %v2227_v36 = vsub.f32 1.0, %v2226_v54 }
 0x616   :  { %v2228_v15 = vmul.f32 %v5209_v52, %v2227_v36  ;;  %v9145_v36 = vld [vmem:[#allocation52_spill] sm:$0xff] }
 0x617   :  { %v1982_v14 = vadd.f32 %v9146_v30, %v9145_v36 }
 0x618   :  { %v2229_v5 = vadd.f32 %v5209_v52, %v2228_v15  ;;  %v9141_v15 = vld [vmem:[#allocation41_spill] sm:$0xff] }
 0x61a   :  { %v2233_v48 = vsel %vm2232_vm10, %v5209_v52, %v2229_v5 }
 0x61b   :  { %v2238_v63 = vsel %vm2235_vm11, %v2237_v32, %v2233_v48 }
 0x61c   :  { %v2243_v11 = vsub.f32 1.0, %v2238_v63  ;;  %v2245_v57 = vmul.f32 0.0, %v2238_v63 }
 0x61e   :  { %v2244_v6 = vmul.f32 %v5211_v42, %v2243_v11 }
 0x620   :  { %v7349_v38 = vadd.f32 %v2245_v57, %v2244_v6 }
 0x622   :  { %9134 = vst [vmem:[#allocation60_spill] sm:$0xff] %v7349_v38  ;;  %2265 = vmatmul.f32.vlgmr.msrb.gmra.mxu3 %v7349_v38  ;;  %2285 = vmatmul.f32.vlgmr.msra.gmra.mxu0 %v7349_v38 }
 0x623   :  { %2305 = vmatmul.f32.vlgmr.msra.gmra.mxu1 %v7349_v38  ;;  %2507 = vmatpush.msrb.mxu3 %v7031_v58 }
 0x624   :  { %2576 = vmatpush.msra.mxu0 %v6879_v24  ;;  %2596 = vmatpush.msra.mxu1 %v7005_v21  ;;  %v9135_v24 = vld [vmem:[#allocation40_spill] sm:$0xff] }
 0x625   :  { %2508 = vmatpush.msrb.mxu3 %v7041_v2 }
 0x626   :  { %2577 = vmatpush.msra.mxu0 %v6889_v40  ;;  %2597 = vmatpush.msra.mxu1 %v7017_v31  ;;  %v9136_v40 = vld [vmem:[#allocation22_spill] sm:$0xff] }
 0x627   :  { %2509 = vmatpush.msrb.mxu3 %v7048_v3 }
 0x628   :  { %2578 = vmatpush.msra.mxu0 %v6892_v45  ;;  %2598 = vmatpush.msra.mxu1 %v7023_v20  ;;  %v9137_v45 = vld [vmem:[#allocation24_spill] sm:$0xff] }
 0x629   :  { %2510 = vmatpush.msrb.mxu3 %v7056_v25 }
 0x62a   :  { %2579 = vmatpush.msra.mxu0 %v6895_v47  ;;  %2599 = vmatpush.msra.mxu1 %v7044_v59  ;;  %v9138_v47 = vld [vmem:[#allocation39_spill] sm:$0xff] }
 0x62b   :  { %2511 = vmatpush.msrb.mxu3 %v7064_v34 }
 0x62c   :  { %2580 = vmatpush.msra.mxu0 %v6898_v29  ;;  %2600 = vmatpush.msra.mxu1 %v7052_v22  ;;  %v9139_v29 = vld [vmem:[#allocation26_spill] sm:$0xff] }
 0x62d   :  { %2512 = vmatpush.msrb.mxu3 %v7073_v17 }
 0x62e   :  { %2581 = vmatpush.msra.mxu0 %v6902_v9  ;;  %2601 = vmatpush.msra.mxu1 %v7060_v60  ;;  %v9140_v9 = vld [vmem:[#allocation33_spill] sm:$0xff] }
 0x62f   :  { %2513 = vmatpush.msrb.mxu3 %v7081_v16 }
 0x630   :  { %2582 = vmatpush.msra.mxu0 %v6915_v26  ;;  %2602 = vmatpush.msra.mxu1 %v7077_v44  ;;  %v9142_v26 = vld [vmem:[#allocation23_spill] sm:$0xff] }
 0x631   :  { %2514 = vmatpush.msrb.mxu3 %v7090_v12 }
 0x632   :  { %2583 = vmatpush.msra.mxu0 %v6921_v23  ;;  %2603 = vmatpush.msra.mxu1 %v7086_v56  ;;  %v9143_v23 = vld [vmem:[#allocation47_spill] sm:$0xff] }
 0x633   :  { %2515 = vmatpush.msrb.mxu3 %v7098_v37 }
 0x634   :  { %2584 = vmatpush.msra.mxu0 %v6926_v4  ;;  %2604 = vmatpush.msra.mxu1 %v7094_v46 }
 0x635   :  { %2516 = vmatpush.msrb.mxu3 %v7106_v0 }
 0x636   :  { %2585 = vmatpush.msra.mxu0 %v6941_v8  ;;  %2605 = vmatpush.msra.mxu1 %v7102_v49  ;;  %v2002_v8 = vadd.f32 %v7341_v50, %v7333_v7 }
 0x637   :  { %2517 = vmatpush.msrb.mxu3 %v7114_v51 }
 0x638   :  { %2586 = vmatpush.msra.mxu0 %v6948_v18  ;;  %2606 = vmatpush.msra.mxu1 %v7110_v55  ;;  %v9144_v18 = vld [vmem:[#allocation59_spill] sm:$0xff] }
 0x639   :  { %2518 = vmatpush.msrb.mxu3 %v7122_v39 }
 0x63a   :  { %2587 = vmatpush.msra.mxu0 %v6953_v43  ;;  %2607 = vmatpush.msra.mxu1 %v7118_v62 }
 0x63b   :  { %2519 = vmatpush.msrb.mxu3 %v7130_v41 }
 0x63c   :  { %2588 = vmatpush.msra.mxu0 %v6962_v19  ;;  %2608 = vmatpush.msra.mxu1 %v7126_v13 }
 0x63d   :  { %2520 = vmatpush.msrb.mxu3 %v9135_v24 }
 0x63e   :  { %2589 = vmatpush.msra.mxu0 %v9136_v40  ;;  %2609 = vmatpush.msra.mxu1 %v9137_v45 }
 0x63f   :  { %2521 = vmatpush.msrb.mxu3 %v9138_v47 }
 0x640   :  { %2590 = vmatpush.msra.mxu0 %v9139_v29  ;;  %2610 = vmatpush.msra.mxu1 %v9140_v9 }
 0x641   :  { %2522 = vmatpush.msrb.mxu3 %v9141_v15 }
 0x642   :  { %2591 = vmatpush.msra.mxu0 %v9142_v26  ;;  %2611 = vmatpush.msra.mxu1 %v9143_v23 }
 0x69f   :  { %v2286_v4 = vpop.f32.mrf.mxu0 }
 0x6a0   :  { %v2287_v43 = vadd.f32 %v2286_v4, %v9144_v18  ;;  %v2306_v4 = vpop.f32.mrf.mxu1 }
 0x6a2   :  { %v2329_v19 = vadd.f32 %v2287_v43, %v2002_v8 }
 0x6a4   :  { %v5073_v27 = vmul.f32 -1.442695, %v2329_v19  ;;  %v2307_v19 = vadd.f32 %v2306_v4, %v7343_v35 }
 0x6a5   :  { %v2266_v53 = vpop.f32.mrf.mxu3 }
 0x6a6   :  { %5212 = vpow2.f32 %v5073_v27  ;;  %v2267_v1 = vadd.f32 %v2266_v53, %v9147_v61 }
 0x6a8   :  { %v2309_v52 = vadd.f32 %v2267_v1, %v1982_v14  ;;  %v9148_v14 = vld [vmem:[#allocation44_spill] sm:$0xff] }
 0x6a9   :  { %v2022_v1 = vadd.f32 %v9148_v14, %v7346_v33 }
 0x6aa   :  { %v5072_v54 = vmul.f32 -1.442695, %v2309_v52 }
 0x6ac   :  { %v5213_v10 = vpop.eup %5212  ;;  %5214 = vpow2.f32 %v5072_v54 }
 0x6ad   :  { %v2333_v28 = vadd.f32 1.0, %v5213_v10 }
 0x6af   :  { %5216 = vrcp.f32 %v2333_v28  ;;  %v2345_v52 = vand.u32 2147483648, %v2333_v28  ;;  %vm2339_vm1 = vweird.f32 %v2333_v28  ;;  %v2343_v10 = vand.u32 2147483647, %v2333_v28 }
 0x6b1   :  { %vm2344_vm3 = vcmp.eq.f32.partialorder %v2343_v10, 8.507059e+37 }
 0x6b2   :  { %v5215_v5 = vpop.eup %5214 }
 0x6b3   :  { %v2313_v32 = vadd.f32 1.0, %v5215_v5 }
 0x6b5   :  { %5218 = vrcp.f32 %v2313_v32  ;;  %v5217_v50 = vpop.eup %5216  ;;  %v2325_v57 = vand.u32 2147483648, %v2313_v32  ;;  %v2323_v29 = vand.u32 2147483647, %v2313_v32  ;;  %vm2319_vm12 = vweird.f32 %v2313_v32 }
 0x6b6   :  { %v2335_v48 = vmul.f32 %v5217_v50, %v2333_v28  ;;  %vm2340_vm15 = vweird.f32 %v5217_v50  ;;  %v7418_v28 = vld [vmem:[#allocation5 + $0x168] sm:$0xff] }
 0x6b7   :  { %v2326_v43 = vor.u32 1.1754944e-38, %v2325_v57  ;;  %vm2324_vm14 = vcmp.eq.f32.partialorder %v2323_v29, 8.507059e+37  ;;  %vm2341_vm2 = vmor %vm2339_vm1, %vm2340_vm15  ;;  %v7428_v29 = vld [vmem:[#allocation5 + $0x138] sm:$0xff] }
 0x6b8   :  { %v2336_v42 = vsub.f32 1.0, %v2335_v48 }
 0x6ba   :  { %v2337_v26 = vmul.f32 %v5217_v50, %v2336_v42 }
 0x6bb   :  { %v5219_v63 = vpop.eup %5218 }
 0x6bc   :  { %v2315_v11 = vmul.f32 %v5219_v63, %v2313_v32  ;;  %vm2320_vm0 = vweird.f32 %v5219_v63  ;;  %v2338_v30 = vadd.f32 %v5217_v50, %v2337_v26  ;;  %v2346_v32 = vor.u32 1.1754944e-38, %v2345_v52 }
 0x6bd   :  { %vm2321_vm13 = vmor %vm2319_vm12, %vm2320_vm0 }
 0x6be   :  { %v2316_v6 = vsub.f32 1.0, %v2315_v11  ;;  %v2342_v48 = vsel %vm2341_vm2, %v5217_v50, %v2338_v30  ;;  %v7423_v50 = vld [vmem:[#allocation5 + $0x150] sm:$0xff] }
 0x6bf   :  { %v2347_v11 = vsel %vm2344_vm3, %v2346_v32, %v2342_v48  ;;  %v9155_v48 = vld [vmem:[#allocation36_spill] sm:$0xff] }
 0x6c0   :  { %v2317_v40 = vmul.f32 %v5219_v63, %v2316_v6  ;;  %v2352_v42 = vsub.f32 1.0, %v2347_v11  ;;  %v2354_v57 = vmul.f32 %v2347_v11, %v7349_v38  ;;  %v1962_v32 = vadd.f32 %v9155_v48, %v7346_v33  ;;  %v7603_v48 = vld [vmem:[#allocation5 + $0x40] sm:$0xff] }
 0x6c1   :  { %9156 = vst [vmem:[#allocation26_spill] sm:$0xff] %v7603_v48 }
 0x6c2   :  { %v2318_v8 = vadd.f32 %v5219_v63, %v2317_v40 }
 0x6c4   :  { %v2322_v27 = vsel %vm2321_vm13, %v5219_v63, %v2318_v8 }
 0x6c5   :  { %v2327_v53 = vsel %vm2324_vm14, %v2326_v43, %v2322_v27 }
 0x6c6   :  { %v2349_v54 = vmul.f32 %v2327_v53, %v2307_v19 }
 0x6c8   :  { %v2350_v5 = vadd.f32 %v2349_v54, %v2022_v1 }
 0x6ca   :  { %5220 = vtanh.f32 %v2350_v5 }
 0x6d0   :  { %v5221_v63 = vpop.eup %5220 }
 0x6d1   :  { %v2353_v6 = vmul.f32 %v5221_v63, %v2352_v42 }
 0x6d3   :  { %v7412_v40 = vadd.f32 %v2354_v57, %v2353_v6 }
 0x6d5   :  { %9149 = vst [vmem:[#allocation40_spill] sm:$0xff] %v7412_v40  ;;  %2374 = vmatmul.f32.vlgmr.msra.gmra.mxu2 %v7412_v40  ;;  %2394 = vmatmul.f32.vlgmr.msra.gmra.mxu3 %v7412_v40 }
 0x6d6   :  { %2414 = vmatmul.f32.vlgmr.msrb.gmra.mxu0 %v7412_v40  ;;  %2616 = vmatpush.msra.mxu2 %v7031_v58  ;;  %v7433_v58 = vld [vmem:[#allocation5 + $0x120] sm:$0xff] }
 0x6d7   :  { %2685 = vmatpush.msra.mxu3 %v7418_v28  ;;  %2705 = vmatpush.msrb.mxu0 %v7005_v21  ;;  %v7438_v21 = vld [vmem:[#allocation5 + $0x108] sm:$0xff] }
 0x6d8   :  { %2617 = vmatpush.msra.mxu2 %v7041_v2  ;;  %v7453_v2 = vld [vmem:[#allocation5 + $0xc0] sm:$0xff] }
 0x6d9   :  { %2686 = vmatpush.msra.mxu3 %v7423_v50  ;;  %2706 = vmatpush.msrb.mxu0 %v7017_v31  ;;  %v7443_v31 = vld [vmem:[#allocation5 + $0xf0] sm:$0xff] }
 0x6da   :  { %2618 = vmatpush.msra.mxu2 %v7048_v3  ;;  %v7463_v3 = vld [vmem:[#allocation5 + $0x90] sm:$0xff] }
 0x6db   :  { %2687 = vmatpush.msra.mxu3 %v7428_v29  ;;  %2707 = vmatpush.msrb.mxu0 %v7023_v20  ;;  %v7448_v20 = vld [vmem:[#allocation5 + $0xd8] sm:$0xff] }
 0x6dc   :  { %2619 = vmatpush.msra.mxu2 %v7056_v25  ;;  %v7473_v25 = vld [vmem:[#allocation5 + $0x60] sm:$0xff] }
 0x6dd   :  { %2688 = vmatpush.msra.mxu3 %v7433_v58  ;;  %2708 = vmatpush.msrb.mxu0 %v7044_v59  ;;  %v7458_v59 = vld [vmem:[#allocation5 + $0xa8] sm:$0xff] }
 0x6de   :  { %2620 = vmatpush.msra.mxu2 %v7064_v34  ;;  %v7483_v34 = vld [vmem:[#allocation5 + $0x30] sm:$0xff] }
 0x6df   :  { %2689 = vmatpush.msra.mxu3 %v7438_v21  ;;  %2709 = vmatpush.msrb.mxu0 %v7052_v22  ;;  %v7468_v22 = vld [vmem:[#allocation5 + $0x78] sm:$0xff]  ;;  %9150 = vst [vmem:[#allocation22_spill] sm:$0xff] %v7483_v34 }
 0x6e0   :  { %2621 = vmatpush.msra.mxu2 %v7073_v17  ;;  %v7488_v17 = vld [vmem:[#allocation5 + $0x18] sm:$0xff] }
 0x6e1   :  { %2690 = vmatpush.msra.mxu3 %v7443_v31  ;;  %2710 = vmatpush.msrb.mxu0 %v7060_v60  ;;  %v7478_v60 = vld [vmem:[#allocation5 + $0x48] sm:$0xff]  ;;  %9151 = vst [vmem:[#allocation24_spill] sm:$0xff] %v7488_v17 }
 0x6e2   :  { %2622 = vmatpush.msra.mxu2 %v7081_v16 }
 0x6e3   :  { %2691 = vmatpush.msra.mxu3 %v7448_v20  ;;  %2711 = vmatpush.msrb.mxu0 %v7077_v44  ;;  %v7493_v44 = vld [vmem:[#allocation5] sm:$0xff] }
 0x6e4   :  { %2623 = vmatpush.msra.mxu2 %v7090_v12  ;;  %9152 = vst [vmem:[#allocation39_spill] sm:$0xff] %v7493_v44  ;;  %v9153_v12 = vld [vmem:[#allocation34_spill] sm:$0xff] }
 0x6e5   :  { %2692 = vmatpush.msra.mxu3 %v7453_v2  ;;  %2712 = vmatpush.msrb.mxu0 %v7086_v56 }
 0x6e6   :  { %2624 = vmatpush.msra.mxu2 %v7098_v37  ;;  %v9154_v37 = vld [vmem:[#allocation58_spill] sm:$0xff] }
 0x6e7   :  { %2693 = vmatpush.msra.mxu3 %v7458_v59  ;;  %2713 = vmatpush.msrb.mxu0 %v7094_v46  ;;  %v1942_v46 = vadd.f32 %v9153_v12, %v7333_v7 }
 0x6e8   :  { %2625 = vmatpush.msra.mxu2 %v7106_v0 }
 0x6e9   :  { %2694 = vmatpush.msra.mxu3 %v7463_v3  ;;  %2714 = vmatpush.msrb.mxu0 %v7102_v49  ;;  %v1922_v49 = vadd.f32 %v9154_v37, %v9145_v36 }
 0x6ea   :  { %2626 = vmatpush.msra.mxu2 %v7114_v51 }
 0x6eb   :  { %2695 = vmatpush.msra.mxu3 %v7468_v22  ;;  %2715 = vmatpush.msrb.mxu0 %v7110_v55 }
 0x6ec   :  { %2627 = vmatpush.msra.mxu2 %v7122_v39 }
 0x6ed   :  { %2696 = vmatpush.msra.mxu3 %v7473_v25  ;;  %2716 = vmatpush.msrb.mxu0 %v7118_v62 }
 0x6ee   :  { %2628 = vmatpush.msra.mxu2 %v7130_v41 }
 0x6ef   :  { %2697 = vmatpush.msra.mxu3 %v7478_v60  ;;  %2717 = vmatpush.msrb.mxu0 %v7126_v13 }
 0x6f0   :  { %2629 = vmatpush.msra.mxu2 %v9135_v24 }
 0x6f1   :  { %2698 = vmatpush.msra.mxu3 %v7483_v34  ;;  %2718 = vmatpush.msrb.mxu0 %v9137_v45 }
 0x6f2   :  { %2630 = vmatpush.msra.mxu2 %v9138_v47 }
 0x6f3   :  { %2699 = vmatpush.msra.mxu3 %v7488_v17  ;;  %2719 = vmatpush.msrb.mxu0 %v9140_v9 }
 0x6f4   :  { %2631 = vmatpush.msra.mxu2 %v9141_v15 }
 0x6f5   :  { %2700 = vmatpush.msra.mxu3 %v7493_v44  ;;  %2720 = vmatpush.msrb.mxu0 %v9143_v23 }
 0x753   :  { %v2415_v53 = vpop.f32.mrf.mxu0 }
 0x754   :  { %v2416_v52 = vadd.f32 %v2415_v53, %v7343_v35  ;;  %v7575_v53 = vld [vmem:[#allocation5 + $0xa0] sm:$0xff] }
 0x758   :  { %v2375_v16 = vpop.f32.mrf.mxu2  ;;  %v2395_v56 = vpop.f32.mrf.mxu3 }
 0x759   :  { %v2376_v0 = vadd.f32 %v2375_v16, %v9147_v61  ;;  %v2396_v55 = vadd.f32 %v2395_v56, %v9144_v18 }
 0x75b   :  { %v2418_v51 = vadd.f32 %v2376_v0, %v1922_v49  ;;  %v2438_v62 = vadd.f32 %v2396_v55, %v1942_v46  ;;  %v7512_v55 = vld [vmem:[#allocation5 + $0x178] sm:$0xff] }
 0x75d   :  { %v5074_v39 = vmul.f32 -1.442695, %v2418_v51  ;;  %v5075_v13 = vmul.f32 -1.442695, %v2438_v62  ;;  %v7516_v51 = vld [vmem:[#allocation5 + $0x170] sm:$0xff]  ;;  %v7519_v62 = vld [vmem:[#allocation5 + $0x160] sm:$0xff] }
 0x75f   :  { %5222 = vpow2.f32 %v5074_v39  ;;  %v7523_v39 = vld [vmem:[#allocation5 + $0x158] sm:$0xff] }
 0x760   :  { %5224 = vpow2.f32 %v5075_v13  ;;  %v7526_v13 = vld [vmem:[#allocation5 + $0x148] sm:$0xff] }
 0x765   :  { %v5223_v41 = vpop.eup %5222 }
 0x766   :  { %v5225_v24 = vpop.eup %5224  ;;  %v2422_v45 = vadd.f32 1.0, %v5223_v41  ;;  %v7530_v41 = vld [vmem:[#allocation5 + $0x140] sm:$0xff] }
 0x767   :  { %v2442_v47 = vadd.f32 1.0, %v5225_v24  ;;  %v7533_v24 = vld [vmem:[#allocation5 + $0x130] sm:$0xff] }
 0x768   :  { %5226 = vrcp.f32 %v2422_v45  ;;  %v2434_v8 = vand.u32 2147483648, %v2422_v45  ;;  %v2432_v27 = vand.u32 2147483647, %v2422_v45  ;;  %vm2428_vm5 = vweird.f32 %v2422_v45 }
 0x769   :  { %5228 = vrcp.f32 %v2442_v47  ;;  %v2454_v42 = vand.u32 2147483648, %v2442_v47  ;;  %vm2448_vm9 = vweird.f32 %v2442_v47  ;;  %v2452_v63 = vand.u32 2147483647, %v2442_v47 }
 0x76a   :  { %v2435_v1 = vor.u32 1.1754944e-38, %v2434_v8  ;;  %vm2433_vm7 = vcmp.eq.f32.partialorder %v2432_v27, 8.507059e+37  ;;  %v7561_v8 = vld [vmem:[#allocation5 + $0xd0] sm:$0xff] }
 0x76b   :  { %v2455_v16 = vor.u32 1.1754944e-38, %v2454_v42  ;;  %vm2453_vm11 = vcmp.eq.f32.partialorder %v2452_v63, 8.507059e+37  ;;  %v7572_v27 = vld [vmem:[#allocation5 + $0xb0] sm:$0xff]  ;;  %v7614_v42 = vld [vmem:[#allocation5 + $0x20] sm:$0xff] }
 0x76c   :  { %9159 = vst [vmem:[#allocation23_spill] sm:$0xff] %v7614_v42  ;;  %v7617_v63 = vld [vmem:[#allocation5 + $0x10] sm:$0xff] }
 0x76d   :  { %9160 = vst [vmem:[#allocation47_spill] sm:$0xff] %v7617_v63 }
 0x76e   :  { %v5227_v9 = vpop.eup %5226 }
 0x76f   :  { %v5229_v15 = vpop.eup %5228  ;;  %v2424_v23 = vmul.f32 %v5227_v9, %v2422_v45  ;;  %vm2429_vm4 = vweird.f32 %v5227_v9  ;;  %v7537_v45 = vld [vmem:[#allocation5 + $0x128] sm:$0xff] }
 0x770   :  { %v2444_v26 = vmul.f32 %v5229_v15, %v2442_v47  ;;  %vm2430_vm6 = vmor %vm2428_vm5, %vm2429_vm4  ;;  %vm2449_vm8 = vweird.f32 %v5229_v15  ;;  %v7540_v47 = vld [vmem:[#allocation5 + $0x118] sm:$0xff]  ;;  %vm3019_vm4 = vcmask 1041408  }
 0x771   :  { %v2425_v4 = vsub.f32 1.0, %v2424_v23  ;;  %vm2450_vm10 = vmor %vm2448_vm9, %vm2449_vm8  ;;  %v7551_v23 = vld [vmem:[#allocation5 + $0xf8] sm:$0xff] }
 0x772   :  { %v2445_v43 = vsub.f32 1.0, %v2444_v26  ;;  %v7554_v26 = vld [vmem:[#allocation5 + $0xe8] sm:$0xff] }
 0x773   :  { %v2426_v19 = vmul.f32 %v5227_v9, %v2425_v4  ;;  %v7558_v4 = vld [vmem:[#allocation5 + $0xe0] sm:$0xff] }
 0x774   :  { %v2446_v30 = vmul.f32 %v5229_v15, %v2445_v43  ;;  %v7565_v43 = vld [vmem:[#allocation5 + $0xc8] sm:$0xff] }
 0x775   :  { %v2427_v14 = vadd.f32 %v5227_v9, %v2426_v19  ;;  %v7568_v19 = vld [vmem:[#allocation5 + $0xb8] sm:$0xff] }
 0x776   :  { %v2447_v5 = vadd.f32 %v5229_v15, %v2446_v30  ;;  %v7579_v30 = vld [vmem:[#allocation5 + $0x98] sm:$0xff] }
 0x777   :  { %v2431_v54 = vsel %vm2430_vm6, %v5227_v9, %v2427_v14  ;;  %v7544_v9 = vld [vmem:[#allocation5 + $0x110] sm:$0xff]  ;;  %v7582_v14 = vld [vmem:[#allocation5 + $0x88] sm:$0xff] }
 0x778   :  { %v2436_v10 = vsel %vm2433_vm7, %v2435_v1, %v2431_v54  ;;  %v2451_v57 = vsel %vm2450_vm10, %v5229_v15, %v2447_v5  ;;  %v7547_v15 = vld [vmem:[#allocation5 + $0x100] sm:$0xff]  ;;  %v7593_v54 = vld [vmem:[#allocation5 + $0x68] sm:$0xff]  ;;  %v7600_v5 = vld [vmem:[#allocation5 + $0x50] sm:$0xff] }
 0x779   :  { %v2458_v11 = vmul.f32 %v2436_v10, %v2416_v52  ;;  %v2456_v56 = vsel %vm2453_vm11, %v2455_v16, %v2451_v57  ;;  %v7586_v1 = vld [vmem:[#allocation5 + $0x80] sm:$0xff]  ;;  %v7589_v52 = vld [vmem:[#allocation5 + $0x70] sm:$0xff]  ;;  %v7596_v10 = vld [vmem:[#allocation5 + $0x58] sm:$0xff] }
 0x77a   :  { %v2461_v12 = vsub.f32 1.0, %v2456_v56  ;;  %v2463_v49 = vmul.f32 %v2456_v56, %v7412_v40  ;;  %v9162_v16 = vld [vmem:[#allocation31_spill] sm:$0xff] }
 0x77b   :  { %v2459_v6 = vadd.f32 %v2458_v11, %v1962_v32  ;;  %v7607_v32 = vld [vmem:[#allocation5 + $0x38] sm:$0xff]  ;;  %v7610_v11 = vld [vmem:[#allocation5 + $0x28] sm:$0xff]  ;;  %v1862_v56 = vadd.f32 %v9162_v16, %v9145_v36 }
 0x77c   :  { %9157 = vst [vmem:[#allocation33_spill] sm:$0xff] %v7607_v32  ;;  %v9163_v40 = vld [vmem:[#allocation35_spill] sm:$0xff] }
 0x77d   :  { %5230 = vtanh.f32 %v2459_v6  ;;  %9158 = vst [vmem:[#allocation41_spill] sm:$0xff] %v7610_v11  ;;  %v7621_v6 = vld [vmem:[#allocation5 + $0x8] sm:$0xff]  ;;  %v1882_v38 = vadd.f32 %v9163_v40, %v7333_v7 }
 0x77e   :  { %9161 = vst [vmem:[#allocation56_spill] sm:$0xff] %v7621_v6 }
 0x783   :  { %v5231_v46 = vpop.eup %5230 }
 0x784   :  { %v2462_v37 = vmul.f32 %v5231_v46, %v2461_v12 }
 0x786   :  { %v7507_v0 = vadd.f32 %v2463_v49, %v2462_v37 }
 0x788   :  { %2483 = vmatmul.f32.vlgmr.msrb.gmra.mxu1 %v7507_v0  ;;  %2503 = vmatmul.f32.vlgmr.msrb.gmra.mxu2 %v7507_v0 }
 0x789   :  { %2523 = vmatmul.f32.vlgmr.msrb.gmra.mxu3 %v7507_v0  ;;  %2725 = vmatpush.msrb.mxu1 %v7512_v55 }
 0x78a   :  { %2794 = vmatpush.msrb.mxu2 %v7418_v28  ;;  %2814 = vmatpush.msrb.mxu3 %v7516_v51 }
 0x78b   :  { %2726 = vmatpush.msrb.mxu1 %v7519_v62 }
 0x78c   :  { %2795 = vmatpush.msrb.mxu2 %v7423_v50  ;;  %2815 = vmatpush.msrb.mxu3 %v7523_v39 }
 0x78d   :  { %2727 = vmatpush.msrb.mxu1 %v7526_v13 }
 0x78e   :  { %2796 = vmatpush.msrb.mxu2 %v7428_v29  ;;  %2816 = vmatpush.msrb.mxu3 %v7530_v41 }
 0x78f   :  { %2728 = vmatpush.msrb.mxu1 %v7533_v24 }
 0x790   :  { %2797 = vmatpush.msrb.mxu2 %v7433_v58  ;;  %2817 = vmatpush.msrb.mxu3 %v7537_v45 }
 0x791   :  { %2729 = vmatpush.msrb.mxu1 %v7540_v47 }
 0x792   :  { %2798 = vmatpush.msrb.mxu2 %v7438_v21  ;;  %2818 = vmatpush.msrb.mxu3 %v7544_v9 }
 0x793   :  { %2730 = vmatpush.msrb.mxu1 %v7547_v15 }
 0x794   :  { %2799 = vmatpush.msrb.mxu2 %v7443_v31  ;;  %2819 = vmatpush.msrb.mxu3 %v7551_v23 }
 0x795   :  { %2731 = vmatpush.msrb.mxu1 %v7554_v26 }
 0x796   :  { %2800 = vmatpush.msrb.mxu2 %v7448_v20  ;;  %2820 = vmatpush.msrb.mxu3 %v7558_v4 }
 0x797   :  { %2732 = vmatpush.msrb.mxu1 %v7561_v8 }
 0x798   :  { %2801 = vmatpush.msrb.mxu2 %v7453_v2  ;;  %2821 = vmatpush.msrb.mxu3 %v7565_v43 }
 0x799   :  { %2733 = vmatpush.msrb.mxu1 %v7568_v19 }
 0x79a   :  { %2802 = vmatpush.msrb.mxu2 %v7458_v59  ;;  %2822 = vmatpush.msrb.mxu3 %v7572_v27 }
 0x79b   :  { %2734 = vmatpush.msrb.mxu1 %v7575_v53 }
 0x79c   :  { %2803 = vmatpush.msrb.mxu2 %v7463_v3  ;;  %2823 = vmatpush.msrb.mxu3 %v7579_v30 }
 0x79d   :  { %2735 = vmatpush.msrb.mxu1 %v7582_v14 }
 0x79e   :  { %2804 = vmatpush.msrb.mxu2 %v7468_v22  ;;  %2824 = vmatpush.msrb.mxu3 %v7586_v1 }
 0x79f   :  { %2736 = vmatpush.msrb.mxu1 %v7589_v52 }
 0x7a0   :  { %2805 = vmatpush.msrb.mxu2 %v7473_v25  ;;  %2825 = vmatpush.msrb.mxu3 %v7593_v54 }
 0x7a1   :  { %2737 = vmatpush.msrb.mxu1 %v7596_v10 }
 0x7a2   :  { %2806 = vmatpush.msrb.mxu2 %v7478_v60  ;;  %2826 = vmatpush.msrb.mxu3 %v7600_v5 }
 0x7a3   :  { %2738 = vmatpush.msrb.mxu1 %v7603_v48 }
 0x7a4   :  { %2807 = vmatpush.msrb.mxu2 %v7483_v34  ;;  %2827 = vmatpush.msrb.mxu3 %v7607_v32 }
 0x7a5   :  { %2739 = vmatpush.msrb.mxu1 %v7610_v11 }
 0x7a6   :  { %2808 = vmatpush.msrb.mxu2 %v7488_v17  ;;  %2828 = vmatpush.msrb.mxu3 %v7614_v42 }
 0x7a7   :  { %2740 = vmatpush.msrb.mxu1 %v7617_v63 }
 0x7a8   :  { %2809 = vmatpush.msrb.mxu2 %v7493_v44  ;;  %2829 = vmatpush.msrb.mxu3 %v7621_v6 }
 0x805   :  { %v2484_v57 = vpop.f32.mrf.mxu1 }
 0x806   :  { %v2485_v12 = vadd.f32 %v2484_v57, %v9147_v61 }
 0x808   :  { %v2527_v46 = vadd.f32 %v2485_v12, %v1862_v56 }
 0x80a   :  { %v5076_v37 = vmul.f32 -1.442695, %v2527_v46 }
 0x80b   :  { %v2504_v49 = vpop.f32.mrf.mxu2 }
 0x80c   :  { %5232 = vpow2.f32 %v5076_v37  ;;  %v2505_v63 = vadd.f32 %v2504_v49, %v9144_v18  ;;  %v2524_v37 = vpop.f32.mrf.mxu3 }
 0x80e   :  { %v2547_v44 = vadd.f32 %v2505_v63, %v1882_v38 }
 0x810   :  { %v5077_v42 = vmul.f32 -1.442695, %v2547_v44 }
 0x812   :  { %v5233_v17 = vpop.eup %5232  ;;  %5234 = vpow2.f32 %v5077_v42 }
 0x813   :  { %v2531_v6 = vadd.f32 1.0, %v5233_v17  ;;  %v2525_v17 = vadd.f32 %v2524_v37, %v7343_v35 }
 0x815   :  { %5236 = vrcp.f32 %v2531_v6  ;;  %v2543_v12 = vand.u32 2147483648, %v2531_v6  ;;  %v2541_v61 = vand.u32 2147483647, %v2531_v6  ;;  %vm2537_vm12 = vweird.f32 %v2531_v6 }
 0x817   :  { %v2544_v38 = vor.u32 1.1754944e-38, %v2543_v12  ;;  %vm2542_vm14 = vcmp.eq.f32.partialorder %v2541_v61, 8.507059e+37 }
 0x818   :  { %v5235_v11 = vpop.eup %5234 }
 0x819   :  { %v2551_v32 = vadd.f32 1.0, %v5235_v11  ;;  %v9164_v11 = vld [vmem:[#allocation54_spill] sm:$0xff] }
 0x81a   :  { %v1902_v63 = vadd.f32 %v9164_v11, %v7346_v33 }
 0x81b   :  { %v5237_v16 = vpop.eup %5236  ;;  %5238 = vrcp.f32 %v2551_v32  ;;  %v2561_v34 = vand.u32 2147483647, %v2551_v32  ;;  %vm2557_vm1 = vweird.f32 %v2551_v32 }
 0x81c   :  { %v2533_v57 = vmul.f32 %v5237_v16, %v2531_v6  ;;  %vm2538_vm0 = vweird.f32 %v5237_v16 }
 0x81d   :  { %vm2539_vm13 = vmor %vm2537_vm12, %vm2538_vm0  ;;  %vm2562_vm3 = vcmp.eq.f32.partialorder %v2561_v34, 8.507059e+37  ;;  %v7647_v34 = vld [vmem:[%s8890_s9] ss:$0 sm:$0xff] }
 0x81e   :  { %v2534_v56 = vsub.f32 1.0, %v2533_v57 }
 0x820   :  { %v2535_v46 = vmul.f32 %v5237_v16, %v2534_v56  ;;  %v2563_v56 = vand.u32 2147483648, %v2551_v32 }
 0x821   :  { %v5239_v40 = vpop.eup %5238 }
 0x822   :  { %v2553_v7 = vmul.f32 %v5239_v40, %v2551_v32  ;;  %v2536_v49 = vadd.f32 %v5237_v16, %v2535_v46  ;;  %vm2558_vm15 = vweird.f32 %v5239_v40  ;;  %v2564_v6 = vor.u32 1.1754944e-38, %v2563_v56  ;;  %v9165_v32 = vld [vmem:[#allocation20_spill] sm:$0xff] }
 0x823   :  { %vm2559_vm2 = vmor %vm2557_vm1, %vm2558_vm15 }
 0x824   :  { %v2554_v44 = vsub.f32 1.0, %v2553_v7  ;;  %v2540_v42 = vsel %vm2539_vm13, %v5237_v16, %v2536_v49 }
 0x825   :  { %v2545_v57 = vsel %vm2542_vm14, %v2544_v38, %v2540_v42 }
 0x826   :  { %v2555_v18 = vmul.f32 %v5239_v40, %v2554_v44  ;;  %v2567_v36 = vmul.f32 %v2545_v57, %v2525_v17 }
 0x828   :  { %v2556_v48 = vadd.f32 %v5239_v40, %v2555_v18  ;;  %v2568_v46 = vadd.f32 %v2567_v36, %v1902_v63 }
 0x82a   :  { %v2560_v12 = vsel %vm2559_vm2, %v5239_v40, %v2556_v48  ;;  %5240 = vtanh.f32 %v2568_v46  ;;  %v9166_v48 = vld [vmem:[#allocation25_spill] sm:$0xff] }
 0x82b   :  { %v2565_v7 = vsel %vm2562_vm3, %v2564_v6, %v2560_v12  ;;  %v2465_v40 = vadd.f32 %v7507_v0, %v9166_v48 }
 0x82c   :  { %v2570_v16 = vsub.f32 1.0, %v2565_v7  ;;  %v2572_v49 = vmul.f32 %v2565_v7, %v7507_v0  ;;  %v9176_v0 = vld [vmem:[#allocation52_spill] sm:$0xff] }
 0x82d   :  { %v7660_v42 = vmul.f32 0.5, %v2465_v40 }
 0x830   :  { %v5241_v61 = vpop.eup %5240 }
 0x831   :  { %v2571_v37 = vmul.f32 %v5241_v61, %v2570_v16 }
 0x833   :  { %v7634_v38 = vadd.f32 %v2572_v49, %v2571_v37 }
 0x835   :  { %2592 = vmatmul.f32.vlgmr.msra.gmra.mxu0 %v7634_v38  ;;  %2612 = vmatmul.f32.vlgmr.msra.gmra.mxu1 %v7634_v38  ;;  %v2574_v18 = vadd.f32 %v7634_v38, %v9165_v32 }
 0x836   :  { %2632 = vmatmul.f32.vlgmr.msra.gmra.mxu2 %v7634_v38  ;;  %2834 = vmatpush.msra.mxu0 %v7512_v55 }
 0x837   :  { %v7642_v36 = vmul.f32 0.5, %v2574_v18  ;;  %2903 = vmatpush.msra.mxu1 %v7418_v28  ;;  %2923 = vmatpush.msra.mxu2 %v7516_v51  ;;  %v3039_v28 = vmul.f32 %v7647_v34, %v7660_v42  ;;  %v9177_v51 = vld [vmem:[#allocation43_spill] sm:$0xff] }
 0x838   :  { %2835 = vmatpush.msra.mxu0 %v7519_v62 }
 0x839   :  { %v3035_v44 = vmul.f32 %v7647_v34, %v7642_v36  ;;  %2904 = vmatpush.msra.mxu1 %v7423_v50  ;;  %2924 = vmatpush.msra.mxu2 %v7523_v39  ;;  %v3040_v50 = vsel %vm3019_vm4, %v3039_v28, 0.0  ;;  %v1802_v39 = vadd.f32 %v9177_v51, %v9176_v0 }
 0x83a   :  { %2836 = vmatpush.msra.mxu0 %v7526_v13 }
 0x83b   :  { %v3036_v17 = vsel %vm3019_vm4, %v3035_v44, 0.0  ;;  %2905 = vmatpush.msra.mxu1 %v7428_v29  ;;  %2925 = vmatpush.msra.mxu2 %v7530_v41  ;;  %v9167_v29 = vld [vmem:[#allocation26_spill] sm:$0xff]  ;;  %v9178_v41 = vld [vmem:[#allocation57_spill] sm:$0xff] }
 0x83c   :  { %3037 = vadd.xlane.f32.xlu2 %v3036_v17  ;;  %2837 = vmatpush.msra.mxu0 %v7533_v24 }
 0x83d   :  { %2906 = vmatpush.msra.mxu1 %v7433_v58  ;;  %2926 = vmatpush.msra.mxu2 %v7537_v45  ;;  %v9168_v58 = vld [vmem:[#allocation22_spill] sm:$0xff]  ;;  %v9179_v45 = vld [vmem:[#allocation37_spill] sm:$0xff] }
 0x83e   :  { %2838 = vmatpush.msra.mxu0 %v7540_v47 }
 0x83f   :  { %2907 = vmatpush.msra.mxu1 %v7438_v21  ;;  %2927 = vmatpush.msra.mxu2 %v7544_v9  ;;  %v9169_v21 = vld [vmem:[#allocation33_spill] sm:$0xff]  ;;  %v1822_v9 = vadd.f32 %v9179_v45, %v9178_v41 }
 0x840   :  { %2839 = vmatpush.msra.mxu0 %v7547_v15 }
 0x841   :  { %2908 = vmatpush.msra.mxu1 %v7443_v31  ;;  %2928 = vmatpush.msra.mxu2 %v7551_v23  ;;  %v9170_v31 = vld [vmem:[#allocation41_spill] sm:$0xff] }
 0x842   :  { %2840 = vmatpush.msra.mxu0 %v7554_v26  ;;  %v9180_v23 = vld [vmem:[#allocation45_spill] sm:$0xff] }
 0x843   :  { %2909 = vmatpush.msra.mxu1 %v7448_v20  ;;  %2929 = vmatpush.msra.mxu2 %v7558_v4  ;;  %v9171_v20 = vld [vmem:[#allocation24_spill] sm:$0xff] }
 0x844   :  { %3041 = vadd.xlane.f32.xlu2 %v3040_v50  ;;  %2841 = vmatpush.msra.mxu0 %v7561_v8 }
 0x845   :  { %2910 = vmatpush.msra.mxu1 %v7453_v2  ;;  %2930 = vmatpush.msra.mxu2 %v7565_v43  ;;  %v9172_v2 = vld [vmem:[#allocation23_spill] sm:$0xff] }
 0x846   :  { %2842 = vmatpush.msra.mxu0 %v7568_v19  ;;  %v9181_v43 = vld [vmem:[#allocation59_spill] sm:$0xff] }
 0x847   :  { %2911 = vmatpush.msra.mxu1 %v7458_v59  ;;  %2931 = vmatpush.msra.mxu2 %v7572_v27  ;;  %v9173_v59 = vld [vmem:[#allocation47_spill] sm:$0xff] }
 0x848   :  { %2843 = vmatpush.msra.mxu0 %v7575_v53 }
 0x849   :  { %2912 = vmatpush.msra.mxu1 %v7463_v3  ;;  %2932 = vmatpush.msra.mxu2 %v7579_v30  ;;  %v9174_v3 = vld [vmem:[#allocation39_spill] sm:$0xff] }
 0x84a   :  { %2844 = vmatpush.msra.mxu0 %v7582_v14 }
 0x84b   :  { %2913 = vmatpush.msra.mxu1 %v7468_v22  ;;  %2933 = vmatpush.msra.mxu2 %v7586_v1  ;;  %v9175_v22 = vld [vmem:[#allocation56_spill] sm:$0xff] }
 0x84c   :  { %2845 = vmatpush.msra.mxu0 %v7589_v52 }
 0x84d   :  { %2914 = vmatpush.msra.mxu1 %v7473_v25  ;;  %2934 = vmatpush.msra.mxu2 %v7593_v54 }
 0x84e   :  { %2846 = vmatpush.msra.mxu0 %v7596_v10 }
 0x84f   :  { %2915 = vmatpush.msra.mxu1 %v7478_v60  ;;  %2935 = vmatpush.msra.mxu2 %v7600_v5 }
 0x850   :  { %2847 = vmatpush.msra.mxu0 %v9167_v29 }
 0x851   :  { %2916 = vmatpush.msra.mxu1 %v9168_v58  ;;  %2936 = vmatpush.msra.mxu2 %v9169_v21  ;;  %v9182_v21 = vld [vmem:[#allocation55_spill] sm:$0xff] }
 0x852   :  { %2848 = vmatpush.msra.mxu0 %v9170_v31 }
 0x853   :  { %2917 = vmatpush.msra.mxu1 %v9171_v20  ;;  %2937 = vmatpush.msra.mxu2 %v9172_v2  ;;  %v1842_v20 = vadd.f32 %v9182_v21, %v7346_v33 }
 0x854   :  { %2849 = vmatpush.msra.mxu0 %v9173_v59 }
 0x855   :  { %2918 = vmatpush.msra.mxu1 %v9174_v3  ;;  %2938 = vmatpush.msra.mxu2 %v9175_v22 }
 0x8b2   :  { %v2593_v25 = vpop.f32.mrf.mxu0  ;;  %v2613_v60 = vpop.f32.mrf.mxu1 }
 0x8b3   :  { %v2594_v4 = vadd.f32 %v2593_v25, %v9180_v23  ;;  %v2614_v27 = vadd.f32 %v2613_v60, %v9181_v43 }
 0x8b5   :  { %v2636_v30 = vadd.f32 %v2594_v4, %v1802_v39  ;;  %v2656_v1 = vadd.f32 %v2614_v27, %v1822_v9 }
 0x8b7   :  { %v5078_v54 = vmul.f32 -1.442695, %v2636_v30  ;;  %v5079_v5 = vmul.f32 -1.442695, %v2656_v1 }
 0x8b9   :  { %5242 = vpow2.f32 %v5078_v54  ;;  %v2633_v48 = vpop.f32.mrf.mxu2 }
 0x8ba   :  { %5244 = vpow2.f32 %v5079_v5  ;;  %v2634_v17 = vadd.f32 %v2633_v48, %v7343_v35 }
 0x8bf   :  { %v5243_v11 = vpop.eup %5242 }
 0x8c0   :  { %v5245_v63 = vpop.eup %5244  ;;  %v2640_v57 = vadd.f32 1.0, %v5243_v11 }
 0x8c1   :  { %v2660_v56 = vadd.f32 1.0, %v5245_v63 }
 0x8c2   :  { %5246 = vrcp.f32 %v2640_v57  ;;  %v2652_v37 = vand.u32 2147483648, %v2640_v57  ;;  %v2650_v32 = vand.u32 2147483647, %v2640_v57  ;;  %vm2646_vm6 = vweird.f32 %v2640_v57 }
 0x8c3   :  { %5248 = vrcp.f32 %v2660_v56  ;;  %v2672_v2 = vand.u32 2147483648, %v2660_v56  ;;  %vm2666_vm10 = vweird.f32 %v2660_v56  ;;  %v2670_v22 = vand.u32 2147483647, %v2660_v56 }
 0x8c4   :  { %v2653_v44 = vor.u32 1.1754944e-38, %v2652_v37  ;;  %vm2651_vm8 = vcmp.eq.f32.partialorder %v2650_v32, 8.507059e+37 }
 0x8c5   :  { %v2673_v51 = vor.u32 1.1754944e-38, %v2672_v2  ;;  %vm2671_vm0 = vcmp.eq.f32.partialorder %v2670_v22, 8.507059e+37 }
 0x8c8   :  { %v5247_v46 = vpop.eup %5246 }
 0x8c9   :  { %v5249_v6 = vpop.eup %5248  ;;  %v2642_v12 = vmul.f32 %v5247_v46, %v2640_v57  ;;  %vm2647_vm5 = vweird.f32 %v5247_v46 }
 0x8ca   :  { %v2662_v7 = vmul.f32 %v5249_v6, %v2660_v56  ;;  %vm2648_vm7 = vmor %vm2646_vm6, %vm2647_vm5  ;;  %vm2667_vm9 = vweird.f32 %v5249_v6 }
 0x8cb   :  { %v2643_v16 = vsub.f32 1.0, %v2642_v12  ;;  %vm2668_vm11 = vmor %vm2666_vm10, %vm2667_vm9 }
 0x8cc   :  { %v2663_v61 = vsub.f32 1.0, %v2662_v7 }
 0x8cd   :  { %v2644_v49 = vmul.f32 %v5247_v46, %v2643_v16 }
 0x8ce   :  { %v2664_v18 = vmul.f32 %v5249_v6, %v2663_v61 }
 0x8cf   :  { %v2645_v40 = vadd.f32 %v5247_v46, %v2644_v49 }
 0x8d0   :  { %v2665_v58 = vadd.f32 %v5249_v6, %v2664_v18  ;;  %v9185_v18 = vld [vmem:[#allocation30_spill] sm:$0xff] }
 0x8d1   :  { %v2649_v28 = vsel %vm2648_vm7, %v5247_v46, %v2645_v40  ;;  %v1782_v48 = vadd.f32 %v9185_v18, %v7346_v33 }
 0x8d2   :  { %v2654_v50 = vsel %vm2651_vm8, %v2653_v44, %v2649_v28  ;;  %v2669_v60 = vsel %vm2668_vm11, %v5249_v6, %v2665_v58 }
 0x8d3   :  { %v2676_v3 = vmul.f32 %v2654_v50, %v2634_v17  ;;  %v2674_v39 = vsel %vm2671_vm0, %v2673_v51, %v2669_v60  ;;  %v9186_v60 = vld [vmem:[#allocation28_spill] sm:$0xff] }
 0x8d4   :  { %v2679_v45 = vsub.f32 1.0, %v2674_v39  ;;  %v2681_v27 = vmul.f32 %v2674_v39, %v7634_v38 }
 0x8d5   :  { %v2677_v25 = vadd.f32 %v2676_v3, %v1842_v20 }
 0x8d7   :  { %5250 = vtanh.f32 %v2677_v25 }
 0x8dd   :  { %v5251_v9 = vpop.eup %5250 }
 0x8de   :  { %v2680_v4 = vmul.f32 %v5251_v9, %v2679_v45  ;;  %v9187_v45 = vld [vmem:[#allocation19_spill] sm:$0xff] }
 0x8e0   :  { %v7716_v30 = vadd.f32 %v2681_v27, %v2680_v4 }
 0x8e2   :  { %2701 = vmatmul.f32.vlgmr.msra.gmra.mxu3 %v7716_v30  ;;  %2721 = vmatmul.f32.vlgmr.msrb.gmra.mxu0 %v7716_v30  ;;  %v2683_v9 = vadd.f32 %v7716_v30, %v9187_v45 }
 0x8e3   :  { %2741 = vmatmul.f32.vlgmr.msrb.gmra.mxu1 %v7716_v30  ;;  %2943 = vmatpush.msra.mxu3 %v7512_v55 }
 0x8e5   :  { %2944 = vmatpush.msra.mxu3 %v7519_v62  ;;  %v9183_v62 = vld [vmem:[#allocation53_spill] sm:$0xff] }
 0x8e7   :  { %2945 = vmatpush.msra.mxu3 %v7526_v13  ;;  %v1762_v13 = vadd.f32 %v9183_v62, %v9178_v41 }
 0x8e9   :  { %2946 = vmatpush.msra.mxu3 %v7533_v24 }
 0x8eb   :  { %2947 = vmatpush.msra.mxu3 %v7540_v47 }
 0x8ed   :  { %2948 = vmatpush.msra.mxu3 %v7547_v15 }
 0x8ef   :  { %2949 = vmatpush.msra.mxu3 %v7554_v26 }
 0x8f1   :  { %2950 = vmatpush.msra.mxu3 %v7561_v8  ;;  %v9184_v8 = vld [vmem:[#allocation49_spill] sm:$0xff] }
 0x8f3   :  { %2951 = vmatpush.msra.mxu3 %v7568_v19  ;;  %v1742_v19 = vadd.f32 %v9184_v8, %v9176_v0 }
 0x8f5   :  { %2952 = vmatpush.msra.mxu3 %v7575_v53 }
 0x8f7   :  { %2953 = vmatpush.msra.mxu3 %v7582_v14 }
 0x8f9   :  { %2954 = vmatpush.msra.mxu3 %v7589_v52 }
 0x8fb   :  { %2955 = vmatpush.msra.mxu3 %v7596_v10 }
 0x8fd   :  { %2956 = vmatpush.msra.mxu3 %v9167_v29 }
 0x8ff   :  { %2957 = vmatpush.msra.mxu3 %v9170_v31 }
 0x901   :  { %2958 = vmatpush.msra.mxu3 %v9173_v59 }
 0x95f   :  { %v2722_v55 = vpop.f32.mrf.mxu0 }
 0x960   :  { %v2723_v24 = vadd.f32 %v2722_v55, %v9181_v43  ;;  %v2742_v12 = vpop.f32.mrf.mxu1  ;;  %v7761_v55 = vmul.f32 0.5, %v2683_v9 }
 0x961   :  { %v2743_v61 = vadd.f32 %v2742_v12, %v7343_v35 }
 0x962   :  { %v2765_v47 = vadd.f32 %v2723_v24, %v1762_v13  ;;  %v3031_v62 = vmul.f32 %v7647_v34, %v7761_v55  ;;  %v9188_v13 = vld [vmem:[#allocation51_spill] sm:$0xff]  ;;  %v9189_v24 = vld [vmem:[#allocation60_spill] sm:$0xff] }
 0x964   :  { %v5081_v15 = vmul.f32 -1.442695, %v2765_v47  ;;  %v2247_v47 = vadd.f32 %v9189_v24, %v9188_v13 }
 0x965   :  { %v2702_v26 = vpop.f32.mrf.mxu3 }
 0x966   :  { %5252 = vpow2.f32 %v5081_v15  ;;  %v2703_v53 = vadd.f32 %v2702_v26, %v9180_v23  ;;  %v3032_v15 = vsel %vm3019_vm4, %v3031_v62, 0.0  ;;  %v7768_v26 = vmul.f32 0.5, %v2247_v47 }
 0x968   :  { %v2745_v14 = vadd.f32 %v2703_v53, %v1742_v19 }
 0x96a   :  { %v5080_v52 = vmul.f32 -1.442695, %v2745_v14  ;;  %v9190_v14 = vld [vmem:[#allocation29_spill] sm:$0xff] }
 0x96c   :  { %v5253_v10 = vpop.eup %5252  ;;  %5254 = vpow2.f32 %v5080_v52  ;;  %v1702_v52 = vadd.f32 %v9190_v14, %v9178_v41 }
 0x96d   :  { %v2769_v38 = vadd.f32 1.0, %v5253_v10  ;;  %v9191_v10 = vld [vmem:[#allocation50_spill] sm:$0xff] }
 0x96f   :  { %5256 = vrcp.f32 %v2769_v38  ;;  %v2781_v40 = vand.u32 2147483648, %v2769_v38  ;;  %vm2775_vm2 = vweird.f32 %v2769_v38  ;;  %v2779_v17 = vand.u32 2147483647, %v2769_v38 }
 0x971   :  { %v2782_v58 = vor.u32 1.1754944e-38, %v2781_v40  ;;  %vm2780_vm5 = vcmp.eq.f32.partialorder %v2779_v17, 8.507059e+37 }
 0x972   :  { %v5255_v29 = vpop.eup %5254 }
 0x973   :  { %v2749_v31 = vadd.f32 1.0, %v5255_v29 }
 0x975   :  { %5258 = vrcp.f32 %v2749_v31  ;;  %v5257_v59 = vpop.eup %5256  ;;  %v2761_v57 = vand.u32 2147483648, %v2749_v31  ;;  %v2759_v46 = vand.u32 2147483647, %v2749_v31  ;;  %vm2755_vm13 = vweird.f32 %v2749_v31 }
 0x976   :  { %v2771_v1 = vmul.f32 %v5257_v59, %v2769_v38  ;;  %vm2776_vm1 = vweird.f32 %v5257_v59  ;;  %v1682_v38 = vadd.f32 %v9191_v10, %v9176_v0 }
 0x977   :  { %v2762_v16 = vor.u32 1.1754944e-38, %v2761_v57  ;;  %vm2760_vm15 = vcmp.eq.f32.partialorder %v2759_v46, 8.507059e+37  ;;  %vm2777_vm3 = vmor %vm2775_vm2, %vm2776_vm1 }
 0x978   :  { %v2772_v11 = vsub.f32 1.0, %v2771_v1 }
 0x97a   :  { %v2773_v6 = vmul.f32 %v5257_v59, %v2772_v11 }
 0x97b   :  { %v5259_v54 = vpop.eup %5258 }
 0x97c   :  { %v2751_v5 = vmul.f32 %v5259_v54, %v2749_v31  ;;  %vm2756_vm12 = vweird.f32 %v5259_v54  ;;  %v2774_v32 = vadd.f32 %v5257_v59, %v2773_v6 }
 0x97d   :  { %vm2757_vm14 = vmor %vm2755_vm13, %vm2756_vm12 }
 0x97e   :  { %v2752_v63 = vsub.f32 1.0, %v2751_v5  ;;  %v2778_v50 = vsel %vm2777_vm3, %v5257_v59, %v2774_v32 }
 0x97f   :  { %v2783_v21 = vsel %vm2780_vm5, %v2782_v58, %v2778_v50 }
 0x980   :  { %v2753_v56 = vmul.f32 %v5259_v54, %v2752_v63  ;;  %v2788_v20 = vsub.f32 1.0, %v2783_v21  ;;  %v2790_v22 = vmul.f32 %v2783_v21, %v7716_v30  ;;  %v3047_v30 = vmul.f32 %v7647_v34, %v7768_v26  ;;  %v9192_v21 = vld [vmem:[#allocation48_spill] sm:$0xff] }
 0x982   :  { %v2754_v7 = vadd.f32 %v5259_v54, %v2753_v56  ;;  %v3048_v8 = vsel %vm3019_vm4, %v3047_v30, 0.0  ;;  %v7791_v30 = vld [vmem:[#allocation10 + $0x240] sm:$0xff] }
 0x984   :  { %v2758_v37 = vsel %vm2757_vm14, %v5259_v54, %v2754_v7 }
 0x985   :  { %v2763_v49 = vsel %vm2760_vm15, %v2762_v16, %v2758_v37 }
 0x986   :  { %v2785_v44 = vmul.f32 %v2763_v49, %v2743_v61 }
 0x988   :  { %v2786_v28 = vadd.f32 %v2785_v44, %v1782_v48 }
 0x98a   :  { %5260 = vtanh.f32 %v2786_v28 }
 0x990   :  { %v5261_v2 = vpop.eup %5260 }
 0x991   :  { %v2789_v3 = vmul.f32 %v5261_v2, %v2788_v20  ;;  %v1722_v20 = vadd.f32 %v9192_v21, %v7346_v33 }
 0x993   :  { %v7747_v25 = vadd.f32 %v2790_v22, %v2789_v3 }
 0x995   :  { %2810 = vmatmul.f32.vlgmr.msrb.gmra.mxu2 %v7747_v25  ;;  %2830 = vmatmul.f32.vlgmr.msrb.gmra.mxu3 %v7747_v25  ;;  %v2792_v51 = vadd.f32 %v7747_v25, %v9186_v60 }
 0x996   :  { %2850 = vmatmul.f32.vlgmr.msra.gmra.mxu0 %v7747_v25 }
 0x997   :  { %v7754_v39 = vmul.f32 0.5, %v2792_v51 }
 0x999   :  { %v3027_v4 = vmul.f32 %v7647_v34, %v7754_v39 }
 0x99b   :  { %v3028_v27 = vsel %vm3019_vm4, %v3027_v4, 0.0 }
 0x99c   :  { %3029 = vadd.xlane.f32.xlu1 %v3028_v27 }
 0x9a4   :  { %3033 = vadd.xlane.f32.xlu1 %v3032_v15  ;;  %v7788_v15 = vld [vmem:[#allocation10 + $0x268] sm:$0xff] }
 0x9a5   :  { %3323 = vmatpush.msrb.mxu3 %v7788_v15 }
 0x9a7   :  { %3324 = vmatpush.msrb.mxu3 %v7791_v30 }
 0x9ac   :  { %3049 = vadd.xlane.f32.xlu1 %v3048_v8  ;;  %v7794_v8 = vld [vmem:[#allocation10 + $0x218] sm:$0xff] }
 0x9ad   :  { %3325 = vmatpush.msrb.mxu3 %v7794_v8 }
 0xa13   :  { %v2851_v18 = vpop.f32.mrf.mxu0 }
 0xa14   :  { %v2852_v17 = vadd.f32 %v2851_v18, %v7343_v35 }
 0xa18   :  { %v2811_v19 = vpop.f32.mrf.mxu2  ;;  %v2831_v53 = vpop.f32.mrf.mxu3 }
 0xa19   :  { %v2812_v29 = vadd.f32 %v2811_v19, %v9180_v23  ;;  %v2832_v31 = vadd.f32 %v2831_v53, %v9181_v43  ;;  %v7800_v19 = vld [vmem:[#allocation10 + $0x1c8] sm:$0xff]  ;;  %v7803_v53 = vld [vmem:[#allocation10 + $0x1a0] sm:$0xff] }
 0xa1b   :  { %v2854_v59 = vadd.f32 %v2812_v29, %v1682_v38  ;;  %v2874_v1 = vadd.f32 %v2832_v31, %v1702_v52  ;;  %v9193_v52 = vld [vmem:[#allocation42_spill] sm:$0xff]  ;;  %v7809_v29 = vld [vmem:[#allocation10 + $0x178] sm:$0xff] }
 0xa1c   :  { %v1622_v10 = vadd.f32 %v9193_v52, %v9176_v0 }
 0xa1d   :  { %v5082_v54 = vmul.f32 -1.442695, %v2854_v59  ;;  %v5083_v5 = vmul.f32 -1.442695, %v2874_v1  ;;  %v7812_v59 = vld [vmem:[#allocation10 + $0x150] sm:$0xff] }
 0xa1f   :  { %5262 = vpow2.f32 %v5082_v54  ;;  %v7815_v54 = vld [vmem:[#allocation10 + $0x128] sm:$0xff] }
 0xa20   :  { %5264 = vpow2.f32 %v5083_v5 }
 0xa25   :  { %v5263_v11 = vpop.eup %5262 }
 0xa26   :  { %v5265_v63 = vpop.eup %5264  ;;  %v2858_v57 = vadd.f32 1.0, %v5263_v11  ;;  %v9194_v11 = vld [vmem:[#allocation38_spill] sm:$0xff] }
 0xa27   :  { %v2878_v56 = vadd.f32 1.0, %v5265_v63  ;;  %v1642_v0 = vadd.f32 %v9194_v11, %v9178_v41  ;;  %v7821_v63 = vld [vmem:[#allocation10 + $0x100] sm:$0xff]  ;;  %v7830_v41 = vld [vmem:[#allocation10 + $0x88] sm:$0xff] }
 0xa28   :  { %5266 = vrcp.f32 %v2858_v57  ;;  %v2870_v61 = vand.u32 2147483648, %v2858_v57  ;;  %v2868_v32 = vand.u32 2147483647, %v2858_v57  ;;  %vm2864_vm7 = vweird.f32 %v2858_v57 }
 0xa29   :  { %5268 = vrcp.f32 %v2878_v56  ;;  %v2890_v3 = vand.u32 2147483648, %v2878_v56  ;;  %vm2884_vm11 = vweird.f32 %v2878_v56  ;;  %v2888_v22 = vand.u32 2147483647, %v2878_v56 }
 0xa2a   :  { %v2871_v44 = vor.u32 1.1754944e-38, %v2870_v61  ;;  %vm2869_vm9 = vcmp.eq.f32.partialorder %v2868_v32, 8.507059e+37  ;;  %v7838_v61 = vld [vmem:[#allocation10 + $0x10] sm:$0xff] }
 0xa2b   :  { %v2891_v45 = vor.u32 1.1754944e-38, %v2890_v3  ;;  %vm2889_vm12 = vcmp.eq.f32.partialorder %v2888_v22, 8.507059e+37 }
 0xa2e   :  { %v5267_v46 = vpop.eup %5266 }
 0xa2f   :  { %v5269_v6 = vpop.eup %5268  ;;  %v2860_v12 = vmul.f32 %v5267_v46, %v2858_v57  ;;  %vm2865_vm6 = vweird.f32 %v5267_v46 }
 0xa30   :  { %v2880_v7 = vmul.f32 %v5269_v6, %v2878_v56  ;;  %vm2866_vm8 = vmor %vm2864_vm7, %vm2865_vm6  ;;  %vm2885_vm10 = vweird.f32 %v5269_v6  ;;  %v7824_v56 = vld [vmem:[#allocation10 + $0xd8] sm:$0xff] }
 0xa31   :  { %v2861_v16 = vsub.f32 1.0, %v2860_v12  ;;  %vm2886_vm0 = vmor %vm2884_vm11, %vm2885_vm10 }
 0xa32   :  { %v2881_v37 = vsub.f32 1.0, %v2880_v7 }
 0xa33   :  { %v2862_v49 = vmul.f32 %v5267_v46, %v2861_v16  ;;  %v7835_v16 = vld [vmem:[#allocation10 + $0x38] sm:$0xff] }
 0xa34   :  { %v2882_v48 = vmul.f32 %v5269_v6, %v2881_v37 }
 0xa35   :  { %v2863_v40 = vadd.f32 %v5267_v46, %v2862_v49 }
 0xa36   :  { %v2883_v58 = vadd.f32 %v5269_v6, %v2882_v48 }
 0xa37   :  { %v2867_v28 = vsel %vm2866_vm8, %v5267_v46, %v2863_v40 }
 0xa38   :  { %v2872_v50 = vsel %vm2869_vm9, %v2871_v44, %v2867_v28  ;;  %v2887_v51 = vsel %vm2886_vm0, %v5269_v6, %v2883_v58  ;;  %v7827_v6 = vld [vmem:[#allocation10 + $0xb0] sm:$0xff] }
 0xa39   :  { %v2894_v2 = vmul.f32 %v2872_v50, %v2852_v17  ;;  %v2892_v9 = vsel %vm2889_vm12, %v2891_v45, %v2887_v51 }
 0xa3a   :  { %v2897_v4 = vsub.f32 1.0, %v2892_v9  ;;  %v2899_v24 = vmul.f32 %v2892_v9, %v7747_v25  ;;  %v7797_v25 = vld [vmem:[#allocation10 + $0x1f0] sm:$0xff] }
 0xa3b   :  { %v2895_v60 = vadd.f32 %v2894_v2, %v1722_v20  ;;  %3326 = vmatpush.msrb.mxu3 %v7797_v25 }
 0xa3d   :  { %5270 = vtanh.f32 %v2895_v60  ;;  %3327 = vmatpush.msrb.mxu3 %v7800_v19  ;;  %v9195_v60 = vld [vmem:[#allocation32_spill] sm:$0xff] }
 0xa3e   :  { %v1662_v51 = vadd.f32 %v9195_v60, %v7346_v33  ;;  %v3156_v60 = vld [vmem:[#allocation7 + $0x128] sm:$0xff] }
 0xa3f   :  { %3328 = vmatpush.msrb.mxu3 %v7803_v53 }
 0xa41   :  { %3329 = vmatpush.msrb.mxu3 %v7809_v29 }
 0xa43   :  { %v5271_v27 = vpop.eup %5270  ;;  %3330 = vmatpush.msrb.mxu3 %v7812_v59 }
 0xa44   :  { %v2898_v62 = vmul.f32 %v5271_v27, %v2897_v4 }
 0xa45   :  { %3331 = vmatpush.msrb.mxu3 %v7815_v54 }
 0xa46   :  { %v7783_v47 = vadd.f32 %v2899_v24, %v2898_v62 }
 0xa47   :  { %3332 = vmatpush.msrb.mxu3 %v7821_v63 }
 0xa48   :  { %2919 = vmatmul.f32.vlgmr.msra.gmra.mxu1 %v7783_v47  ;;  %2939 = vmatmul.f32.vlgmr.msra.gmra.mxu2 %v7783_v47 }
 0xa49   :  { %2959 = vmatmul.f32.vlgmr.msra.gmra.mxu3 %v7783_v47 }
 0xa4a   :  { %3333 = vmatpush.msrb.mxu3 %v7824_v56 }
 0xa4c   :  { %3334 = vmatpush.msrb.mxu3 %v7827_v6 }
 0xa4e   :  { %3335 = vmatpush.msrb.mxu3 %v7830_v41 }
 0xac5   :  { %v2920_v14 = vpop.f32.mrf.mxu1 }
 0xac6   :  { %v2921_v38 = vadd.f32 %v2920_v14, %v9180_v23 }
 0xac8   :  { %v2963_v31 = vadd.f32 %v2921_v38, %v1622_v10 }
 0xaca   :  { %v5084_v1 = vmul.f32 -1.442695, %v2963_v31 }
 0xacb   :  { %v2940_v5 = vpop.f32.mrf.mxu2 }
 0xacc   :  { %5272 = vpow2.f32 %v5084_v1  ;;  %v2941_v23 = vadd.f32 %v2940_v5, %v9181_v43  ;;  %v7833_v43 = vld [vmem:[#allocation10 + $0x60] sm:$0xff]  ;;  %v2960_v50 = vpop.f32.mrf.mxu3 }
 0xacd   :  { %3336 = vmatpush.msrb.mxu3 %v7833_v43  ;;  %v2961_v3 = vadd.f32 %v2960_v50, %v7343_v35  ;;  %v3164_v50 = vld [vmem:[#allocation7 + $0x168] sm:$0xff] }
 0xace   :  { %v2983_v57 = vadd.f32 %v2941_v23, %v1642_v0  ;;  %v9196_v0 = vld [vmem:[#allocation46_spill] sm:$0xff]  ;;  %3167 = vmatpush.msrb.mxu0 %v3164_v50 }
 0xacf   :  { %3337 = vmatpush.msrb.mxu3 %v7835_v16 }
 0xad0   :  { %v5085_v46 = vmul.f32 -1.442695, %v2983_v57 }
 0xad1   :  { %3338 = vmatpush.msrb.mxu3 %v7838_v61 }
 0xad2   :  { %v5273_v12 = vpop.eup %5272  ;;  %5274 = vpow2.f32 %v5085_v46 }
 0xad3   :  { %v2967_v7 = vadd.f32 1.0, %v5273_v12  ;;  %v9197_v12 = vld [vmem:[#allocation27_spill] sm:$0xff] }
 0xad5   :  { %5276 = vrcp.f32 %v2967_v7  ;;  %v2979_v40 = vand.u32 2147483648, %v2967_v7  ;;  %v2977_v17 = vand.u32 2147483647, %v2967_v7  ;;  %vm2973_vm14 = vweird.f32 %v2967_v7 }
 0xad7   :  { %v2980_v20 = vor.u32 1.1754944e-38, %v2979_v40  ;;  %vm2978_vm1 = vcmp.eq.f32.partialorder %v2977_v17, 8.507059e+37 }
 0xad8   :  { %v5275_v37 = vpop.eup %5274 }
 0xad9   :  { %v2987_v49 = vadd.f32 1.0, %v5275_v37 }
 0xadb   :  { %v5277_v32 = vpop.eup %5276  ;;  %5278 = vrcp.f32 %v2987_v49  ;;  %v2999_v4 = vand.u32 2147483648, %v2987_v49  ;;  %v2997_v62 = vand.u32 2147483647, %v2987_v49  ;;  %vm2993_vm3 = vweird.f32 %v2987_v49 }
 0xadc   :  { %v2969_v18 = vmul.f32 %v5277_v32, %v2967_v7  ;;  %vm2974_vm13 = vweird.f32 %v5277_v32  ;;  %v2901_v7 = vadd.f32 %v7783_v47, %v9197_v12  ;;  %v3132_v12 = vld [vmem:[#allocation7 + $0x68] sm:$0xff] }
 0xadd   :  { %vm2975_vm15 = vmor %vm2973_vm14, %vm2974_vm13  ;;  %v3000_v52 = vor.u32 1.1754944e-38, %v2999_v4  ;;  %vm2998_vm6 = vcmp.eq.f32.partialorder %v2997_v62, 8.507059e+37  ;;  %v3146_v4 = vld [vmem:[#allocation7 + $0xd8] sm:$0xff]  ;;  %v7870_v62 = vpop.xlane.xlu1 %3029 }
 0xade   :  { %v2970_v48 = vsub.f32 1.0, %v2969_v18  ;;  %v9198_v18 = vld [vmem:[#allocation21_spill] sm:$0xff] }
 0xae0   :  { %v2971_v44 = vmul.f32 %v5277_v32, %v2970_v48  ;;  %v9199_v48 = vld [vmem:[#allocation40_spill] sm:$0xff] }
 0xae1   :  { %v5279_v28 = vpop.eup %5278  ;;  %v2356_v40 = vadd.f32 %v9199_v48, %v9198_v18  ;;  %v3129_v18 = vld [vmem:[#allocation7 + $0x50] sm:$0xff]  ;;  %v3163_v48 = vld [vmem:[#allocation7 + $0x160] sm:$0xff] }
 0xae2   :  { %v2989_v58 = vmul.f32 %v5279_v28, %v2987_v49  ;;  %v2972_v21 = vadd.f32 %v5277_v32, %v2971_v44  ;;  %vm2994_vm2 = vweird.f32 %v5279_v28 }
 0xae3   :  { %vm2995_vm5 = vmor %vm2993_vm3, %vm2994_vm2  ;;  %v7865_v17 = vmul.f32 0.5, %v2356_v40 }
 0xae4   :  { %v2990_v2 = vsub.f32 1.0, %v2989_v58  ;;  %v2976_v22 = vsel %vm2975_vm15, %v5277_v32, %v2972_v21  ;;  %v7858_v32 = vmul.f32 0.5, %v2901_v7  ;;  %v3165_v58 = vld [vmem:[#allocation7 + $0x170] sm:$0xff] }
 0xae5   :  { %v2981_v45 = vsel %vm2978_vm1, %v2980_v20, %v2976_v22  ;;  %3187 = vmatpush.msrb.mxu1 %v3165_v58  ;;  %v3161_v21 = vld [vmem:[#allocation7 + $0x150] sm:$0xff]  ;;  %v3162_v20 = vld [vmem:[#allocation7 + $0x158] sm:$0xff]  ;;  %v3155_v22 = vld [vmem:[#allocation7 + $0x120] sm:$0xff]  ;;  %v7880_v7 = vpop.xlane.xlu1 %3033 }
 0xae6   :  { %v2991_v9 = vmul.f32 %v5279_v28, %v2990_v2  ;;  %v3003_v27 = vmul.f32 %v2981_v45, %v2961_v3  ;;  %3168 = vmatpush.msrb.mxu0 %v3161_v21  ;;  %v3158_v2 = vld [vmem:[#allocation7 + $0x138] sm:$0xff]  ;;  %v3159_v3 = vld [vmem:[#allocation7 + $0x140] sm:$0xff]  ;;  %v3149_v45 = vld [vmem:[#allocation7 + $0xf0] sm:$0xff] }
 0xae7   :  { %3188 = vmatpush.msrb.mxu1 %v3162_v20  ;;  %v3122_v58 = vld [vmem:[#allocation7 + $0x18] sm:$0xff]  ;;  %v3123_v21 = vld [vmem:[#allocation7 + $0x20] sm:$0xff] }
 0xae8   :  { %v2992_v24 = vadd.f32 %v5279_v28, %v2991_v9  ;;  %v3004_v14 = vadd.f32 %v3003_v27, %v1662_v51  ;;  %3169 = vmatpush.msrb.mxu0 %v3158_v2  ;;  %v3153_v51 = vld [vmem:[#allocation7 + $0x110] sm:$0xff]  ;;  %v3150_v9 = vld [vmem:[#allocation7 + $0xf8] sm:$0xff]  ;;  %v3147_v27 = vld [vmem:[#allocation7 + $0xe0] sm:$0xff] }
 0xae9   :  { %3189 = vmatpush.msrb.mxu1 %v3159_v3  ;;  %v3157_v2 = vld [vmem:[#allocation7 + $0x130] sm:$0xff] }
 0xaea   :  { %v2996_v10 = vsel %vm2995_vm5, %v5279_v28, %v2992_v24  ;;  %5280 = vtanh.f32 %v3004_v14  ;;  %3170 = vmatpush.msrb.mxu0 %v3155_v22  ;;  %v3143_v14 = vld [vmem:[#allocation7 + $0xc0] sm:$0xff] }
 0xaeb   :  { %v3001_v35 = vsel %vm2998_vm6, %v3000_v52, %v2996_v10  ;;  %3190 = vmatpush.msrb.mxu1 %v3156_v60  ;;  %v3144_v52 = vld [vmem:[#allocation7 + $0xc8] sm:$0xff]  ;;  %v3119_v22 = vld [vmem:[#allocation7] sm:$0xff] }
 0xaec   :  { %v3006_v38 = vsub.f32 1.0, %v3001_v35  ;;  %v3008_v33 = vmul.f32 %v3001_v35, %v7783_v47  ;;  %v3043_v47 = vmul.f32 %v7647_v34, %v7865_v17  ;;  %v3140_v10 = vld [vmem:[#allocation7 + $0xa8] sm:$0xff]  ;;  %v3141_v35 = vld [vmem:[#allocation7 + $0xb0] sm:$0xff] }
 0xaed   :  { %3191 = vmatpush.msrb.mxu1 %v3153_v51  ;;  %v3120_v60 = vld [vmem:[#allocation7 + $0x8] sm:$0xff] }
 0xaee   :  { %v3044_v28 = vsel %vm3019_vm4, %v3043_v47, 0.0  ;;  %v3126_v47 = vld [vmem:[#allocation7 + $0x38] sm:$0xff] }
 0xaef   :  { %3192 = vmatpush.msrb.mxu1 %v3150_v9  ;;  %v7892_v9 = vld [vmem:[#allocation10 + $0x278] sm:$0xff] }
 0xaf0   :  { %v5281_v31 = vpop.eup %5280 }
 0xaf1   :  { %v3007_v1 = vmul.f32 %v5281_v31, %v3006_v38  ;;  %3193 = vmatpush.msrb.mxu1 %v3147_v27  ;;  %v3137_v38 = vld [vmem:[#allocation7 + $0x90] sm:$0xff]  ;;  %v3138_v31 = vld [vmem:[#allocation7 + $0x98] sm:$0xff] }
 0xaf3   :  { %v3009_v5 = vadd.f32 %v3008_v33, %v3007_v1  ;;  %3194 = vmatpush.msrb.mxu1 %v3144_v52  ;;  %v7874_v1 = vpop.xlane.xlu2 %3037  ;;  %v3134_v33 = vld [vmem:[#allocation7 + $0x78] sm:$0xff]  ;;  %v7898_v52 = vld [vmem:[#allocation10 + $0x250] sm:$0xff] }
 0xaf5   :  { %v3012_v11 = vadd.f32 %v3009_v5, %v9188_v13  ;;  %v3010_v23 = vadd.f32 %v3009_v5, %v9196_v0  ;;  %v3023_v13 = vmul.f32 %v7647_v34, %v7858_v32  ;;  %3195 = vmatpush.msrb.mxu1 %v3141_v35  ;;  %v3135_v5 = vld [vmem:[#allocation7 + $0x80] sm:$0xff]  ;;  %v3148_v35 = vld [vmem:[#allocation7 + $0xe8] sm:$0xff] }
 0xaf7   :  { %v7848_v57 = vmul.f32 0.5, %v3012_v11  ;;  %v7850_v46 = vmul.f32 0.5, %v3010_v23  ;;  %v3024_v44 = vsel %vm3019_vm4, %v3023_v13, 0.0  ;;  %3196 = vmatpush.msrb.mxu1 %v3138_v31  ;;  %v3131_v23 = vld [vmem:[#allocation7 + $0x60] sm:$0xff]  ;;  %v3128_v13 = vld [vmem:[#allocation7 + $0x48] sm:$0xff] }
 0xaf8   :  { %v7907_v31 = vld [vmem:[#allocation10 + $0x220] sm:$0xff] }
 0xaf9   :  { %3339 = vmatmul.f32.vlgmr.msrb.gmra.mxu3 %v7848_v57  ;;  %v3018_v37 = vmul.f32 %v7647_v34, %v7850_v46  ;;  %v3152_v34 = vld [vmem:[#allocation7 + $0x108] sm:$0xff]  ;;  %3197 = vmatpush.msrb.mxu1 %v3135_v5  ;;  %v3145_v5 = vld [vmem:[#allocation7 + $0xd0] sm:$0xff] }
 0xafa   :  { %3171 = vmatpush.msrb.mxu0 %v3152_v34  ;;  %v3154_v34 = vld [vmem:[#allocation7 + $0x118] sm:$0xff] }
 0xafb   :  { %v3020_v49 = vsel %vm3019_vm4, %v3018_v37, 0.0  ;;  %3198 = vmatpush.msrb.mxu1 %v3132_v12  ;;  %v3166_v37 = vld [vmem:[#allocation7 + $0x178] sm:$0xff]  ;;  %v7885_v20 = vpop.xlane.xlu2 %3041 }
 0xafc   :  { %3021 = vadd.xlane.f32.xlu0 %v3020_v49  ;;  %3172 = vmatpush.msrb.mxu0 %v3149_v45  ;;  %v7890_v45 = vld [vmem:[#allocation10 + $0x270] sm:$0xff] }
 0xafd   :  { %3207 = vmatpush.msrb.mxu2 %v3166_v37  ;;  %3199 = vmatpush.msrb.mxu1 %v3129_v18  ;;  %v7918_v37 = vld [vmem:[#allocation10 + $0x1f8] sm:$0xff] }
 0xafe   :  { %3173 = vmatpush.msrb.mxu0 %v3146_v4  ;;  %v3151_v4 = vld [vmem:[#allocation7 + $0x100] sm:$0xff]  ;;  %v3142_v18 = vld [vmem:[#allocation7 + $0xb8] sm:$0xff] }
 0xaff   :  { %3208 = vmatpush.msrb.mxu2 %v3163_v48  ;;  %3200 = vmatpush.msrb.mxu1 %v3126_v47  ;;  %v7934_v47 = vld [vmem:[#allocation10 + $0x1a8] sm:$0xff] }
 0xb00   :  { %3174 = vmatpush.msrb.mxu0 %v3143_v14  ;;  %v7896_v14 = vld [vmem:[#allocation10 + $0x248] sm:$0xff] }
 0xb01   :  { %3201 = vmatpush.msrb.mxu1 %v3123_v21  ;;  %v7942_v21 = vld [vmem:[#allocation10 + $0x180] sm:$0xff] }
 0xb02   :  { %3175 = vmatpush.msrb.mxu0 %v3140_v10  ;;  %v7900_v10 = vpop.xlane.xlu1 %3049 }
 0xb03   :  { %3202 = vmatpush.msrb.mxu1 %v3120_v60  ;;  %v7950_v60 = vld [vmem:[#allocation10 + $0x158] sm:$0xff] }
 0xb04   :  { %3025 = vadd.xlane.f32.xlu0 %v3024_v44  ;;  %3176 = vmatpush.msrb.mxu0 %v3137_v38  ;;  %v3125_v44 = vld [vmem:[#allocation7 + $0x30] sm:$0xff] }
 0xb05   :  { %3363 = vmatpush.msra.mxu1 %v7892_v9 }
 0xb06   :  { %3177 = vmatpush.msrb.mxu0 %v3134_v33  ;;  %v7910_v33 = vld [vmem:[#allocation10 + $0x228] sm:$0xff] }
 0xb07   :  { %3364 = vmatpush.msra.mxu1 %v7898_v52 }
 0xb08   :  { %3178 = vmatpush.msrb.mxu0 %v3131_v23 }
 0xb09   :  { %3365 = vmatpush.msra.mxu1 %v7910_v33 }
 0xb0a   :  { %3179 = vmatpush.msrb.mxu0 %v3128_v13  ;;  %v7923_v13 = vld [vmem:[#allocation10 + $0x200] sm:$0xff] }
 0xb0b   :  { %3366 = vmatpush.msra.mxu1 %v7923_v13 }
 0xb0c   :  { %3045 = vadd.xlane.f32.xlu0 %v3044_v28  ;;  %3180 = vmatpush.msrb.mxu0 %v3125_v44  ;;  %v3160_v28 = vld [vmem:[#allocation7 + $0x148] sm:$0xff]  ;;  %v7931_v44 = vld [vmem:[#allocation10 + $0x1d8] sm:$0xff] }
 0xb0d   :  { %3209 = vmatpush.msrb.mxu2 %v3160_v28  ;;  %3367 = vmatpush.msra.mxu1 %v7931_v44 }
 0xb0e   :  { %3181 = vmatpush.msrb.mxu0 %v3122_v58  ;;  %v7939_v58 = vld [vmem:[#allocation10 + $0x1b0] sm:$0xff] }
 0xb0f   :  { %3210 = vmatpush.msrb.mxu2 %v3157_v2  ;;  %3368 = vmatpush.msra.mxu1 %v7939_v58 }
 0xb10   :  { %3182 = vmatpush.msrb.mxu0 %v3119_v22  ;;  %v7947_v22 = vld [vmem:[#allocation10 + $0x188] sm:$0xff] }
 0xb11   :  { %3211 = vmatpush.msrb.mxu2 %v3154_v34  ;;  %3369 = vmatpush.msra.mxu1 %v7947_v22 }
 0xb12   :  { %3343 = vmatpush.msra.mxu0 %v7890_v45 }
 0xb13   :  { %3212 = vmatpush.msrb.mxu2 %v3151_v4 }
 0xb14   :  { %3344 = vmatpush.msra.mxu0 %v7896_v14 }
 0xb15   :  { %3213 = vmatpush.msrb.mxu2 %v3148_v35 }
 0xb16   :  { %3345 = vmatpush.msra.mxu0 %v7907_v31 }
 0xb17   :  { %3214 = vmatpush.msrb.mxu2 %v3145_v5  ;;  %v7958_v5 = vld [vmem:[#allocation10 + $0x130] sm:$0xff] }
 0xb18   :  { %3346 = vmatpush.msra.mxu0 %v7918_v37 }
 0xb19   :  { %3215 = vmatpush.msrb.mxu2 %v3142_v18 }
 0xb6f   :  { %v7872_v24 = vpop.xlane.xlu0 %3021 }
 0xb77   :  { %v7876_v11 = vpop.xlane.xlu0 %3025 }
 0xb78   :  { %v3051_v0 = vmax.f32 %v7872_v24, %v7876_v11 }
 0xb7a   :  { %v3052_v49 = vmax.f32 %v3051_v0, %v7870_v62 }
 0xb7c   :  { %v3053_v40 = vmax.f32 %v3052_v49, %v7880_v7 }
 0xb7e   :  { %v3054_v50 = vmax.f32 %v3053_v40, %v7874_v1 }
 0xb7f   :  { %v7888_v51 = vpop.xlane.xlu0 %3045 }
 0xb80   :  { %v3055_v3 = vmax.f32 %v3054_v50, %v7885_v20 }
 0xb82   :  { %v3056_v27 = vmax.f32 %v3055_v3, %v7888_v51 }
 0xb84   :  { %v7904_v38 = vmax.f32 %v3056_v27, %v7900_v10  ;;  %v7955_v27 = vld [vmem:[#allocation10 + $0x160] sm:$0xff] }
 0xb85   :  { %3370 = vmatpush.msra.mxu1 %v7955_v27 }
 0xb86   :  { %v3058_v0 = vsub.f32 %v7872_v24, %v7904_v38  ;;  %v3061_v23 = vsub.f32 %v7876_v11, %v7904_v38  ;;  %v3064_v12 = vsub.f32 %v7870_v62, %v7904_v38  ;;  %v3067_v49 = vsub.f32 %v7880_v7, %v7904_v38  ;;  %v7926_v24 = vld [vmem:[#allocation10 + $0x1d0] sm:$0xff]  ;;  %v3139_v7 = vld [vmem:[#allocation7 + $0xa0] sm:$0xff] }
 0xb87   :  { %v3070_v62 = vsub.f32 %v7874_v1, %v7904_v38  ;;  %v3073_v50 = vsub.f32 %v7885_v20, %v7904_v38  ;;  %3347 = vmatpush.msra.mxu0 %v7926_v24  ;;  %v3136_v1 = vld [vmem:[#allocation7 + $0x88] sm:$0xff]  ;;  %3216 = vmatpush.msrb.mxu2 %v3139_v7  ;;  %v3076_v3 = vsub.f32 %v7888_v51, %v7904_v38  ;;  %v3133_v20 = vld [vmem:[#allocation7 + $0x70] sm:$0xff]  ;;  %v3130_v51 = vld [vmem:[#allocation7 + $0x58] sm:$0xff] }
 0xb88   :  { %v3059_v48 = vmul.f32 1.442695, %v3058_v0  ;;  %v3062_v40 = vmul.f32 1.442695, %v3061_v23  ;;  %v3065_v11 = vmul.f32 1.442695, %v3064_v12  ;;  %v3079_v4 = vsub.f32 %v7900_v10, %v7904_v38 }
 0xb89   :  { %v3068_v28 = vmul.f32 1.442695, %v3067_v49  ;;  %v3071_v2 = vmul.f32 1.442695, %v3070_v62  ;;  %3348 = vmatpush.msra.mxu0 %v7934_v47  ;;  %3217 = vmatpush.msrb.mxu2 %v3136_v1  ;;  %v3074_v34 = vmul.f32 1.442695, %v3073_v50 }
 0xb8a   :  { %5282 = vpow2.f32 %v3059_v48  ;;  %v3077_v23 = vmul.f32 1.442695, %v3076_v3  ;;  %v7961_v12 = vld [vmem:[#allocation10 + $0x138] sm:$0xff]  ;;  %v3127_v49 = vld [vmem:[#allocation7 + $0x40] sm:$0xff]  ;;  %v7964_v38 = vld [vmem:[#allocation10 + $0x108] sm:$0xff] }
 0xb8b   :  { %5284 = vpow2.f32 %v3062_v40  ;;  %3349 = vmatpush.msra.mxu0 %v7942_v21  ;;  %3218 = vmatpush.msrb.mxu2 %v3133_v20  ;;  %9200 = vst [vmem:[#allocation44_spill] sm:$0xff] %v7961_v12  ;;  %v3080_v48 = vmul.f32 1.442695, %v3079_v4  ;;  %v7967_v40 = vld [vmem:[#allocation10 + $0x110] sm:$0xff]  ;;  %v7972_v50 = vld [vmem:[#allocation10 + $0xe0] sm:$0xff] }
 0xb8c   :  { %5286 = vpow2.f32 %v3065_v11  ;;  %9201 = vst [vmem:[#allocation34_spill] sm:$0xff] %v7967_v40  ;;  %v3124_v11 = vld [vmem:[#allocation7 + $0x28] sm:$0xff]  ;;  %3371 = vmatpush.msra.mxu1 %v7961_v12  ;;  %v3121_v3 = vld [vmem:[#allocation7 + $0x10] sm:$0xff] }
 0xb8d   :  { %5288 = vpow2.f32 %v3068_v28  ;;  %3350 = vmatpush.msra.mxu0 %v7950_v60  ;;  %3219 = vmatpush.msrb.mxu2 %v3130_v51 }
 0xb8e   :  { %5290 = vpow2.f32 %v3071_v2  ;;  %v7975_v2 = vld [vmem:[#allocation10 + $0xe8] sm:$0xff]  ;;  %3372 = vmatpush.msra.mxu1 %v7967_v40 }
 0xb8f   :  { %5292 = vpow2.f32 %v3074_v34  ;;  %3351 = vmatpush.msra.mxu0 %v7958_v5  ;;  %3220 = vmatpush.msrb.mxu2 %v3127_v49  ;;  %9202 = vst [vmem:[#allocation58_spill] sm:$0xff] %v7975_v2  ;;  %v7981_v34 = vld [vmem:[#allocation10 + $0xc0] sm:$0xff]  ;;  %v7988_v49 = vld [vmem:[#allocation10 + $0x98] sm:$0xff] }
 0xb90   :  { %v5283_v35 = vpop.eup %5282  ;;  %5294 = vpow2.f32 %v3077_v23  ;;  %9203 = vst [vmem:[#allocation36_spill] sm:$0xff] %v7981_v34  ;;  %3373 = vmatpush.msra.mxu1 %v7975_v2  ;;  %v8011_v2 = vld [vmem:[#allocation10 + $0x18] sm:$0xff] }
 0xb91   :  { %v5285_v0 = vpop.eup %5284  ;;  %v3089_v62 = vmul.f32 %v5283_v35, %v7850_v46  ;;  %3352 = vmatpush.msra.mxu0 %v7964_v38  ;;  %3221 = vmatpush.msrb.mxu2 %v3124_v11  ;;  %v7978_v46 = vld [vmem:[#allocation10 + $0xb8] sm:$0xff]  ;;  %5296 = vpow2.f32 %v3080_v48  ;;  %9204 = vst [vmem:[#allocation31_spill] sm:$0xff] %v7988_v49  ;;  %v7991_v48 = vld [vmem:[#allocation10 + $0x68] sm:$0xff] }
 0xb92   :  { %v3082_v10 = vadd.f32 %v5285_v0, %v5283_v35  ;;  %v5287_v18 = vpop.eup %5286  ;;  %v3090_v7 = vmul.f32 %v5285_v0, %v7858_v32  ;;  %v7984_v35 = vld [vmem:[#allocation10 + $0x90] sm:$0xff]  ;;  %3374 = vmatpush.msra.mxu1 %v7981_v34  ;;  %9210 = vst [vmem:[#allocation22_spill] sm:$0xff] %v8011_v2 }
 0xb93   :  { %v5289_v1 = vpop.eup %5288  ;;  %3353 = vmatpush.msra.mxu0 %v7972_v50  ;;  %3222 = vmatpush.msrb.mxu2 %v3121_v3  ;;  %v3092_v23 = vmul.f32 %v5287_v18, %v7754_v39  ;;  %v7998_v3 = vld [vmem:[#allocation10 + $0x230] sm:$0xff]  ;;  %v8001_v39 = vld [vmem:[#allocation10 + $0x40] sm:$0xff] }
 0xb94   :  { %v3083_v28 = vadd.f32 %v5287_v18, %v3082_v10  ;;  %v5291_v32 = vpop.eup %5290  ;;  %v3091_v4 = vadd.f32 %v3090_v7, %v3089_v62  ;;  %v7994_v7 = vld [vmem:[#allocation10 + $0x70] sm:$0xff]  ;;  %9207 = vst [vmem:[#allocation20_spill] sm:$0xff] %v7998_v3  ;;  %3375 = vmatpush.msra.mxu1 %v7988_v49 }
 0xb95   :  { %v5293_v0 = vpop.eup %5292  ;;  %3354 = vmatpush.msra.mxu0 %v7978_v46  ;;  %9205 = vst [vmem:[#allocation35_spill] sm:$0xff] %v7994_v7 }
 0xb96   :  { %v3084_v20 = vadd.f32 %v5289_v1, %v3083_v28  ;;  %v5295_v11 = vpop.eup %5294  ;;  %v3093_v62 = vadd.f32 %v3092_v23, %v3091_v4  ;;  %v7996_v28 = vld [vmem:[#allocation10 + $0x258] sm:$0xff]  ;;  %v8006_v4 = vld [vmem:[#allocation10 + $0x48] sm:$0xff]  ;;  %3376 = vmatpush.msra.mxu1 %v7994_v7 }
 0xb97   :  { %3355 = vmatpush.msra.mxu0 %v7984_v35  ;;  %9206 = vst [vmem:[#allocation54_spill] sm:$0xff] %v7996_v28  ;;  %3440 = vmatpush.msra.mxu2 %v7996_v28  ;;  %v5297_v18 = vpop.eup %5296  ;;  %v8008_v23 = vld [vmem:[#allocation10 + $0x208] sm:$0xff]  ;;  %v8015_v28 = vld [vmem:[#allocation10 + $0x20] sm:$0xff]  ;;  %v3100_v7 = vmul.f32 %v5295_v11, %v7865_v17 }
 0xb98   :  { %v3085_v51 = vadd.f32 %v5291_v32, %v3084_v20  ;;  %9208 = vst [vmem:[#allocation25_spill] sm:$0xff] %v8006_v4  ;;  %3377 = vmatpush.msra.mxu1 %v8006_v4  ;;  %v8114_v17 = vld [vmem:[#allocation10 + $0x1e8] sm:$0xff] }
 0xb99   :  { %3356 = vmatpush.msra.mxu0 %v7991_v48  ;;  %9209 = vst [vmem:[#allocation26_spill] sm:$0xff] %v8008_v23  ;;  %3441 = vmatpush.msra.mxu2 %v7998_v3 }
 0xb9a   :  { %v3086_v10 = vadd.f32 %v5293_v0, %v3085_v51  ;;  %v3094_v51 = vmul.f32 %v5289_v1, %v7761_v55  ;;  %9211 = vst [vmem:[#allocation33_spill] sm:$0xff] %v8015_v28  ;;  %v3096_v55 = vmul.f32 %v5291_v32, %v7642_v36  ;;  %3378 = vmatpush.msra.mxu1 %v8015_v28 }
 0xb9b   :  { %3357 = vmatpush.msra.mxu0 %v8001_v39  ;;  %3442 = vmatpush.msra.mxu2 %v8008_v23  ;;  %v3102_v36 = vmul.f32 %v5297_v18, %v7768_v26  ;;  %v8059_v26 = vld [vmem:[#allocation10 + $0x1e0] sm:$0xff] }
 0xb9c   :  { %v3087_v20 = vadd.f32 %v5295_v11, %v3086_v10  ;;  %v3095_v10 = vadd.f32 %v3094_v51, %v3093_v62 }
 0xb9d   :  { %3358 = vmatpush.msra.mxu0 %v8011_v2  ;;  %3443 = vmatpush.msra.mxu2 %v8059_v26 }
 0xb9e   :  { %v3088_v34 = vadd.f32 %v5297_v18, %v3087_v20  ;;  %v3097_v1 = vadd.f32 %v3096_v55, %v3095_v10  ;;  %v3098_v20 = vmul.f32 %v5293_v0, %v7660_v42 }
 0xba0   :  { %5298 = vrcp.f32 %v3088_v34  ;;  %v3099_v62 = vadd.f32 %v3098_v20, %v3097_v1  ;;  %v3115_v40 = vand.u32 2147483648, %v3088_v34  ;;  %v3113_v23 = vand.u32 2147483647, %v3088_v34 }
 0xba1   :  { %vm3109_vm8 = vweird.f32 %v3088_v34 }
 0xba2   :  { %v3101_v12 = vadd.f32 %v3100_v7, %v3099_v62  ;;  %v3116_v28 = vor.u32 1.1754944e-38, %v3115_v40  ;;  %vm3114_vm10 = vcmp.eq.f32.partialorder %v3113_v23, 8.507059e+37 }
 0xba4   :  { %v3103_v10 = vadd.f32 %v3102_v36, %v3101_v12  ;;  %v8168_v36 = vld [vmem:[#allocation10 + $0x58] sm:$0xff] }
 0xba6   :  { %v5299_v3 = vpop.eup %5298 }
 0xba7   :  { %v3105_v51 = vmul.f32 %v5299_v3, %v3088_v34  ;;  %vm3110_vm7 = vweird.f32 %v5299_v3 }
 0xba8   :  { %vm3111_vm9 = vmor %vm3109_vm8, %vm3110_vm7 }
 0xba9   :  { %v3106_v49 = vsub.f32 1.0, %v3105_v51  ;;  %v8166_v51 = vld [vmem:[#allocation10 + $0x80] sm:$0xff] }
 0xbab   :  { %v3107_v4 = vmul.f32 %v5299_v3, %v3106_v49 }
 0xbad   :  { %v3108_v32 = vadd.f32 %v5299_v3, %v3107_v4 }
 0xbaf   :  { %v3112_v55 = vsel %vm3111_vm9, %v5299_v3, %v3108_v32  ;;  %v8151_v3 = vld [vmem:[#allocation10 + $0xf8] sm:$0xff]  ;;  %v9215_v32 = vld [vmem:[#allocation34_spill] sm:$0xff] }
 0xbb0   :  { %v3117_v42 = vsel %vm3114_vm10, %v3116_v28, %v3112_v55 }
 0xbb1   :  { %v3118_v0 = vmul.f32 %v3117_v42, %v3103_v10  ;;  %v8176_v10 = vld [vmem:[#allocation10 + $0x8] sm:$0xff]  ;;  %v9217_v42 = vld [vmem:[#allocation36_spill] sm:$0xff] }
 0xbb3   :  { %3183 = vmatmul.f32.vlgmr.msrb.gmra.mxu0 %v3118_v0  ;;  %3203 = vmatmul.f32.vlgmr.msrb.gmra.mxu1 %v3118_v0 }
 0xbb4   :  { %3223 = vmatmul.f32.vlgmr.msrb.gmra.mxu2 %v3118_v0  ;;  %3480 = vmatpush.msrb.mxu0 %v7788_v15  ;;  %v8062_v15 = vld [vmem:[#allocation10 + $0x1b8] sm:$0xff] }
 0xbb5   :  { %3500 = vmatpush.msrb.mxu1 %v7890_v45  ;;  %3444 = vmatpush.msra.mxu2 %v8062_v15 }
 0xbb6   :  { %3481 = vmatpush.msrb.mxu0 %v7791_v30  ;;  %v8065_v30 = vld [vmem:[#allocation10 + $0x190] sm:$0xff] }
 0xbb7   :  { %3501 = vmatpush.msrb.mxu1 %v7896_v14  ;;  %3445 = vmatpush.msra.mxu2 %v8065_v30 }
 0xbb8   :  { %3482 = vmatpush.msrb.mxu0 %v7794_v8  ;;  %v8068_v8 = vld [vmem:[#allocation10 + $0x168] sm:$0xff] }
 0xbb9   :  { %3502 = vmatpush.msrb.mxu1 %v7907_v31  ;;  %3446 = vmatpush.msra.mxu2 %v8068_v8 }
 0xbba   :  { %3483 = vmatpush.msrb.mxu0 %v7797_v25  ;;  %v8071_v25 = vld [vmem:[#allocation10 + $0x140] sm:$0xff] }
 0xbbb   :  { %3359 = vmatmul.f32.vlgmr.msra.gmra.mxu0 %v7848_v57  ;;  %3379 = vmatmul.f32.vlgmr.msra.gmra.mxu1 %v7848_v57 }
 0xbbc   :  { %3503 = vmatpush.msrb.mxu1 %v7918_v37  ;;  %3484 = vmatpush.msrb.mxu0 %v7800_v19  ;;  %v8074_v19 = vld [vmem:[#allocation10 + $0x118] sm:$0xff] }
 0xbbd   :  { %3447 = vmatpush.msra.mxu2 %v8071_v25 }
 0xbbe   :  { %3504 = vmatpush.msrb.mxu1 %v7926_v24  ;;  %3485 = vmatpush.msrb.mxu0 %v7803_v53  ;;  %v8077_v53 = vld [vmem:[#allocation10 + $0xf0] sm:$0xff] }
 0xbbf   :  { %3448 = vmatpush.msra.mxu2 %v8074_v19 }
 0xbc0   :  { %3505 = vmatpush.msrb.mxu1 %v7934_v47  ;;  %3486 = vmatpush.msrb.mxu0 %v7809_v29  ;;  %v8080_v29 = vld [vmem:[#allocation10 + $0xc8] sm:$0xff] }
 0xbc1   :  { %3449 = vmatpush.msra.mxu2 %v8077_v53 }
 0xbc2   :  { %3506 = vmatpush.msrb.mxu1 %v7942_v21  ;;  %3487 = vmatpush.msrb.mxu0 %v7812_v59  ;;  %v8083_v59 = vld [vmem:[#allocation10 + $0xa0] sm:$0xff] }
 0xbc3   :  { %3450 = vmatpush.msra.mxu2 %v8080_v29  ;;  %v8119_v21 = vld [vmem:[#allocation10] sm:$0xff] }
 0xbc4   :  { %3507 = vmatpush.msrb.mxu1 %v7950_v60  ;;  %3488 = vmatpush.msrb.mxu0 %v7815_v54  ;;  %v8086_v54 = vld [vmem:[#allocation10 + $0x260] sm:$0xff]  ;;  %v3340_v60 = vpop.f32.mrf.mxu3 }
 0xbc5   :  { %3451 = vmatpush.msra.mxu2 %v8083_v59  ;;  %3460 = vmatpush.msra.mxu3 %v8086_v54 }
 0xbc6   :  { %3508 = vmatpush.msrb.mxu1 %v7958_v5  ;;  %3489 = vmatpush.msrb.mxu0 %v7821_v63  ;;  %v8089_v63 = vld [vmem:[#allocation10 + $0x78] sm:$0xff]  ;;  %v8122_v5 = vld [vmem:[#allocation10 + $0x1c0] sm:$0xff] }
 0xbc7   :  { %3452 = vmatpush.msra.mxu2 %v8089_v63 }
 0xbc8   :  { %3509 = vmatpush.msrb.mxu1 %v7964_v38  ;;  %3490 = vmatpush.msrb.mxu0 %v7824_v56  ;;  %v8092_v56 = vld [vmem:[#allocation10 + $0x238] sm:$0xff] }
 0xbc9   :  { %3461 = vmatpush.msra.mxu3 %v8092_v56  ;;  %v8128_v38 = vld [vmem:[#allocation10 + $0x198] sm:$0xff] }
 0xbca   :  { %3510 = vmatpush.msrb.mxu1 %v7972_v50  ;;  %3491 = vmatpush.msrb.mxu0 %v7827_v6  ;;  %v8095_v6 = vld [vmem:[#allocation10 + $0x50] sm:$0xff] }
 0xbcb   :  { %3453 = vmatpush.msra.mxu2 %v8095_v6 }
 0xbcc   :  { %3511 = vmatpush.msrb.mxu1 %v7978_v46  ;;  %3492 = vmatpush.msrb.mxu0 %v7830_v41  ;;  %v8100_v41 = vld [vmem:[%s8895_s14] sm:$0x1f]  ;;  %v8135_v46 = vld [vmem:[#allocation10 + $0x170] sm:$0xff] }
 0xbcd   :  { %v8984_v24 = vperm.slane %v8100_v41, 2  ;;  %v8985_v7 = vperm.slane %v8100_v41, 3 }
 0xbce   :  { %3512 = vmatpush.msrb.mxu1 %v7984_v35  ;;  %3493 = vmatpush.msrb.mxu0 %v7833_v43  ;;  %v8105_v43 = vld [vmem:[%s8892_s11] sm:$0x7] }
 0xbcf   :  { %v3384_v47 = vperm.slane %v8105_v43, 0  ;;  %v3341_v40 = vadd.f32 %v3340_v60, %v8984_v24  ;;  %v3385_v11 = vperm.slane %v8105_v43, 1 }
 0xbd0   :  { %3513 = vmatpush.msrb.mxu1 %v7991_v48  ;;  %3494 = vmatpush.msrb.mxu0 %v7835_v16  ;;  %v8108_v16 = vld [vmem:[#allocation10 + $0x210] sm:$0xff] }
 0xbd1   :  { %3462 = vmatpush.msra.mxu3 %v8108_v16 }
 0xbd2   :  { %3514 = vmatpush.msrb.mxu1 %v8001_v39  ;;  %3495 = vmatpush.msrb.mxu0 %v7838_v61  ;;  %v8111_v61 = vld [vmem:[#allocation10 + $0x28] sm:$0xff] }
 0xbd3   :  { %3454 = vmatpush.msra.mxu2 %v8111_v61  ;;  %3463 = vmatpush.msra.mxu3 %v8114_v17 }
 0xbd4   :  { %3515 = vmatpush.msrb.mxu1 %v8011_v2 }
 0xbd5   :  { %3455 = vmatpush.msra.mxu2 %v8119_v21  ;;  %3464 = vmatpush.msra.mxu3 %v8122_v5 }
 0xbd7   :  { %3520 = vmatpush.msrb.mxu2 %v7892_v9  ;;  %3465 = vmatpush.msra.mxu3 %v8128_v38  ;;  %v8139_v9 = vld [vmem:[#allocation10 + $0x148] sm:$0xff] }
 0xbd9   :  { %3521 = vmatpush.msrb.mxu2 %v7898_v52  ;;  %3466 = vmatpush.msra.mxu3 %v8135_v46  ;;  %v8147_v52 = vld [vmem:[#allocation10 + $0x120] sm:$0xff] }
 0xbdb   :  { %3522 = vmatpush.msrb.mxu2 %v7910_v33  ;;  %3467 = vmatpush.msra.mxu3 %v8139_v9 }
 0xbdd   :  { %3523 = vmatpush.msrb.mxu2 %v7923_v13  ;;  %3468 = vmatpush.msra.mxu3 %v8147_v52  ;;  %v8158_v13 = vld [vmem:[#allocation10 + $0xd0] sm:$0xff] }
 0xbdf   :  { %3524 = vmatpush.msrb.mxu2 %v7931_v44  ;;  %3469 = vmatpush.msra.mxu3 %v8151_v3  ;;  %v8162_v44 = vld [vmem:[#allocation10 + $0xa8] sm:$0xff] }
 0xbe1   :  { %3525 = vmatpush.msrb.mxu2 %v7939_v58  ;;  %3470 = vmatpush.msra.mxu3 %v8158_v13  ;;  %v9214_v58 = vld [vmem:[#allocation44_spill] sm:$0xff] }
 0xbe3   :  { %3526 = vmatpush.msrb.mxu2 %v7947_v22  ;;  %3471 = vmatpush.msra.mxu3 %v8162_v44  ;;  %v8172_v22 = vld [vmem:[#allocation10 + $0x30] sm:$0xff] }
 0xbe5   :  { %3527 = vmatpush.msrb.mxu2 %v7955_v27  ;;  %3472 = vmatpush.msra.mxu3 %v8166_v51  ;;  %v9216_v27 = vld [vmem:[#allocation58_spill] sm:$0xff] }
 0xbe7   :  { %3528 = vmatpush.msrb.mxu2 %v9214_v58  ;;  %3473 = vmatpush.msra.mxu3 %v8168_v36  ;;  %v9221_v58 = vld [vmem:[#allocation33_spill] sm:$0xff] }
 0xbe9   :  { %3529 = vmatpush.msrb.mxu2 %v9215_v32  ;;  %3474 = vmatpush.msra.mxu3 %v8172_v22 }
 0xbeb   :  { %3530 = vmatpush.msrb.mxu2 %v9216_v27  ;;  %3475 = vmatpush.msra.mxu3 %v8176_v10 }
 0xbed   :  { %3531 = vmatpush.msrb.mxu2 %v9217_v42 }
 0xc30   :  { %v8126_v12 = vpop.f32.mrf.mxu0  ;;  %v8145_v28 = vpop.f32.mrf.mxu1 }
 0xc31   :  { %9212 = vst [vmem:[#allocation41_spill] sm:$0xff] %v8126_v12  ;;  %v3390_v50 = vadd.f32 %v3384_v47, %v8126_v12  ;;  %v3391_v18 = vadd.f32 %v3385_v11, %v8145_v28  ;;  %v8989_v11 = vperm.slane %v8100_v41, 4 }
 0xc32   :  { %9213 = vst [vmem:[#allocation24_spill] sm:$0xff] %v8145_v28 }
 0xc33   :  { %v3393_v34 = vadd.f32 %v3390_v50, %v3341_v40  ;;  %v9218_v40 = vld [vmem:[#allocation31_spill] sm:$0xff] }
 0xc34   :  { %3532 = vmatpush.msrb.mxu2 %v9218_v40 }
 0xc35   :  { %v5086_v49 = vmul.f32 -1.442695, %v3393_v34  ;;  %v9219_v34 = vld [vmem:[#allocation35_spill] sm:$0xff] }
 0xc36   :  { %3533 = vmatpush.msrb.mxu2 %v9219_v34 }
 0xc37   :  { %5300 = vpow2.f32 %v5086_v49  ;;  %v8188_v27 = vpop.f32.mrf.mxu2 }
 0xc38   :  { %v3360_v33 = vpop.f32.mrf.mxu0  ;;  %9222 = vst [vmem:[#allocation23_spill] sm:$0xff] %v8188_v27 }
 0xc39   :  { %v3361_v4 = vadd.f32 %v3360_v33, %v8985_v7 }
 0xc3b   :  { %v3413_v23 = vadd.f32 %v3391_v18, %v3361_v4  ;;  %v9220_v4 = vld [vmem:[#allocation25_spill] sm:$0xff] }
 0xc3c   :  { %3534 = vmatpush.msrb.mxu2 %v9220_v4 }
 0xc3d   :  { %v5301_v1 = vpop.eup %5300  ;;  %v5087_v20 = vmul.f32 -1.442695, %v3413_v23  ;;  %v3380_v23 = vpop.f32.mrf.mxu1 }
 0xc3e   :  { %v3397_v62 = vadd.f32 1.0, %v5301_v1  ;;  %v3386_v1 = vperm.slane %v8105_v43, 2  ;;  %3535 = vmatpush.msrb.mxu2 %v9221_v58 }
 0xc3f   :  { %5302 = vpow2.f32 %v5087_v20 }
 0xc40   :  { %5304 = vrcp.f32 %v3397_v62  ;;  %v3409_v49 = vand.u32 2147483648, %v3397_v62  ;;  %v3407_v18 = vand.u32 2147483647, %v3397_v62  ;;  %vm3403_vm0 = vweird.f32 %v3397_v62 }
 0xc41   :  { %v3392_v34 = vadd.f32 %v3386_v1, %v8188_v27 }
 0xc42   :  { %vm3408_vm13 = vcmp.eq.f32.partialorder %v3407_v18, 8.507059e+37 }
 0xc45   :  { %v5303_v55 = vpop.eup %5302 }
 0xc46   :  { %v5305_v0 = vpop.eup %5304  ;;  %v3417_v47 = vadd.f32 1.0, %v5303_v55  ;;  %v3410_v55 = vor.u32 1.1754944e-38, %v3409_v49 }
 0xc47   :  { %v3399_v60 = vmul.f32 %v5305_v0, %v3397_v62  ;;  %vm3404_vm11 = vweird.f32 %v5305_v0 }
 0xc48   :  { %5306 = vrcp.f32 %v3417_v47  ;;  %vm3405_vm12 = vmor %vm3403_vm0, %vm3404_vm11  ;;  %v3427_v58 = vand.u32 2147483647, %v3417_v47  ;;  %vm3423_vm15 = vweird.f32 %v3417_v47 }
 0xc49   :  { %v3400_v50 = vsub.f32 1.0, %v3399_v60  ;;  %v3381_v60 = vadd.f32 %v3380_v23, %v8989_v11 }
 0xc4a   :  { %vm3428_vm2 = vcmp.eq.f32.partialorder %v3427_v58, 8.507059e+37  ;;  %v3614_v58 = vld [vmem:[#allocation8 + $0x178] sm:$0xff] }
 0xc4b   :  { %v3401_v33 = vmul.f32 %v5305_v0, %v3400_v50  ;;  %3655 = vmatpush.msra.mxu1 %v3614_v58  ;;  %v3584_v58 = vld [vmem:[#allocation8 + $0x88] sm:$0xff] }
 0xc4d   :  { %v3402_v20 = vadd.f32 %v5305_v0, %v3401_v33  ;;  %v3429_v33 = vand.u32 2147483648, %v3417_v47 }
 0xc4e   :  { %v5307_v32 = vpop.eup %5306 }
 0xc4f   :  { %v3419_v42 = vmul.f32 %v5307_v32, %v3417_v47  ;;  %v3406_v40 = vsel %vm3405_vm12, %v5305_v0, %v3402_v20  ;;  %vm3424_vm14 = vweird.f32 %v5307_v32  ;;  %v3430_v49 = vor.u32 1.1754944e-38, %v3429_v33  ;;  %v3612_v33 = vld [vmem:[#allocation8 + $0x168] sm:$0xff] }
 0xc50   :  { %v3411_v50 = vsel %vm3408_vm13, %v3410_v55, %v3406_v40  ;;  %vm3425_vm1 = vmor %vm3423_vm15, %vm3424_vm14  ;;  %3615 = vmatpush.msrb.mxu3 %v3612_v33  ;;  %v3582_v33 = vld [vmem:[#allocation8 + $0x78] sm:$0xff] }
 0xc51   :  { %v3420_v4 = vsub.f32 1.0, %v3419_v42  ;;  %v3433_v43 = vmul.f32 %v3411_v50, %v3381_v60 }
 0xc53   :  { %v3421_v62 = vmul.f32 %v5307_v32, %v3420_v4  ;;  %v3434_v24 = vadd.f32 %v3433_v43, %v3392_v34 }
 0xc55   :  { %v3422_v7 = vadd.f32 %v5307_v32, %v3421_v62  ;;  %5308 = vtanh.f32 %v3434_v24  ;;  %v9223_v24 = vld [vmem:[#allocation54_spill] sm:$0xff] }
 0xc56   :  { %v3613_v62 = vld [vmem:[#allocation8 + $0x170] sm:$0xff] }
 0xc57   :  { %v3426_v2 = vsel %vm3425_vm1, %v5307_v32, %v3422_v7  ;;  %v9224_v7 = vld [vmem:[#allocation20_spill] sm:$0xff]  ;;  %3635 = vmatpush.msra.mxu0 %v3613_v62 }
 0xc58   :  { %v3431_v23 = vsel %vm3428_vm2, %v3430_v49, %v3426_v2  ;;  %v9225_v2 = vld [vmem:[#allocation26_spill] sm:$0xff]  ;;  %v3583_v62 = vld [vmem:[#allocation8 + $0x80] sm:$0xff] }
 0xc59   :  { %v3436_v0 = vsub.f32 1.0, %v3431_v23  ;;  %v3438_v1 = vmul.f32 %v3431_v23, %v7848_v57  ;;  %v3228_v57 = vlaneseq  ;;  %v3609_v49 = vld [vmem:[#allocation8 + $0x150] sm:$0xff]  ;;  %v3610_v23 = vld [vmem:[#allocation8 + $0x158] sm:$0xff] }
 0xc5a   :  { %3616 = vmatpush.msrb.mxu3 %v3609_v49  ;;  %3636 = vmatpush.msra.mxu0 %v3610_v23  ;;  %v3579_v49 = vld [vmem:[#allocation8 + $0x60] sm:$0xff]  ;;  %v3580_v23 = vld [vmem:[#allocation8 + $0x68] sm:$0xff] }
 0xc5b   :  { %v5309_v18 = vpop.eup %5308 }
 0xc5c   :  { %v3437_v20 = vmul.f32 %v5309_v18, %v3436_v0  ;;  %v3611_v0 = vld [vmem:[#allocation8 + $0x160] sm:$0xff]  ;;  %v3606_v18 = vld [vmem:[#allocation8 + $0x138] sm:$0xff] }
 0xc5d   :  { %3656 = vmatpush.msra.mxu1 %v3611_v0  ;;  %3617 = vmatpush.msrb.mxu3 %v3606_v18  ;;  %v3581_v0 = vld [vmem:[#allocation8 + $0x70] sm:$0xff]  ;;  %v3576_v18 = vld [vmem:[#allocation8 + $0x48] sm:$0xff] }
 0xc5e   :  { %v8194_v55 = vadd.f32 %v3438_v1, %v3437_v20  ;;  %v3607_v20 = vld [vmem:[#allocation8 + $0x140] sm:$0xff]  ;;  %v3608_v1 = vld [vmem:[#allocation8 + $0x148] sm:$0xff] }
 0xc5f   :  { %3637 = vmatpush.msra.mxu0 %v3607_v20  ;;  %3657 = vmatpush.msra.mxu1 %v3608_v1  ;;  %v3577_v20 = vld [vmem:[#allocation8 + $0x50] sm:$0xff]  ;;  %v3578_v1 = vld [vmem:[#allocation8 + $0x58] sm:$0xff] }
 0xc60   :  { %3456 = vmatmul.f32.vlgmr.msra.gmra.mxu2 %v8194_v55  ;;  %3476 = vmatmul.f32.vlgmr.msra.gmra.mxu3 %v8194_v55 }
 0xc61   :  { %3496 = vmatmul.f32.vlgmr.msrb.gmra.mxu0 %v8194_v55  ;;  %3516 = vmatmul.f32.vlgmr.msrb.gmra.mxu1 %v8194_v55 }
 0xc62   :  { %3814 = vmatpush.msra.mxu2 %v9223_v24  ;;  %v3603_v24 = vld [vmem:[#allocation8 + $0x120] sm:$0xff] }
 0xc63   :  { %3618 = vmatpush.msrb.mxu3 %v3603_v24  ;;  %v3573_v24 = vld [vmem:[#allocation8 + $0x30] sm:$0xff] }
 0xc64   :  { %3815 = vmatpush.msra.mxu2 %v9224_v7  ;;  %v3604_v7 = vld [vmem:[#allocation8 + $0x128] sm:$0xff] }
 0xc65   :  { %3638 = vmatpush.msra.mxu0 %v3604_v7  ;;  %v3574_v7 = vld [vmem:[#allocation8 + $0x38] sm:$0xff] }
 0xc66   :  { %3816 = vmatpush.msra.mxu2 %v9225_v2  ;;  %v3605_v2 = vld [vmem:[#allocation8 + $0x130] sm:$0xff] }
 0xc67   :  { %3658 = vmatpush.msra.mxu1 %v3605_v2  ;;  %v3575_v2 = vld [vmem:[#allocation8 + $0x40] sm:$0xff] }
 0xc68   :  { %3536 = vmatmul.f32.vlgmr.msrb.gmra.mxu2 %v8194_v55 }
 0xc69   :  { %3817 = vmatpush.msra.mxu2 %v8059_v26  ;;  %v8217_v26 = vand.u32 127, %v3228_v57  ;;  %v3600_v57 = vld [vmem:[#allocation8 + $0x108] sm:$0xff] }
 0xc6a   :  { %3619 = vmatpush.msrb.mxu3 %v3600_v57 }
 0xc6b   :  { %3818 = vmatpush.msra.mxu2 %v8062_v15  ;;  %9226 = vst [vmem:[#allocation47_spill] sm:$0xff] %v8217_v26  ;;  %v3313_v15 = vperm.slane %v8100_v41, 0  ;;  %vm3540_vm3 = vcmp.lt.s32.totalorder %v8217_v26, 5  ;;  %v8232_v57 = vcvt.s32.f32 %v8217_v26 }
 0xc6d   :  { %3819 = vmatpush.msra.mxu2 %v8065_v30  ;;  %v3314_v30 = vperm.slane %v8100_v41, 1  ;;  %9227 = vst [vmem:[#allocation39_spill] sm:$0xff] %v8232_v57 }
 0xc6f   :  { %3820 = vmatpush.msra.mxu2 %v8068_v8 }
 0xc71   :  { %3821 = vmatpush.msra.mxu2 %v8071_v25 }
 0xc73   :  { %3822 = vmatpush.msra.mxu2 %v8074_v19 }
 0xc75   :  { %3823 = vmatpush.msra.mxu2 %v8077_v53 }
 0xc77   :  { %3824 = vmatpush.msra.mxu2 %v8080_v29 }
 0xc79   :  { %3825 = vmatpush.msra.mxu2 %v8083_v59 }
 0xc7b   :  { %3826 = vmatpush.msra.mxu2 %v8089_v63 }
 0xc7d   :  { %3827 = vmatpush.msra.mxu2 %v8095_v6 }
 0xc7f   :  { %3828 = vmatpush.msra.mxu2 %v8111_v61 }
 0xc81   :  { %3829 = vmatpush.msra.mxu2 %v8119_v21 }
 0xce3   :  { %v3457_v8 = vpop.f32.mrf.mxu2  ;;  %v3477_v47 = vpop.f32.mrf.mxu3 }
 0xce4   :  { %v3458_v29 = vadd.f32 %v3457_v8, %v3313_v15  ;;  %v3478_v59 = vadd.f32 %v3477_v47, %v3314_v30  ;;  %v3601_v15 = vld [vmem:[#allocation8 + $0x110] sm:$0xff]  ;;  %v3602_v30 = vld [vmem:[#allocation8 + $0x118] sm:$0xff] }
 0xce5   :  { %v3597_v8 = vld [vmem:[#allocation8 + $0xf0] sm:$0xff]  ;;  %v3598_v47 = vld [vmem:[#allocation8 + $0xf8] sm:$0xff]  ;;  %3639 = vmatpush.msra.mxu0 %v3601_v15  ;;  %3659 = vmatpush.msra.mxu1 %v3602_v30  ;;  %v3571_v30 = vld [vmem:[#allocation8 + $0x20] sm:$0xff] }
 0xce6   :  { %3555 = vst [vmem:[#allocation12] sm:$0x3] %v3478_v59  ;;  %v3541_v63 = vsel %vm3540_vm3, %v3458_v29, -1e+30  ;;  %v3599_v29 = vld [vmem:[#allocation8 + $0x100] sm:$0xff]  ;;  %v3594_v59 = vld [vmem:[#allocation8 + $0xd8] sm:$0xff]  ;;  %3620 = vmatpush.msrb.mxu3 %v3597_v8 }
 0xce7   :  { %v3542_v6 = vsel %vm3019_vm4, %v3541_v63, -inf  ;;  %3640 = vmatpush.msra.mxu0 %v3598_v47  ;;  %3660 = vmatpush.msra.mxu1 %v3599_v29  ;;  %v3570_v15 = vld [vmem:[#allocation8 + $0x18] sm:$0xff]  ;;  %v3572_v8 = vld [vmem:[#allocation8 + $0x28] sm:$0xff] }
 0xce8   :  { %3543 = vmax.xlane.f32.xlu2 %v3542_v6  ;;  %v3596_v6 = vld [vmem:[#allocation8 + $0xe8] sm:$0xff]  ;;  %3621 = vmatpush.msrb.mxu3 %v3594_v59 }
 0xce9   :  { %3661 = vmatpush.msra.mxu1 %v3596_v6  ;;  %v3568_v6 = vld [vmem:[#allocation8 + $0x8] sm:$0xff] }
 0xd5b   :  { %v3544_v61 = vpop.xlane.xlu2 %3543 }
 0xd5c   :  { %v3545_v21 = vsub.f32 %v3541_v63, %v3544_v61  ;;  %v3595_v63 = vld [vmem:[#allocation8 + $0xe0] sm:$0xff] }
 0xd5d   :  { %v3591_v61 = vld [vmem:[#allocation8 + $0xc0] sm:$0xff]  ;;  %3641 = vmatpush.msra.mxu0 %v3595_v63 }
 0xd5e   :  { %v3546_v32 = vmul.f32 1.442695, %v3545_v21  ;;  %3622 = vmatpush.msrb.mxu3 %v3591_v61  ;;  %v3567_v63 = vld [vmem:[#allocation8] sm:$0xff]  ;;  %v3569_v61 = vld [vmem:[#allocation8 + $0x10] sm:$0xff] }
 0xd60   :  { %5310 = vpow2.f32 %v3546_v32  ;;  %v3593_v32 = vld [vmem:[#allocation8 + $0xd0] sm:$0xff] }
 0xd61   :  { %3662 = vmatpush.msra.mxu1 %v3593_v32 }
 0xd66   :  { %v5311_v42 = vpop.eup %5310 }
 0xd67   :  { %v3548_v60 = vsel %vm3019_vm4, %v5311_v42, 0.0  ;;  %v3588_v42 = vld [vmem:[#allocation8 + $0xa8] sm:$0xff] }
 0xd68   :  { %3549 = vadd.xlane.f32.xlu0 %v3548_v60  ;;  %v3589_v60 = vld [vmem:[#allocation8 + $0xb0] sm:$0xff]  ;;  %3623 = vmatpush.msrb.mxu3 %v3588_v42 }
 0xddb   :  { %v3550_v40 = vpop.xlane.xlu0 %3549 }
 0xddc   :  { %5312 = vlog2.f32 %v3550_v40  ;;  %v3590_v40 = vld [vmem:[#allocation8 + $0xb8] sm:$0xff] }
 0xddd   :  { %3663 = vmatpush.msra.mxu1 %v3590_v40  ;;  %v8304_v40 = vld [vmem:[#allocation10 + $0x180] sm:$0xff] }
 0xde2   :  { %v5313_v50 = vpop.eup %5312 }
 0xde3   :  { %v3552_v34 = vmul.f32 0.6931472, %v5313_v50  ;;  %v3585_v50 = vld [vmem:[#allocation8 + $0x90] sm:$0xff] }
 0xde4   :  { %3624 = vmatpush.msrb.mxu3 %v3585_v50  ;;  %v8306_v50 = vld [vmem:[#allocation10 + $0x228] sm:$0xff] }
 0xde5   :  { %v8226_v4 = vsub.f32 %v3545_v21, %v3552_v34  ;;  %v3592_v21 = vld [vmem:[#allocation8 + $0xc8] sm:$0xff]  ;;  %v3586_v34 = vld [vmem:[#allocation8 + $0x98] sm:$0xff] }
 0xde6   :  { %3642 = vmatpush.msra.mxu0 %v3592_v21  ;;  %3625 = vmatpush.msrb.mxu3 %v3582_v33  ;;  %v9232_v21 = vperm.slane %v8100_v41, 2  ;;  %v8313_v33 = vld [vmem:[#allocation10 + $0x158] sm:$0xff] }
 0xde7   :  { %3554 = vst [vmem:[#allocation11] sm:$0x3] %v8226_v4  ;;  %v3556_v43 = vsel %vm3019_vm4, %v8226_v4, -inf }
 0xde8   :  { %3557 = vmax.xlane.f32.xlu1 %v3556_v43  ;;  %3643 = vmatpush.msra.mxu0 %v3589_v60  ;;  %v3587_v43 = vld [vmem:[#allocation8 + $0xa0] sm:$0xff]  ;;  %v8302_v60 = vld [vmem:[#allocation10 + $0x178] sm:$0xff] }
 0xde9   :  { %3664 = vmatpush.msra.mxu1 %v3587_v43  ;;  %3626 = vmatpush.msrb.mxu3 %v3579_v49  ;;  %v8311_v43 = vld [vmem:[#allocation10 + $0x150] sm:$0xff] }
 0xdea   :  { %3644 = vmatpush.msra.mxu0 %v3586_v34  ;;  %v8320_v49 = vld [vmem:[#allocation10 + $0x130] sm:$0xff] }
 0xdeb   :  { %3665 = vmatpush.msra.mxu1 %v3584_v58  ;;  %3627 = vmatpush.msrb.mxu3 %v3576_v18  ;;  %v8318_v58 = vld [vmem:[#allocation10 + $0x128] sm:$0xff]  ;;  %v8327_v18 = vld [vmem:[#allocation10 + $0x100] sm:$0xff] }
 0xdec   :  { %3645 = vmatpush.msra.mxu0 %v3583_v62  ;;  %v8315_v62 = vld [vmem:[#allocation10 + $0x200] sm:$0xff] }
 0xded   :  { %3666 = vmatpush.msra.mxu1 %v3581_v0  ;;  %3628 = vmatpush.msrb.mxu3 %v3573_v24  ;;  %v8324_v0 = vld [vmem:[#allocation10 + $0x1d8] sm:$0xff]  ;;  %v8333_v24 = vld [vmem:[#allocation10 + $0x1b0] sm:$0xff] }
 0xdee   :  { %3646 = vmatpush.msra.mxu0 %v3580_v23 }
 0xdef   :  { %3667 = vmatpush.msra.mxu1 %v3578_v1  ;;  %3629 = vmatpush.msrb.mxu3 %v3570_v15  ;;  %v8340_v15 = vld [vmem:[#allocation10 + $0xe0] sm:$0xff] }
 0xdf0   :  { %3647 = vmatpush.msra.mxu0 %v3577_v20  ;;  %v8329_v20 = vld [vmem:[#allocation10 + $0x108] sm:$0xff] }
 0xdf1   :  { %3668 = vmatpush.msra.mxu1 %v3575_v2  ;;  %3630 = vmatpush.msrb.mxu3 %v3567_v63  ;;  %v8338_v2 = vld [vmem:[#allocation10 + $0xd8] sm:$0xff] }
 0xdf2   :  { %3648 = vmatpush.msra.mxu0 %v3574_v7 }
 0xdf3   :  { %3669 = vmatpush.msra.mxu1 %v3572_v8  ;;  %3834 = vmatpush.msra.mxu3 %v8086_v54  ;;  %v3517_v54 = vpop.f32.mrf.mxu1  ;;  %v8347_v8 = vld [vmem:[#allocation10 + $0xb0] sm:$0xff] }
 0xdf4   :  { %3649 = vmatpush.msra.mxu0 %v3571_v30  ;;  %v8344_v30 = vld [vmem:[#allocation10 + $0x188] sm:$0xff] }
 0xdf5   :  { %3670 = vmatpush.msra.mxu1 %v3569_v61  ;;  %3835 = vmatpush.msra.mxu3 %v8092_v56  ;;  %v8264_v56 = vld [vmem:[#allocation10 + $0x240] sm:$0xff] }
 0xdf6   :  { %3650 = vmatpush.msra.mxu0 %v3568_v6  ;;  %9228 = vst [vmem:[#allocation56_spill] sm:$0xff] %v8264_v56  ;;  %v8361_v6 = vld [vmem:[#allocation10 + $0x138] sm:$0xff] }
 0xdf7   :  { %3874 = vmatpush.msrb.mxu1 %v7890_v45  ;;  %3836 = vmatpush.msra.mxu3 %v8108_v16  ;;  %9233 = vst [vmem:[#allocation57_spill] sm:$0xff] %v8361_v6 }
 0xdf9   :  { %3875 = vmatpush.msrb.mxu1 %v7896_v14  ;;  %3837 = vmatpush.msra.mxu3 %v8114_v17  ;;  %v8987_v14 = vmov 1.0   ;;  %v8267_v17 = vld [vmem:[#allocation10 + $0x218] sm:$0xff] }
 0xdfa   :  { %9229 = vst [vmem:[#allocation52_spill] sm:$0xff] %v8267_v17 }
 0xdfb   :  { %3876 = vmatpush.msrb.mxu1 %v7907_v31  ;;  %3838 = vmatpush.msra.mxu3 %v8122_v5  ;;  %v3497_v31 = vpop.f32.mrf.mxu0  ;;  %v9230_v5 = vperm.slane %v8100_v41, 3 }
 0xdfc   :  { %v3498_v32 = vadd.f32 %v3497_v31, %v9232_v21  ;;  %v8368_v31 = vld [vmem:[#allocation10 + $0x110] sm:$0xff] }
 0xdfd   :  { %3877 = vmatpush.msrb.mxu1 %v7918_v37  ;;  %3839 = vmatpush.msra.mxu3 %v8128_v38  ;;  %v8261_v37 = vld [vmem:[#allocation10 + $0x268] sm:$0xff]  ;;  %v3518_v38 = vadd.f32 %v3517_v54, %v9230_v5  ;;  %9234 = vst [vmem:[#allocation37_spill] sm:$0xff] %v8368_v31  ;;  %v8371_v54 = vld [vmem:[#allocation10 + $0x38] sm:$0xff] }
 0xdfe   :  { %3854 = vmatpush.msrb.mxu0 %v8261_v37  ;;  %v8377_v5 = vld [vmem:[#allocation10 + $0xe8] sm:$0xff] }
 0xdff   :  { %3840 = vmatpush.msra.mxu3 %v8135_v46  ;;  %9235 = vst [vmem:[#allocation45_spill] sm:$0xff] %v8377_v5 }
 0xe00   :  { %3855 = vmatpush.msrb.mxu0 %v8264_v56 }
 0xe01   :  { %3841 = vmatpush.msra.mxu3 %v8139_v9  ;;  %v8275_v9 = vld [vmem:[#allocation10 + $0x1f0] sm:$0xff] }
 0xe02   :  { %3856 = vmatpush.msrb.mxu0 %v8267_v17 }
 0xe03   :  { %3842 = vmatpush.msra.mxu3 %v8147_v52 }
 0xe04   :  { %3857 = vmatpush.msrb.mxu0 %v8275_v9 }
 0xe05   :  { %3843 = vmatpush.msra.mxu3 %v8151_v3  ;;  %v8279_v3 = vld [vmem:[#allocation10 + $0x1c8] sm:$0xff] }
 0xe06   :  { %3858 = vmatpush.msrb.mxu0 %v8279_v3 }
 0xe07   :  { %3844 = vmatpush.msra.mxu3 %v8158_v13  ;;  %v8281_v13 = vld [vmem:[#allocation10 + $0x1d0] sm:$0xff] }
 0xe08   :  { %3878 = vmatpush.msrb.mxu1 %v8281_v13 }
 0xe09   :  { %3845 = vmatpush.msra.mxu3 %v8162_v44  ;;  %v8283_v44 = vld [vmem:[#allocation10 + $0x278] sm:$0xff] }
 0xe0a   :  { %9231 = vst [vmem:[#allocation43_spill] sm:$0xff] %v8283_v44  ;;  %3894 = vmatpush.msrb.mxu2 %v8283_v44 }
 0xe0b   :  { %3846 = vmatpush.msra.mxu3 %v8166_v51 }
 0xe0d   :  { %3847 = vmatpush.msra.mxu3 %v8168_v36 }
 0xe0f   :  { %3848 = vmatpush.msra.mxu3 %v8172_v22  ;;  %v8288_v22 = vld [vmem:[#allocation10 + $0x1a0] sm:$0xff] }
 0xe10   :  { %3859 = vmatpush.msrb.mxu0 %v8288_v22 }
 0xe11   :  { %3849 = vmatpush.msra.mxu3 %v8176_v10  ;;  %v8290_v10 = vld [vmem:[#allocation10 + $0x1a8] sm:$0xff] }
 0xe12   :  { %3879 = vmatpush.msrb.mxu1 %v8290_v10  ;;  %3860 = vmatpush.msrb.mxu0 %v8302_v60 }
 0xe14   :  { %3880 = vmatpush.msrb.mxu1 %v8304_v40  ;;  %3861 = vmatpush.msrb.mxu0 %v8311_v43 }
 0xe16   :  { %3881 = vmatpush.msrb.mxu1 %v8313_v33  ;;  %3862 = vmatpush.msrb.mxu0 %v8318_v58 }
 0xe18   :  { %3882 = vmatpush.msrb.mxu1 %v8320_v49  ;;  %3863 = vmatpush.msrb.mxu0 %v8327_v18 }
 0xe1a   :  { %3883 = vmatpush.msrb.mxu1 %v8329_v20  ;;  %3864 = vmatpush.msrb.mxu0 %v8338_v2 }
 0xe1c   :  { %3884 = vmatpush.msrb.mxu1 %v8340_v15  ;;  %3865 = vmatpush.msrb.mxu0 %v8347_v8 }
 0xe5b   :  { %v3558_v47 = vpop.xlane.xlu1 %3557 }
 0xe5c   :  { %vm3559_vm5 = vcmp.ge.f32.partialorder %v8226_v4, %v3558_v47  ;;  %v8292_v4 = vld [vmem:[#allocation10 + $0x250] sm:$0xff]  ;;  %v8349_v47 = vld [vmem:[#allocation10 + $0xb8] sm:$0xff] }
 0xe5d   :  { %v3560_v29 = vsel %vm3559_vm5, %v8232_v57, 128.0  ;;  %3895 = vmatpush.msrb.mxu2 %v8292_v4  ;;  %3885 = vmatpush.msrb.mxu1 %v8349_v47 }
 0xe5e   :  { %v3561_v59 = vsel %vm3019_vm4, %v3560_v29, inf  ;;  %v8354_v29 = vld [vmem:[#allocation10 + $0x160] sm:$0xff] }
 0xe5f   :  { %3562 = vmin.xlane.f32.xlu2 %v3561_v59  ;;  %3896 = vmatpush.msrb.mxu2 %v8306_v50  ;;  %v8357_v59 = vld [vmem:[#allocation10 + $0x88] sm:$0xff] }
 0xe60   :  { %3866 = vmatpush.msrb.mxu0 %v8357_v59  ;;  %3886 = vmatpush.msrb.mxu1 %v7984_v35  ;;  %v8384_v35 = vld [vmem:[#allocation10 + $0xc0] sm:$0xff] }
 0xe61   :  { %3897 = vmatpush.msrb.mxu2 %v8315_v62  ;;  %9236 = vst [vmem:[#allocation59_spill] sm:$0xff] %v8384_v35 }
 0xe62   :  { %3887 = vmatpush.msrb.mxu1 %v7991_v48  ;;  %v9237_v48 = vld [vmem:[#allocation22_spill] sm:$0xff] }
 0xe63   :  { %3898 = vmatpush.msrb.mxu2 %v8324_v0 }
 0xe64   :  { %3888 = vmatpush.msrb.mxu1 %v8001_v39  ;;  %v8395_v39 = vld [vmem:[#allocation10 + $0x70] sm:$0xff] }
 0xe65   :  { %3899 = vmatpush.msrb.mxu2 %v8333_v24  ;;  %9239 = vst [vmem:[#allocation53_spill] sm:$0xff] %v8395_v39 }
 0xe66   :  { %3889 = vmatpush.msrb.mxu1 %v9237_v48 }
 0xe67   :  { %3900 = vmatpush.msrb.mxu2 %v8344_v30 }
 0xe69   :  { %3901 = vmatpush.msrb.mxu2 %v8354_v29 }
 0xe6b   :  { %3902 = vmatpush.msrb.mxu2 %v8361_v6 }
 0xe6d   :  { %3903 = vmatpush.msrb.mxu2 %v8368_v31 }
 0xe6f   :  { %3904 = vmatpush.msrb.mxu2 %v8377_v5 }
 0xe71   :  { %3905 = vmatpush.msrb.mxu2 %v8384_v35 }
 0xed2   :  { %v3563_v45 = vpop.xlane.xlu2 %3562 }
 0xed3   :  { %vm3564_vm6 = vcmp.eq.f32.partialorder %v8232_v57, %v3563_v45  ;;  %v8364_v45 = vld [vmem:[#allocation10 + $0x60] sm:$0xff] }
 0xed4   :  { %5089 = vmatmul.msk.f32.vlgmr.msrb.gmra.mxu3 %vm3564_vm6, %v8987_v14  ;;  %5090 = vmatmul.msk.f32.vlgmr.msra.gmra.mxu0 %vm3564_vm6, %v8987_v14 }
 0xed5   :  { %5091 = vmatmul.msk.f32.vlgmr.msra.gmra.mxu1 %vm3564_vm6, %v8987_v14  ;;  %3867 = vmatpush.msrb.mxu0 %v8364_v45  ;;  %v8407_v14 = vld [vmem:[#allocation10 + $0x208] sm:$0xff] }
 0xed6   :  { %4110 = vmatpush.msra.mxu1 %v8261_v37 }
 0xed7   :  { %3868 = vmatpush.msrb.mxu0 %v8371_v54 }
 0xed8   :  { %4111 = vmatpush.msra.mxu1 %v8264_v56 }
 0xeda   :  { %4112 = vmatpush.msra.mxu1 %v8267_v17  ;;  %v9241_v17 = vperm.slane %v8100_v41, 4 }
 0xedc   :  { %4113 = vmatpush.msra.mxu1 %v8275_v9 }
 0xede   :  { %4114 = vmatpush.msra.mxu1 %v8279_v3 }
 0xee0   :  { %4115 = vmatpush.msra.mxu1 %v8288_v22 }
 0xee2   :  { %4116 = vmatpush.msra.mxu1 %v8302_v60 }
 0xee4   :  { %4117 = vmatpush.msra.mxu1 %v8311_v43 }
 0xee6   :  { %4118 = vmatpush.msra.mxu1 %v8318_v58 }
 0xee8   :  { %4119 = vmatpush.msra.mxu1 %v8327_v18 }
 0xeea   :  { %4120 = vmatpush.msra.mxu1 %v8338_v2 }
 0xeec   :  { %4121 = vmatpush.msra.mxu1 %v8347_v8 }
 0xeee   :  { %4122 = vmatpush.msra.mxu1 %v8357_v59 }
 0xef0   :  { %4123 = vmatpush.msra.mxu1 %v8364_v45 }
 0xef2   :  { %4124 = vmatpush.msra.mxu1 %v8371_v54 }
 0xf51   :  { %v3652_v16 = vpop.f32.mrf.mxu0 }
 0xf52   :  { %v8272_v46 = vadd.f32 %v3652_v16, %v8145_v28  ;;  %v8410_v28 = vld [vmem:[#allocation10 + $0x20] sm:$0xff]  ;;  %v3672_v26 = vpop.f32.mrf.mxu1 }
 0xf53   :  { %9240 = vst [vmem:[#allocation49_spill] sm:$0xff] %v8410_v28 }
 0xf54   :  { %v3695_v52 = vadd.f32 %v8272_v46, %v3518_v38  ;;  %v8380_v38 = vld [vmem:[#allocation10 + $0x10] sm:$0xff] }
 0xf55   :  { %3869 = vmatpush.msrb.mxu0 %v8380_v38  ;;  %4125 = vmatpush.msra.mxu1 %v8380_v38 }
 0xf56   :  { %v5093_v51 = vmul.f32 -1.442695, %v3695_v52 }
 0xf57   :  { %v3632_v36 = vpop.f32.mrf.mxu3 }
 0xf58   :  { %5314 = vpow2.f32 %v5093_v51  ;;  %v8297_v42 = vadd.f32 %v3632_v36, %v8126_v12  ;;  %v8391_v51 = vld [vmem:[#allocation10 + $0x98] sm:$0xff]  ;;  %v3537_v12 = vpop.f32.mrf.mxu2 }
 0xf59   :  { %9238 = vst [vmem:[#allocation55_spill] sm:$0xff] %v8391_v51  ;;  %3906 = vmatpush.msrb.mxu2 %v8391_v51 }
 0xf5a   :  { %v3675_v34 = vadd.f32 %v8297_v42, %v3498_v32 }
 0xf5b   :  { %3907 = vmatpush.msrb.mxu2 %v8395_v39  ;;  %v3538_v39 = vadd.f32 %v3537_v12, %v9241_v17 }
 0xf5c   :  { %v5092_v23 = vmul.f32 -1.442695, %v3675_v34  ;;  %v8398_v34 = vld [vmem:[#allocation10 + $0x258] sm:$0xff] }
 0xf5d   :  { %4070 = vmatpush.msrb.mxu3 %v8398_v34 }
 0xf5e   :  { %v5315_v1 = vpop.eup %5314  ;;  %5316 = vpow2.f32 %v5092_v23  ;;  %v8400_v23 = vld [vmem:[#allocation10 + $0x230] sm:$0xff] }
 0xf5f   :  { %v8335_v7 = vadd.f32 1.0, %v5315_v1  ;;  %4071 = vmatpush.msrb.mxu3 %v8400_v23 }
 0xf61   :  { %5318 = vrcp.f32 %v8335_v7  ;;  %4072 = vmatpush.msrb.mxu3 %v8407_v14  ;;  %vm3705_vm0 = vweird.f32 %v8335_v7  ;;  %v3709_v41 = vand.u32 2147483647, %v8335_v7 }
 0xf63   :  { %vm3710_vm13 = vcmp.eq.f32.partialorder %v3709_v41, 8.507059e+37  ;;  %v8474_v41 = vld [vmem:[#allocation10 + $0x78] sm:$0xff] }
 0xf64   :  { %v5317_v63 = vpop.eup %5316  ;;  %9243 = vst [vmem:[#allocation28_spill] sm:$0xff] %v8474_v41 }
 0xf65   :  { %v3679_v61 = vadd.f32 1.0, %v5317_v63  ;;  %v8403_v63 = vld [vmem:[#allocation10 + $0x48] sm:$0xff] }
 0xf66   :  { %3908 = vmatpush.msrb.mxu2 %v8403_v63 }
 0xf67   :  { %5320 = vrcp.f32 %v3679_v61  ;;  %v8373_v16 = vpop.eup %5318  ;;  %v3691_v48 = vand.u32 2147483648, %v3679_v61  ;;  %v3689_v11 = vand.u32 2147483647, %v3679_v61  ;;  %vm3685_vm8 = vweird.f32 %v3679_v61 }
 0xf68   :  { %v3701_v52 = vmul.f32 %v8373_v16, %v8335_v7  ;;  %3909 = vmatpush.msrb.mxu2 %v8410_v28  ;;  %vm3706_vm11 = vweird.f32 %v8373_v16 }
 0xf69   :  { %vm3690_vm10 = vcmp.eq.f32.partialorder %v3689_v11, 8.507059e+37  ;;  %vm3707_vm12 = vmor %vm3705_vm0, %vm3706_vm11 }
 0xf6a   :  { %v3702_v32 = vsub.f32 1.0, %v3701_v52 }
 0xf6d   :  { %v5321_v36 = vpop.eup %5320 }
 0xf6e   :  { %v3681_v21 = vmul.f32 %v5321_v36, %v3679_v61  ;;  %vm3686_vm7 = vweird.f32 %v5321_v36  ;;  %v3711_v61 = vand.u32 2147483648, %v8335_v7 }
 0xf6f   :  { %vm3687_vm9 = vmor %vm3685_vm8, %vm3686_vm7 }
 0xf70   :  { %v3682_v1 = vsub.f32 1.0, %v3681_v21  ;;  %v3703_v21 = vmul.f32 %v8373_v16, %v3702_v32 }
 0xf72   :  { %v3683_v52 = vmul.f32 %v5321_v36, %v3682_v1  ;;  %v3692_v1 = vor.u32 1.1754944e-38, %v3691_v48  ;;  %v3704_v32 = vadd.f32 %v8373_v16, %v3703_v21  ;;  %v8426_v48 = vadd.f32 %v3672_v26, %v8188_v27  ;;  %v8459_v21 = vld [vmem:[#allocation10 + $0x168] sm:$0xff]  ;;  %v4029_v27 = vld [vmem:[#allocation10 + $0x198] sm:$0xff] }
 0xf74   :  { %v3684_v57 = vadd.f32 %v5321_v36, %v3683_v52  ;;  %v3708_v11 = vsel %vm3707_vm12, %v8373_v16, %v3704_v32  ;;  %v8453_v16 = vld [vmem:[#allocation10 + $0x1b8] sm:$0xff]  ;;  %v8468_v32 = vld [vmem:[#allocation10 + $0xa0] sm:$0xff] }
 0xf75   :  { %9242 = vst [vmem:[#allocation30_spill] sm:$0xff] %v8468_v32 }
 0xf76   :  { %v3688_v56 = vsel %vm3687_vm9, %v5321_v36, %v3684_v57  ;;  %v3712_v57 = vor.u32 1.1754944e-38, %v3711_v61  ;;  %v8471_v61 = vld [vmem:[#allocation10 + $0x270] sm:$0xff] }
 0xf77   :  { %v3693_v52 = vsel %vm3690_vm10, %v3692_v1, %v3688_v56  ;;  %v8465_v1 = vld [vmem:[#allocation10 + $0xc8] sm:$0xff] }
 0xf78   :  { %v3715_v28 = vmul.f32 %v3693_v52, %v3538_v39  ;;  %v3713_v26 = vsel %vm3710_vm13, %v3712_v57, %v3708_v11  ;;  %v8456_v39 = vld [vmem:[#allocation10 + $0x190] sm:$0xff]  ;;  %v4054_v52 = vld [vmem:[#allocation10 + $0x260] sm:$0xff] }
 0xf79   :  { %v3718_v56 = vsub.f32 1.0, %v3713_v26  ;;  %v3720_v36 = vmul.f32 %v3713_v26, %v8194_v55  ;;  %v8450_v55 = vld [vmem:[#allocation10 + $0x1e0] sm:$0xff]  ;;  %4090 = vmatpush.msra.mxu0 %v4054_v52  ;;  %v8491_v26 = vld [vmem:[#allocation10 + $0x28] sm:$0xff] }
 0xf7a   :  { %v3716_v12 = vadd.f32 %v3715_v28, %v8426_v48  ;;  %4073 = vmatpush.msrb.mxu3 %v8450_v55  ;;  %v8483_v11 = vld [vmem:[#allocation10 + $0x220] sm:$0xff]  ;;  %9245 = vst [vmem:[#allocation51_spill] sm:$0xff] %v8491_v26 }
 0xf7b   :  { %v8488_v57 = vld [vmem:[%s8895_s14] sm:$0x1f] }
 0xf7c   :  { %5322 = vtanh.f32 %v3716_v12  ;;  %4074 = vmatpush.msrb.mxu3 %v8453_v16  ;;  %v4044_v12 = vld [vmem:[#allocation10 + $0x210] sm:$0xff] }
 0xf7e   :  { %4075 = vmatpush.msrb.mxu3 %v8456_v39 }
 0xf80   :  { %4076 = vmatpush.msrb.mxu3 %v8459_v21 }
 0xf82   :  { %v5323_v17 = vpop.eup %5322  ;;  %4077 = vmatpush.msrb.mxu3 %v8071_v25  ;;  %v4049_v25 = vld [vmem:[#allocation10 + $0x238] sm:$0xff] }
 0xf83   :  { %v3719_v7 = vmul.f32 %v5323_v17, %v3718_v56  ;;  %4091 = vmatpush.msra.mxu0 %v4049_v25  ;;  %v4039_v56 = vld [vmem:[#allocation10 + $0x1e8] sm:$0xff]  ;;  %v8494_v17 = vld [vmem:[#allocation10 + $0x1f8] sm:$0xff] }
 0xf84   :  { %4078 = vmatpush.msrb.mxu3 %v8074_v19  ;;  %v8477_v19 = vld [vmem:[#allocation10 + $0x248] sm:$0xff] }
 0xf85   :  { %v8439_v28 = vadd.f32 %v3720_v36, %v3719_v7  ;;  %4092 = vmatpush.msra.mxu0 %v4044_v12  ;;  %v8497_v7 = vld [vmem:[#allocation10] sm:$0xff]  ;;  %v3806_v36 = vperm.slane %v8488_v57, 2 }
 0xf86   :  { %4079 = vmatpush.msrb.mxu3 %v8077_v53  ;;  %v8480_v53 = vld [vmem:[#allocation10 + $0x50] sm:$0xff]  ;;  %9246 = vst [vmem:[#allocation60_spill] sm:$0xff] %v8497_v7 }
 0xf87   :  { %3830 = vmatmul.f32.vlgmr.msra.gmra.mxu2 %v8439_v28  ;;  %3850 = vmatmul.f32.vlgmr.msra.gmra.mxu3 %v8439_v28  ;;  %9244 = vst [vmem:[#allocation19_spill] sm:$0xff] %v8480_v53 }
 0xf88   :  { %3870 = vmatmul.f32.vlgmr.msrb.gmra.mxu0 %v8439_v28  ;;  %3890 = vmatmul.f32.vlgmr.msrb.gmra.mxu1 %v8439_v28 }
 0xf89   :  { %4080 = vmatpush.msrb.mxu3 %v8465_v1  ;;  %4130 = vmatpush.msra.mxu2 %v8471_v61 }
 0xf8a   :  { %4346 = vmatpush.msrb.mxu1 %v4054_v52  ;;  %4093 = vmatpush.msra.mxu0 %v4039_v56  ;;  %v3807_v52 = vperm.slane %v8488_v57, 3 }
 0xf8b   :  { %4081 = vmatpush.msrb.mxu3 %v8468_v32  ;;  %4131 = vmatpush.msra.mxu2 %v8477_v19  ;;  %v4024_v32 = vld [vmem:[#allocation10 + $0x170] sm:$0xff] }
 0xf8c   :  { %4347 = vmatpush.msrb.mxu1 %v4049_v25  ;;  %v4034_v25 = vld [vmem:[#allocation10 + $0x1c0] sm:$0xff] }
 0xf8d   :  { %4082 = vmatpush.msrb.mxu3 %v8474_v41  ;;  %4132 = vmatpush.msra.mxu2 %v8483_v11 }
 0xf8e   :  { %4348 = vmatpush.msrb.mxu1 %v4044_v12  ;;  %4094 = vmatpush.msra.mxu0 %v4034_v25 }
 0xf8f   :  { %3910 = vmatmul.f32.vlgmr.msrb.gmra.mxu2 %v8439_v28  ;;  %4083 = vmatpush.msrb.mxu3 %v8480_v53 }
 0xf90   :  { %4133 = vmatpush.msra.mxu2 %v8494_v17  ;;  %4349 = vmatpush.msrb.mxu1 %v4039_v56  ;;  %v3805_v56 = vperm.slane %v8488_v57, 1 }
 0xf91   :  { %4084 = vmatpush.msrb.mxu3 %v8491_v26  ;;  %4095 = vmatpush.msra.mxu0 %v4029_v27 }
 0xf92   :  { %4134 = vmatpush.msra.mxu2 %v8281_v13  ;;  %4350 = vmatpush.msrb.mxu1 %v4034_v25 }
 0xf93   :  { %4085 = vmatpush.msrb.mxu3 %v8497_v7  ;;  %4096 = vmatpush.msra.mxu0 %v4024_v32  ;;  %v4019_v7 = vld [vmem:[#allocation10 + $0x148] sm:$0xff] }
 0xf94   :  { %4135 = vmatpush.msra.mxu2 %v8290_v10  ;;  %4351 = vmatpush.msrb.mxu1 %v4029_v27  ;;  %v4014_v27 = vld [vmem:[#allocation10 + $0x120] sm:$0xff] }
 0xf95   :  { %4150 = vmatpush.msra.mxu3 %v8283_v44  ;;  %4097 = vmatpush.msra.mxu0 %v4019_v7 }
 0xf96   :  { %4136 = vmatpush.msra.mxu2 %v8304_v40  ;;  %4352 = vmatpush.msrb.mxu1 %v4024_v32  ;;  %v3999_v32 = vld [vmem:[#allocation10 + $0xa8] sm:$0xff] }
 0xf97   :  { %4151 = vmatpush.msra.mxu3 %v8292_v4  ;;  %4098 = vmatpush.msra.mxu0 %v4014_v27 }
 0xf98   :  { %4137 = vmatpush.msra.mxu2 %v8313_v33  ;;  %4353 = vmatpush.msrb.mxu1 %v4019_v7  ;;  %v3994_v7 = vld [vmem:[#allocation10 + $0x80] sm:$0xff] }
 0xf99   :  { %4152 = vmatpush.msra.mxu3 %v8306_v50 }
 0xf9a   :  { %4138 = vmatpush.msra.mxu2 %v8320_v49  ;;  %4354 = vmatpush.msrb.mxu1 %v4014_v27 }
 0xf9b   :  { %4153 = vmatpush.msra.mxu3 %v8315_v62 }
 0xf9c   :  { %4139 = vmatpush.msra.mxu2 %v8329_v20 }
 0xf9d   :  { %4154 = vmatpush.msra.mxu3 %v8324_v0 }
 0xf9e   :  { %4140 = vmatpush.msra.mxu2 %v8340_v15 }
 0xf9f   :  { %4155 = vmatpush.msra.mxu3 %v8333_v24 }
 0xfa0   :  { %4141 = vmatpush.msra.mxu2 %v8349_v47 }
 0xfa1   :  { %4156 = vmatpush.msra.mxu3 %v8344_v30 }
 0xfa3   :  { %4157 = vmatpush.msra.mxu3 %v8354_v29 }
 0xfa5   :  { %4158 = vmatpush.msra.mxu3 %v8361_v6  ;;  %v9250_v6 = vld [vmem:[#allocation52_spill] sm:$0xff] }
 0xfa7   :  { %4159 = vmatpush.msra.mxu3 %v8368_v31  ;;  %v9249_v31 = vld [vmem:[#allocation53_spill] sm:$0xff] }
 0xfa9   :  { %4160 = vmatpush.msra.mxu3 %v8377_v5 }
 0xfab   :  { %4161 = vmatpush.msra.mxu3 %v8384_v35 }
 0xfad   :  { %4162 = vmatpush.msra.mxu3 %v8391_v51 }
 0xfaf   :  { %4163 = vmatpush.msra.mxu3 %v9249_v31 }
 0xfb1   :  { %4164 = vmatpush.msra.mxu3 %v8403_v63 }
0x1005   :  { %v3871_v12 = vpop.f32.mrf.mxu0  ;;  %v3891_v26 = vpop.f32.mrf.mxu1 }
0x1006   :  { %v3872_v53 = vadd.f32 %v3871_v12, %v3806_v36  ;;  %v3892_v41 = vadd.f32 %v3891_v26, %v3807_v52 }
0x1008   :  { %v3931_v44 = vadd.f32 %v3872_v53, %v8297_v42  ;;  %v3951_v25 = vadd.f32 %v3892_v41, %v8272_v46  ;;  %v4009_v41 = vld [vmem:[#allocation10 + $0xf8] sm:$0xff] }
0x1009   :  { %4099 = vmatpush.msra.mxu0 %v4009_v41  ;;  %4355 = vmatpush.msrb.mxu1 %v4009_v41  ;;  %v8529_v41 = vld [vmem:[#allocation10 + $0x40] sm:$0xff] }
0x100a   :  { %v5094_v26 = vmul.f32 -1.442695, %v3931_v44  ;;  %v5095_v36 = vmul.f32 -1.442695, %v3951_v25  ;;  %v3851_v52 = vpop.f32.mrf.mxu3  ;;  %v4004_v44 = vld [vmem:[#allocation10 + $0xd0] sm:$0xff] }
0x100b   :  { %v3852_v12 = vadd.f32 %v3851_v52, %v3805_v56  ;;  %4100 = vmatpush.msra.mxu0 %v4004_v44  ;;  %4356 = vmatpush.msrb.mxu1 %v4004_v44  ;;  %v8521_v56 = vld [vmem:[#allocation10 + $0x90] sm:$0xff]  ;;  %v8524_v52 = vld [vmem:[#allocation10 + $0x68] sm:$0xff] }
0x100c   :  { %5324 = vpow2.f32 %v5094_v26  ;;  %4142 = vmatpush.msra.mxu2 %v8521_v56  ;;  %v3979_v44 = vld [vmem:[#allocation10 + $0x8] sm:$0xff] }
0x100d   :  { %5326 = vpow2.f32 %v5095_v36  ;;  %3930 = vst [vmem:[#allocation12 + $0x2] sm:$0x3] %v3852_v12  ;;  %4101 = vmatpush.msra.mxu0 %v3999_v32  ;;  %4357 = vmatpush.msrb.mxu1 %v3999_v32  ;;  %v3989_v36 = vld [vmem:[#allocation10 + $0x58] sm:$0xff]  ;;  %v3984_v12 = vld [vmem:[#allocation10 + $0x30] sm:$0xff] }
0x100e   :  { %4143 = vmatpush.msra.mxu2 %v8524_v52  ;;  %v8534_v32 = vld [vmem:[#allocation10 + $0x18] sm:$0xff] }
0x100f   :  { %4102 = vmatpush.msra.mxu0 %v3994_v7  ;;  %4358 = vmatpush.msrb.mxu1 %v3994_v7 }
0x1010   :  { %4144 = vmatpush.msra.mxu2 %v8529_v41 }
0x1011   :  { %4103 = vmatpush.msra.mxu0 %v3989_v36  ;;  %4359 = vmatpush.msrb.mxu1 %v3989_v36 }
0x1012   :  { %v5325_v53 = vpop.eup %5324  ;;  %4145 = vmatpush.msra.mxu2 %v8534_v32 }
0x1013   :  { %v5327_v25 = vpop.eup %5326  ;;  %v3935_v26 = vadd.f32 1.0, %v5325_v53  ;;  %v8536_v53 = vpop.f32.mrf.mxu2  ;;  %4104 = vmatpush.msra.mxu0 %v3984_v12  ;;  %4360 = vmatpush.msrb.mxu1 %v3984_v12  ;;  %v9248_v12 = vld [vmem:[#allocation56_spill] sm:$0xff] }
0x1014   :  { %v8526_v27 = vadd.f32 1.0, %v5327_v25  ;;  %9247 = vst [vmem:[#allocation29_spill] sm:$0xff] %v8536_v53  ;;  %4366 = vmatpush.msrb.mxu2 %v8261_v37  ;;  %v3808_v37 = vperm.slane %v8488_v57, 4 }
0x1015   :  { %5328 = vrcp.f32 %v3935_v26  ;;  %4105 = vmatpush.msra.mxu0 %v3979_v44  ;;  %4361 = vmatpush.msrb.mxu1 %v3979_v44  ;;  %v3947_v35 = vand.u32 2147483648, %v3935_v26  ;;  %v3945_v51 = vand.u32 2147483647, %v3935_v26  ;;  %vm3941_vm15 = vweird.f32 %v3935_v26 }
0x1016   :  { %5330 = vrcp.f32 %v8526_v27  ;;  %4367 = vmatpush.msrb.mxu2 %v9248_v12  ;;  %vm3961_vm6 = vweird.f32 %v8526_v27 }
0x1017   :  { %4326 = vmatpush.msrb.mxu0 %v8398_v34  ;;  %vm3946_vm2 = vcmp.eq.f32.partialorder %v3945_v51, 8.507059e+37 }
0x1018   :  { %4368 = vmatpush.msrb.mxu2 %v9250_v6  ;;  %v3948_v6 = vor.u32 1.1754944e-38, %v3947_v35  ;;  %v3965_v35 = vand.u32 2147483647, %v8526_v27 }
0x1019   :  { %4327 = vmatpush.msrb.mxu0 %v8400_v23 }
0x101a   :  { %4369 = vmatpush.msrb.mxu2 %v8275_v9  ;;  %v3967_v9 = vand.u32 2147483648, %v8526_v27  ;;  %vm3966_vm8 = vcmp.eq.f32.partialorder %v3965_v35, 8.507059e+37 }
0x101b   :  { %v5329_v7 = vpop.eup %5328  ;;  %4328 = vmatpush.msrb.mxu0 %v8407_v14  ;;  %v3911_v12 = vpop.f32.mrf.mxu2  ;;  %v9251_v14 = vld [vmem:[#allocation49_spill] sm:$0xff] }
0x101c   :  { %v5331_v25 = vpop.eup %5330  ;;  %v3937_v36 = vmul.f32 %v5329_v7, %v3935_v26  ;;  %vm3942_vm14 = vweird.f32 %v5329_v7  ;;  %4165 = vmatpush.msra.mxu3 %v9251_v14  ;;  %4370 = vmatpush.msrb.mxu2 %v8279_v3 }
0x101d   :  { %v3957_v53 = vmul.f32 %v5331_v25, %v8526_v27  ;;  %4329 = vmatpush.msrb.mxu0 %v8450_v55  ;;  %vm3943_vm1 = vmor %vm3941_vm15, %vm3942_vm14  ;;  %vm3962_vm5 = vweird.f32 %v5331_v25 }
0x101e   :  { %v3938_v5 = vsub.f32 1.0, %v3937_v36  ;;  %4371 = vmatpush.msrb.mxu2 %v8288_v22  ;;  %vm3963_vm7 = vmor %vm3961_vm6, %vm3962_vm5 }
0x101f   :  { %v3958_v34 = vsub.f32 1.0, %v3957_v53  ;;  %4330 = vmatpush.msrb.mxu0 %v8453_v16  ;;  %v3968_v16 = vor.u32 1.1754944e-38, %v3967_v9 }
0x1020   :  { %v3939_v44 = vmul.f32 %v5329_v7, %v3938_v5  ;;  %v3912_v5 = vadd.f32 %v3911_v12, %v3808_v37  ;;  %4372 = vmatpush.msrb.mxu2 %v8302_v60 }
0x1021   :  { %v3959_v23 = vmul.f32 %v5331_v25, %v3958_v34  ;;  %4331 = vmatpush.msrb.mxu0 %v8456_v39 }
0x1022   :  { %v3940_v36 = vadd.f32 %v5329_v7, %v3939_v44  ;;  %4373 = vmatpush.msrb.mxu2 %v8311_v43  ;;  %v9252_v43 = vld [vmem:[#allocation30_spill] sm:$0xff] }
0x1023   :  { %v3960_v34 = vadd.f32 %v5331_v25, %v3959_v23  ;;  %4332 = vmatpush.msrb.mxu0 %v8459_v21 }
0x1024   :  { %v3944_v53 = vsel %vm3943_vm1, %v5329_v7, %v3940_v36  ;;  %4374 = vmatpush.msrb.mxu2 %v8318_v58  ;;  %v9254_v58 = vld [vmem:[#allocation19_spill] sm:$0xff] }
0x1025   :  { %v3949_v55 = vsel %vm3946_vm2, %v3948_v6, %v3944_v53  ;;  %v3964_v51 = vsel %vm3963_vm7, %v5331_v25, %v3960_v34 }
0x1026   :  { %v3971_v26 = vmul.f32 %v3949_v55, %v3912_v5  ;;  %v3969_v22 = vsel %vm3966_vm8, %v3968_v16, %v3964_v51  ;;  %4375 = vmatpush.msrb.mxu2 %v8327_v18  ;;  %v9255_v18 = vld [vmem:[#allocation51_spill] sm:$0xff] }
0x1027   :  { %v3974_v39 = vsub.f32 1.0, %v3969_v22  ;;  %v3976_v60 = vmul.f32 %v3969_v22, %v8439_v28 }
0x1028   :  { %v3972_v3 = vadd.f32 %v3971_v26, %v8426_v48  ;;  %4376 = vmatpush.msrb.mxu2 %v8338_v2  ;;  %v9256_v2 = vld [vmem:[#allocation60_spill] sm:$0xff] }
0x102a   :  { %5332 = vtanh.f32 %v3972_v3  ;;  %4377 = vmatpush.msrb.mxu2 %v8347_v8  ;;  %v9257_v8 = vld [vmem:[#allocation43_spill] sm:$0xff] }
0x102c   :  { %4378 = vmatpush.msrb.mxu2 %v8357_v59 }
0x102e   :  { %4379 = vmatpush.msrb.mxu2 %v8364_v45 }
0x1030   :  { %v5333_v21 = vpop.eup %5332  ;;  %4380 = vmatpush.msrb.mxu2 %v8371_v54 }
0x1031   :  { %v3975_v27 = vmul.f32 %v5333_v21, %v3974_v39 }
0x1032   :  { %4381 = vmatpush.msrb.mxu2 %v8380_v38 }
0x1033   :  { %v8572_v7 = vadd.f32 %v3976_v60, %v3975_v27 }
0x1035   :  { %4086 = vmatmul.f32.vlgmr.msrb.gmra.mxu3 %v8572_v7  ;;  %4106 = vmatmul.f32.vlgmr.msra.gmra.mxu0 %v8572_v7 }
0x1036   :  { %4126 = vmatmul.f32.vlgmr.msra.gmra.mxu1 %v8572_v7  ;;  %4146 = vmatmul.f32.vlgmr.msra.gmra.mxu2 %v8572_v7 }
0x1037   :  { %4386 = vmatpush.msrb.mxu3 %v8471_v61 }
0x1039   :  { %4387 = vmatpush.msrb.mxu3 %v8477_v19 }
0x103b   :  { %4388 = vmatpush.msrb.mxu3 %v8483_v11  ;;  %v9258_v11 = vld [vmem:[#allocation57_spill] sm:$0xff] }
0x103d   :  { %4166 = vmatmul.f32.vlgmr.msra.gmra.mxu3 %v8572_v7 }
0x103e   :  { %4389 = vmatpush.msrb.mxu3 %v8494_v17  ;;  %v9259_v17 = vld [vmem:[#allocation37_spill] sm:$0xff] }
0x1040   :  { %4390 = vmatpush.msrb.mxu3 %v8281_v13  ;;  %v8599_v13 = vld [vmem:[#allocation10 + $0x140] sm:$0xff] }
0x1041   :  { %4333 = vmatpush.msrb.mxu0 %v8599_v13 }
0x1042   :  { %4391 = vmatpush.msrb.mxu3 %v8290_v10  ;;  %v8602_v10 = vld [vmem:[#allocation10 + $0x118] sm:$0xff] }
0x1043   :  { %4334 = vmatpush.msrb.mxu0 %v8602_v10 }
0x1044   :  { %4392 = vmatpush.msrb.mxu3 %v8304_v40  ;;  %v8605_v40 = vld [vmem:[#allocation10 + $0xf0] sm:$0xff] }
0x1045   :  { %4335 = vmatpush.msrb.mxu0 %v8605_v40 }
0x1046   :  { %4393 = vmatpush.msrb.mxu3 %v8313_v33  ;;  %v9253_v33 = vld [vmem:[#allocation28_spill] sm:$0xff] }
0x1047   :  { %4336 = vmatpush.msrb.mxu0 %v8465_v1 }
0x1048   :  { %4394 = vmatpush.msrb.mxu3 %v8320_v49  ;;  %v8615_v49 = vld [vmem:[%s8895_s14] sm:$0x1f] }
0x1049   :  { %4337 = vmatpush.msrb.mxu0 %v9252_v43  ;;  %v4063_v28 = vperm.slane %v8615_v49, 3  ;;  %v4064_v37 = vperm.slane %v8615_v49, 4 }
0x104a   :  { %4395 = vmatpush.msrb.mxu3 %v8329_v20  ;;  %v4061_v20 = vperm.slane %v8615_v49, 1 }
0x104b   :  { %4338 = vmatpush.msrb.mxu0 %v9253_v33 }
0x104c   :  { %4396 = vmatpush.msrb.mxu3 %v8340_v15  ;;  %v4062_v15 = vperm.slane %v8615_v49, 2 }
0x104d   :  { %4339 = vmatpush.msrb.mxu0 %v9254_v58 }
0x104e   :  { %4397 = vmatpush.msrb.mxu3 %v8349_v47 }
0x104f   :  { %4340 = vmatpush.msrb.mxu0 %v9255_v18 }
0x1050   :  { %4398 = vmatpush.msrb.mxu3 %v8521_v56 }
0x1051   :  { %4341 = vmatpush.msrb.mxu0 %v9256_v2 }
0x1052   :  { %4399 = vmatpush.msrb.mxu3 %v8524_v52  ;;  %v9261_v52 = vld [vmem:[#allocation59_spill] sm:$0xff] }
0x1053   :  { %4406 = vmatpush.msra.mxu0 %v9257_v8 }
0x1054   :  { %4400 = vmatpush.msrb.mxu3 %v8529_v41 }
0x1055   :  { %4407 = vmatpush.msra.mxu0 %v8292_v4 }
0x1056   :  { %4401 = vmatpush.msrb.mxu3 %v8534_v32 }
0x1057   :  { %4408 = vmatpush.msra.mxu0 %v8306_v50 }
0x1059   :  { %4409 = vmatpush.msra.mxu0 %v8315_v62 }
0x105b   :  { %4410 = vmatpush.msra.mxu0 %v8324_v0  ;;  %v9260_v0 = vld [vmem:[#allocation45_spill] sm:$0xff] }
0x105d   :  { %4411 = vmatpush.msra.mxu0 %v8333_v24 }
0x105f   :  { %4412 = vmatpush.msra.mxu0 %v8344_v30  ;;  %v9262_v30 = vld [vmem:[#allocation55_spill] sm:$0xff] }
0x1061   :  { %4413 = vmatpush.msra.mxu0 %v8354_v29 }
0x1063   :  { %4414 = vmatpush.msra.mxu0 %v9258_v11 }
0x1065   :  { %4415 = vmatpush.msra.mxu0 %v9259_v17 }
0x1067   :  { %4416 = vmatpush.msra.mxu0 %v9260_v0 }
0x1069   :  { %4417 = vmatpush.msra.mxu0 %v9261_v52 }
0x106b   :  { %4418 = vmatpush.msra.mxu0 %v9262_v30 }
0x106d   :  { %4419 = vmatpush.msra.mxu0 %v9249_v31 }
0x106f   :  { %4420 = vmatpush.msra.mxu0 %v8403_v63 }
0x1071   :  { %4421 = vmatpush.msra.mxu0 %v9251_v14 }
0x10b2   :  { %v4107_v47 = vpop.f32.mrf.mxu0 }
0x10b3   :  { %v4108_v59 = vadd.f32 %v4107_v47, %v4061_v20  ;;  %v4127_v45 = vpop.f32.mrf.mxu1 }
0x10b4   :  { %v4128_v54 = vadd.f32 %v4127_v45, %v4062_v15 }
0x10b5   :  { %4186 = vst [vmem:[#allocation12 + $0x4] sm:$0x3] %v4108_v59 }
0x10b6   :  { %v4187_v38 = vadd.f32 %v4128_v54, %v8297_v42 }
0x10b8   :  { %v5096_v1 = vmul.f32 -1.442695, %v4187_v38  ;;  %v8635_v56 = vpop.f32.mrf.mxu3 }
0x10b9   :  { %v4147_v61 = vpop.f32.mrf.mxu2 }
0x10ba   :  { %5334 = vpow2.f32 %v5096_v1  ;;  %v4148_v19 = vadd.f32 %v4147_v61, %v4063_v28  ;;  %v3804_v28 = vperm.slane %v8488_v57, 0 }
0x10bc   :  { %v4207_v4 = vadd.f32 %v4148_v19, %v8272_v46  ;;  %v9264_v19 = vld [vmem:[#allocation29_spill] sm:$0xff] }
0x10be   :  { %v5097_v50 = vmul.f32 -1.442695, %v4207_v4  ;;  %v3832_v4 = vadd.f32 %v9264_v19, %v3804_v28  ;;  %v4471_v28 = vld [vmem:[#allocation8 + $0x88] sm:$0xff] }
0x10bf   :  { %v4467_v19 = vld [vmem:[#allocation8 + $0x68] sm:$0xff] }
0x10c0   :  { %v5335_v42 = vpop.eup %5334  ;;  %5336 = vpow2.f32 %v5097_v50  ;;  %v4167_v36 = vpop.f32.mrf.mxu3  ;;  %v3914_v50 = vsel %vm3540_vm3, %v3832_v4, -1e+30  ;;  %v4468_v4 = vld [vmem:[#allocation8 + $0x70] sm:$0xff] }
0x10c1   :  { %v4191_v62 = vadd.f32 1.0, %v5335_v42  ;;  %v4168_v31 = vadd.f32 %v4167_v36, %v4064_v37  ;;  %v3915_v42 = vsel %vm3019_vm4, %v3914_v50, -inf  ;;  %v4499_v37 = vld [vmem:[#allocation8 + $0x168] sm:$0xff]  ;;  %v4498_v36 = vld [vmem:[#allocation8 + $0x160] sm:$0xff] }
0x10c2   :  { %4502 = vmatpush.msra.mxu1 %v4499_v37  ;;  %v4456_v37 = vld [vmem:[#allocation8 + $0x10] sm:$0xff] }
0x10c3   :  { %5338 = vrcp.f32 %v4191_v62  ;;  %v4203_v25 = vand.u32 2147483648, %v4191_v62  ;;  %v4201_v23 = vand.u32 2147483647, %v4191_v62  ;;  %vm4197_vm10 = vweird.f32 %v4191_v62 }
0x10c5   :  { %v4204_v53 = vor.u32 1.1754944e-38, %v4203_v25  ;;  %vm4202_vm0 = vcmp.eq.f32.partialorder %v4201_v23, 8.507059e+37  ;;  %v4501_v23 = vld [vmem:[#allocation8 + $0x178] sm:$0xff] }
0x10c6   :  { %v5337_v24 = vpop.eup %5336  ;;  %4542 = vmatpush.msra.mxu3 %v4501_v23  ;;  %v8688_v23 = vld [vmem:[#allocation10 + $0x230] sm:$0xff] }
0x10c7   :  { %v4211_v46 = vadd.f32 1.0, %v5337_v24  ;;  %v4060_v24 = vperm.slane %v8615_v49, 0 }
0x10c8   :  { %4543 = vmatpush.msra.mxu3 %v4498_v36  ;;  %v8699_v36 = vld [vmem:[#allocation10 + $0x1e0] sm:$0xff] }
0x10c9   :  { %v5339_v41 = vpop.eup %5338  ;;  %5340 = vrcp.f32 %v4211_v46  ;;  %v4223_v26 = vand.u32 2147483648, %v4211_v46  ;;  %v4221_v3 = vand.u32 2147483647, %v4211_v46  ;;  %vm4217_vm13 = vweird.f32 %v4211_v46 }
0x10ca   :  { %v4193_v29 = vmul.f32 %v5339_v41, %v4191_v62  ;;  %vm4198_vm9 = vweird.f32 %v5339_v41  ;;  %v4088_v30 = vadd.f32 %v8635_v56, %v4060_v24  ;;  %v4496_v56 = vld [vmem:[#allocation8 + $0x150] sm:$0xff]  ;;  %v4457_v24 = vld [vmem:[#allocation8 + $0x18] sm:$0xff] }
0x10cb   :  { %vm4199_vm11 = vmor %vm4197_vm10, %vm4198_vm9  ;;  %v4224_v16 = vor.u32 1.1754944e-38, %v4223_v26  ;;  %vm4222_vm15 = vcmp.eq.f32.partialorder %v4221_v3, 8.507059e+37  ;;  %4503 = vmatpush.msra.mxu1 %v4496_v56  ;;  %v4488_v3 = vld [vmem:[#allocation8 + $0x110] sm:$0xff]  ;;  %v8691_v56 = vld [vmem:[#allocation10 + $0x208] sm:$0xff] }
0x10cc   :  { %v4194_v32 = vsub.f32 1.0, %v4193_v29  ;;  %v8676_v29 = vsel %vm3540_vm3, %v4088_v30, -1e+30  ;;  %v4459_v30 = vld [vmem:[#allocation8 + $0x28] sm:$0xff] }
0x10ce   :  { %v4195_v44 = vmul.f32 %v5339_v41, %v4194_v32  ;;  %v4171_v32 = vsel %vm3019_vm4, %v8676_v29, -inf }
0x10cf   :  { %v5341_v12 = vpop.eup %5340 }
0x10d0   :  { %v4213_v6 = vmul.f32 %v5341_v12, %v4211_v46  ;;  %v4196_v5 = vadd.f32 %v5339_v41, %v4195_v44  ;;  %vm4218_vm12 = vweird.f32 %v5341_v12  ;;  %v4500_v44 = vld [vmem:[#allocation8 + $0x170] sm:$0xff] }
0x10d1   :  { %vm4219_vm14 = vmor %vm4217_vm13, %vm4218_vm12  ;;  %4522 = vmatpush.msra.mxu2 %v4500_v44  ;;  %v8686_v44 = vld [vmem:[#allocation10 + $0x258] sm:$0xff] }
0x10d2   :  { %v4214_v55 = vsub.f32 1.0, %v4213_v6  ;;  %v4200_v34 = vsel %vm4199_vm11, %v5339_v41, %v4196_v5  ;;  %v4493_v6 = vld [vmem:[#allocation8 + $0x138] sm:$0xff]  ;;  %v4494_v5 = vld [vmem:[#allocation8 + $0x140] sm:$0xff] }
0x10d3   :  { %v4205_v63 = vsel %vm4202_vm0, %v4204_v53, %v4200_v34  ;;  %v4495_v53 = vld [vmem:[#allocation8 + $0x148] sm:$0xff]  ;;  %4504 = vmatpush.msra.mxu1 %v4493_v6  ;;  %v8702_v6 = vld [vmem:[#allocation10 + $0x1b8] sm:$0xff] }
0x10d4   :  { %v4215_v9 = vmul.f32 %v5341_v12, %v4214_v55  ;;  %v4227_v35 = vmul.f32 %v4205_v63, %v4168_v31  ;;  %v4490_v31 = vld [vmem:[#allocation8 + $0x120] sm:$0xff]  ;;  %v4491_v34 = vld [vmem:[#allocation8 + $0x128] sm:$0xff]  ;;  %v4492_v63 = vld [vmem:[#allocation8 + $0x130] sm:$0xff]  ;;  %4544 = vmatpush.msra.mxu3 %v4495_v53 }
0x10d5   :  { %4505 = vmatpush.msra.mxu1 %v4490_v31  ;;  %v8708_v53 = vld [vmem:[#allocation10 + $0x168] sm:$0xff]  ;;  %v8717_v31 = vld [vmem:[#allocation10 + $0xa0] sm:$0xff] }
0x10d6   :  { %v4216_v51 = vadd.f32 %v5341_v12, %v4215_v9  ;;  %v4228_v14 = vadd.f32 %v4227_v35, %v8426_v48  ;;  %v8655_v48 = vld [vmem:[%s8895_s14] sm:$0x1f]  ;;  %v9265_v9 = vld [vmem:[#allocation39_spill] sm:$0xff]  ;;  %v4487_v35 = vld [vmem:[#allocation8 + $0x108] sm:$0xff]  ;;  %4545 = vmatpush.msra.mxu3 %v4492_v63 }
0x10d7   :  { %v4316_v58 = vperm.slane %v8655_v48, 0  ;;  %4506 = vmatpush.msra.mxu1 %v4487_v35  ;;  %v4686_v63 = vld [vmem:[#allocation10 + $0x268] sm:$0xff]  ;;  %v8729_v35 = vld [vmem:[#allocation10 + $0x50] sm:$0xff] }
0x10d8   :  { %v4220_v22 = vsel %vm4219_vm14, %v5341_v12, %v4216_v51  ;;  %5342 = vtanh.f32 %v4228_v14  ;;  %v4497_v12 = vld [vmem:[#allocation8 + $0x158] sm:$0xff] }
0x10d9   :  { %v4225_v39 = vsel %vm4222_vm15, %v4224_v16, %v4220_v22  ;;  %4523 = vmatpush.msra.mxu2 %v4497_v12  ;;  %v4489_v14 = vld [vmem:[#allocation8 + $0x118] sm:$0xff]  ;;  %v4484_v16 = vld [vmem:[#allocation8 + $0xf0] sm:$0xff]  ;;  %v9266_v12 = vmov 1.0  }
0x10da   :  { %v4230_v21 = vsub.f32 1.0, %v4225_v39  ;;  %v4232_v43 = vmul.f32 %v4225_v39, %v8572_v7  ;;  %v4317_v7 = vperm.slane %v8655_v48, 1  ;;  %v4485_v22 = vld [vmem:[#allocation8 + $0xf8] sm:$0xff]  ;;  %v4486_v39 = vld [vmem:[#allocation8 + $0x100] sm:$0xff]  ;;  %4546 = vmatpush.msra.mxu3 %v4489_v14  ;;  %4507 = vmatpush.msra.mxu1 %v4484_v16  ;;  %v8735_v16 = vld [vmem:[#allocation10 + $0x28] sm:$0xff] }
0x10db   :  { %4524 = vmatpush.msra.mxu2 %v4494_v5  ;;  %v8705_v5 = vld [vmem:[#allocation10 + $0x190] sm:$0xff]  ;;  %v4677_v14 = vld [vmem:[#allocation10 + $0x220] sm:$0xff] }
0x10dc   :  { %4547 = vmatpush.msra.mxu3 %v4486_v39  ;;  %v4671_v39 = vld [vmem:[#allocation10 + $0x1f0] sm:$0xff] }
0x10dd   :  { %4525 = vmatpush.msra.mxu2 %v4491_v34  ;;  %v8720_v34 = vld [vmem:[#allocation10 + $0x260] sm:$0xff] }
0x10de   :  { %v5343_v27 = vpop.eup %5342 }
0x10df   :  { %v4231_v60 = vmul.f32 %v5343_v27, %v4230_v21  ;;  %4526 = vmatpush.msra.mxu2 %v4488_v3  ;;  %v4481_v21 = vld [vmem:[#allocation8 + $0xd8] sm:$0xff]  ;;  %v4482_v27 = vld [vmem:[#allocation8 + $0xe0] sm:$0xff]  ;;  %v8732_v3 = vld [vmem:[#allocation10 + $0x210] sm:$0xff] }
0x10e0   :  { %4508 = vmatpush.msra.mxu1 %v4481_v21  ;;  %v4672_v21 = vld [vmem:[#allocation10 + $0x1f8] sm:$0xff] }
0x10e1   :  { %v8645_v33 = vadd.f32 %v4232_v43, %v4231_v60  ;;  %4527 = vmatpush.msra.mxu2 %v4485_v22  ;;  %v4483_v60 = vld [vmem:[#allocation8 + $0xe8] sm:$0xff] }
0x10e2   :  { %4548 = vmatpush.msra.mxu3 %v4483_v60  ;;  %v8738_v22 = vld [vmem:[#allocation10 + $0x1e8] sm:$0xff]  ;;  %v8744_v60 = vld [vmem:[#allocation10 + $0x1c0] sm:$0xff] }
0x10e3   :  { %4342 = vmatmul.f32.vlgmr.msrb.gmra.mxu0 %v8645_v33  ;;  %4362 = vmatmul.f32.vlgmr.msrb.gmra.mxu1 %v8645_v33 }
0x10e4   :  { %4382 = vmatmul.f32.vlgmr.msrb.gmra.mxu2 %v8645_v33  ;;  %4402 = vmatmul.f32.vlgmr.msrb.gmra.mxu3 %v8645_v33 }
0x10e5   :  { %4528 = vmatpush.msra.mxu2 %v4482_v27  ;;  %4701 = vmatpush.msrb.mxu0 %v8686_v44  ;;  %v8741_v27 = vld [vmem:[#allocation10] sm:$0xff] }
0x10e7   :  { %4702 = vmatpush.msrb.mxu0 %v8688_v23 }
0x10e9   :  { %4703 = vmatpush.msrb.mxu0 %v8691_v56 }
0x10eb   :  { %4422 = vmatmul.f32.vlgmr.msra.gmra.mxu0 %v8645_v33 }
0x10ec   :  { %4704 = vmatpush.msrb.mxu0 %v8699_v36 }
0x10ee   :  { %4705 = vmatpush.msrb.mxu0 %v8702_v6 }
0x10f0   :  { %4706 = vmatpush.msrb.mxu0 %v8705_v5 }
0x10f2   :  { %4707 = vmatpush.msrb.mxu0 %v8708_v53 }
0x10f4   :  { %4708 = vmatpush.msrb.mxu0 %v8599_v13  ;;  %v8723_v13 = vld [vmem:[#allocation10 + $0x78] sm:$0xff] }
0x10f6   :  { %4709 = vmatpush.msrb.mxu0 %v8602_v10  ;;  %v8726_v10 = vld [vmem:[#allocation10 + $0x238] sm:$0xff] }
0x10f8   :  { %4710 = vmatpush.msrb.mxu0 %v8605_v40  ;;  %v4681_v40 = vld [vmem:[#allocation10 + $0x240] sm:$0xff] }
0x1160   :  { %v4343_v18 = vpop.f32.mrf.mxu0  ;;  %v4363_v20 = vpop.f32.mrf.mxu1 }
0x1161   :  { %v4344_v2 = vadd.f32 %v4343_v18, %v4316_v58  ;;  %v4364_v15 = vadd.f32 %v4363_v20, %v4317_v7  ;;  %v4478_v58 = vld [vmem:[#allocation8 + $0xc0] sm:$0xff]  ;;  %v4479_v7 = vld [vmem:[#allocation8 + $0xc8] sm:$0xff]  ;;  %v4480_v18 = vld [vmem:[#allocation8 + $0xd0] sm:$0xff] }
0x1162   :  { %v4475_v20 = vld [vmem:[#allocation8 + $0xa8] sm:$0xff]  ;;  %4509 = vmatpush.msra.mxu1 %v4478_v58  ;;  %4529 = vmatpush.msra.mxu2 %v4479_v7  ;;  %v4667_v7 = vld [vmem:[#allocation10 + $0x1d0] sm:$0xff] }
0x1163   :  { %4442 = vst [vmem:[#allocation12 + $0x6] sm:$0x3] %v4364_v15  ;;  %v4426_v47 = vsel %vm3540_vm3, %v4344_v2, -1e+30  ;;  %v4476_v2 = vld [vmem:[#allocation8 + $0xb0] sm:$0xff]  ;;  %v4477_v15 = vld [vmem:[#allocation8 + $0xb8] sm:$0xff]  ;;  %4549 = vmatpush.msra.mxu3 %v4480_v18 }
0x1164   :  { %v4427_v59 = vsel %vm3019_vm4, %v4426_v47, -inf  ;;  %4510 = vmatpush.msra.mxu1 %v4475_v20  ;;  %4530 = vmatpush.msra.mxu2 %v4476_v2  ;;  %v4666_v58 = vld [vmem:[#allocation10 + $0x1c8] sm:$0xff]  ;;  %v4318_v18 = vperm.slane %v8655_v48, 2  ;;  %v4688_v20 = vld [vmem:[#allocation10 + $0x278] sm:$0xff] }
0x1165   :  { %4428 = vmax.xlane.f32.xlu0 %v4427_v59  ;;  %v4473_v59 = vld [vmem:[#allocation8 + $0x98] sm:$0xff]  ;;  %4550 = vmatpush.msra.mxu3 %v4477_v15 }
0x1166   :  { %4531 = vmatpush.msra.mxu2 %v4473_v59  ;;  %v8748_v15 = vld [vmem:[#allocation10 + $0x198] sm:$0xff]  ;;  %v4662_v59 = vld [vmem:[#allocation10 + $0x1a8] sm:$0xff] }
0x1167   :  { %v4383_v2 = vpop.f32.mrf.mxu2 }
0x11d8   :  { %v4429_v45 = vpop.xlane.xlu0 %4428 }
0x11d9   :  { %v4430_v54 = vsub.f32 %v4426_v47, %v4429_v45  ;;  %v4472_v47 = vld [vmem:[#allocation8 + $0x90] sm:$0xff]  ;;  %v4474_v45 = vld [vmem:[#allocation8 + $0xa0] sm:$0xff] }
0x11da   :  { %4511 = vmatpush.msra.mxu1 %v4472_v47  ;;  %4551 = vmatpush.msra.mxu3 %v4474_v45  ;;  %v4661_v47 = vld [vmem:[#allocation10 + $0x1a0] sm:$0xff]  ;;  %v4683_v45 = vld [vmem:[#allocation10 + $0x250] sm:$0xff] }
0x11db   :  { %v4431_v38 = vmul.f32 1.442695, %v4430_v54 }
0x11dc   :  { %4552 = vmatpush.msra.mxu3 %v4471_v28  ;;  %v4656_v28 = vld [vmem:[#allocation10 + $0x178] sm:$0xff] }
0x11dd   :  { %5344 = vpow2.f32 %v4431_v38  ;;  %v4470_v38 = vld [vmem:[#allocation8 + $0x80] sm:$0xff] }
0x11de   :  { %4532 = vmatpush.msra.mxu2 %v4470_v38  ;;  %4553 = vmatpush.msra.mxu3 %v4468_v4  ;;  %v8751_v38 = vld [vmem:[#allocation10 + $0x170] sm:$0xff] }
0x11e0   :  { %4533 = vmatpush.msra.mxu2 %v4467_v19  ;;  %v9267_v19 = vld [vmem:[#allocation41_spill] sm:$0xff] }
0x11e3   :  { %v5345_v1 = vpop.eup %5344 }
0x11e4   :  { %v4433_v61 = vsel %vm3019_vm4, %v5345_v1, 0.0 }
0x11e5   :  { %4434 = vadd.xlane.f32.xlu1 %v4433_v61  ;;  %v4466_v61 = vld [vmem:[#allocation8 + $0x60] sm:$0xff] }
0x11ed   :  { %3916 = vmax.xlane.f32.xlu1 %v3915_v42  ;;  %v4464_v42 = vld [vmem:[#allocation8 + $0x50] sm:$0xff] }
0x11ee   :  { %4534 = vmatpush.msra.mxu2 %v4464_v42  ;;  %v8757_v42 = vld [vmem:[#allocation10 + $0x148] sm:$0xff] }
0x1258   :  { %v4435_v11 = vpop.xlane.xlu1 %4434 }
0x1259   :  { %5346 = vlog2.f32 %v4435_v11  ;;  %v4465_v11 = vld [vmem:[#allocation8 + $0x58] sm:$0xff] }
0x125a   :  { %4554 = vmatpush.msra.mxu3 %v4465_v11  ;;  %v4651_v11 = vld [vmem:[#allocation10 + $0x150] sm:$0xff] }
0x125f   :  { %v5347_v62 = vpop.eup %5346 }
0x1260   :  { %v4437_v17 = vmul.f32 0.6931472, %v5347_v62  ;;  %v3917_v0 = vpop.xlane.xlu1 %3916  ;;  %v4460_v62 = vld [vmem:[#allocation8 + $0x30] sm:$0xff] }
0x1261   :  { %v8669_v52 = vsub.f32 %v3914_v50, %v3917_v0  ;;  %v4463_v50 = vld [vmem:[#allocation8 + $0x48] sm:$0xff]  ;;  %v4462_v0 = vld [vmem:[#allocation8 + $0x40] sm:$0xff] }
0x1262   :  { %v4438_v57 = vsub.f32 %v4430_v54, %v4437_v17  ;;  %v4469_v54 = vld [vmem:[#allocation8 + $0x78] sm:$0xff]  ;;  %4555 = vmatpush.msra.mxu3 %v4462_v0 }
0x1263   :  { %v3919_v41 = vmul.f32 1.442695, %v8669_v52  ;;  %4512 = vmatpush.msra.mxu1 %v4469_v54  ;;  %v4461_v17 = vld [vmem:[#allocation8 + $0x38] sm:$0xff] }
0x1264   :  { %4440 = vst [vmem:[#allocation11 + $0x6] sm:$0x3] %v4438_v57  ;;  %v4443_v46 = vsel %vm3019_vm4, %v4438_v57, -inf  ;;  %4535 = vmatpush.msra.mxu2 %v4461_v17  ;;  %4556 = vmatpush.msra.mxu3 %v4459_v30  ;;  %v4319_v17 = vperm.slane %v8655_v48, 3  ;;  %v4646_v30 = vld [vmem:[#allocation10 + $0x128] sm:$0xff] }
0x1265   :  { %4444 = vmax.xlane.f32.xlu2 %v4443_v46  ;;  %5348 = vpow2.f32 %v3919_v41  ;;  %4513 = vmatpush.msra.mxu1 %v4466_v61  ;;  %v4384_v61 = vadd.f32 %v4383_v2, %v4318_v18  ;;  %v4631_v18 = vld [vmem:[#allocation10 + $0xb0] sm:$0xff] }
0x1266   :  { %4557 = vmatpush.msra.mxu3 %v4456_v37  ;;  %v8765_v37 = vld [vmem:[#allocation10 + $0xf8] sm:$0xff] }
0x1267   :  { %4514 = vmatpush.msra.mxu1 %v4463_v50  ;;  %v4678_v50 = vld [vmem:[#allocation10 + $0x228] sm:$0xff] }
0x1269   :  { %4515 = vmatpush.msra.mxu1 %v4460_v62  ;;  %v4652_v62 = vld [vmem:[#allocation10 + $0x158] sm:$0xff] }
0x126b   :  { %v5349_v49 = vpop.eup %5348  ;;  %4516 = vmatpush.msra.mxu1 %v4457_v24  ;;  %v4673_v24 = vld [vmem:[#allocation10 + $0x200] sm:$0xff] }
0x126c   :  { %v3921_v25 = vsel %vm3019_vm4, %v5349_v49, 0.0  ;;  %v4454_v49 = vld [vmem:[#allocation8] sm:$0xff] }
0x126d   :  { %4172 = vmax.xlane.f32.xlu2 %v4171_v32  ;;  %4517 = vmatpush.msra.mxu1 %v4454_v49  ;;  %v4668_v49 = vld [vmem:[#allocation10 + $0x1d8] sm:$0xff] }
0x126f   :  { %4721 = vmatpush.msrb.mxu1 %v8720_v34 }
0x1271   :  { %4722 = vmatpush.msrb.mxu1 %v8726_v10 }
0x1273   :  { %4723 = vmatpush.msrb.mxu1 %v8732_v3 }
0x1275   :  { %3922 = vadd.xlane.f32.xlu2 %v3921_v25  ;;  %v4455_v25 = vld [vmem:[#allocation8 + $0x8] sm:$0xff]  ;;  %4724 = vmatpush.msrb.mxu1 %v8738_v22 }
0x1277   :  { %4725 = vmatpush.msrb.mxu1 %v8744_v60 }
0x1279   :  { %4726 = vmatpush.msrb.mxu1 %v8748_v15 }
0x127b   :  { %4727 = vmatpush.msrb.mxu1 %v8751_v38 }
0x127d   :  { %4728 = vmatpush.msrb.mxu1 %v8757_v42 }
0x12d8   :  { %v4445_v55 = vpop.xlane.xlu2 %4444 }
0x12d9   :  { %vm4446_vm1 = vcmp.ge.f32.partialorder %v4438_v57, %v4445_v55  ;;  %v4458_v57 = vld [vmem:[#allocation8 + $0x20] sm:$0xff]  ;;  %v8714_v55 = vld [vmem:[#allocation10 + $0xc8] sm:$0xff] }
0x12da   :  { %v4447_v26 = vsel %vm4446_vm1, %v9265_v9, 128.0  ;;  %4536 = vmatpush.msra.mxu2 %v4458_v57  ;;  %4711 = vmatpush.msrb.mxu0 %v8714_v55  ;;  %v4403_v57 = vpop.f32.mrf.mxu3 }
0x12db   :  { %v4448_v51 = vsel %vm3019_vm4, %v4447_v26, inf  ;;  %v4682_v26 = vld [vmem:[#allocation10 + $0x248] sm:$0xff] }
0x12dc   :  { %4449 = vmin.xlane.f32.xlu0 %v4448_v51  ;;  %4537 = vmatpush.msra.mxu2 %v4455_v25  ;;  %v4676_v51 = vld [vmem:[#allocation10 + $0x218] sm:$0xff] }
0x12dd   :  { %4712 = vmatpush.msrb.mxu0 %v8717_v31 }
0x12de   :  { %4741 = vmatpush.msrb.mxu2 %v4686_v63  ;;  %v4404_v63 = vadd.f32 %v4403_v57, %v4319_v17  ;;  %v8786_v17 = vld [vmem:[#allocation10 + $0x30] sm:$0xff]  ;;  %v4638_v57 = vld [vmem:[#allocation10 + $0xe8] sm:$0xff] }
0x12df   :  { %4713 = vmatpush.msrb.mxu0 %v8723_v13 }
0x12e0   :  { %v8683_v43 = vpop.xlane.xlu2 %4172  ;;  %4742 = vmatpush.msrb.mxu2 %v4681_v40 }
0x12e1   :  { %4714 = vmatpush.msrb.mxu0 %v8729_v35 }
0x12e2   :  { %4743 = vmatpush.msrb.mxu2 %v4676_v51  ;;  %v8771_v51 = vld [vmem:[#allocation10 + $0xd0] sm:$0xff] }
0x12e3   :  { %4715 = vmatpush.msrb.mxu0 %v8735_v16 }
0x12e4   :  { %4744 = vmatpush.msrb.mxu2 %v4671_v39  ;;  %v4637_v39 = vld [vmem:[#allocation10 + $0xe0] sm:$0xff] }
0x12e5   :  { %4716 = vmatpush.msrb.mxu0 %v8741_v27 }
0x12e6   :  { %4745 = vmatpush.msrb.mxu2 %v4666_v58  ;;  %v4658_v58 = vld [vmem:[#allocation10 + $0x188] sm:$0xff] }
0x12e7   :  { %4781 = vmatpush.msra.mxu0 %v4688_v20  ;;  %v4632_v20 = vld [vmem:[#allocation10 + $0xb8] sm:$0xff] }
0x12e8   :  { %v3923_v1 = vpop.xlane.xlu2 %3922  ;;  %4746 = vmatpush.msrb.mxu2 %v4661_v47  ;;  %v4653_v47 = vld [vmem:[#allocation10 + $0x160] sm:$0xff] }
0x12e9   :  { %5350 = vlog2.f32 %v3923_v1  ;;  %4782 = vmatpush.msra.mxu0 %v4683_v45  ;;  %v4657_v1 = vld [vmem:[#allocation10 + $0x180] sm:$0xff]  ;;  %v4626_v45 = vld [vmem:[#allocation10 + $0x88] sm:$0xff] }
0x12ea   :  { %4747 = vmatpush.msrb.mxu2 %v4656_v28 }
0x12eb   :  { %4783 = vmatpush.msra.mxu0 %v4678_v50  ;;  %v4621_v50 = vld [vmem:[#allocation10 + $0x60] sm:$0xff] }
0x12ec   :  { %4748 = vmatpush.msrb.mxu2 %v4651_v11  ;;  %v4622_v11 = vld [vmem:[#allocation10 + $0x68] sm:$0xff] }
0x12ed   :  { %4784 = vmatpush.msra.mxu0 %v4673_v24  ;;  %v4617_v24 = vld [vmem:[#allocation10 + $0x40] sm:$0xff] }
0x12ee   :  { %4749 = vmatpush.msrb.mxu2 %v4646_v30  ;;  %v8789_v30 = vld [vmem:[#allocation10 + $0x8] sm:$0xff] }
0x12ef   :  { %v5351_v46 = vpop.eup %5350  ;;  %4785 = vmatpush.msra.mxu0 %v4668_v49  ;;  %v4633_v49 = vld [vmem:[#allocation10 + $0xc0] sm:$0xff] }
0x12f0   :  { %v3925_v41 = vmul.f32 0.6931472, %v5351_v46  ;;  %v8762_v46 = vld [vmem:[#allocation10 + $0x120] sm:$0xff] }
0x12f1   :  { %4729 = vmatpush.msrb.mxu1 %v8762_v46 }
0x12f2   :  { %v3926_v32 = vsub.f32 %v8669_v52, %v3925_v41  ;;  %v4647_v41 = vld [vmem:[#allocation10 + $0x130] sm:$0xff] }
0x12f3   :  { %4730 = vmatpush.msrb.mxu1 %v8765_v37 }
0x12f4   :  { %3928 = vst [vmem:[#allocation11 + $0x2] sm:$0x3] %v3926_v32 }
0x12f5   :  { %4731 = vmatpush.msrb.mxu1 %v8771_v51 }
0x134f   :  { %v4450_v52 = vpop.xlane.xlu0 %4449 }
0x1350   :  { %vm4451_vm2 = vcmp.eq.f32.partialorder %v9265_v9, %v4450_v52  ;;  %v4687_v9 = vld [vmem:[#allocation10 + $0x270] sm:$0xff]  ;;  %v4641_v52 = vld [vmem:[#allocation10 + $0x100] sm:$0xff] }
0x1351   :  { %5099 = vmatmul.msk.f32.vlgmr.msra.gmra.mxu1 %vm4451_vm2, %v9266_v12  ;;  %5100 = vmatmul.msk.f32.vlgmr.msra.gmra.mxu2 %vm4451_vm2, %v9266_v12 }
0x1352   :  { %5101 = vmatmul.msk.f32.vlgmr.msra.gmra.mxu3 %vm4451_vm2, %v9266_v12  ;;  %v4642_v12 = vld [vmem:[#allocation10 + $0x108] sm:$0xff]  ;;  %4750 = vmatpush.msrb.mxu2 %v4641_v52  ;;  %v4628_v52 = vld [vmem:[#allocation10 + $0x98] sm:$0xff] }
0x1353   :  { %4761 = vmatpush.msrb.mxu3 %v4687_v9  ;;  %v9268_v9 = vld [vmem:[#allocation24_spill] sm:$0xff] }
0x1355   :  { %4762 = vmatpush.msrb.mxu3 %v4682_v26  ;;  %v4663_v26 = vld [vmem:[#allocation10 + $0x1b0] sm:$0xff] }
0x1356   :  { %4786 = vmatpush.msra.mxu0 %v4663_v26 }
0x1357   :  { %4763 = vmatpush.msrb.mxu3 %v4677_v14  ;;  %v4636_v14 = vld [vmem:[#allocation10 + $0xd8] sm:$0xff] }
0x1358   :  { %4751 = vmatpush.msrb.mxu2 %v4636_v14  ;;  %4787 = vmatpush.msra.mxu0 %v4658_v58  ;;  %v4618_v14 = vld [vmem:[#allocation10 + $0x48] sm:$0xff] }
0x1359   :  { %4764 = vmatpush.msrb.mxu3 %v4672_v21 }
0x135a   :  { %4752 = vmatpush.msrb.mxu2 %v4631_v18  ;;  %4788 = vmatpush.msra.mxu0 %v4653_v47 }
0x135b   :  { %4765 = vmatpush.msrb.mxu3 %v4667_v7  ;;  %v8775_v7 = vld [vmem:[#allocation10 + $0xa8] sm:$0xff] }
0x135c   :  { %4732 = vmatpush.msrb.mxu1 %v8775_v7  ;;  %4753 = vmatpush.msrb.mxu2 %v4626_v45 }
0x135d   :  { %4766 = vmatpush.msrb.mxu3 %v4662_v59  ;;  %v8778_v59 = vld [vmem:[#allocation10 + $0x80] sm:$0xff] }
0x135e   :  { %4733 = vmatpush.msrb.mxu1 %v8778_v59  ;;  %4754 = vmatpush.msrb.mxu2 %v4621_v50 }
0x135f   :  { %4767 = vmatpush.msrb.mxu3 %v4657_v1  ;;  %v4648_v1 = vld [vmem:[#allocation10 + $0x138] sm:$0xff] }
0x1360   :  { %4789 = vmatpush.msra.mxu0 %v4648_v1 }
0x1361   :  { %4768 = vmatpush.msrb.mxu3 %v4652_v62  ;;  %v4643_v62 = vld [vmem:[#allocation10 + $0x110] sm:$0xff] }
0x1362   :  { %4790 = vmatpush.msra.mxu0 %v4643_v62 }
0x1363   :  { %4769 = vmatpush.msrb.mxu3 %v4647_v41  ;;  %v4611_v41 = vld [vmem:[#allocation10 + $0x10] sm:$0xff] }
0x1364   :  { %4791 = vmatpush.msra.mxu0 %v4638_v57 }
0x1365   :  { %4770 = vmatpush.msrb.mxu3 %v4642_v12 }
0x1366   :  { %4792 = vmatpush.msra.mxu0 %v4633_v49 }
0x1367   :  { %4771 = vmatpush.msrb.mxu3 %v4637_v39 }
0x1368   :  { %4793 = vmatpush.msra.mxu0 %v4628_v52  ;;  %v4881_v52 = vld [vmem:[#allocation10 + $0x140] sm:$0xff] }
0x1369   :  { %4772 = vmatpush.msrb.mxu3 %v4632_v20 }
0x13ce   :  { %v4519_v54 = vpop.f32.mrf.mxu1 }
0x13cf   :  { %v8754_v4 = vadd.f32 %v4519_v54, %v9267_v19  ;;  %v4627_v54 = vld [vmem:[#allocation10 + $0x90] sm:$0xff]  ;;  %v8783_v19 = vld [vmem:[#allocation10 + $0x58] sm:$0xff] }
0x13d0   :  { %4773 = vmatpush.msrb.mxu3 %v4627_v54  ;;  %4734 = vmatpush.msrb.mxu1 %v8783_v19 }
0x13d1   :  { %v4562_v0 = vadd.f32 %v8754_v4, %v4384_v61 }
0x13d2   :  { %4774 = vmatpush.msrb.mxu3 %v4622_v11  ;;  %4735 = vmatpush.msrb.mxu1 %v8786_v17 }
0x13d3   :  { %v5102_v32 = vmul.f32 -1.442695, %v4562_v0  ;;  %v4616_v0 = vld [vmem:[#allocation10 + $0x38] sm:$0xff] }
0x13d4   :  { %v4539_v25 = vpop.f32.mrf.mxu2  ;;  %4755 = vmatpush.msrb.mxu2 %v4616_v0  ;;  %4775 = vmatpush.msrb.mxu3 %v4617_v24 }
0x13d5   :  { %5352 = vpow2.f32 %v5102_v32  ;;  %v8768_v40 = vadd.f32 %v4539_v25, %v9268_v9  ;;  %v4612_v32 = vld [vmem:[#allocation10 + $0x18] sm:$0xff]  ;;  %4736 = vmatpush.msrb.mxu1 %v8789_v30 }
0x13d6   :  { %4756 = vmatpush.msrb.mxu2 %v4611_v41  ;;  %4776 = vmatpush.msrb.mxu3 %v4612_v32 }
0x13d7   :  { %v4582_v21 = vadd.f32 %v8768_v40, %v4404_v63  ;;  %v4623_v63 = vld [vmem:[#allocation10 + $0x70] sm:$0xff]  ;;  %4903 = vmatpush.msra.mxu1 %v8686_v44 }
0x13d8   :  { %4923 = vmatpush.msra.mxu2 %v8720_v34  ;;  %4794 = vmatpush.msra.mxu0 %v4623_v63  ;;  %v4320_v34 = vperm.slane %v8655_v48, 4 }
0x13d9   :  { %v5103_v2 = vmul.f32 -1.442695, %v4582_v21  ;;  %4904 = vmatpush.msra.mxu1 %v8688_v23  ;;  %v4613_v21 = vld [vmem:[#allocation10 + $0x20] sm:$0xff] }
0x13da   :  { %4924 = vmatpush.msra.mxu2 %v8726_v10  ;;  %4795 = vmatpush.msra.mxu0 %v4618_v14  ;;  %v4423_v10 = vpop.f32.mrf.mxu0 }
0x13db   :  { %v5353_v28 = vpop.eup %5352  ;;  %5354 = vpow2.f32 %v5103_v2  ;;  %4905 = vmatpush.msra.mxu1 %v8691_v56  ;;  %v4559_v56 = vpop.f32.mrf.mxu3 }
0x13dc   :  { %v8781_v61 = vadd.f32 1.0, %v5353_v28  ;;  %4925 = vmatpush.msra.mxu2 %v8732_v3  ;;  %4796 = vmatpush.msra.mxu0 %v4613_v21  ;;  %v4424_v3 = vadd.f32 %v4423_v10, %v4320_v34 }
0x13dd   :  { %4906 = vmatpush.msra.mxu1 %v8699_v36  ;;  %v9269_v36 = vld [vmem:[#allocation23_spill] sm:$0xff] }
0x13de   :  { %5356 = vrcp.f32 %v8781_v61  ;;  %v4578_v44 = vand.u32 2147483648, %v8781_v61  ;;  %v4576_v18 = vand.u32 2147483647, %v8781_v61  ;;  %4926 = vmatpush.msra.mxu2 %v8738_v22  ;;  %vm4572_vm6 = vweird.f32 %v8781_v61 }
0x13df   :  { %4907 = vmatpush.msra.mxu1 %v8702_v6  ;;  %v8811_v22 = vadd.f32 %v4559_v56, %v9269_v36 }
0x13e0   :  { %4927 = vmatpush.msra.mxu2 %v8744_v60  ;;  %v4579_v48 = vor.u32 1.1754944e-38, %v4578_v44  ;;  %vm4577_vm8 = vcmp.eq.f32.partialorder %v4576_v18, 8.507059e+37  ;;  %v4877_v44 = vld [vmem:[#allocation10 + $0xf0] sm:$0xff] }
0x13e1   :  { %v5355_v25 = vpop.eup %5354  ;;  %4908 = vmatpush.msra.mxu1 %v8705_v5 }
0x13e2   :  { %v4586_v12 = vadd.f32 1.0, %v5355_v25  ;;  %4928 = vmatpush.msra.mxu2 %v8748_v15 }
0x13e3   :  { %4909 = vmatpush.msra.mxu1 %v8708_v53 }
0x13e4   :  { %v5357_v9 = vpop.eup %5356  ;;  %5358 = vrcp.f32 %v4586_v12  ;;  %v4598_v1 = vand.u32 2147483648, %v4586_v12  ;;  %4929 = vmatpush.msra.mxu2 %v8751_v38  ;;  %v4596_v60 = vand.u32 2147483647, %v4586_v12  ;;  %vm4592_vm10 = vweird.f32 %v4586_v12 }
0x13e5   :  { %v4568_v26 = vmul.f32 %v5357_v9, %v8781_v61  ;;  %vm4573_vm5 = vweird.f32 %v5357_v9  ;;  %4910 = vmatpush.msra.mxu1 %v4881_v52 }
0x13e6   :  { %vm4574_vm7 = vmor %vm4572_vm6, %vm4573_vm5  ;;  %4930 = vmatpush.msra.mxu2 %v8757_v42  ;;  %v4599_v15 = vor.u32 1.1754944e-38, %v4598_v1  ;;  %vm4597_vm0 = vcmp.eq.f32.partialorder %v4596_v60, 8.507059e+37 }
0x13e7   :  { %v4569_v39 = vsub.f32 1.0, %v4568_v26  ;;  %v4879_v26 = vld [vmem:[#allocation10 + $0x118] sm:$0xff] }
0x13e8   :  { %4931 = vmatpush.msra.mxu2 %v8762_v46  ;;  %v8840_v46 = vsub.f32 %v8676_v29, %v8683_v43  ;;  %4911 = vmatpush.msra.mxu1 %v4879_v26 }
0x13e9   :  { %v4570_v58 = vmul.f32 %v5357_v9, %v4569_v39 }
0x13ea   :  { %v5359_v23 = vpop.eup %5358  ;;  %4932 = vmatpush.msra.mxu2 %v8765_v37  ;;  %4912 = vmatpush.msra.mxu1 %v4877_v44 }
0x13eb   :  { %v4588_v20 = vmul.f32 %v5359_v23, %v4586_v12  ;;  %v4571_v2 = vadd.f32 %v5357_v9, %v4570_v58  ;;  %vm4593_vm9 = vweird.f32 %v5359_v23 }
0x13ec   :  { %vm4594_vm11 = vmor %vm4592_vm10, %vm4593_vm9  ;;  %4933 = vmatpush.msra.mxu2 %v8771_v51  ;;  %4913 = vmatpush.msra.mxu1 %v8714_v55 }
0x13ed   :  { %v4589_v47 = vsub.f32 1.0, %v4588_v20  ;;  %v4575_v45 = vsel %vm4574_vm7, %v5357_v9, %v4571_v2 }
0x13ee   :  { %v4580_v54 = vsel %vm4577_vm8, %v4579_v48, %v4575_v45  ;;  %4934 = vmatpush.msra.mxu2 %v8775_v7  ;;  %v4175_v7 = vmul.f32 1.442695, %v8840_v46  ;;  %4914 = vmatpush.msra.mxu1 %v8717_v31 }
0x13ef   :  { %v4590_v28 = vmul.f32 %v5359_v23, %v4589_v47  ;;  %v4602_v6 = vmul.f32 %v4580_v54, %v4424_v3 }
0x13f0   :  { %4935 = vmatpush.msra.mxu2 %v8778_v59  ;;  %4915 = vmatpush.msra.mxu1 %v8723_v13 }
0x13f1   :  { %v4591_v61 = vadd.f32 %v5359_v23, %v4590_v28  ;;  %v4603_v50 = vadd.f32 %v4602_v6, %v8811_v22 }
0x13f2   :  { %4936 = vmatpush.msra.mxu2 %v8783_v19  ;;  %4916 = vmatpush.msra.mxu1 %v8729_v35 }
0x13f3   :  { %v4595_v5 = vsel %vm4594_vm11, %v5359_v23, %v4591_v61  ;;  %5360 = vtanh.f32 %v4603_v50 }
0x13f4   :  { %v4600_v11 = vsel %vm4597_vm0, %v4599_v15, %v4595_v5  ;;  %4937 = vmatpush.msra.mxu2 %v8786_v17  ;;  %5362 = vpow2.f32 %v4175_v7  ;;  %4917 = vmatpush.msra.mxu1 %v8735_v16  ;;  %v4897_v7 = vld [vmem:[%s8895_s14] sm:$0x1f] }
0x13f5   :  { %v4605_v53 = vsub.f32 1.0, %v4600_v11  ;;  %v4607_v0 = vmul.f32 %v4600_v11, %v8645_v33  ;;  %v8836_v33 = vld [vmem:[%s8895_s14] sm:$0x1f]  ;;  %s5677_s14 = smov [#allocation12]  }
0x13f6   :  { %4938 = vmatpush.msra.mxu2 %v8789_v30  ;;  %v4691_v37 = vperm.slane %v8836_v33, 0  ;;  %v4692_v51 = vperm.slane %v8836_v33, 1  ;;  %v4693_v43 = vperm.slane %v8836_v33, 2  ;;  %v4694_v30 = vperm.slane %v8836_v33, 3  ;;  %4918 = vmatpush.msra.mxu1 %v8741_v27  ;;  %s4977_s12 = sshll.u32 %s5677_s14, 4  ;;  %s4978_s12 = int_to_ptr.vmem [resolvable:$true] %s4977_s12 }
0x13f7   :  { %v4695_v13 = vperm.slane %v8836_v33, 4 }
0x13f9   :  { %v5361_v38 = vpop.eup %5360 }
0x13fa   :  { %v4606_v62 = vmul.f32 %v5361_v38, %v4605_v53  ;;  %v5363_v12 = vpop.eup %5362 }
0x13fb   :  { %v4177_v21 = vsel %vm3019_vm4, %v5363_v12, 0.0 }
0x13fc   :  { %v8823_v42 = vadd.f32 %v4607_v0, %v4606_v62 }
0x13fe   :  { %4717 = vmatmul.f32.vlgmr.msrb.gmra.mxu0 %v8823_v42  ;;  %4737 = vmatmul.f32.vlgmr.msrb.gmra.mxu1 %v8823_v42 }
0x13ff   :  { %4757 = vmatmul.f32.vlgmr.msrb.gmra.mxu2 %v8823_v42  ;;  %4777 = vmatmul.f32.vlgmr.msrb.gmra.mxu3 %v8823_v42 }
0x1406   :  { %4797 = vmatmul.f32.vlgmr.msra.gmra.mxu0 %v8823_v42 }
0x147b   :  { %v4718_v59 = vpop.f32.mrf.mxu0  ;;  %v4738_v19 = vpop.f32.mrf.mxu1 }
0x147c   :  { %v4719_v17 = vadd.f32 %v4718_v59, %v4691_v37  ;;  %v4739_v24 = vadd.f32 %v4738_v19, %v4692_v51  ;;  %v4899_v19 = vperm.slane %v4897_v7, 0 }
0x147e   :  { %4817 = vst [vmem:[#allocation12 + $0x8] sm:$0x3] %v4739_v24  ;;  %v8847_v57 = vsel %vm3540_vm3, %v4719_v17, -1e+30 }
0x147f   :  { %v4802_v29 = vsel %vm3019_vm4, %v8847_v57, -inf }
0x1480   :  { %4803 = vmax.xlane.f32.xlu0 %v4802_v29 }
0x1482   :  { %v4758_v41 = vpop.f32.mrf.mxu2  ;;  %v4778_v32 = vpop.f32.mrf.mxu3 }
0x1483   :  { %v4759_v49 = vadd.f32 %v4758_v41, %v4693_v43  ;;  %v4779_v25 = vadd.f32 %v4778_v32, %v4694_v30  ;;  %v4798_v3 = vpop.f32.mrf.mxu0  ;;  %v4900_v43 = vperm.slane %v4897_v7, 1 }
0x1484   :  { %v4799_v45 = vadd.f32 %v4798_v3, %v4695_v13 }
0x1485   :  { %v4818_v63 = vadd.f32 %v4759_v49, %v8754_v4  ;;  %v4838_v9 = vadd.f32 %v4779_v25, %v8768_v40 }
0x1487   :  { %v5104_v14 = vmul.f32 -1.442695, %v4818_v63  ;;  %v5105_v39 = vmul.f32 -1.442695, %v4838_v9 }
0x1488   :  { %4178 = vadd.xlane.f32.xlu0 %v4177_v21 }
0x1489   :  { %5364 = vpow2.f32 %v5104_v14 }
0x148a   :  { %5366 = vpow2.f32 %v5105_v39 }
0x148f   :  { %v5365_v4 = vpop.eup %5364 }
0x1490   :  { %v5367_v34 = vpop.eup %5366  ;;  %v4822_v40 = vadd.f32 1.0, %v5365_v4 }
0x1491   :  { %v4842_v58 = vadd.f32 1.0, %v5367_v34 }
0x1492   :  { %5368 = vrcp.f32 %v4822_v40  ;;  %v4834_v56 = vand.u32 2147483648, %v4822_v40  ;;  %v4832_v48 = vand.u32 2147483647, %v4822_v40  ;;  %vm4828_vm13 = vweird.f32 %v4822_v40 }
0x1493   :  { %5370 = vrcp.f32 %v4842_v58  ;;  %v4854_v28 = vand.u32 2147483648, %v4842_v58  ;;  %vm4848_vm2 = vweird.f32 %v4842_v58  ;;  %v4852_v6 = vand.u32 2147483647, %v4842_v58 }
0x1494   :  { %v4835_v16 = vor.u32 1.1754944e-38, %v4834_v56  ;;  %vm4833_vm15 = vcmp.eq.f32.partialorder %v4832_v48, 8.507059e+37 }
0x1495   :  { %v4855_v50 = vor.u32 1.1754944e-38, %v4854_v28  ;;  %vm4853_vm6 = vcmp.eq.f32.partialorder %v4852_v6, 8.507059e+37 }
0x1498   :  { %v5369_v18 = vpop.eup %5368 }
0x1499   :  { %v5371_v23 = vpop.eup %5370  ;;  %v4824_v10 = vmul.f32 %v5369_v18, %v4822_v40  ;;  %vm4829_vm12 = vweird.f32 %v5369_v18 }
0x149a   :  { %v4844_v55 = vmul.f32 %v5371_v23, %v4842_v58  ;;  %vm4830_vm14 = vmor %vm4828_vm13, %vm4829_vm12  ;;  %vm4849_vm1 = vweird.f32 %v5371_v23 }
0x149b   :  { %v4825_v20 = vsub.f32 1.0, %v4824_v10  ;;  %vm4850_vm5 = vmor %vm4848_vm2, %vm4849_vm1 }
0x149c   :  { %v4845_v31 = vsub.f32 1.0, %v4844_v55 }
0x149d   :  { %v4826_v2 = vmul.f32 %v5369_v18, %v4825_v20 }
0x149e   :  { %v4846_v35 = vmul.f32 %v5371_v23, %v4845_v31 }
0x149f   :  { %v4827_v47 = vadd.f32 %v5369_v18, %v4826_v2 }
0x14a0   :  { %v4847_v54 = vadd.f32 %v5371_v23, %v4846_v35 }
0x14a1   :  { %v4831_v27 = vsel %vm4830_vm14, %v5369_v18, %v4827_v47 }
0x14a2   :  { %v4836_v36 = vsel %vm4833_vm15, %v4835_v16, %v4831_v27  ;;  %v4851_v61 = vsel %vm4850_vm5, %v5371_v23, %v4847_v54 }
0x14a3   :  { %v4858_v1 = vmul.f32 %v4836_v36, %v4799_v45  ;;  %v4856_v5 = vsel %vm4853_vm6, %v4855_v50, %v4851_v61 }
0x14a4   :  { %v4861_v15 = vsub.f32 1.0, %v4856_v5  ;;  %v4863_v38 = vmul.f32 %v4856_v5, %v8823_v42 }
0x14a5   :  { %v4859_v60 = vadd.f32 %v4858_v1, %v8811_v22 }
0x14a7   :  { %5372 = vtanh.f32 %v4859_v60 }
0x14ad   :  { %v5373_v11 = vpop.eup %5372 }
0x14ae   :  { %v4862_v53 = vmul.f32 %v5373_v11, %v4861_v15 }
0x14b0   :  { %v4864_v62 = vadd.f32 %v4863_v38, %v4862_v53 }
0x14b2   :  { %4919 = vmatmul.f32.vlgmr.msra.gmra.mxu1 %v4864_v62  ;;  %4939 = vmatmul.f32.vlgmr.msra.gmra.mxu2 %v4864_v62 }
0x14f3   :  { %v4804_v0 = vpop.xlane.xlu0 %4803 }
0x14f4   :  { %v4805_v59 = vsub.f32 %v8847_v57, %v4804_v0 }
0x14f6   :  { %v4806_v17 = vmul.f32 1.442695, %v4805_v59 }
0x14fb   :  { %v4179_v33 = vpop.xlane.xlu0 %4178 }
0x14fc   :  { %5374 = vlog2.f32 %v4179_v33 }
0x14fd   :  { %5376 = vpow2.f32 %v4806_v17 }
0x1502   :  { %v5375_v37 = vpop.eup %5374 }
0x1503   :  { %v4181_v51 = vmul.f32 0.6931472, %v5375_v37  ;;  %v5377_v32 = vpop.eup %5376 }
0x1504   :  { %v4808_v49 = vsel %vm3019_vm4, %v5377_v32, 0.0 }
0x1505   :  { %v4182_v22 = vsub.f32 %v8840_v46, %v4181_v51 }
0x1507   :  { %4184 = vst [vmem:[#allocation11 + $0x4] sm:$0x3] %v4182_v22 }
0x152f   :  { %v4920_v42 = vpop.f32.mrf.mxu1 }
0x1530   :  { %v4921_v24 = vadd.f32 %v4920_v42, %v4899_v19 }
0x1532   :  { %v4943_v29 = vsel %vm3540_vm3, %v4921_v24, -1e+30 }
0x1533   :  { %v4944_v30 = vsel %vm3019_vm4, %v4943_v29, -inf }
0x1534   :  { %4945 = vmax.xlane.f32.xlu1 %v4944_v30 }
0x1535   :  { %v4940_v46 = vpop.f32.mrf.mxu2 }
0x1536   :  { %v4941_v41 = vadd.f32 %v4940_v46, %v4900_v43 }
0x1538   :  { %4959 = vst [vmem:[#allocation12 + $0xa] sm:$0x3] %v4941_v41 }
0x1539   :  { %4985 = dma.vmem_to_hbm [thread:$0]  %s4978_s12, 192, %s4980_s27, [#allocation13], %s5678_s0, %s5678_s0, %s5679_s3  }
0x153c   :  { %4809 = vadd.xlane.f32.xlu1 %v4808_v49 }
0x15a7   :  { %v4946_v57 = vpop.xlane.xlu1 %4945 }
0x15a8   :  { %v4947_v25 = vsub.f32 %v4943_v29, %v4946_v57 }
0x15aa   :  { %v4948_v52 = vmul.f32 1.442695, %v4947_v25 }
0x15ac   :  { %5378 = vpow2.f32 %v4948_v52 }
0x15af   :  { %v4810_v12 = vpop.xlane.xlu1 %4809 }
0x15b0   :  { %5380 = vlog2.f32 %v4810_v12 }
0x15b2   :  { %v5379_v63 = vpop.eup %5378 }
0x15b3   :  { %v4950_v8 = vsel %vm3019_vm4, %v5379_v63, 0.0 }
0x15b4   :  { %4951 = vadd.xlane.f32.xlu2 %v4950_v8 }
0x15b6   :  { %v5381_v9 = vpop.eup %5380 }
0x15b7   :  { %v4812_v26 = vmul.f32 0.6931472, %v5381_v9 }
0x15b9   :  { %v4813_v14 = vsub.f32 %v4805_v59, %v4812_v26 }
0x15bb   :  { %4815 = vst [vmem:[#allocation11 + $0x8] sm:$0x3] %v4813_v14 }
0x1627   :  { %v4952_v39 = vpop.xlane.xlu2 %4951 }
0x1628   :  { %5382 = vlog2.f32 %v4952_v39 }
0x162e   :  { %v5383_v21 = vpop.eup %5382 }
0x162f   :  { %v4954_v44 = vmul.f32 0.6931472, %v5383_v21 }
0x1631   :  { %v4955_v4 = vsub.f32 %v4947_v25, %v4954_v44 }
0x1633   :  { %4957 = vst [vmem:[#allocation11 + $0xa] sm:$0x3] %v4955_v4 }
0x1634   :  { %4972 = dma.vmem_to_hbm [thread:$0]  %s4965_s17, 192, %s4967_s10, [#allocation4], %s5678_s0, %s5678_s0, %s5679_s3  }
0x1635   :  { %5662 = dma.done.wait [#allocation4], 192  }
0x1636   :  { %5663 = vsyncadd [#allocation4], 4294967104 }
0x1637   :  { %5664 = dma.done.wait [#allocation13], 192  }
0x1638   :  { %5665 = vsyncadd [#allocation13], 4294967104 }
0x1639   :  { %4994 = vsyncpa [#allocation3], 1 }
0x163a   :  { %4995 = vsyncpa [#allocation6], 1 }
0x163b   :  { %4996 = vsyncpa [#allocation9], 1 }
0x163c   :  { %4997 = vsyncpa [#allocation4], 1 }
0x163d   :  { %4998 = vsyncpa [#allocation13], 1 }

</bundles_post_ra>
